<compile_context>
chip_gen: v7x
topology: tpu7x:2x2x1
jax: 0.10.0
libtpu: 0.0.40
codegen_flags: <defaults>
</compile_context>

<pallas_src>
import functools
import numpy as np
import jax
import jax.numpy as jnp
from jax.experimental import pallas as pl
from jax.experimental.pallas import tpu as pltpu


def _round_up(x, m):
  return (x + m - 1) // m * m


def _pad1(x, c):
  return x if c == 0 else jnp.pad(x, (0, c))


def _pad2(x, r, c):
  return x if (r == 0 and c == 0) else jnp.pad(x, ((0, r), (0, c)))


def _pick_tk(K, cap):
  """Largest K-tile <= cap that divides K cleanly (avoids K zero-padding)."""
  for cand in (2048, 1536, 1024, 512, 384, 256, 128):
    if cand <= cap and K >= cand and K % cand == 0:
      return cand, K
  tk = min(cap, _round_up(K, 128))
  return tk, _round_up(K, tk)


# -----------------------------------------------------------------------------
# Pallas kernel: K-tiled matmul.  A is bf16; B is bf16 or weight-only-quantized int8
# (dequantized to bf16 on the VPU right before the MXU dot — the kernel is DMA-bound,
# so the cast is free).  f32 accumulation directly into the resident output block,
# fused per-column scale/shift (+ ReLU) epilogue on the last K step.
# -----------------------------------------------------------------------------
def _mm_kernel(relu, a_ref, b_ref, st_ref, o_ref):
  k = pl.program_id(2)

  @pl.when(k == 0)
  def _():
    o_ref[...] = jnp.zeros_like(o_ref)

  b = b_ref[...]
  if jnp.issubdtype(b.dtype, jnp.integer):
    # int8 -> f32 -> bf16; the per-output-channel dequant scale is already folded
    # into the epilogue scale row of st_ref.
    b = b.astype(jnp.float32).astype(jnp.bfloat16)
  o_ref[...] += jnp.dot(a_ref[...], b, preferred_element_type=jnp.float32)

  @pl.when(k == pl.num_programs(2) - 1)
  def _():
    y = o_ref[...] * st_ref[0:1, :] + st_ref[1:2, :]
    if relu:
      y = jnp.maximum(y, 0.0)
    o_ref[...] = y


# Pure-XLA path (also the numerical reference): identical math to the kernel.
def jnp_matmul_scale_shift(a, b, scale=None, shift=None, relu=False):
  Ncol = b.shape[1]
  if scale is None:
    scale = jnp.ones((Ncol,), jnp.float32)
  if shift is None:
    shift = jnp.zeros((Ncol,), jnp.float32)
  if jnp.issubdtype(b.dtype, jnp.integer):
    bb = b.astype(jnp.float32).astype(jnp.bfloat16)
  else:
    bb = b.astype(jnp.bfloat16)
  y = jnp.dot(a.astype(jnp.bfloat16), bb, preferred_element_type=jnp.float32)
  y = y * scale[None, :] + shift[None, :]
  return jnp.maximum(y, 0.0) if relu else y


# Below this, a pallas_call launch + pipeline steps cost more than the matmul itself
# (bp3 48x512x256, bp4 48x256x1, global_reduction 2x2048x1024 all fall through).
_PALLAS_MIN_MKN = 1 << 26


def matmul_scale_shift(a, b, scale=None, shift=None, relu=False):
  """out = maybe_relu((a @ dequant(b)) * scale + shift)."""
  M, K = a.shape
  K2, Ncol = b.shape
  assert K == K2
  if M * K * Ncol < _PALLAS_MIN_MKN:
    return jnp_matmul_scale_shift(a, b, scale, shift, relu)

  if scale is None:
    scale = jnp.ones((Ncol,), jnp.float32)
  if shift is None:
    shift = jnp.zeros((Ncol,), jnp.float32)

  # ---- tile selection ----
  tm = _round_up(M, 16) if M <= 256 else 128          # one M tile for the head convs
  Mp = _round_up(M, tm)
  Np = _round_up(Ncol, 128)
  # Single N tile: the LHS is streamed exactly once (no re-DMA of A per N tile).
  tn = Np if Np <= 1024 else 512
  # Cap tk at 1024 for int8 weights so the in-kernel dequant temporaries (bf16/f32
  # copies of the B tile) stay small; bf16 weights keep the larger 2048 cap.
  tk_cap = 1024 if jnp.issubdtype(b.dtype, jnp.integer) else 2048
  tk, Kp = _pick_tk(K, tk_cap)

  a_p = _pad2(a.astype(jnp.bfloat16), Mp - M, Kp - K)
  b_p = _pad2(b, Kp - K, Np - Ncol)                    # stored dtype (int8 or bf16)
  st = jnp.stack([_pad1(scale.astype(jnp.float32), Np - Ncol),
                  _pad1(shift.astype(jnp.float32), Np - Ncol)], axis=0)   # (2, Np)

  bytes_accessed = (a_p.size * np.dtype(a_p.dtype).itemsize
                    + b_p.size * np.dtype(b_p.dtype).itemsize
                    + Mp * Np * 4 + 2 * Np * 4)

  out = pl.pallas_call(
      functools.partial(_mm_kernel, relu),
      out_shape=jax.ShapeDtypeStruct((Mp, Np), jnp.float32),
      grid_spec=pltpu.PrefetchScalarGridSpec(
          num_scalar_prefetch=0,
          grid=(Mp // tm, Np // tn, Kp // tk),
          in_specs=[
              pl.BlockSpec((tm, tk), lambda i, j, k: (i, k)),
              pl.BlockSpec((tk, tn), lambda i, j, k: (k, j)),
              pl.BlockSpec((2, tn), lambda i, j, k: (0, j)),
          ],
          out_specs=pl.BlockSpec((tm, tn), lambda i, j, k: (i, j)),
      ),
      compiler_params=pltpu.CompilerParams(
          dimension_semantics=("parallel", "parallel", "arbitrary"),
          vmem_limit_bytes=32 << 20),
      cost_estimate=pl.CostEstimate(flops=2 * Mp * Kp * Np,
                                    bytes_accessed=bytes_accessed,
                                    transcendentals=0),
  )(a_p, b_p, st)
  if Mp == M and Np == Ncol:
    return out
  return out[:M, :Ncol]


# -----------------------------------------------------------------------------
# Glue: im2col, conv-as-matmul with pre-folded weights, interpolation/pool matrices.
# -----------------------------------------------------------------------------
def im2col(x, kh, kw, stride, pad):
  N, C, H, W = x.shape
  if kh == 1 and kw == 1 and stride == 1 and pad == 0:
    return x.transpose(0, 2, 3, 1).reshape(N * H * W, C), H, W
  Ho = (H + 2 * pad - kh) // stride + 1
  Wo = (W + 2 * pad - kw) // stride + 1
  xp = x if pad == 0 else jnp.pad(x, ((0, 0), (0, 0), (pad, pad), (pad, pad)))
  parts = []
  for i in range(kh):
    for j in range(kw):
      parts.append(xp[:, :, i:i + stride * (Ho - 1) + 1:stride,
                      j:j + stride * (Wo - 1) + 1:stride])
  cols = jnp.stack(parts, axis=2)                     # (N, C, kh*kw, Ho, Wo)
  cols = cols.transpose(0, 3, 4, 1, 2).reshape(N * Ho * Wo, C * kh * kw)
  return cols, Ho, Wo


def conv2d_folded(x, wmat, scale, shift, kh, kw, stride, pad, relu, mm):
  """PyTorch Conv2d (+ eval BN folded into scale/shift) (+ ReLU) via im2col matmul."""
  N = x.shape[0]
  # Build the im2col LHS in bf16: im2col is pure data movement, so this is exactly
  # the bf16 cast the matmul needs, done before the kh*kw expansion (half the bytes).
  cols, Ho, Wo = im2col(x.astype(jnp.bfloat16), kh, kw, stride, pad)
  Cout = wmat.shape[1]
  y = mm(cols, wmat, scale, shift, relu=relu)
  return y.reshape(N, Ho, Wo, Cout).transpose(0, 3, 1, 2)


def bilinear_matrix(n_in, n_out):
  """Interpolation matrix matching nn.Upsample(mode='bilinear', align_corners=False)."""
  scale = n_in / n_out
  U = np.zeros((n_out, n_in), np.float32)
  for o in range(n_out):
    src = max((o + 0.5) * scale - 0.5, 0.0)
    i0 = min(int(np.floor(src)), n_in - 1)
    i1 = min(i0 + 1, n_in - 1)
    lam = src - i0
    U[o, i0] += 1.0 - lam
    U[o, i1] += lam
  return jnp.asarray(U)


def pool_matrix(h, w, sh=3, sw=2):
  """0/1 matrix implementing the split(3,dim_h)/stack/split(2,dim_w)/cat/sum pattern."""
  nrow = h // sh
  M = np.zeros((h * w, nrow * (w // sw)), np.float32)
  for r in range(h):
    for c in range(w):
      M[r * w + c, (c // sw) * nrow + (r // sh)] = 1.0
  return jnp.asarray(M)


# -----------------------------------------------------------------------------
# BFE head forward (eval mode).  Returns global_triplet_feature.squeeze().
# -----------------------------------------------------------------------------
def bfe_head_forward(x, p, mm):
  N, C, H, W = x.shape

  # x_upsampled = self.upsample(x): separable bilinear (tiny contraction) -> XLA.
  xu = jnp.einsum('nchw,Hh,Ww->ncHW', x, p['Uh'], p['Uw'])

  # predicted_mask = self.blk_position(x_upsampled)   -> (N, 1, H, W)
  m = conv2d_folded(xu, p['bp1_wmat'], p['bp1_scale'], p['bp1_shift'], 5, 5, 2, 2, True, mm)
  m = conv2d_folded(m, p['bp2_wmat'], p['bp2_scale'], p['bp2_shift'], 3, 3, 2, 1, True, mm)
  m = conv2d_folded(m, p['bp3_wmat'], p['bp3_scale'], p['bp3_shift'], 1, 1, 1, 0, True, mm)
  m = conv2d_folded(m, p['bp4_wmat'], p['bp4_scale'], p['bp4_shift'], 1, 1, 1, 0, False, mm)
  pred_mask = m.reshape(N, H, W)                      # .squeeze()

  # 3x2 block patch sums (K = H*W, P patches): tiny contraction -> XLA einsums.
  patch_logits = jnp.einsum('nhw,hwp->np', pred_mask, p['PoolHW'])      # (N, P)
  patchs_x = jnp.einsum('nchw,hwp->npc', x, p['PoolHW'])                # (N, P, C)

  # softmax over patch logits + attended channel pooling: a few KB of work, so a
  # dedicated pallas_call would be pure launch overhead -> XLA.
  w = jax.nn.softmax(patch_logits, axis=-1)
  pooled = jnp.einsum('npc,np->nc', patchs_x, w)                        # (N, C)

  # TODO(synk): the eval-mode dead branches of the torch forward (label_mask via
  # global_reduction/global_softmax on x.detach(), and global_softmax on gtf) are
  # omitted: they do not affect the eval return value.

  # global_reduction: 1x1 conv + BN + ReLU on the pooled vector == dense matmul
  # (M = N is tiny -> XLA fallback inside matmul_scale_shift).
  gtf = mm(pooled, p['gr_wmat'], p['gr_scale'], p['gr_shift'], relu=True)
  return gtf                                                            # (N, 1024)


# -----------------------------------------------------------------------------
# Deterministic synthetic parameters (kaiming fan_in for convs, BN at init stats),
# with weights pre-transposed, BN pre-folded, bf16/int8 pre-cast (done once).
# -----------------------------------------------------------------------------
def kaiming_conv(key, cout, cin, kh, kw):
  fan_in = cin * kh * kw
  return jax.random.normal(key, (cout, cin, kh, kw), jnp.float32) * np.sqrt(2.0 / fan_in)


def bn_init(key, c):
  gamma = 1.0 + 0.02 * jax.random.normal(key, (c,), jnp.float32)
  beta = jnp.zeros((c,), jnp.float32)
  running_mean = jnp.zeros((c,), jnp.float32)
  running_var = jnp.ones((c,), jnp.float32)
  return (gamma, beta, running_mean, running_var)


def fold_conv(w, b, bn=None, eps=1e-5, quantize=False):
  cout = w.shape[0]
  k = int(np.prod(w.shape[1:]))
  wmat = w.reshape(cout, k).T                               # (K, Cout) f32
  if bn is not None:
    gamma, beta, mean, var = bn
    scale = gamma / jnp.sqrt(var + eps)                     # fold eval-mode BN
    shift = beta + (b - mean) * scale
  else:
    scale = jnp.ones((cout,), jnp.float32)
    shift = b
  if quantize:
    # Weight-only int8 (symmetric, per output channel).  The dequant scale folds
    # into the epilogue scale; the kernel dequantizes to bf16 before the MXU dot.
    absmax = jnp.maximum(jnp.max(jnp.abs(wmat), axis=0), 1e-8)
    qs = absmax / 127.0
    wq = jnp.clip(jnp.round(wmat / qs[None, :]), -127, 127).astype(jnp.int8)
    return wq, (scale * qs).astype(jnp.float32), shift.astype(jnp.float32)
  return (wmat.astype(jnp.bfloat16), scale.astype(jnp.float32),
          shift.astype(jnp.float32))


def make_params(key, H, W):
  ks = jax.random.split(key, 10)
  p = {
      'Uh': bilinear_matrix(H, 4 * H),
      'Uw': bilinear_matrix(W, 4 * W),
      'PoolHW': pool_matrix(H, W, 3, 2).reshape(H, W, -1),
  }
  # blk_position: Conv(2048->1024,5,2,2)+BN+ReLU, Conv(1024->512,3,2,1)+BN+ReLU,
  #               Conv(512->256,1)+BN+ReLU, Conv(256->1,1)
  w = kaiming_conv(ks[0], 1024, 2048, 5, 5)
  p['bp1_wmat'], p['bp1_scale'], p['bp1_shift'] = fold_conv(
      w, jnp.zeros((1024,), jnp.float32), bn_init(ks[1], 1024), quantize=True)
  w = kaiming_conv(ks[2], 512, 1024, 3, 3)
  p['bp2_wmat'], p['bp2_scale'], p['bp2_shift'] = fold_conv(
      w, jnp.zeros((512,), jnp.float32), bn_init(ks[3], 512))
  w = kaiming_conv(ks[4], 256, 512, 1, 1)
  p['bp3_wmat'], p['bp3_scale'], p['bp3_shift'] = fold_conv(
      w, jnp.zeros((256,), jnp.float32), bn_init(ks[5], 256))
  w = kaiming_conv(ks[6], 1, 256, 1, 1)
  p['bp4_wmat'], p['bp4_scale'], p['bp4_shift'] = fold_conv(
      w, jnp.zeros((1,), jnp.float32), None)
  # global_reduction: Conv(2048->1024,1)+BN+ReLU
  w = kaiming_conv(ks[7], 1024, 2048, 1, 1)
  p['gr_wmat'], p['gr_scale'], p['gr_shift'] = fold_conv(
      w, jnp.zeros((1024,), jnp.float32), bn_init(ks[8], 1024))
  return p


if __name__ == "__main__":
  # res_part feature map: real channel count (2048), small spatial (H % 3 == 0, W % 2 == 0).
  N, C, H, W = 2, 2048, 6, 4
  key = jax.random.PRNGKey(0)
  kx, kp = jax.random.split(key)
  x = jax.random.normal(kx, (N, C, H, W), jnp.float32)
  params = make_params(kp, H, W)

  fwd = jax.jit(functools.partial(bfe_head_forward, mm=matmul_scale_shift))
  ref_fwd = jax.jit(functools.partial(bfe_head_forward, mm=jnp_matmul_scale_shift))

  out = jax.block_until_ready(fwd(x, params))
  ref = jax.block_until_ready(ref_fwd(x, params))

  assert out.shape == (N, 1024), out.shape
  assert bool(jnp.all(jnp.isfinite(out)))
  np.testing.assert_allclose(np.asarray(out), np.asarray(ref), rtol=2e-2, atol=2e-2)
  print("KERNEL_OK")
</pallas_src>

<mosaic_0001>
module attributes {stable_mosaic.version = 11 : i64} {
  func.func @_mm_kernel(%arg0: i32, %arg1: i32, %arg2: i32, %arg3: memref<192x1024xbf16, #tpu.memory_space<vmem>>, %arg4: memref<1024x1024xi8, #tpu.memory_space<vmem>>, %arg5: memref<2x1024xf32, #tpu.memory_space<vmem>>, %arg6: memref<192x1024xf32, #tpu.memory_space<vmem>>) attributes {dimension_semantics = [#tpu.dimension_semantics<parallel>, #tpu.dimension_semantics<parallel>, #tpu.dimension_semantics<arbitrary>], iteration_bounds = array<i64: 1, 1, 50>, scalar_prefetch = 0 : i64, scratch_operands = 0 : i64, tpu.core_type = #tpu.core_type<tc>, window_params = [{transform_indices = @transform_0, window_bounds = array<i64: 192, 1024>}, {transform_indices = @transform_1, window_bounds = array<i64: 1024, 1024>}, {transform_indices = @transform_2, window_bounds = array<i64: 2, 1024>}, {transform_indices = @transform_3, window_bounds = array<i64: 192, 1024>}]} {
    %c0_i32 = arith.constant 0 : i32
    %0 = arith.cmpi eq, %arg2, %c0_i32 : i32
    %1 = arith.extui %0 : i1 to i32
    %c0_i32_0 = arith.constant 0 : i32
    %2 = arith.cmpi ne, %1, %c0_i32_0 : i32
    scf.if %2 {
      %cst_9 = arith.constant 0.000000e+00 : f32
      %14 = vector.broadcast %cst_9 : f32 to vector<192x1024xf32>
      %c0_10 = arith.constant 0 : index
      %c0_11 = arith.constant 0 : index
      %15 = vector.load %arg6[%c0_10, %c0_11] : memref<192x1024xf32, #tpu.memory_space<vmem>>, vector<192x1024xf32>
      tpu.vector_store %arg6[%c0_10, %c0_11], %14 {strides = array<i32>} : memref<192x1024xf32, #tpu.memory_space<vmem>>, vector<192x1024xf32>,
    } else {
    }
    %c0 = arith.constant 0 : index
    %c0_1 = arith.constant 0 : index
    %3 = vector.load %arg4[%c0, %c0_1] : memref<1024x1024xi8, #tpu.memory_space<vmem>>, vector<1024x1024xi8>
    %4 = arith.sitofp %3 : vector<1024x1024xi8> to vector<1024x1024xf32>
    %5 = arith.truncf %4 : vector<1024x1024xf32> to vector<1024x1024xbf16>
    %c0_2 = arith.constant 0 : index
    %c0_3 = arith.constant 0 : index
    %6 = vector.load %arg6[%c0_2, %c0_3] : memref<192x1024xf32, #tpu.memory_space<vmem>>, vector<192x1024xf32>
    %c0_4 = arith.constant 0 : index
    %c0_5 = arith.constant 0 : index
    %7 = vector.load %arg3[%c0_4, %c0_5] : memref<192x1024xbf16, #tpu.memory_space<vmem>>, vector<192x1024xbf16>
    %cst = arith.constant dense<0.000000e+00> : vector<192x1024xf32>
    %8 = tpu.matmul %7, %5, %cst {dimension_numbers = #tpu.dot_dimension_numbers<[1], [0], [0], [1], [0, 0, 1, 1], [], []>} : vector<192x1024xbf16>, vector<1024x1024xbf16>, vector<192x1024xf32> -> vector<192x1024xf32>
    %9 = arith.addf %6, %8 : vector<192x1024xf32>
    %c0_6 = arith.constant 0 : index
    %c0_7 = arith.constant 0 : index
    %10 = vector.load %arg6[%c0_6, %c0_7] : memref<192x1024xf32, #tpu.memory_space<vmem>>, vector<192x1024xf32>
    tpu.vector_store %arg6[%c0_6, %c0_7], %9 {strides = array<i32>} : memref<192x1024xf32, #tpu.memory_space<vmem>>, vector<192x1024xf32>,
    %c49_i32 = arith.constant 49 : i32
    %11 = arith.cmpi eq, %arg2, %c49_i32 : i32
    %12 = arith.extui %11 : i1 to i32
    %c0_i32_8 = arith.constant 0 : i32
    %13 = arith.cmpi ne, %12, %c0_i32_8 : i32
    scf.if %13 {
      %c0_9 = arith.constant 0 : index
      %c0_10 = arith.constant 0 : index
      %14 = vector.load %arg6[%c0_9, %c0_10] : memref<192x1024xf32, #tpu.memory_space<vmem>>, vector<192x1024xf32>
      %c0_11 = arith.constant 0 : index
      %c0_12 = arith.constant 0 : index
      %15 = vector.load %arg5[%c0_11, %c0_12] : memref<2x1024xf32, #tpu.memory_space<vmem>>, vector<1x1024xf32>
      %16 = vector.broadcast %15 : vector<1x1024xf32> to vector<192x1024xf32>
      %17 = arith.mulf %14, %16 : vector<192x1024xf32>
      %c1 = arith.constant 1 : index
      %c0_13 = arith.constant 0 : index
      %18 = vector.load %arg5[%c1, %c0_13] : memref<2x1024xf32, #tpu.memory_space<vmem>>, vector<1x1024xf32>
      %19 = vector.broadcast %18 : vector<1x1024xf32> to vector<192x1024xf32>
      %20 = arith.addf %17, %19 : vector<192x1024xf32>
      %cst_14 = arith.constant 0.000000e+00 : f32
      %21 = vector.broadcast %cst_14 : f32 to vector<192x1024xf32>
      %22 = arith.maximumf %20, %21 : vector<192x1024xf32>
      %c0_15 = arith.constant 0 : index
      %c0_16 = arith.constant 0 : index
      %23 = vector.load %arg6[%c0_15, %c0_16] : memref<192x1024xf32, #tpu.memory_space<vmem>>, vector<192x1024xf32>
      tpu.vector_store %arg6[%c0_15, %c0_16], %22 {strides = array<i32>} : memref<192x1024xf32, #tpu.memory_space<vmem>>, vector<192x1024xf32>,
    } else {
    }
    return
  }
  func.func @transform_0(%arg0: i32, %arg1: i32, %arg2: i32) -> (i32, i32) {
    %c0_i32 = arith.constant 0 : i32
    return %arg0, %arg2 : i32, i32
  }
  func.func @transform_1(%arg0: i32, %arg1: i32, %arg2: i32) -> (i32, i32) {
    %c0_i32 = arith.constant 0 : i32
    return %arg2, %arg1 : i32, i32
  }
  func.func @transform_2(%arg0: i32, %arg1: i32, %arg2: i32) -> (i32, i32) {
    %c0_i32 = arith.constant 0 : i32
    %c0_i32_0 = arith.constant 0 : i32
    return %c0_i32, %arg1 : i32, i32
  }
  func.func @transform_3(%arg0: i32, %arg1: i32, %arg2: i32) -> (i32, i32) {
    %c0_i32 = arith.constant 0 : i32
    return %arg0, %arg1 : i32, i32
  }
}

module attributes {stable_mosaic.version = 11 : i64} {
  func.func @_mm_kernel(%arg0: i32, %arg1: i32, %arg2: i32, %arg3: memref<48x1536xbf16, #tpu.memory_space<vmem>>, %arg4: memref<1536x512xbf16, #tpu.memory_space<vmem>>, %arg5: memref<2x512xf32, #tpu.memory_space<vmem>>, %arg6: memref<48x512xf32, #tpu.memory_space<vmem>>) attributes {dimension_semantics = [#tpu.dimension_semantics<parallel>, #tpu.dimension_semantics<parallel>, #tpu.dimension_semantics<arbitrary>], iteration_bounds = array<i64: 1, 1, 6>, scalar_prefetch = 0 : i64, scratch_operands = 0 : i64, tpu.core_type = #tpu.core_type<tc>, window_params = [{transform_indices = @transform_0, window_bounds = array<i64: 48, 1536>}, {transform_indices = @transform_1, window_bounds = array<i64: 1536, 512>}, {transform_indices = @transform_2, window_bounds = array<i64: 2, 512>}, {transform_indices = @transform_3, window_bounds = array<i64: 48, 512>}]} {
    %c0_i32 = arith.constant 0 : i32
    %0 = arith.cmpi eq, %arg2, %c0_i32 : i32
    %1 = arith.extui %0 : i1 to i32
    %c0_i32_0 = arith.constant 0 : i32
    %2 = arith.cmpi ne, %1, %c0_i32_0 : i32
    scf.if %2 {
      %cst_9 = arith.constant 0.000000e+00 : f32
      %12 = vector.broadcast %cst_9 : f32 to vector<48x512xf32>
      %c0_10 = arith.constant 0 : index
      %c0_11 = arith.constant 0 : index
      %13 = vector.load %arg6[%c0_10, %c0_11] : memref<48x512xf32, #tpu.memory_space<vmem>>, vector<48x512xf32>
      tpu.vector_store %arg6[%c0_10, %c0_11], %12 {strides = array<i32>} : memref<48x512xf32, #tpu.memory_space<vmem>>, vector<48x512xf32>,
    } else {
    }
    %c0 = arith.constant 0 : index
    %c0_1 = arith.constant 0 : index
    %3 = vector.load %arg4[%c0, %c0_1] : memref<1536x512xbf16, #tpu.memory_space<vmem>>, vector<1536x512xbf16>
    %c0_2 = arith.constant 0 : index
    %c0_3 = arith.constant 0 : index
    %4 = vector.load %arg6[%c0_2, %c0_3] : memref<48x512xf32, #tpu.memory_space<vmem>>, vector<48x512xf32>
    %c0_4 = arith.constant 0 : index
    %c0_5 = arith.constant 0 : index
    %5 = vector.load %arg3[%c0_4, %c0_5] : memref<48x1536xbf16, #tpu.memory_space<vmem>>, vector<48x1536xbf16>
    %cst = arith.constant dense<0.000000e+00> : vector<48x512xf32>
    %6 = tpu.matmul %5, %3, %cst {dimension_numbers = #tpu.dot_dimension_numbers<[1], [0], [0], [1], [0, 0, 1, 1], [], []>} : vector<48x1536xbf16>, vector<1536x512xbf16>, vector<48x512xf32> -> vector<48x512xf32>
    %7 = arith.addf %4, %6 : vector<48x512xf32>
    %c0_6 = arith.constant 0 : index
    %c0_7 = arith.constant 0 : index
    %8 = vector.load %arg6[%c0_6, %c0_7] : memref<48x512xf32, #tpu.memory_space<vmem>>, vector<48x512xf32>
    tpu.vector_store %arg6[%c0_6, %c0_7], %7 {strides = array<i32>} : memref<48x512xf32, #tpu.memory_space<vmem>>, vector<48x512xf32>,
    %c5_i32 = arith.constant 5 : i32
    %9 = arith.cmpi eq, %arg2, %c5_i32 : i32
    %10 = arith.extui %9 : i1 to i32
    %c0_i32_8 = arith.constant 0 : i32
    %11 = arith.cmpi ne, %10, %c0_i32_8 : i32
    scf.if %11 {
      %c0_9 = arith.constant 0 : index
      %c0_10 = arith.constant 0 : index
      %12 = vector.load %arg6[%c0_9, %c0_10] : memref<48x512xf32, #tpu.memory_space<vmem>>, vector<48x512xf32>
      %c0_11 = arith.constant 0 : index
      %c0_12 = arith.constant 0 : index
      %13 = vector.load %arg5[%c0_11, %c0_12] : memref<2x512xf32, #tpu.memory_space<vmem>>, vector<1x512xf32>
      %14 = vector.broadcast %13 : vector<1x512xf32> to vector<48x512xf32>
      %15 = arith.mulf %12, %14 : vector<48x512xf32>
      %c1 = arith.constant 1 : index
      %c0_13 = arith.constant 0 : index
      %16 = vector.load %arg5[%c1, %c0_13] : memref<2x512xf32, #tpu.memory_space<vmem>>, vector<1x512xf32>
      %17 = vector.broadcast %16 : vector<1x512xf32> to vector<48x512xf32>
      %18 = arith.addf %15, %17 : vector<48x512xf32>
      %cst_14 = arith.constant 0.000000e+00 : f32
      %19 = vector.broadcast %cst_14 : f32 to vector<48x512xf32>
      %20 = arith.maximumf %18, %19 : vector<48x512xf32>
      %c0_15 = arith.constant 0 : index
      %c0_16 = arith.constant 0 : index
      %21 = vector.load %arg6[%c0_15, %c0_16] : memref<48x512xf32, #tpu.memory_space<vmem>>, vector<48x512xf32>
      tpu.vector_store %arg6[%c0_15, %c0_16], %20 {strides = array<i32>} : memref<48x512xf32, #tpu.memory_space<vmem>>, vector<48x512xf32>,
    } else {
    }
    return
  }
  func.func @transform_0(%arg0: i32, %arg1: i32, %arg2: i32) -> (i32, i32) {
    %c0_i32 = arith.constant 0 : i32
    return %arg0, %arg2 : i32, i32
  }
  func.func @transform_1(%arg0: i32, %arg1: i32, %arg2: i32) -> (i32, i32) {
    %c0_i32 = arith.constant 0 : i32
    return %arg2, %arg1 : i32, i32
  }
  func.func @transform_2(%arg0: i32, %arg1: i32, %arg2: i32) -> (i32, i32) {
    %c0_i32 = arith.constant 0 : i32
    %c0_i32_0 = arith.constant 0 : i32
    return %c0_i32, %arg1 : i32, i32
  }
  func.func @transform_3(%arg0: i32, %arg1: i32, %arg2: i32) -> (i32, i32) {
    %c0_i32 = arith.constant 0 : i32
    return %arg0, %arg1 : i32, i32
  }
}

</mosaic_0001>

<bundles_post_ra>
// kernel: bfe_head_forward.2
= control target key start
LH: loop header
LB: loop body
LE: loop exit
PB: predicated region body
PF: predicated region fallthrough
CT: control target
= control target key end

     0   :  { %8 = vsyncpa [#allocation4], 0  ;;  %s11982_s0 = inlined_call_operand.vmem [shape: bf16[192,51200], index: 0, kind: input, shape index: {}]   ;;  %s11983_s1 = inlined_call_operand.hbm [shape: s8[51200,1024], index: 1, kind: input, shape index: {}]   ;;  %s11984_s2 = inlined_call_operand.vmem [shape: f32[2,1024], index: 2, kind: input, shape index: {}]   ;;  %s11985_s3 = inlined_call_operand.vmem [shape: f32[192,1024], index: 3, kind: output, shape index: {}]  }
   0x1   :  { %10 = vsyncpa [#allocation4 + $0x1], 0  ;;  %s7090_s12 = smov 0   ;;  %s7092_s13 = smov 0  }
   0x2   :  { %s7094_s14 = smov 0   ;;  %s7096_s15 = smov 0  }
   0x3   :  { %s7098_s16 = smov 0   ;;  %s7100_s17 = smov 0  }
   0x4 LB: > { %s6237_s18 = sadd.s32 4294967295, %s7064_s17   ;;  %s28_s19 = sadd.s32 1, %s7060_s16  ;;  %s7064_s17 = sphi %s7100_s17, %s16_s17   ;;  %s7060_s16 = sphi %s7098_s16, %s12180_s16   ;;  %s7056_s15 = sphi %s7096_s15, %s12179_s15   ;;  %s7052_s14 = sphi %s7094_s14, %s12178_s14   ;;  %s7048_s13 = sphi %s7092_s13, %s12177_s13   ;;  %s7044_s12 = sphi %s7090_s12, %s12176_s12  }
   0x5   : > { %p29_p0 = scmp.ge.s32.totalorder %s28_s19, 50  ;;  %s44_s20 = sadd.s32 1, %s7052_s14 }
   0x6   : > { %p51_p1 = scmp.ne.s32.totalorder %s7052_s14, %s7048_s13  ;;  %p52_p2 = scmp.eq.s32.totalorder %s7064_s17, 0 }
   0x7   : > { %s12182_s19 = smov (%p29_p0, %s28_s19), 0  ;;  %p85_p4 = scmp.ne.s32.totalorder %s7048_s13, %s7044_s12 }
   0x8   : > { %p7126_p3 = por %p52_p2, %p51_p1  ;;  %s40_s22 = ssub.s32 %s7060_s16, %s12182_s19 }
   0x9   : > { %p86_p5 = scmp.eq.s32.totalorder %s6237_s18, 0  ;;  %p42_p6 = scmp.eq.s32.totalorder %s40_s22, 0 }
   0xa   : > { %p6240_p8 = scmp.ge.s32.totalorder %s7064_s17, 50 }
   0xb   : > { %p7133_p7 = por %p86_p5, %p85_p4 }
   0xc   : > { %s7138_s24 = scalar_select %p42_p6, %s7052_s14, %s44_s20  }
   0xd   : > { %168 = sbr.rel (%p6240_p8) target bundleno = 99 (0x63), region = 20 }
  0x14   : > { %171 = sbr.rel (!%p7126_p3) target bundleno = 73 (0x49), region = 24  ;;  %s173_s25 = sand.u32 (%p7126_p3), 1, %s7052_s14  }
  0x15   : > { %s6352_s26 = sshll.u32 (%p7126_p3), %s7060_s16, 5  ;;  %s6931_s27 = smul.u32 (%p7126_p3), 768, %s173_s25 }
  0x16   : > { %s7148_s30 = scalar_lea.vmem (%p7126_p3), %s11982_s0, %s6352_s26 }
  0x17   : > { %v194_v0 = vld [vmem:[%s7148_s30] sm:$0xff] (%p7126_p3)  ;;  %v196_v1 = vld [vmem:[%s7148_s30 + $0x8] sm:$0xff] (%p7126_p3)  ;;  %v198_v2 = vld [vmem:[%s7148_s30 + $0x10] sm:$0xff] (%p7126_p3)  ;;  %s7156_s4 = scalar_lea.vmem (%p7126_p3), [#allocation2], %s6931_s27 }
  0x18   : > { %v200_v3 = vld [vmem:[%s7148_s30 + $0x18] sm:$0xff] (%p7126_p3)  ;;  %v202_v4 = vld [vmem:[%s7148_s30 + $0x640] sm:$0xff] (%p7126_p3)  ;;  %v204_v5 = vld [vmem:[%s7148_s30 + $0x648] sm:$0xff] (%p7126_p3)  ;;  %195 = vst [vmem:[%s7156_s4] sm:$0xff] (%p7126_p3), %v194_v0 }
  0x19   : > { %197 = vst [vmem:[%s7156_s4 + $0x8] sm:$0xff] (%p7126_p3), %v196_v1  ;;  %199 = vst [vmem:[%s7156_s4 + $0x10] sm:$0xff] (%p7126_p3), %v198_v2  ;;  %v206_v6 = vld [vmem:[%s7148_s30 + $0x650] sm:$0xff] (%p7126_p3)  ;;  %v208_v7 = vld [vmem:[%s7148_s30 + $0x658] sm:$0xff] (%p7126_p3) }
  0x1a   : > { %201 = vst [vmem:[%s7156_s4 + $0x18] sm:$0xff] (%p7126_p3), %v200_v3  ;;  %203 = vst [vmem:[%s7156_s4 + $0x20] sm:$0xff] (%p7126_p3), %v202_v4  ;;  %v210_v8 = vld [vmem:[%s7148_s30 + $0xc80] sm:$0xff] (%p7126_p3)  ;;  %v212_v9 = vld [vmem:[%s7148_s30 + $0xc88] sm:$0xff] (%p7126_p3) }
  0x1b   : > { %205 = vst [vmem:[%s7156_s4 + $0x28] sm:$0xff] %v204_v5  ;;  %207 = vst [vmem:[%s7156_s4 + $0x30] sm:$0xff] %v206_v6  ;;  %v214_v10 = vld [vmem:[%s7148_s30 + $0xc90] sm:$0xff]  ;;  %v216_v11 = vld [vmem:[%s7148_s30 + $0xc98] sm:$0xff] }
  0x1c   : > { %209 = vst [vmem:[%s7156_s4 + $0x38] sm:$0xff] %v208_v7  ;;  %211 = vst [vmem:[%s7156_s4 + $0x40] sm:$0xff] %v210_v8  ;;  %v218_v12 = vld [vmem:[%s7148_s30 + $0x12c0] sm:$0xff]  ;;  %v220_v13 = vld [vmem:[%s7148_s30 + $0x12c8] sm:$0xff] }
  0x1d   : > { %213 = vst [vmem:[%s7156_s4 + $0x48] sm:$0xff] %v212_v9  ;;  %215 = vst [vmem:[%s7156_s4 + $0x50] sm:$0xff] %v214_v10  ;;  %v222_v14 = vld [vmem:[%s7148_s30 + $0x12d0] sm:$0xff]  ;;  %v224_v15 = vld [vmem:[%s7148_s30 + $0x12d8] sm:$0xff] }
  0x1e   : > { %217 = vst [vmem:[%s7156_s4 + $0x58] sm:$0xff] %v216_v11  ;;  %219 = vst [vmem:[%s7156_s4 + $0x60] sm:$0xff] %v218_v12  ;;  %v226_v16 = vld [vmem:[%s7148_s30 + $0x1900] sm:$0xff]  ;;  %v228_v17 = vld [vmem:[%s7148_s30 + $0x1908] sm:$0xff] }
  0x1f   : > { %221 = vst [vmem:[%s7156_s4 + $0x68] sm:$0xff] %v220_v13  ;;  %223 = vst [vmem:[%s7156_s4 + $0x70] sm:$0xff] %v222_v14  ;;  %v230_v18 = vld [vmem:[%s7148_s30 + $0x1910] sm:$0xff]  ;;  %v232_v19 = vld [vmem:[%s7148_s30 + $0x1918] sm:$0xff] }
  0x20   : > { %225 = vst [vmem:[%s7156_s4 + $0x78] sm:$0xff] %v224_v15  ;;  %227 = vst [vmem:[%s7156_s4 + $0x80] sm:$0xff] %v226_v16  ;;  %v234_v20 = vld [vmem:[%s7148_s30 + $0x1f40] sm:$0xff]  ;;  %v236_v21 = vld [vmem:[%s7148_s30 + $0x1f48] sm:$0xff] }
  0x21   : > { %229 = vst [vmem:[%s7156_s4 + $0x88] sm:$0xff] %v228_v17  ;;  %231 = vst [vmem:[%s7156_s4 + $0x90] sm:$0xff] %v230_v18  ;;  %v238_v22 = vld [vmem:[%s7148_s30 + $0x1f50] sm:$0xff]  ;;  %v240_v23 = vld [vmem:[%s7148_s30 + $0x1f58] sm:$0xff] }
  0x22   : > { %233 = vst [vmem:[%s7156_s4 + $0x98] sm:$0xff] %v232_v19  ;;  %235 = vst [vmem:[%s7156_s4 + $0xa0] sm:$0xff] %v234_v20  ;;  %v242_v24 = vld [vmem:[%s7148_s30 + $0x2580] sm:$0xff]  ;;  %v244_v25 = vld [vmem:[%s7148_s30 + $0x2588] sm:$0xff] }
  0x23   : > { %237 = vst [vmem:[%s7156_s4 + $0xa8] sm:$0xff] %v236_v21  ;;  %239 = vst [vmem:[%s7156_s4 + $0xb0] sm:$0xff] %v238_v22  ;;  %v246_v26 = vld [vmem:[%s7148_s30 + $0x2590] sm:$0xff]  ;;  %v248_v27 = vld [vmem:[%s7148_s30 + $0x2598] sm:$0xff] }
  0x24   : > { %241 = vst [vmem:[%s7156_s4 + $0xb8] sm:$0xff] %v240_v23  ;;  %243 = vst [vmem:[%s7156_s4 + $0xc0] sm:$0xff] %v242_v24  ;;  %v250_v28 = vld [vmem:[%s7148_s30 + $0x2bc0] sm:$0xff]  ;;  %v252_v29 = vld [vmem:[%s7148_s30 + $0x2bc8] sm:$0xff] }
  0x25   : > { %245 = vst [vmem:[%s7156_s4 + $0xc8] sm:$0xff] %v244_v25  ;;  %247 = vst [vmem:[%s7156_s4 + $0xd0] sm:$0xff] %v246_v26  ;;  %v254_v30 = vld [vmem:[%s7148_s30 + $0x2bd0] sm:$0xff]  ;;  %v256_v31 = vld [vmem:[%s7148_s30 + $0x2bd8] sm:$0xff] }
  0x26   : > { %249 = vst [vmem:[%s7156_s4 + $0xd8] sm:$0xff] %v248_v27  ;;  %251 = vst [vmem:[%s7156_s4 + $0xe0] sm:$0xff] %v250_v28  ;;  %v258_v32 = vld [vmem:[%s7148_s30 + $0x3200] sm:$0xff]  ;;  %v260_v33 = vld [vmem:[%s7148_s30 + $0x3208] sm:$0xff] }
  0x27   : > { %253 = vst [vmem:[%s7156_s4 + $0xe8] sm:$0xff] %v252_v29  ;;  %255 = vst [vmem:[%s7156_s4 + $0xf0] sm:$0xff] %v254_v30  ;;  %v262_v34 = vld [vmem:[%s7148_s30 + $0x3210] sm:$0xff]  ;;  %v264_v35 = vld [vmem:[%s7148_s30 + $0x3218] sm:$0xff] }
  0x28   : > { %257 = vst [vmem:[%s7156_s4 + $0xf8] sm:$0xff] %v256_v31  ;;  %259 = vst [vmem:[%s7156_s4 + $0x100] sm:$0xff] %v258_v32  ;;  %v266_v36 = vld [vmem:[%s7148_s30 + $0x3840] sm:$0xff]  ;;  %v268_v37 = vld [vmem:[%s7148_s30 + $0x3848] sm:$0xff] }
  0x29   : > { %261 = vst [vmem:[%s7156_s4 + $0x108] sm:$0xff] %v260_v33  ;;  %263 = vst [vmem:[%s7156_s4 + $0x110] sm:$0xff] %v262_v34  ;;  %v270_v38 = vld [vmem:[%s7148_s30 + $0x3850] sm:$0xff]  ;;  %v272_v39 = vld [vmem:[%s7148_s30 + $0x3858] sm:$0xff] }
  0x2a   : > { %265 = vst [vmem:[%s7156_s4 + $0x118] sm:$0xff] %v264_v35  ;;  %267 = vst [vmem:[%s7156_s4 + $0x120] sm:$0xff] %v266_v36  ;;  %v274_v40 = vld [vmem:[%s7148_s30 + $0x3e80] sm:$0xff]  ;;  %v276_v41 = vld [vmem:[%s7148_s30 + $0x3e88] sm:$0xff] }
  0x2b   : > { %269 = vst [vmem:[%s7156_s4 + $0x128] sm:$0xff] %v268_v37  ;;  %271 = vst [vmem:[%s7156_s4 + $0x130] sm:$0xff] %v270_v38  ;;  %v278_v42 = vld [vmem:[%s7148_s30 + $0x3e90] sm:$0xff]  ;;  %v280_v43 = vld [vmem:[%s7148_s30 + $0x3e98] sm:$0xff] }
  0x2c   : > { %273 = vst [vmem:[%s7156_s4 + $0x138] sm:$0xff] %v272_v39  ;;  %275 = vst [vmem:[%s7156_s4 + $0x140] sm:$0xff] %v274_v40  ;;  %v282_v44 = vld [vmem:[%s7148_s30 + $0x44c0] sm:$0xff]  ;;  %v284_v45 = vld [vmem:[%s7148_s30 + $0x44c8] sm:$0xff] }
  0x2d   : > { %277 = vst [vmem:[%s7156_s4 + $0x148] sm:$0xff] %v276_v41  ;;  %279 = vst [vmem:[%s7156_s4 + $0x150] sm:$0xff] %v278_v42  ;;  %v286_v46 = vld [vmem:[%s7148_s30 + $0x44d0] sm:$0xff]  ;;  %v288_v47 = vld [vmem:[%s7148_s30 + $0x44d8] sm:$0xff] }
  0x2e   : > { %281 = vst [vmem:[%s7156_s4 + $0x158] sm:$0xff] %v280_v43  ;;  %283 = vst [vmem:[%s7156_s4 + $0x160] sm:$0xff] %v282_v44  ;;  %v290_v48 = vld [vmem:[%s7148_s30 + $0x4b00] sm:$0xff]  ;;  %v292_v49 = vld [vmem:[%s7148_s30 + $0x4b08] sm:$0xff] }
  0x2f   : > { %285 = vst [vmem:[%s7156_s4 + $0x168] sm:$0xff] %v284_v45  ;;  %287 = vst [vmem:[%s7156_s4 + $0x170] sm:$0xff] %v286_v46  ;;  %v294_v50 = vld [vmem:[%s7148_s30 + $0x4b10] sm:$0xff]  ;;  %v296_v51 = vld [vmem:[%s7148_s30 + $0x4b18] sm:$0xff] }
  0x30   : > { %289 = vst [vmem:[%s7156_s4 + $0x178] sm:$0xff] %v288_v47  ;;  %291 = vst [vmem:[%s7156_s4 + $0x180] sm:$0xff] %v290_v48  ;;  %v298_v52 = vld [vmem:[%s7148_s30 + $0x5140] sm:$0xff]  ;;  %v300_v53 = vld [vmem:[%s7148_s30 + $0x5148] sm:$0xff] }
  0x31   : > { %293 = vst [vmem:[%s7156_s4 + $0x188] sm:$0xff] %v292_v49  ;;  %295 = vst [vmem:[%s7156_s4 + $0x190] sm:$0xff] %v294_v50  ;;  %v302_v54 = vld [vmem:[%s7148_s30 + $0x5150] sm:$0xff]  ;;  %v304_v55 = vld [vmem:[%s7148_s30 + $0x5158] sm:$0xff] }
  0x32   : > { %297 = vst [vmem:[%s7156_s4 + $0x198] sm:$0xff] %v296_v51  ;;  %299 = vst [vmem:[%s7156_s4 + $0x1a0] sm:$0xff] %v298_v52  ;;  %v306_v56 = vld [vmem:[%s7148_s30 + $0x5780] sm:$0xff]  ;;  %v308_v57 = vld [vmem:[%s7148_s30 + $0x5788] sm:$0xff] }
  0x33   : > { %301 = vst [vmem:[%s7156_s4 + $0x1a8] sm:$0xff] %v300_v53  ;;  %303 = vst [vmem:[%s7156_s4 + $0x1b0] sm:$0xff] %v302_v54  ;;  %v310_v58 = vld [vmem:[%s7148_s30 + $0x5790] sm:$0xff]  ;;  %v312_v59 = vld [vmem:[%s7148_s30 + $0x5798] sm:$0xff] }
  0x34   : > { %305 = vst [vmem:[%s7156_s4 + $0x1b8] sm:$0xff] %v304_v55  ;;  %307 = vst [vmem:[%s7156_s4 + $0x1c0] sm:$0xff] %v306_v56  ;;  %v314_v60 = vld [vmem:[%s7148_s30 + $0x5dc0] sm:$0xff]  ;;  %v316_v61 = vld [vmem:[%s7148_s30 + $0x5dc8] sm:$0xff] }
  0x35   : > { %309 = vst [vmem:[%s7156_s4 + $0x1c8] sm:$0xff] %v308_v57  ;;  %311 = vst [vmem:[%s7156_s4 + $0x1d0] sm:$0xff] %v310_v58  ;;  %v318_v62 = vld [vmem:[%s7148_s30 + $0x5dd0] sm:$0xff]  ;;  %v320_v63 = vld [vmem:[%s7148_s30 + $0x5dd8] sm:$0xff] }
  0x36   : > { %313 = vst [vmem:[%s7156_s4 + $0x1d8] sm:$0xff] %v312_v59  ;;  %315 = vst [vmem:[%s7156_s4 + $0x1e0] sm:$0xff] %v314_v60  ;;  %v322_v0 = vld [vmem:[%s7148_s30 + $0x6400] sm:$0xff]  ;;  %v324_v1 = vld [vmem:[%s7148_s30 + $0x6408] sm:$0xff] }
  0x37   : > { %317 = vst [vmem:[%s7156_s4 + $0x1e8] sm:$0xff] %v316_v61  ;;  %319 = vst [vmem:[%s7156_s4 + $0x1f0] sm:$0xff] %v318_v62  ;;  %v326_v2 = vld [vmem:[%s7148_s30 + $0x6410] sm:$0xff]  ;;  %v328_v3 = vld [vmem:[%s7148_s30 + $0x6418] sm:$0xff] }
  0x38   : > { %321 = vst [vmem:[%s7156_s4 + $0x1f8] sm:$0xff] %v320_v63  ;;  %323 = vst [vmem:[%s7156_s4 + $0x200] sm:$0xff] %v322_v0  ;;  %v330_v4 = vld [vmem:[%s7148_s30 + $0x6a40] sm:$0xff]  ;;  %v332_v5 = vld [vmem:[%s7148_s30 + $0x6a48] sm:$0xff] }
  0x39   : > { %325 = vst [vmem:[%s7156_s4 + $0x208] sm:$0xff] %v324_v1  ;;  %327 = vst [vmem:[%s7156_s4 + $0x210] sm:$0xff] %v326_v2  ;;  %v334_v6 = vld [vmem:[%s7148_s30 + $0x6a50] sm:$0xff]  ;;  %v336_v7 = vld [vmem:[%s7148_s30 + $0x6a58] sm:$0xff] }
  0x3a   : > { %329 = vst [vmem:[%s7156_s4 + $0x218] sm:$0xff] %v328_v3  ;;  %331 = vst [vmem:[%s7156_s4 + $0x220] sm:$0xff] %v330_v4  ;;  %v338_v8 = vld [vmem:[%s7148_s30 + $0x7080] sm:$0xff]  ;;  %v340_v9 = vld [vmem:[%s7148_s30 + $0x7088] sm:$0xff] }
  0x3b   : > { %333 = vst [vmem:[%s7156_s4 + $0x228] sm:$0xff] %v332_v5  ;;  %335 = vst [vmem:[%s7156_s4 + $0x230] sm:$0xff] %v334_v6  ;;  %v342_v10 = vld [vmem:[%s7148_s30 + $0x7090] sm:$0xff]  ;;  %v344_v11 = vld [vmem:[%s7148_s30 + $0x7098] sm:$0xff] }
  0x3c   : > { %337 = vst [vmem:[%s7156_s4 + $0x238] sm:$0xff] %v336_v7  ;;  %339 = vst [vmem:[%s7156_s4 + $0x240] sm:$0xff] %v338_v8  ;;  %v346_v12 = vld [vmem:[%s7148_s30 + $0x76c0] sm:$0xff]  ;;  %v348_v13 = vld [vmem:[%s7148_s30 + $0x76c8] sm:$0xff] }
  0x3d   : > { %341 = vst [vmem:[%s7156_s4 + $0x248] sm:$0xff] %v340_v9  ;;  %343 = vst [vmem:[%s7156_s4 + $0x250] sm:$0xff] %v342_v10  ;;  %v350_v14 = vld [vmem:[%s7148_s30 + $0x76d0] sm:$0xff]  ;;  %v352_v15 = vld [vmem:[%s7148_s30 + $0x76d8] sm:$0xff] }
  0x3e   : > { %345 = vst [vmem:[%s7156_s4 + $0x258] sm:$0xff] %v344_v11  ;;  %347 = vst [vmem:[%s7156_s4 + $0x260] sm:$0xff] %v346_v12  ;;  %v354_v16 = vld [vmem:[%s7148_s30 + $0x7d00] sm:$0xff]  ;;  %v356_v17 = vld [vmem:[%s7148_s30 + $0x7d08] sm:$0xff] }
  0x3f   : > { %349 = vst [vmem:[%s7156_s4 + $0x268] sm:$0xff] %v348_v13  ;;  %351 = vst [vmem:[%s7156_s4 + $0x270] sm:$0xff] %v350_v14  ;;  %v358_v18 = vld [vmem:[%s7148_s30 + $0x7d10] sm:$0xff]  ;;  %v360_v19 = vld [vmem:[%s7148_s30 + $0x7d18] sm:$0xff] }
  0x40   : > { %353 = vst [vmem:[%s7156_s4 + $0x278] sm:$0xff] %v352_v15  ;;  %355 = vst [vmem:[%s7156_s4 + $0x280] sm:$0xff] %v354_v16  ;;  %v362_v20 = vld [vmem:[%s7148_s30 + $0x8340] sm:$0xff]  ;;  %v364_v21 = vld [vmem:[%s7148_s30 + $0x8348] sm:$0xff] }
  0x41   : > { %357 = vst [vmem:[%s7156_s4 + $0x288] sm:$0xff] %v356_v17  ;;  %359 = vst [vmem:[%s7156_s4 + $0x290] sm:$0xff] %v358_v18  ;;  %v366_v22 = vld [vmem:[%s7148_s30 + $0x8350] sm:$0xff]  ;;  %v368_v23 = vld [vmem:[%s7148_s30 + $0x8358] sm:$0xff] }
  0x42   : > { %361 = vst [vmem:[%s7156_s4 + $0x298] sm:$0xff] %v360_v19  ;;  %363 = vst [vmem:[%s7156_s4 + $0x2a0] sm:$0xff] %v362_v20  ;;  %v370_v24 = vld [vmem:[%s7148_s30 + $0x8980] sm:$0xff]  ;;  %v372_v25 = vld [vmem:[%s7148_s30 + $0x8988] sm:$0xff] }
  0x43   : > { %365 = vst [vmem:[%s7156_s4 + $0x2a8] sm:$0xff] %v364_v21  ;;  %367 = vst [vmem:[%s7156_s4 + $0x2b0] sm:$0xff] %v366_v22  ;;  %v374_v26 = vld [vmem:[%s7148_s30 + $0x8990] sm:$0xff]  ;;  %v376_v27 = vld [vmem:[%s7148_s30 + $0x8998] sm:$0xff] }
  0x44   : > { %369 = vst [vmem:[%s7156_s4 + $0x2b8] sm:$0xff] %v368_v23  ;;  %371 = vst [vmem:[%s7156_s4 + $0x2c0] sm:$0xff] %v370_v24  ;;  %v378_v28 = vld [vmem:[%s7148_s30 + $0x8fc0] sm:$0xff]  ;;  %v380_v29 = vld [vmem:[%s7148_s30 + $0x8fc8] sm:$0xff] }
  0x45   : > { %373 = vst [vmem:[%s7156_s4 + $0x2c8] sm:$0xff] %v372_v25  ;;  %375 = vst [vmem:[%s7156_s4 + $0x2d0] sm:$0xff] %v374_v26  ;;  %v382_v30 = vld [vmem:[%s7148_s30 + $0x8fd0] sm:$0xff]  ;;  %v384_v31 = vld [vmem:[%s7148_s30 + $0x8fd8] sm:$0xff] }
  0x46   : > { %377 = vst [vmem:[%s7156_s4 + $0x2d8] sm:$0xff] %v376_v27  ;;  %379 = vst [vmem:[%s7156_s4 + $0x2e0] sm:$0xff] %v378_v28 }
  0x47   : > { %381 = vst [vmem:[%s7156_s4 + $0x2e8] sm:$0xff] %v380_v29  ;;  %383 = vst [vmem:[%s7156_s4 + $0x2f0] sm:$0xff] %v382_v30 }
  0x48   : > { %385 = vst [vmem:[%s7156_s4 + $0x2f8] sm:$0xff] %v384_v31 }
  0x49 PF: > { %s392_s5 = sand.u32 1, %s7052_s14   ;;  %s6354_s6 = sshll.u32 %s7060_s16, 15 }
  0x4a   : > { %s6243_s7 = sshll.u32 %s392_s5, 11  ;;  %s7349_s10 = scalar_lea.hbm %s11983_s1, %s6354_s6 }
  0x4b   : > { %s396_s11 = scalar_lea.vmem [#allocation3], %s6243_s7  ;;  %s7353_s18 = scalar_lea.sflag [#allocation4], %s392_s5 }
  0x4c   : > { %s406_s12 = sshll.u32 %s396_s11, 4  ;;  %s6986_s20 = scalar_lea.hbm %s7349_s10, 32768  ;;  %s7351_s12 = int_to_ptr.vmem [resolvable:$true] %s406_s12 }
  0x4d   : > { %p6987_p9 = scmp.ne.s32.totalorder %s7349_s10, %s6986_s20  ;;  %s6990_s26 = scalar_lea.hbm %s11983_s1, 1638400 }
  0x4e   : > { %p6991_p12 = scmp.lt.u32.totalorder %s7349_s10, %s11983_s1  ;;  %p6992_p13 = scmp.lt.u32.totalorder %s6990_s26, %s6986_s20 }
  0x4f   : > { %p6988_p10 = pnand %p6987_p9, %p7126_p3  ;;  %p6994_p1 = scmp.lt.u32.totalorder %s6986_s20, %s7349_s10 }
  0x50   : > { %p6993_p0 = por %p6992_p13, %p6991_p12 }
  0x51   : > { %p6989_p11 = pneg %p6988_p10 }
  0x52   : > { %p6995_p2 = por %p6994_p1, %p6993_p0 }
  0x54   : > { %p6996_p4 = pnand %p6995_p2, %p6989_p11 }
  0x56   : > { %6999 = shalt.err (!%p6996_p4)
}
  0x57   : > { %s7000_s29 = scalar_lea.vmem %s7351_s12, 32768  ;;  %s7066_s30 = smov [#allocation3]  }
  0x58   : > { %p7001_p5 = scmp.ne.s32.totalorder %s7351_s12, %s7000_s29  ;;  %s7004_s4 = sshll.u32 %s7066_s30, 4  ;;  %s7005_s4 = int_to_ptr.vmem [resolvable:$false] %s7004_s4 }
  0x59   : > { %s7006_s5 = scalar_lea.vmem %s7005_s4, 65536  ;;  %p7007_p9 = scmp.lt.s32.totalorder %s7351_s12, %s7005_s4 }
  0x5a   : > { %p7002_p6 = pnand %p7001_p5, %p7126_p3  ;;  %p7008_p10 = scmp.lt.s32.totalorder %s7006_s5, %s7000_s29 }
  0x5c   : > { %p7003_p8 = pneg %p7002_p6  ;;  %p7009_p12 = por %p7008_p10, %p7007_p9 }
  0x5e   : > { %p7010_p13 = pnand %p7009_p12, %p7003_p8 }
  0x60   : > { %7013 = shalt.err (!%p7010_p13)
}
  0x61   : > { %s7067_s6 = smov 1024   ;;  %s7068_s7 = smov 64  }
  0x62   : > { %6933 = dma.hbm_to_vmem [thread:$0]  (%p7126_p3), %s7349_s10, 32768, %s7351_s12, %s7353_s18, %s7067_s6, %s7067_s6, %s7068_s7  }
  0x63 PF: > { %p6247_p11 = scmp.ge.s32.totalorder %s7064_s17, 1  ;;  %p414_p0 = scmp.lt.s32.totalorder %s7064_s17, 51 }
  0x65   : > { %p415_p1 = pnand %p6247_p11, %p414_p0 }
  0x67   : > { %418 = sbr.rel (%p415_p1) target bundleno = 1402 (0x57a), region = 51 }
  0x6e   : > { %s421_s8 = sand.u32 1, %s7048_s13  }
  0x6f   : > { %s6932_s9 = smul.u32 768, %s421_s8  ;;  %s6248_s11 = sshll.u32 %s421_s8, 11 }
  0x70   : > { %s428_s22 = scalar_lea.sflag [#allocation4], %s421_s8  ;;  %s7382_s25 = scalar_lea.vmem [#allocation3], %s6248_s11 }
  0x71   : > { %s7380_s20 = scalar_lea.vmem [#allocation2], %s6932_s9 }
  0x72   : > { %7039 = dma.done.wait (%p7133_p7), %s428_s22, 32768  }
  0x73   : > { %7041 = vsyncadd (%p7133_p7), %s428_s22, 4294934528  ;;  %p6249_p3 = scmp.ne.s32.totalorder %s7056_s15, 0 }
  0x74   : > { %v7069_v32 = vmov (!%p6249_p3), 0.0  }
  0x75   : > { %493 = sbr.rel (%p6249_p3) target bundleno = 213 (0xd5), region = 63  ;;  %494 = vst [vmem:[%s11985_s3] sm:$0xff] (!%p6249_p3), %v7069_v32  ;;  %495 = vst [vmem:[%s11985_s3 + $0x8] sm:$0xff] (!%p6249_p3), %v7069_v32 }
  0x76   : > { %496 = vst [vmem:[%s11985_s3 + $0x10] sm:$0xff] (!%p6249_p3), %v7069_v32  ;;  %497 = vst [vmem:[%s11985_s3 + $0x18] sm:$0xff] (!%p6249_p3), %v7069_v32 }
  0x77   : > { %498 = vst [vmem:[%s11985_s3 + $0x20] sm:$0xff] (!%p6249_p3), %v7069_v32  ;;  %499 = vst [vmem:[%s11985_s3 + $0x28] sm:$0xff] (!%p6249_p3), %v7069_v32 }
  0x78   : > { %500 = vst [vmem:[%s11985_s3 + $0x30] sm:$0xff] (!%p6249_p3), %v7069_v32  ;;  %501 = vst [vmem:[%s11985_s3 + $0x38] sm:$0xff] (!%p6249_p3), %v7069_v32 }
  0x79   : > { %502 = vst [vmem:[%s11985_s3 + $0x40] sm:$0xff] (!%p6249_p3), %v7069_v32  ;;  %503 = vst [vmem:[%s11985_s3 + $0x48] sm:$0xff] (!%p6249_p3), %v7069_v32 }
  0x7a   : > { %504 = vst [vmem:[%s11985_s3 + $0x50] sm:$0xff] (!%p6249_p3), %v7069_v32  ;;  %505 = vst [vmem:[%s11985_s3 + $0x58] sm:$0xff] (!%p6249_p3), %v7069_v32 }
  0x7b   : > { %506 = vst [vmem:[%s11985_s3 + $0x60] sm:$0xff] (!%p6249_p3), %v7069_v32  ;;  %507 = vst [vmem:[%s11985_s3 + $0x68] sm:$0xff] (!%p6249_p3), %v7069_v32 }
  0x7c   : > { %508 = vst [vmem:[%s11985_s3 + $0x70] sm:$0xff] %v7069_v32  ;;  %509 = vst [vmem:[%s11985_s3 + $0x78] sm:$0xff] %v7069_v32 }
  0x7d   : > { %510 = vst [vmem:[%s11985_s3 + $0x80] sm:$0xff] %v7069_v32  ;;  %511 = vst [vmem:[%s11985_s3 + $0x88] sm:$0xff] %v7069_v32 }
  0x7e   : > { %512 = vst [vmem:[%s11985_s3 + $0x90] sm:$0xff] %v7069_v32  ;;  %513 = vst [vmem:[%s11985_s3 + $0x98] sm:$0xff] %v7069_v32 }
  0x7f   : > { %514 = vst [vmem:[%s11985_s3 + $0xa0] sm:$0xff] %v7069_v32  ;;  %515 = vst [vmem:[%s11985_s3 + $0xa8] sm:$0xff] %v7069_v32 }
  0x80   : > { %516 = vst [vmem:[%s11985_s3 + $0xb0] sm:$0xff] %v7069_v32  ;;  %517 = vst [vmem:[%s11985_s3 + $0xb8] sm:$0xff] %v7069_v32 }
  0x81   : > { %518 = vst [vmem:[%s11985_s3 + $0xc0] sm:$0xff] %v7069_v32  ;;  %519 = vst [vmem:[%s11985_s3 + $0xc8] sm:$0xff] %v7069_v32 }
  0x82   : > { %520 = vst [vmem:[%s11985_s3 + $0xd0] sm:$0xff] %v7069_v32  ;;  %521 = vst [vmem:[%s11985_s3 + $0xd8] sm:$0xff] %v7069_v32 }
  0x83   : > { %522 = vst [vmem:[%s11985_s3 + $0xe0] sm:$0xff] %v7069_v32  ;;  %523 = vst [vmem:[%s11985_s3 + $0xe8] sm:$0xff] %v7069_v32 }
  0x84   : > { %524 = vst [vmem:[%s11985_s3 + $0xf0] sm:$0xff] %v7069_v32  ;;  %525 = vst [vmem:[%s11985_s3 + $0xf8] sm:$0xff] %v7069_v32 }
  0x85   : > { %526 = vst [vmem:[%s11985_s3 + $0x100] sm:$0xff] %v7069_v32  ;;  %527 = vst [vmem:[%s11985_s3 + $0x108] sm:$0xff] %v7069_v32 }
  0x86   : > { %528 = vst [vmem:[%s11985_s3 + $0x110] sm:$0xff] %v7069_v32  ;;  %529 = vst [vmem:[%s11985_s3 + $0x118] sm:$0xff] %v7069_v32 }
  0x87   : > { %530 = vst [vmem:[%s11985_s3 + $0x120] sm:$0xff] %v7069_v32  ;;  %531 = vst [vmem:[%s11985_s3 + $0x128] sm:$0xff] %v7069_v32 }
  0x88   : > { %532 = vst [vmem:[%s11985_s3 + $0x130] sm:$0xff] %v7069_v32  ;;  %533 = vst [vmem:[%s11985_s3 + $0x138] sm:$0xff] %v7069_v32 }
  0x89   : > { %534 = vst [vmem:[%s11985_s3 + $0x140] sm:$0xff] %v7069_v32  ;;  %535 = vst [vmem:[%s11985_s3 + $0x148] sm:$0xff] %v7069_v32 }
  0x8a   : > { %536 = vst [vmem:[%s11985_s3 + $0x150] sm:$0xff] %v7069_v32  ;;  %537 = vst [vmem:[%s11985_s3 + $0x158] sm:$0xff] %v7069_v32 }
  0x8b   : > { %538 = vst [vmem:[%s11985_s3 + $0x160] sm:$0xff] %v7069_v32  ;;  %539 = vst [vmem:[%s11985_s3 + $0x168] sm:$0xff] %v7069_v32 }
  0x8c   : > { %540 = vst [vmem:[%s11985_s3 + $0x170] sm:$0xff] %v7069_v32  ;;  %541 = vst [vmem:[%s11985_s3 + $0x178] sm:$0xff] %v7069_v32 }
  0x8d   : > { %542 = vst [vmem:[%s11985_s3 + $0x180] sm:$0xff] %v7069_v32  ;;  %543 = vst [vmem:[%s11985_s3 + $0x188] sm:$0xff] %v7069_v32 }
  0x8e   : > { %544 = vst [vmem:[%s11985_s3 + $0x190] sm:$0xff] %v7069_v32  ;;  %545 = vst [vmem:[%s11985_s3 + $0x198] sm:$0xff] %v7069_v32 }
  0x8f   : > { %546 = vst [vmem:[%s11985_s3 + $0x1a0] sm:$0xff] %v7069_v32  ;;  %547 = vst [vmem:[%s11985_s3 + $0x1a8] sm:$0xff] %v7069_v32 }
  0x90   : > { %548 = vst [vmem:[%s11985_s3 + $0x1b0] sm:$0xff] %v7069_v32  ;;  %549 = vst [vmem:[%s11985_s3 + $0x1b8] sm:$0xff] %v7069_v32 }
  0x91   : > { %550 = vst [vmem:[%s11985_s3 + $0x1c0] sm:$0xff] %v7069_v32  ;;  %551 = vst [vmem:[%s11985_s3 + $0x1c8] sm:$0xff] %v7069_v32 }
  0x92   : > { %552 = vst [vmem:[%s11985_s3 + $0x1d0] sm:$0xff] %v7069_v32  ;;  %553 = vst [vmem:[%s11985_s3 + $0x1d8] sm:$0xff] %v7069_v32 }
  0x93   : > { %554 = vst [vmem:[%s11985_s3 + $0x1e0] sm:$0xff] %v7069_v32  ;;  %555 = vst [vmem:[%s11985_s3 + $0x1e8] sm:$0xff] %v7069_v32 }
  0x94   : > { %556 = vst [vmem:[%s11985_s3 + $0x1f0] sm:$0xff] %v7069_v32  ;;  %557 = vst [vmem:[%s11985_s3 + $0x1f8] sm:$0xff] %v7069_v32 }
  0x95   : > { %558 = vst [vmem:[%s11985_s3 + $0x200] sm:$0xff] %v7069_v32  ;;  %559 = vst [vmem:[%s11985_s3 + $0x208] sm:$0xff] %v7069_v32 }
  0x96   : > { %560 = vst [vmem:[%s11985_s3 + $0x210] sm:$0xff] %v7069_v32  ;;  %561 = vst [vmem:[%s11985_s3 + $0x218] sm:$0xff] %v7069_v32 }
  0x97   : > { %562 = vst [vmem:[%s11985_s3 + $0x220] sm:$0xff] %v7069_v32  ;;  %563 = vst [vmem:[%s11985_s3 + $0x228] sm:$0xff] %v7069_v32 }
  0x98   : > { %564 = vst [vmem:[%s11985_s3 + $0x230] sm:$0xff] %v7069_v32  ;;  %565 = vst [vmem:[%s11985_s3 + $0x238] sm:$0xff] %v7069_v32 }
  0x99   : > { %566 = vst [vmem:[%s11985_s3 + $0x240] sm:$0xff] %v7069_v32  ;;  %567 = vst [vmem:[%s11985_s3 + $0x248] sm:$0xff] %v7069_v32 }
  0x9a   : > { %568 = vst [vmem:[%s11985_s3 + $0x250] sm:$0xff] %v7069_v32  ;;  %569 = vst [vmem:[%s11985_s3 + $0x258] sm:$0xff] %v7069_v32 }
  0x9b   : > { %570 = vst [vmem:[%s11985_s3 + $0x260] sm:$0xff] %v7069_v32  ;;  %571 = vst [vmem:[%s11985_s3 + $0x268] sm:$0xff] %v7069_v32 }
  0x9c   : > { %572 = vst [vmem:[%s11985_s3 + $0x270] sm:$0xff] %v7069_v32  ;;  %573 = vst [vmem:[%s11985_s3 + $0x278] sm:$0xff] %v7069_v32 }
  0x9d   : > { %574 = vst [vmem:[%s11985_s3 + $0x280] sm:$0xff] %v7069_v32  ;;  %575 = vst [vmem:[%s11985_s3 + $0x288] sm:$0xff] %v7069_v32 }
  0x9e   : > { %576 = vst [vmem:[%s11985_s3 + $0x290] sm:$0xff] %v7069_v32  ;;  %577 = vst [vmem:[%s11985_s3 + $0x298] sm:$0xff] %v7069_v32 }
  0x9f   : > { %578 = vst [vmem:[%s11985_s3 + $0x2a0] sm:$0xff] %v7069_v32  ;;  %579 = vst [vmem:[%s11985_s3 + $0x2a8] sm:$0xff] %v7069_v32 }
  0xa0   : > { %580 = vst [vmem:[%s11985_s3 + $0x2b0] sm:$0xff] %v7069_v32  ;;  %581 = vst [vmem:[%s11985_s3 + $0x2b8] sm:$0xff] %v7069_v32 }
  0xa1   : > { %582 = vst [vmem:[%s11985_s3 + $0x2c0] sm:$0xff] %v7069_v32  ;;  %583 = vst [vmem:[%s11985_s3 + $0x2c8] sm:$0xff] %v7069_v32 }
  0xa2   : > { %584 = vst [vmem:[%s11985_s3 + $0x2d0] sm:$0xff] %v7069_v32  ;;  %585 = vst [vmem:[%s11985_s3 + $0x2d8] sm:$0xff] %v7069_v32 }
  0xa3   : > { %586 = vst [vmem:[%s11985_s3 + $0x2e0] sm:$0xff] %v7069_v32  ;;  %587 = vst [vmem:[%s11985_s3 + $0x2e8] sm:$0xff] %v7069_v32 }
  0xa4   : > { %588 = vst [vmem:[%s11985_s3 + $0x2f0] sm:$0xff] %v7069_v32  ;;  %589 = vst [vmem:[%s11985_s3 + $0x2f8] sm:$0xff] %v7069_v32 }
  0xa5   : > { %590 = vst [vmem:[%s11985_s3 + $0x300] sm:$0xff] %v7069_v32  ;;  %591 = vst [vmem:[%s11985_s3 + $0x308] sm:$0xff] %v7069_v32 }
  0xa6   : > { %592 = vst [vmem:[%s11985_s3 + $0x310] sm:$0xff] %v7069_v32  ;;  %593 = vst [vmem:[%s11985_s3 + $0x318] sm:$0xff] %v7069_v32 }
  0xa7   : > { %594 = vst [vmem:[%s11985_s3 + $0x320] sm:$0xff] %v7069_v32  ;;  %595 = vst [vmem:[%s11985_s3 + $0x328] sm:$0xff] %v7069_v32 }
  0xa8   : > { %596 = vst [vmem:[%s11985_s3 + $0x330] sm:$0xff] %v7069_v32  ;;  %597 = vst [vmem:[%s11985_s3 + $0x338] sm:$0xff] %v7069_v32 }
  0xa9   : > { %598 = vst [vmem:[%s11985_s3 + $0x340] sm:$0xff] %v7069_v32  ;;  %599 = vst [vmem:[%s11985_s3 + $0x348] sm:$0xff] %v7069_v32 }
  0xaa   : > { %600 = vst [vmem:[%s11985_s3 + $0x350] sm:$0xff] %v7069_v32  ;;  %601 = vst [vmem:[%s11985_s3 + $0x358] sm:$0xff] %v7069_v32 }
  0xab   : > { %602 = vst [vmem:[%s11985_s3 + $0x360] sm:$0xff] %v7069_v32  ;;  %603 = vst [vmem:[%s11985_s3 + $0x368] sm:$0xff] %v7069_v32 }
  0xac   : > { %604 = vst [vmem:[%s11985_s3 + $0x370] sm:$0xff] %v7069_v32  ;;  %605 = vst [vmem:[%s11985_s3 + $0x378] sm:$0xff] %v7069_v32 }
  0xad   : > { %606 = vst [vmem:[%s11985_s3 + $0x380] sm:$0xff] %v7069_v32  ;;  %607 = vst [vmem:[%s11985_s3 + $0x388] sm:$0xff] %v7069_v32 }
  0xae   : > { %608 = vst [vmem:[%s11985_s3 + $0x390] sm:$0xff] %v7069_v32  ;;  %609 = vst [vmem:[%s11985_s3 + $0x398] sm:$0xff] %v7069_v32 }
  0xaf   : > { %610 = vst [vmem:[%s11985_s3 + $0x3a0] sm:$0xff] %v7069_v32  ;;  %611 = vst [vmem:[%s11985_s3 + $0x3a8] sm:$0xff] %v7069_v32 }
  0xb0   : > { %612 = vst [vmem:[%s11985_s3 + $0x3b0] sm:$0xff] %v7069_v32  ;;  %613 = vst [vmem:[%s11985_s3 + $0x3b8] sm:$0xff] %v7069_v32 }
  0xb1   : > { %614 = vst [vmem:[%s11985_s3 + $0x3c0] sm:$0xff] %v7069_v32  ;;  %615 = vst [vmem:[%s11985_s3 + $0x3c8] sm:$0xff] %v7069_v32 }
  0xb2   : > { %616 = vst [vmem:[%s11985_s3 + $0x3d0] sm:$0xff] %v7069_v32  ;;  %617 = vst [vmem:[%s11985_s3 + $0x3d8] sm:$0xff] %v7069_v32 }
  0xb3   : > { %618 = vst [vmem:[%s11985_s3 + $0x3e0] sm:$0xff] %v7069_v32  ;;  %619 = vst [vmem:[%s11985_s3 + $0x3e8] sm:$0xff] %v7069_v32 }
  0xb4   : > { %620 = vst [vmem:[%s11985_s3 + $0x3f0] sm:$0xff] %v7069_v32  ;;  %621 = vst [vmem:[%s11985_s3 + $0x3f8] sm:$0xff] %v7069_v32 }
  0xb5   : > { %622 = vst [vmem:[%s11985_s3 + $0x400] sm:$0xff] %v7069_v32  ;;  %623 = vst [vmem:[%s11985_s3 + $0x408] sm:$0xff] %v7069_v32 }
  0xb6   : > { %624 = vst [vmem:[%s11985_s3 + $0x410] sm:$0xff] %v7069_v32  ;;  %625 = vst [vmem:[%s11985_s3 + $0x418] sm:$0xff] %v7069_v32 }
  0xb7   : > { %626 = vst [vmem:[%s11985_s3 + $0x420] sm:$0xff] %v7069_v32  ;;  %627 = vst [vmem:[%s11985_s3 + $0x428] sm:$0xff] %v7069_v32 }
  0xb8   : > { %628 = vst [vmem:[%s11985_s3 + $0x430] sm:$0xff] %v7069_v32  ;;  %629 = vst [vmem:[%s11985_s3 + $0x438] sm:$0xff] %v7069_v32 }
  0xb9   : > { %630 = vst [vmem:[%s11985_s3 + $0x440] sm:$0xff] %v7069_v32  ;;  %631 = vst [vmem:[%s11985_s3 + $0x448] sm:$0xff] %v7069_v32 }
  0xba   : > { %632 = vst [vmem:[%s11985_s3 + $0x450] sm:$0xff] %v7069_v32  ;;  %633 = vst [vmem:[%s11985_s3 + $0x458] sm:$0xff] %v7069_v32 }
  0xbb   : > { %634 = vst [vmem:[%s11985_s3 + $0x460] sm:$0xff] %v7069_v32  ;;  %635 = vst [vmem:[%s11985_s3 + $0x468] sm:$0xff] %v7069_v32 }
  0xbc   : > { %636 = vst [vmem:[%s11985_s3 + $0x470] sm:$0xff] %v7069_v32  ;;  %637 = vst [vmem:[%s11985_s3 + $0x478] sm:$0xff] %v7069_v32 }
  0xbd   : > { %638 = vst [vmem:[%s11985_s3 + $0x480] sm:$0xff] %v7069_v32  ;;  %639 = vst [vmem:[%s11985_s3 + $0x488] sm:$0xff] %v7069_v32 }
  0xbe   : > { %640 = vst [vmem:[%s11985_s3 + $0x490] sm:$0xff] %v7069_v32  ;;  %641 = vst [vmem:[%s11985_s3 + $0x498] sm:$0xff] %v7069_v32 }
  0xbf   : > { %642 = vst [vmem:[%s11985_s3 + $0x4a0] sm:$0xff] %v7069_v32  ;;  %643 = vst [vmem:[%s11985_s3 + $0x4a8] sm:$0xff] %v7069_v32 }
  0xc0   : > { %644 = vst [vmem:[%s11985_s3 + $0x4b0] sm:$0xff] %v7069_v32  ;;  %645 = vst [vmem:[%s11985_s3 + $0x4b8] sm:$0xff] %v7069_v32 }
  0xc1   : > { %646 = vst [vmem:[%s11985_s3 + $0x4c0] sm:$0xff] %v7069_v32  ;;  %647 = vst [vmem:[%s11985_s3 + $0x4c8] sm:$0xff] %v7069_v32 }
  0xc2   : > { %648 = vst [vmem:[%s11985_s3 + $0x4d0] sm:$0xff] %v7069_v32  ;;  %649 = vst [vmem:[%s11985_s3 + $0x4d8] sm:$0xff] %v7069_v32 }
  0xc3   : > { %650 = vst [vmem:[%s11985_s3 + $0x4e0] sm:$0xff] %v7069_v32  ;;  %651 = vst [vmem:[%s11985_s3 + $0x4e8] sm:$0xff] %v7069_v32 }
  0xc4   : > { %652 = vst [vmem:[%s11985_s3 + $0x4f0] sm:$0xff] %v7069_v32  ;;  %653 = vst [vmem:[%s11985_s3 + $0x4f8] sm:$0xff] %v7069_v32 }
  0xc5   : > { %654 = vst [vmem:[%s11985_s3 + $0x500] sm:$0xff] %v7069_v32  ;;  %655 = vst [vmem:[%s11985_s3 + $0x508] sm:$0xff] %v7069_v32 }
  0xc6   : > { %656 = vst [vmem:[%s11985_s3 + $0x510] sm:$0xff] %v7069_v32  ;;  %657 = vst [vmem:[%s11985_s3 + $0x518] sm:$0xff] %v7069_v32 }
  0xc7   : > { %658 = vst [vmem:[%s11985_s3 + $0x520] sm:$0xff] %v7069_v32  ;;  %659 = vst [vmem:[%s11985_s3 + $0x528] sm:$0xff] %v7069_v32 }
  0xc8   : > { %660 = vst [vmem:[%s11985_s3 + $0x530] sm:$0xff] %v7069_v32  ;;  %661 = vst [vmem:[%s11985_s3 + $0x538] sm:$0xff] %v7069_v32 }
  0xc9   : > { %662 = vst [vmem:[%s11985_s3 + $0x540] sm:$0xff] %v7069_v32  ;;  %663 = vst [vmem:[%s11985_s3 + $0x548] sm:$0xff] %v7069_v32 }
  0xca   : > { %664 = vst [vmem:[%s11985_s3 + $0x550] sm:$0xff] %v7069_v32  ;;  %665 = vst [vmem:[%s11985_s3 + $0x558] sm:$0xff] %v7069_v32 }
  0xcb   : > { %666 = vst [vmem:[%s11985_s3 + $0x560] sm:$0xff] %v7069_v32  ;;  %667 = vst [vmem:[%s11985_s3 + $0x568] sm:$0xff] %v7069_v32 }
  0xcc   : > { %668 = vst [vmem:[%s11985_s3 + $0x570] sm:$0xff] %v7069_v32  ;;  %669 = vst [vmem:[%s11985_s3 + $0x578] sm:$0xff] %v7069_v32 }
  0xcd   : > { %670 = vst [vmem:[%s11985_s3 + $0x580] sm:$0xff] %v7069_v32  ;;  %671 = vst [vmem:[%s11985_s3 + $0x588] sm:$0xff] %v7069_v32 }
  0xce   : > { %672 = vst [vmem:[%s11985_s3 + $0x590] sm:$0xff] %v7069_v32  ;;  %673 = vst [vmem:[%s11985_s3 + $0x598] sm:$0xff] %v7069_v32 }
  0xcf   : > { %674 = vst [vmem:[%s11985_s3 + $0x5a0] sm:$0xff] %v7069_v32  ;;  %675 = vst [vmem:[%s11985_s3 + $0x5a8] sm:$0xff] %v7069_v32 }
  0xd0   : > { %676 = vst [vmem:[%s11985_s3 + $0x5b0] sm:$0xff] %v7069_v32  ;;  %677 = vst [vmem:[%s11985_s3 + $0x5b8] sm:$0xff] %v7069_v32 }
  0xd1   : > { %678 = vst [vmem:[%s11985_s3 + $0x5c0] sm:$0xff] %v7069_v32  ;;  %679 = vst [vmem:[%s11985_s3 + $0x5c8] sm:$0xff] %v7069_v32 }
  0xd2   : > { %680 = vst [vmem:[%s11985_s3 + $0x5d0] sm:$0xff] %v7069_v32  ;;  %681 = vst [vmem:[%s11985_s3 + $0x5d8] sm:$0xff] %v7069_v32 }
  0xd3   : > { %682 = vst [vmem:[%s11985_s3 + $0x5e0] sm:$0xff] %v7069_v32  ;;  %683 = vst [vmem:[%s11985_s3 + $0x5e8] sm:$0xff] %v7069_v32 }
  0xd4   : > { %684 = vst [vmem:[%s11985_s3 + $0x5f0] sm:$0xff] %v7069_v32  ;;  %685 = vst [vmem:[%s11985_s3 + $0x5f8] sm:$0xff] %v7069_v32 }
  0xd5 PF: > { %v687_v33 = vld [vmem:[%s7382_s25 + $0x8] sm:$0xff]  ;;  %v689_v34 = vld [vmem:[%s7382_s25 + $0x18] sm:$0xff]  ;;  %v686_v35 = vld [vmem:[%s7382_s25] sm:$0xff]  ;;  %p6346_p7 = scmp.ne.s32.totalorder %s7056_s15, 49 }
  0xd6   : > { %v943_v36 = vunpack.c.l.s8.bf16 %v687_v33  ;;  %v951_v37 = vunpack.c.h.s8.bf16 %v687_v33  ;;  %v945_v38 = vunpack.c.l.s8.bf16 %v689_v34  ;;  %v953_v39 = vunpack.c.h.s8.bf16 %v689_v34  ;;  %v688_v40 = vld [vmem:[%s7382_s25 + $0x10] sm:$0xff]  ;;  %v695_v43 = vld [vmem:[%s7382_s25 + $0x48] sm:$0xff]  ;;  %v697_v44 = vld [vmem:[%s7382_s25 + $0x58] sm:$0xff] }
  0xd7   : > { %v942_v41 = vunpack.c.l.s8.bf16 %v686_v35  ;;  %v944_v42 = vunpack.c.l.s8.bf16 %v688_v40  ;;  %v950_v45 = vunpack.c.h.s8.bf16 %v686_v35  ;;  %v952_v46 = vunpack.c.h.s8.bf16 %v688_v40  ;;  %v694_v49 = vld [vmem:[%s7382_s25 + $0x40] sm:$0xff]  ;;  %v696_v50 = vld [vmem:[%s7382_s25 + $0x50] sm:$0xff]  ;;  %v703_v55 = vld [vmem:[%s7382_s25 + $0x88] sm:$0xff] }
  0xd8   : > { %2222 = vmatprep.subr.bf16.mxu0 %v943_v36  ;;  %2834 = vmatprep.subr.bf16.mxu1 %v945_v38  ;;  %v959_v47 = vunpack.c.l.s8.bf16 %v695_v43  ;;  %v961_v48 = vunpack.c.l.s8.bf16 %v697_v44  ;;  %v958_v51 = vunpack.c.l.s8.bf16 %v694_v49  ;;  %v960_v52 = vunpack.c.l.s8.bf16 %v696_v50  ;;  %v705_v56 = vld [vmem:[%s7382_s25 + $0x98] sm:$0xff]  ;;  %v702_v61 = vld [vmem:[%s7382_s25 + $0x80] sm:$0xff]  ;;  %v704_v62 = vld [vmem:[%s7382_s25 + $0x90] sm:$0xff] }
  0xd9   : > { %2223 = vmatpush1.bf16.msra.mxu0 %v942_v41  ;;  %2835 = vmatpush1.bf16.msra.mxu1 %v944_v42  ;;  %v967_v53 = vunpack.c.h.s8.bf16 %v695_v43  ;;  %v969_v54 = vunpack.c.h.s8.bf16 %v697_v44  ;;  %v966_v57 = vunpack.c.h.s8.bf16 %v694_v49  ;;  %v968_v58 = vunpack.c.h.s8.bf16 %v696_v50  ;;  %v8170_v63 = vld [vmem:[%s7380_s20] sm:$0xff]  ;;  %v711_v6 = vld [vmem:[%s7382_s25 + $0xc8] sm:$0xff]  ;;  %v713_v7 = vld [vmem:[%s7382_s25 + $0xd8] sm:$0xff] }
  0xda   : > { %2224 = vmatprep.subr.bf16.mxu0 %v951_v37  ;;  %2836 = vmatprep.subr.bf16.mxu1 %v953_v39  ;;  %v975_v59 = vunpack.c.l.s8.bf16 %v703_v55  ;;  %v977_v60 = vunpack.c.l.s8.bf16 %v705_v56  ;;  %v8173_v0 = vld [vmem:[%s7380_s20 + $0x20] sm:$0xff]  ;;  %v974_v1 = vunpack.c.l.s8.bf16 %v702_v61  ;;  %v976_v2 = vunpack.c.l.s8.bf16 %v704_v62  ;;  %v712_v13 = vld [vmem:[%s7382_s25 + $0xd0] sm:$0xff]  ;;  %v719_v18 = vld [vmem:[%s7382_s25 + $0x108] sm:$0xff] }
  0xdb   : > { %v983_v3 = vunpack.c.h.s8.bf16 %v703_v55  ;;  %v985_v4 = vunpack.c.h.s8.bf16 %v705_v56  ;;  %v8177_v5 = vcombine.high %v8170_v63, %v8173_v0  ;;  %v982_v8 = vunpack.c.h.s8.bf16 %v702_v61  ;;  %v710_v12 = vld [vmem:[%s7382_s25 + $0xc0] sm:$0xff]  ;;  %v721_v19 = vld [vmem:[%s7382_s25 + $0x118] sm:$0xff]  ;;  %v720_v25 = vld [vmem:[%s7382_s25 + $0x110] sm:$0xff] }
  0xdc   : > { %v984_v9 = vunpack.c.h.s8.bf16 %v704_v62  ;;  %v991_v10 = vunpack.c.l.s8.bf16 %v711_v6  ;;  %v993_v11 = vunpack.c.l.s8.bf16 %v713_v7  ;;  %v990_v14 = vunpack.c.l.s8.bf16 %v710_v12  ;;  %v718_v24 = vld [vmem:[%s7382_s25 + $0x100] sm:$0xff]  ;;  %v727_v30 = vld [vmem:[%s7382_s25 + $0x148] sm:$0xff]  ;;  %v729_v31 = vld [vmem:[%s7382_s25 + $0x158] sm:$0xff] }
  0xdd   : > { %2225 = vmatpush1.bf16.msra.mxu0 %v950_v45  ;;  %2837 = vmatpush1.bf16.msra.mxu1 %v952_v46  ;;  %v992_v15 = vunpack.c.l.s8.bf16 %v712_v13  ;;  %v999_v16 = vunpack.c.h.s8.bf16 %v711_v6  ;;  %v1001_v17 = vunpack.c.h.s8.bf16 %v713_v7  ;;  %v998_v20 = vunpack.c.h.s8.bf16 %v710_v12  ;;  %v726_v36 = vld [vmem:[%s7382_s25 + $0x140] sm:$0xff]  ;;  %v728_v37 = vld [vmem:[%s7382_s25 + $0x150] sm:$0xff]  ;;  %v735_v42 = vld [vmem:[%s7382_s25 + $0x188] sm:$0xff] }
  0xde   : > { %2226 = vmatprep.subr.bf16.mxu0 %v959_v47  ;;  %2838 = vmatprep.subr.bf16.mxu1 %v961_v48  ;;  %v1000_v21 = vunpack.c.h.s8.bf16 %v712_v13  ;;  %v1007_v22 = vunpack.c.l.s8.bf16 %v719_v18  ;;  %v1009_v23 = vunpack.c.l.s8.bf16 %v721_v19  ;;  %v1006_v26 = vunpack.c.l.s8.bf16 %v718_v24  ;;  %v737_v43 = vld [vmem:[%s7382_s25 + $0x198] sm:$0xff]  ;;  %v734_v48 = vld [vmem:[%s7382_s25 + $0x180] sm:$0xff]  ;;  %v736_v49 = vld [vmem:[%s7382_s25 + $0x190] sm:$0xff] }
  0xdf   : > { %2254 = vmatprep.mubr.bf16.mxu0 %v8177_v5  ;;  %2866 = vmatprep.mubr.bf16.mxu1 %v8177_v5  ;;  %v1008_v27 = vunpack.c.l.s8.bf16 %v720_v25  ;;  %v1015_v28 = vunpack.c.h.s8.bf16 %v719_v18  ;;  %v1017_v29 = vunpack.c.h.s8.bf16 %v721_v19  ;;  %v1014_v32 = vunpack.c.h.s8.bf16 %v718_v24  ;;  %v745_v55 = vld [vmem:[%s7382_s25 + $0x1d8] sm:$0xff]  ;;  %v744_v61 = vld [vmem:[%s7382_s25 + $0x1d0] sm:$0xff] }
  0xe0   : > { %v1016_v33 = vunpack.c.h.s8.bf16 %v720_v25  ;;  %v1023_v34 = vunpack.c.l.s8.bf16 %v727_v30  ;;  %v1025_v35 = vunpack.c.l.s8.bf16 %v729_v31  ;;  %v1022_v38 = vunpack.c.l.s8.bf16 %v726_v36  ;;  %v753_v6 = vld [vmem:[%s7382_s25 + $0x218] sm:$0xff]  ;;  %v752_v12 = vld [vmem:[%s7382_s25 + $0x210] sm:$0xff]  ;;  %v758_v25 = vld [vmem:[%s7382_s25 + $0x240] sm:$0xff] }
  0xe1   : > { %2227 = vmatpush1.bf16.msra.mxu0 %v958_v51  ;;  %2839 = vmatpush1.bf16.msra.mxu1 %v960_v52  ;;  %v1024_v39 = vunpack.c.l.s8.bf16 %v728_v37  ;;  %v1031_v40 = vunpack.c.h.s8.bf16 %v727_v30  ;;  %v1033_v41 = vunpack.c.h.s8.bf16 %v729_v31  ;;  %v1030_v44 = vunpack.c.h.s8.bf16 %v726_v36  ;;  %v769_v36 = vld [vmem:[%s7382_s25 + $0x298] sm:$0xff] }
  0xe2   : > { %2228 = vmatprep.subr.bf16.mxu0 %v967_v53  ;;  %2840 = vmatprep.subr.bf16.mxu1 %v969_v54  ;;  %v1032_v45 = vunpack.c.h.s8.bf16 %v728_v37  ;;  %v1039_v46 = vunpack.c.l.s8.bf16 %v735_v42  ;;  %v1041_v47 = vunpack.c.l.s8.bf16 %v737_v43  ;;  %v1038_v50 = vunpack.c.l.s8.bf16 %v734_v48  ;;  %v743_v54 = vld [vmem:[%s7382_s25 + $0x1c8] sm:$0xff] }
  0xe3   : > { %v1040_v51 = vunpack.c.l.s8.bf16 %v736_v49  ;;  %v1047_v52 = vunpack.c.h.s8.bf16 %v735_v42  ;;  %v1049_v53 = vunpack.c.h.s8.bf16 %v737_v43  ;;  %v1046_v56 = vunpack.c.h.s8.bf16 %v734_v48  ;;  %v766_v43 = vld [vmem:[%s7382_s25 + $0x280] sm:$0xff] }
  0xe4   : > { %v8207_v13 = vcombine.low %v8170_v63, %v8173_v0  ;;  %v1081_v19 = vunpack.c.h.s8.bf16 %v753_v6  ;;  %v1080_v0 = vunpack.c.h.s8.bf16 %v752_v12  ;;  %v1086_v30 = vunpack.c.l.s8.bf16 %v758_v25 }
  0xe5   : > { %2229 = vmatpush1.bf16.msra.mxu0 %v966_v57  ;;  %2841 = vmatpush1.bf16.msra.mxu1 %v968_v58  ;;  %v1048_v57 = vunpack.c.h.s8.bf16 %v736_v49  ;;  %v1055_v58 = vunpack.c.l.s8.bf16 %v743_v54  ;;  %v1094_v37 = vunpack.c.h.s8.bf16 %v758_v25  ;;  %v1105_v42 = vunpack.c.l.s8.bf16 %v769_v36  ;;  %v1698_v25 = vld [vmem:[%s7380_s20 + $0x1a0] sm:$0xff] }
  0xe6   : > { %2230 = vmatprep.subr.bf16.mxu0 %v975_v59  ;;  %2842 = vmatprep.subr.bf16.mxu1 %v977_v60  ;;  %v1057_v59 = vunpack.c.l.s8.bf16 %v745_v55  ;;  %v742_v60 = vld [vmem:[%s7382_s25 + $0x1c0] sm:$0xff] }
  0xe7   : > { %v1054_v62 = vunpack.c.l.s8.bf16 %v742_v60  ;;  %v1062_v7 = vunpack.c.h.s8.bf16 %v742_v60  ;;  %v776_v60 = vld [vmem:[%s7382_s25 + $0x2d0] sm:$0xff] }
  0xe9   : > { %2231 = vmatpush1.bf16.msra.mxu0 %v974_v1  ;;  %2843 = vmatpush1.bf16.msra.mxu1 %v976_v2  ;;  %v1056_v1 = vunpack.c.l.s8.bf16 %v744_v61  ;;  %v1063_v2 = vunpack.c.h.s8.bf16 %v743_v54  ;;  %v1682_v54 = vld [vmem:[%s7380_s20 + $0x120] sm:$0xff] }
  0xea   : > { %2232 = vmatprep.subr.bf16.mxu0 %v983_v3  ;;  %2844 = vmatprep.subr.bf16.mxu1 %v985_v4  ;;  %v1065_v3 = vunpack.c.h.s8.bf16 %v745_v55  ;;  %v751_v4 = vld [vmem:[%s7382_s25 + $0x208] sm:$0xff]  ;;  %v1110_v55 = vunpack.c.h.s8.bf16 %v766_v43 }
  0xeb   : > { %v1079_v18 = vunpack.c.h.s8.bf16 %v751_v4 }
  0xed   : > { %2233 = vmatpush1.bf16.msra.mxu0 %v982_v8  ;;  %2845 = vmatpush1.bf16.msra.mxu1 %v984_v9  ;;  %v1064_v8 = vunpack.c.h.s8.bf16 %v744_v61  ;;  %v1071_v9 = vunpack.c.l.s8.bf16 %v751_v4 }
  0xee   : > { %2234 = vmatprep.subr.bf16.mxu0 %v991_v10  ;;  %2846 = vmatprep.subr.bf16.mxu1 %v993_v11  ;;  %v1073_v10 = vunpack.c.l.s8.bf16 %v753_v6  ;;  %v750_v11 = vld [vmem:[%s7382_s25 + $0x200] sm:$0xff]  ;;  %v783_v6 = vld [vmem:[%s7382_s25 + $0x308] sm:$0xff] }
  0xef   : > { %v1078_v63 = vunpack.c.h.s8.bf16 %v750_v11 }
  0xf1   : > { %2235 = vmatpush1.bf16.msra.mxu0 %v990_v14  ;;  %2847 = vmatpush1.bf16.msra.mxu1 %v992_v15  ;;  %v1654_v14 = vld [vmem:[%s7380_s20 + $0x40] sm:$0xff] }
  0xf2   : > { %2236 = vmatprep.subr.bf16.mxu0 %v999_v16  ;;  %2848 = vmatprep.subr.bf16.mxu1 %v1001_v17  ;;  %v1658_v15 = vld [vmem:[%s7380_s20 + $0x60] sm:$0xff]  ;;  %v1070_v16 = vunpack.c.l.s8.bf16 %v750_v11  ;;  %v1072_v17 = vunpack.c.l.s8.bf16 %v752_v12  ;;  %v1128_v11 = vunpack.c.h.s8.bf16 %v776_v60  ;;  %v1135_v12 = vunpack.c.l.s8.bf16 %v783_v6 }
  0xf5   : > { %2237 = vmatpush1.bf16.msra.mxu0 %v998_v20  ;;  %2849 = vmatpush1.bf16.msra.mxu1 %v1000_v21  ;;  %v8211_v20 = vcombine.high %v1654_v14, %v1658_v15  ;;  %v759_v21 = vld [vmem:[%s7382_s25 + $0x248] sm:$0xff] }
  0xf6   : > { %2238 = vmatprep.subr.bf16.mxu0 %v1007_v22  ;;  %2850 = vmatprep.subr.bf16.mxu1 %v1009_v23  ;;  %v761_v22 = vld [vmem:[%s7382_s25 + $0x258] sm:$0xff]  ;;  %v1087_v23 = vunpack.c.l.s8.bf16 %v759_v21 }
  0xf7   : > { %v1089_v24 = vunpack.c.l.s8.bf16 %v761_v22 }
  0xf9   : > { %2239 = vmatpush1.bf16.msra.mxu0 %v1006_v26  ;;  %2851 = vmatpush1.bf16.msra.mxu1 %v1008_v27  ;;  %v760_v26 = vld [vmem:[%s7382_s25 + $0x250] sm:$0xff]  ;;  %v1662_v27 = vld [vmem:[%s7380_s20 + $0x80] sm:$0xff] }
  0xfa   : > { %2240 = vmatprep.subr.bf16.mxu0 %v1015_v28  ;;  %2852 = vmatprep.subr.bf16.mxu1 %v1017_v29  ;;  %v1666_v28 = vld [vmem:[%s7380_s20 + $0xa0] sm:$0xff]  ;;  %v8223_v29 = vcombine.low %v1654_v14, %v1658_v15  ;;  %v1088_v31 = vunpack.c.l.s8.bf16 %v760_v26 }
  0xfb   : > { %v782_v15 = vld [vmem:[%s7382_s25 + $0x300] sm:$0xff] }
  0xfd   : > { %2241 = vmatpush1.bf16.msra.mxu0 %v1014_v32  ;;  %2853 = vmatpush1.bf16.msra.mxu1 %v1016_v33  ;;  %v8225_v32 = vcombine.high %v1662_v27, %v1666_v28  ;;  %v1095_v33 = vunpack.c.h.s8.bf16 %v759_v21 }
  0xfe   : > { %2242 = vmatprep.subr.bf16.mxu0 %v1023_v34  ;;  %2854 = vmatprep.subr.bf16.mxu1 %v1025_v35  ;;  %v1097_v34 = vunpack.c.h.s8.bf16 %v761_v22  ;;  %v767_v35 = vld [vmem:[%s7382_s25 + $0x288] sm:$0xff]  ;;  %v1143_v22 = vunpack.c.h.s8.bf16 %v783_v6 }
  0xff   : > { %v1111_v49 = vunpack.c.h.s8.bf16 %v767_v35 }
 0x101   : > { %2243 = vmatpush1.bf16.msra.mxu0 %v1022_v38  ;;  %2855 = vmatpush1.bf16.msra.mxu1 %v1024_v39  ;;  %v1096_v38 = vunpack.c.h.s8.bf16 %v760_v26  ;;  %v1670_v39 = vld [vmem:[%s7380_s20 + $0xc0] sm:$0xff]  ;;  %v1142_v26 = vunpack.c.h.s8.bf16 %v782_v15 }
 0x102   : > { %2244 = vmatprep.subr.bf16.mxu0 %v1031_v40  ;;  %2856 = vmatprep.subr.bf16.mxu1 %v1033_v41  ;;  %v1674_v40 = vld [vmem:[%s7380_s20 + $0xe0] sm:$0xff]  ;;  %v1103_v41 = vunpack.c.l.s8.bf16 %v767_v35 }
 0x103   : > { %v8251_v61 = vcombine.low %v1670_v39, %v1674_v40 }
 0x105   : > { %2245 = vmatpush1.bf16.msra.mxu0 %v1030_v44  ;;  %2857 = vmatpush1.bf16.msra.mxu1 %v1032_v45  ;;  %v768_v44 = vld [vmem:[%s7382_s25 + $0x290] sm:$0xff]  ;;  %v8237_v45 = vcombine.low %v1662_v27, %v1666_v28 }
 0x106   : > { %2246 = vmatprep.subr.bf16.mxu0 %v1039_v46  ;;  %2858 = vmatprep.subr.bf16.mxu1 %v1041_v47  ;;  %v8239_v46 = vcombine.high %v1670_v39, %v1674_v40  ;;  %v1102_v47 = vunpack.c.l.s8.bf16 %v766_v43  ;;  %v1104_v48 = vunpack.c.l.s8.bf16 %v768_v44  ;;  %v799_v40 = vld [vmem:[%s7382_s25 + $0x388] sm:$0xff]  ;;  %v1706_v43 = vld [vmem:[%s7380_s20 + $0x1e0] sm:$0xff] }
 0x109   : > { %2247 = vmatpush1.bf16.msra.mxu0 %v1038_v50  ;;  %2859 = vmatpush1.bf16.msra.mxu1 %v1040_v51  ;;  %v1113_v50 = vunpack.c.h.s8.bf16 %v769_v36  ;;  %v775_v51 = vld [vmem:[%s7382_s25 + $0x2c8] sm:$0xff] }
 0x10a   : > { %2248 = vmatprep.subr.bf16.mxu0 %v1047_v52  ;;  %2860 = vmatprep.subr.bf16.mxu1 %v1049_v53  ;;  %v777_v52 = vld [vmem:[%s7382_s25 + $0x2d8] sm:$0xff]  ;;  %v1678_v53 = vld [vmem:[%s7380_s20 + $0x100] sm:$0xff] }
 0x10b   : > { %v1129_v4 = vunpack.c.h.s8.bf16 %v777_v52 }
 0x10d   : > { %2249 = vmatpush1.bf16.msra.mxu0 %v1046_v56  ;;  %2861 = vmatpush1.bf16.msra.mxu1 %v1048_v57  ;;  %v1112_v56 = vunpack.c.h.s8.bf16 %v768_v44  ;;  %v1119_v57 = vunpack.c.l.s8.bf16 %v775_v51 }
 0x10e   : > { %2250 = vmatprep.subr.bf16.mxu0 %v1055_v58  ;;  %2862 = vmatprep.subr.bf16.mxu1 %v1057_v59  ;;  %v1121_v58 = vunpack.c.l.s8.bf16 %v777_v52  ;;  %v774_v59 = vld [vmem:[%s7382_s25 + $0x2c0] sm:$0xff] }
 0x111   : > { %2251 = vmatpush1.bf16.msra.mxu0 %v1054_v62  ;;  %2863 = vmatpush1.bf16.msra.mxu1 %v1056_v1  ;;  %v8253_v62 = vcombine.high %v1678_v53, %v1682_v54  ;;  %v1118_v1 = vunpack.c.l.s8.bf16 %v774_v59 }
 0x112   : > { %2252 = vmatprep.subr.bf16.mxu0 %v1063_v2  ;;  %2864 = vmatprep.subr.bf16.mxu1 %v1065_v3  ;;  %v1120_v2 = vunpack.c.l.s8.bf16 %v776_v60  ;;  %v1127_v3 = vunpack.c.h.s8.bf16 %v775_v51  ;;  %v800_v51 = vld [vmem:[%s7382_s25 + $0x390] sm:$0xff]  ;;  %v1710_v60 = vld [vmem:[%s7380_s20 + $0x200] sm:$0xff] }
 0x115   : > { %2253 = vmatpush1.bf16.msra.mxu0 %v1062_v7  ;;  %2865 = vmatpush1.bf16.msra.mxu1 %v1064_v8  ;;  %v785_v7 = vld [vmem:[%s7382_s25 + $0x318] sm:$0xff]  ;;  %v1686_v8 = vld [vmem:[%s7380_s20 + $0x140] sm:$0xff] }
 0x116   : > { %2375 = vmatprep.subr.bf16.mxu0 %v1071_v9  ;;  %2987 = vmatprep.subr.bf16.mxu1 %v1073_v10  ;;  %v1690_v9 = vld [vmem:[%s7380_s20 + $0x160] sm:$0xff]  ;;  %v1126_v10 = vunpack.c.h.s8.bf16 %v774_v59  ;;  %v1137_v14 = vunpack.c.l.s8.bf16 %v785_v7  ;;  %v809_v59 = vld [vmem:[%s7382_s25 + $0x3d8] sm:$0xff] }
 0x117   : > { %v1185_v6 = vunpack.c.l.s8.bf16 %v809_v59 }
 0x118   : > { %2255 = vmatmul.mubr.bf16.vlgmr.msra.gmra.mrb[0].mxu0 %v8207_v13  ;;  %2867 = vmatmul.mubr.bf16.vlgmr.msra.gmra.mrb[0].mxu1 %v8207_v13 }
 0x119   : > { %2376 = vmatpush1.bf16.msra.mxu0 %v1070_v16  ;;  %2988 = vmatpush1.bf16.msra.mxu1 %v1072_v17  ;;  %v784_v16 = vld [vmem:[%s7382_s25 + $0x310] sm:$0xff]  ;;  %v8265_v17 = vcombine.low %v1678_v53, %v1682_v54 }
 0x11a   : > { %2377 = vmatprep.subr.bf16.mxu0 %v1079_v18  ;;  %2989 = vmatprep.subr.bf16.mxu1 %v1081_v19  ;;  %v8267_v18 = vcombine.high %v1686_v8, %v1690_v9  ;;  %v1134_v19 = vunpack.c.l.s8.bf16 %v782_v15  ;;  %v1136_v21 = vunpack.c.l.s8.bf16 %v784_v16  ;;  %v1144_v27 = vunpack.c.h.s8.bf16 %v784_v16  ;;  %v8314_v16 = vld [vmem:[%s7382_s25 + $0x408] sm:$0xff] }
 0x11b   : > { %2264 = vmatprep.mubr.bf16.mxu0 %v8211_v20  ;;  %2876 = vmatprep.mubr.bf16.mxu1 %v8211_v20  ;;  %v1193_v15 = vunpack.c.h.s8.bf16 %v809_v59 }
 0x11d   : > { %2378 = vmatpush1.bf16.msra.mxu0 %v1078_v63  ;;  %2990 = vmatpush1.bf16.msra.mxu1 %v1080_v0  ;;  %v1145_v63 = vunpack.c.h.s8.bf16 %v785_v7  ;;  %v791_v0 = vld [vmem:[%s7382_s25 + $0x348] sm:$0xff]  ;;  %v806_v7 = vld [vmem:[%s7382_s25 + $0x3c0] sm:$0xff] }
 0x11e   : > { %2379 = vmatprep.subr.bf16.mxu0 %v1087_v23  ;;  %2991 = vmatprep.subr.bf16.mxu1 %v1089_v24  ;;  %v793_v23 = vld [vmem:[%s7382_s25 + $0x358] sm:$0xff]  ;;  %v1694_v24 = vld [vmem:[%s7380_s20 + $0x180] sm:$0xff]  ;;  %v1151_v28 = vunpack.c.l.s8.bf16 %v791_v0 }
 0x11f   : > { %v8281_v35 = vcombine.high %v1694_v24, %v1698_v25  ;;  %v1161_v39 = vunpack.c.h.s8.bf16 %v793_v23  ;;  %v8293_v52 = vcombine.low %v1694_v24, %v1698_v25 }
 0x120   : > { %2265 = vmatmul.mubr.bf16.gmra.mrb[4].mxu0 %v8223_v29  ;;  %2877 = vmatmul.mubr.bf16.gmra.mrb[4].mxu1 %v8223_v29 }
 0x121   : > { %2380 = vmatpush1.bf16.msra.mxu0 %v1086_v30  ;;  %2992 = vmatpush1.bf16.msra.mxu1 %v1088_v31  ;;  %v1153_v30 = vunpack.c.l.s8.bf16 %v793_v23  ;;  %v790_v31 = vld [vmem:[%s7382_s25 + $0x340] sm:$0xff]  ;;  %v1199_v23 = vunpack.c.l.s8.bf16 %v8314_v16 }
 0x122   : > { %2274 = vmatprep.mubr.bf16.mxu0 %v8225_v32  ;;  %2886 = vmatprep.mubr.bf16.mxu1 %v8225_v32  ;;  %v1150_v36 = vunpack.c.l.s8.bf16 %v790_v31  ;;  %v1158_v44 = vunpack.c.h.s8.bf16 %v790_v31 }
 0x123   : > { %2381 = vmatprep.subr.bf16.mxu0 %v1095_v33  ;;  %2993 = vmatprep.subr.bf16.mxu1 %v1097_v34  ;;  %v792_v33 = vld [vmem:[%s7382_s25 + $0x350] sm:$0xff]  ;;  %v8279_v34 = vcombine.low %v1686_v8, %v1690_v9 }
 0x124   : > { %v808_v8 = vld [vmem:[%s7382_s25 + $0x3d0] sm:$0xff] }
 0x125   : > { %2382 = vmatpush1.bf16.msra.mxu0 %v1094_v37  ;;  %2994 = vmatpush1.bf16.msra.mxu1 %v1096_v38  ;;  %v1152_v37 = vunpack.c.l.s8.bf16 %v792_v33  ;;  %v1159_v38 = vunpack.c.h.s8.bf16 %v791_v0  ;;  %v1192_v0 = vunpack.c.h.s8.bf16 %v808_v8 }
 0x126   : > { %2383 = vmatprep.subr.bf16.mxu0 %v1103_v41  ;;  %2995 = vmatprep.subr.bf16.mxu1 %v1105_v42  ;;  %v801_v41 = vld [vmem:[%s7382_s25 + $0x398] sm:$0xff]  ;;  %v1702_v42 = vld [vmem:[%s7380_s20 + $0x1c0] sm:$0xff] }
 0x127   : > { %v8295_v53 = vcombine.high %v1702_v42, %v1706_v43  ;;  %v8307_v9 = vcombine.low %v1702_v42, %v1706_v43  ;;  %v814_v43 = vld [vmem:[%s7382_s25 + $0x400] sm:$0xff] }
 0x128   : > { %2275 = vmatmul.mubr.bf16.gmra.mrb[8].mxu0 %v8237_v45  ;;  %2887 = vmatmul.mubr.bf16.gmra.mrb[8].mxu1 %v8237_v45  ;;  %v1206_v59 = vunpack.c.h.s8.bf16 %v814_v43 }
 0x129   : > { %2284 = vmatprep.mubr.bf16.mxu0 %v8239_v46  ;;  %2896 = vmatprep.mubr.bf16.mxu1 %v8239_v46 }
 0x12a   : > { %2384 = vmatpush1.bf16.msra.mxu0 %v1102_v47  ;;  %2996 = vmatpush1.bf16.msra.mxu1 %v1104_v48  ;;  %v1160_v47 = vunpack.c.h.s8.bf16 %v792_v33  ;;  %v1167_v48 = vunpack.c.l.s8.bf16 %v799_v40  ;;  %v1734_v33 = vld [vmem:[%s7380_s20 + $0x2c0] sm:$0xff] }
 0x12b   : > { %2385 = vmatprep.subr.bf16.mxu0 %v1111_v49  ;;  %2997 = vmatprep.subr.bf16.mxu1 %v1113_v50  ;;  %v1169_v49 = vunpack.c.l.s8.bf16 %v801_v41  ;;  %v798_v50 = vld [vmem:[%s7382_s25 + $0x380] sm:$0xff] }
 0x12c   : > { %v1166_v54 = vunpack.c.l.s8.bf16 %v798_v50 }
 0x12e   : > { %2386 = vmatpush1.bf16.msra.mxu0 %v1110_v55  ;;  %2998 = vmatpush1.bf16.msra.mxu1 %v1112_v56  ;;  %v1168_v55 = vunpack.c.l.s8.bf16 %v800_v51  ;;  %v1175_v56 = vunpack.c.h.s8.bf16 %v799_v40  ;;  %v1651_v40 = vld [vmem:[%s7380_s20 + $0x28] sm:$0xff] }
 0x12f   : > { %2387 = vmatprep.subr.bf16.mxu0 %v1119_v57  ;;  %2999 = vmatprep.subr.bf16.mxu1 %v1121_v58  ;;  %v1177_v57 = vunpack.c.h.s8.bf16 %v801_v41  ;;  %v807_v58 = vld [vmem:[%s7382_s25 + $0x3c8] sm:$0xff] }
 0x130   : > { %2285 = vmatmul.mubr.bf16.gmra.mrb[12].mxu0 %v8251_v61  ;;  %2897 = vmatmul.mubr.bf16.gmra.mrb[12].mxu1 %v8251_v61 }
 0x131   : > { %2294 = vmatprep.mubr.bf16.mxu0 %v8253_v62  ;;  %2906 = vmatprep.mubr.bf16.mxu1 %v8253_v62 }
 0x132   : > { %2388 = vmatpush1.bf16.msra.mxu0 %v1118_v1  ;;  %3000 = vmatpush1.bf16.msra.mxu1 %v1120_v2  ;;  %v1714_v1 = vld [vmem:[%s7380_s20 + $0x220] sm:$0xff]  ;;  %v1174_v2 = vunpack.c.h.s8.bf16 %v798_v50  ;;  %v1198_v50 = vunpack.c.l.s8.bf16 %v814_v43 }
 0x133   : > { %2389 = vmatprep.subr.bf16.mxu0 %v1127_v3  ;;  %3001 = vmatprep.subr.bf16.mxu1 %v1129_v4  ;;  %v1176_v3 = vunpack.c.h.s8.bf16 %v800_v51  ;;  %v1183_v4 = vunpack.c.l.s8.bf16 %v807_v58  ;;  %v8325_v25 = vcombine.low %v1710_v60, %v1714_v1 }
 0x136   : > { %2390 = vmatpush1.bf16.msra.mxu0 %v1126_v10  ;;  %3002 = vmatpush1.bf16.msra.mxu1 %v1128_v11  ;;  %v8309_v10 = vcombine.high %v1710_v60, %v1714_v1  ;;  %v1182_v11 = vunpack.c.l.s8.bf16 %v806_v7 }
 0x137   : > { %2391 = vmatprep.subr.bf16.mxu0 %v1135_v12  ;;  %3003 = vmatprep.subr.bf16.mxu1 %v1137_v14  ;;  %v1184_v12 = vunpack.c.l.s8.bf16 %v808_v8  ;;  %v1191_v14 = vunpack.c.h.s8.bf16 %v807_v58  ;;  %v825_v58 = vld [vmem:[%s7382_s25 + $0x458] sm:$0xff] }
 0x138   : > { %2295 = vmatmul.mubr.bf16.gmra.mrb[16].mxu0 %v8265_v17  ;;  %2907 = vmatmul.mubr.bf16.gmra.mrb[16].mxu1 %v8265_v17 }
 0x139   : > { %2304 = vmatprep.mubr.bf16.mxu0 %v8267_v18  ;;  %2916 = vmatprep.mubr.bf16.mxu1 %v8267_v18 }
 0x13a   : > { %2392 = vmatpush1.bf16.msra.mxu0 %v1134_v19  ;;  %3004 = vmatpush1.bf16.msra.mxu1 %v1136_v21  ;;  %v8317_v19 = vld [vmem:[%s7382_s25 + $0x418] sm:$0xff]  ;;  %v1718_v21 = vld [vmem:[%s7380_s20 + $0x240] sm:$0xff] }
 0x13b   : > { %2393 = vmatprep.subr.bf16.mxu0 %v1143_v22  ;;  %3005 = vmatprep.subr.bf16.mxu1 %v1145_v63  ;;  %v1722_v22 = vld [vmem:[%s7380_s20 + $0x260] sm:$0xff]  ;;  %v1190_v63 = vunpack.c.h.s8.bf16 %v806_v7  ;;  %v1201_v24 = vunpack.c.l.s8.bf16 %v8317_v19  ;;  %v1667_v7 = vld [vmem:[%s7380_s20 + $0xa8] sm:$0xff] }
 0x13e   : > { %2394 = vmatpush1.bf16.msra.mxu0 %v1142_v26  ;;  %3006 = vmatpush1.bf16.msra.mxu1 %v1144_v27  ;;  %v8327_v26 = vcombine.high %v1718_v21, %v1722_v22  ;;  %v1726_v27 = vld [vmem:[%s7380_s20 + $0x280] sm:$0xff] }
 0x13f   : > { %2395 = vmatprep.subr.bf16.mxu0 %v1151_v28  ;;  %3007 = vmatprep.subr.bf16.mxu1 %v1153_v30  ;;  %v1730_v28 = vld [vmem:[%s7380_s20 + $0x2a0] sm:$0xff]  ;;  %v8335_v30 = vcombine.low %v1718_v21, %v1722_v22  ;;  %v833_v21 = vld [vmem:[%s7382_s25 + $0x498] sm:$0xff] }
 0x140   : > { %2305 = vmatmul.mubr.bf16.gmra.mrb[20].mxu0 %v8279_v34  ;;  %2917 = vmatmul.mubr.bf16.gmra.mrb[20].mxu1 %v8279_v34  ;;  %v8337_v31 = vcombine.high %v1726_v27, %v1730_v28 }
 0x141   : > { %2314 = vmatprep.mubr.bf16.mxu0 %v8281_v35  ;;  %2926 = vmatprep.mubr.bf16.mxu1 %v8281_v35 }
 0x142   : > { %2396 = vmatpush1.bf16.msra.mxu0 %v1150_v36  ;;  %3008 = vmatpush1.bf16.msra.mxu1 %v1152_v37  ;;  %v1738_v36 = vld [vmem:[%s7380_s20 + $0x2e0] sm:$0xff]  ;;  %v8345_v37 = vcombine.low %v1726_v27, %v1730_v28  ;;  %v1233_v27 = vunpack.c.l.s8.bf16 %v833_v21 }
 0x143   : > { %2397 = vmatprep.subr.bf16.mxu0 %v1159_v38  ;;  %3009 = vmatprep.subr.bf16.mxu1 %v1161_v39  ;;  %v8347_v38 = vcombine.high %v1734_v33, %v1738_v36  ;;  %v1647_v39 = vld [vmem:[%s7380_s20 + $0x8] sm:$0xff]  ;;  %v8355_v41 = vcombine.low %v1734_v33, %v1738_v36  ;;  %v830_v28 = vld [vmem:[%s7382_s25 + $0x480] sm:$0xff]  ;;  %v832_v33 = vld [vmem:[%s7382_s25 + $0x490] sm:$0xff] }
 0x144   : > { %v8357_v42 = vcombine.high %v1647_v39, %v1651_v40  ;;  %v1232_v43 = vunpack.c.l.s8.bf16 %v832_v33 }
 0x146   : > { %2398 = vmatpush1.bf16.msra.mxu0 %v1158_v44  ;;  %3010 = vmatpush1.bf16.msra.mxu1 %v1160_v47  ;;  %v816_v44 = vld [vmem:[%s7382_s25 + $0x410] sm:$0xff]  ;;  %v8365_v47 = vcombine.low %v1647_v39, %v1651_v40  ;;  %v1230_v40 = vunpack.c.l.s8.bf16 %v830_v28 }
 0x147   : > { %2399 = vmatprep.subr.bf16.mxu0 %v1167_v48  ;;  %3011 = vmatprep.subr.bf16.mxu1 %v1169_v49  ;;  %v1655_v48 = vld [vmem:[%s7380_s20 + $0x48] sm:$0xff]  ;;  %v1200_v51 = vunpack.c.l.s8.bf16 %v816_v44  ;;  %v1208_v60 = vunpack.c.h.s8.bf16 %v816_v44 }
 0x148   : > { %2315 = vmatmul.mubr.bf16.gmra.mrb[24].mxu0 %v8293_v52  ;;  %2927 = vmatmul.mubr.bf16.gmra.mrb[24].mxu1 %v8293_v52  ;;  %v1659_v49 = vld [vmem:[%s7380_s20 + $0x68] sm:$0xff] }
 0x149   : > { %2324 = vmatprep.mubr.bf16.mxu0 %v8295_v53  ;;  %2936 = vmatprep.mubr.bf16.mxu1 %v8295_v53  ;;  %v8383_v8 = vcombine.low %v1655_v48, %v1659_v49 }
 0x14a   : > { %2400 = vmatpush1.bf16.msra.mxu0 %v1166_v54  ;;  %3012 = vmatpush1.bf16.msra.mxu1 %v1168_v55  ;;  %v1207_v54 = vunpack.c.h.s8.bf16 %v8314_v16  ;;  %v1209_v55 = vunpack.c.h.s8.bf16 %v8317_v19  ;;  %v1225_v16 = vunpack.c.h.s8.bf16 %v825_v58  ;;  %v831_v19 = vld [vmem:[%s7382_s25 + $0x488] sm:$0xff] }
 0x14b   : > { %2401 = vmatprep.subr.bf16.mxu0 %v1175_v56  ;;  %3013 = vmatprep.subr.bf16.mxu1 %v1177_v57  ;;  %v8371_v56 = vcombine.high %v1655_v48, %v1659_v49  ;;  %v823_v57 = vld [vmem:[%s7382_s25 + $0x448] sm:$0xff]  ;;  %v1239_v44 = vunpack.c.h.s8.bf16 %v831_v19  ;;  %v1241_v48 = vunpack.c.h.s8.bf16 %v833_v21 }
 0x14c   : > { %v1215_v1 = vunpack.c.l.s8.bf16 %v823_v57  ;;  %v839_v49 = vld [vmem:[%s7382_s25 + $0x4c8] sm:$0xff] }
 0x14e   : > { %2402 = vmatpush1.bf16.msra.mxu0 %v1174_v2  ;;  %3014 = vmatpush1.bf16.msra.mxu1 %v1176_v3  ;;  %v1217_v2 = vunpack.c.l.s8.bf16 %v825_v58  ;;  %v822_v3 = vld [vmem:[%s7382_s25 + $0x440] sm:$0xff]  ;;  %v1247_v58 = vunpack.c.l.s8.bf16 %v839_v49 }
 0x14f   : > { %2403 = vmatprep.subr.bf16.mxu0 %v1183_v4  ;;  %3015 = vmatprep.subr.bf16.mxu1 %v1185_v6  ;;  %v824_v4 = vld [vmem:[%s7382_s25 + $0x450] sm:$0xff]  ;;  %v1663_v6 = vld [vmem:[%s7380_s20 + $0x88] sm:$0xff]  ;;  %v1222_v22 = vunpack.c.h.s8.bf16 %v822_v3 }
 0x150   : > { %2325 = vmatmul.mubr.bf16.gmra.mrb[28].mxu0 %v8307_v9  ;;  %2937 = vmatmul.mubr.bf16.gmra.mrb[28].mxu1 %v8307_v9  ;;  %v8397_v36 = vcombine.low %v1663_v6, %v1667_v7 }
 0x151   : > { %2334 = vmatprep.mubr.bf16.mxu0 %v8309_v10  ;;  %2946 = vmatprep.mubr.bf16.mxu1 %v8309_v10 }
 0x152   : > { %2404 = vmatpush1.bf16.msra.mxu0 %v1182_v11  ;;  %3016 = vmatpush1.bf16.msra.mxu1 %v1184_v12  ;;  %v1214_v11 = vunpack.c.l.s8.bf16 %v822_v3  ;;  %v1216_v12 = vunpack.c.l.s8.bf16 %v824_v4 }
 0x153   : > { %2405 = vmatprep.subr.bf16.mxu0 %v1191_v14  ;;  %3017 = vmatprep.subr.bf16.mxu1 %v1193_v15  ;;  %v8385_v14 = vcombine.high %v1663_v6, %v1667_v7  ;;  %v1223_v15 = vunpack.c.h.s8.bf16 %v823_v57  ;;  %v1240_v57 = vunpack.c.h.s8.bf16 %v832_v33  ;;  %v1255_v7 = vunpack.c.h.s8.bf16 %v839_v49  ;;  %v857_v49 = vld [vmem:[%s7382_s25 + $0x558] sm:$0xff] }
 0x156   : > { %2406 = vmatpush1.bf16.msra.mxu0 %v1190_v63  ;;  %3018 = vmatpush1.bf16.msra.mxu1 %v1192_v0  ;;  %v1224_v63 = vunpack.c.h.s8.bf16 %v824_v4  ;;  %v1671_v0 = vld [vmem:[%s7380_s20 + $0xc8] sm:$0xff] }
 0x157   : > { %2528 = vmatprep.subr.bf16.mxu0 %v1199_v23  ;;  %3140 = vmatprep.subr.bf16.mxu1 %v1201_v24  ;;  %v1675_v23 = vld [vmem:[%s7380_s20 + $0xe8] sm:$0xff]  ;;  %v1231_v24 = vunpack.c.l.s8.bf16 %v831_v19 }
 0x158   : > { %2335 = vmatmul.mubr.bf16.gmra.mrb[32].mxu0 %v8325_v25  ;;  %2947 = vmatmul.mubr.bf16.gmra.mrb[32].mxu1 %v8325_v25  ;;  %v8399_v39 = vcombine.high %v1671_v0, %v1675_v23  ;;  %v1691_v19 = vld [vmem:[%s7380_s20 + $0x168] sm:$0xff] }
 0x159   : > { %2344 = vmatprep.mubr.bf16.mxu0 %v8327_v26  ;;  %2956 = vmatprep.mubr.bf16.mxu1 %v8327_v26 }
 0x160   : > { %2345 = vmatmul.mubr.bf16.gmra.mrb[36].mxu0 %v8335_v30  ;;  %2957 = vmatmul.mubr.bf16.gmra.mrb[36].mxu1 %v8335_v30 }
 0x161   : > { %2354 = vmatprep.mubr.bf16.mxu0 %v8337_v31  ;;  %2966 = vmatprep.mubr.bf16.mxu1 %v8337_v31 }
 0x168   : > { %2355 = vmatmul.mubr.bf16.gmra.mrb[40].mxu0 %v8345_v37  ;;  %2967 = vmatmul.mubr.bf16.gmra.mrb[40].mxu1 %v8345_v37 }
 0x169   : > { %2364 = vmatprep.mubr.bf16.mxu0 %v8347_v38  ;;  %2976 = vmatprep.mubr.bf16.mxu1 %v8347_v38 }
 0x170   : > { %2365 = vmatmul.mubr.bf16.gmra.mrb[44].mxu0 %v8355_v41  ;;  %2977 = vmatmul.mubr.bf16.gmra.mrb[44].mxu1 %v8355_v41 }
 0x171   : > { %2407 = vmatprep.mubr.bf16.mxu0 %v8357_v42  ;;  %3019 = vmatprep.mubr.bf16.mxu1 %v8357_v42 }
 0x178   : > { %2408 = vmatmul.mubr.bf16.vlgmr.msra.gmra.mrb[0].mxu0 %v8365_v47  ;;  %3020 = vmatmul.mubr.bf16.vlgmr.msra.gmra.mrb[0].mxu1 %v8365_v47 }
 0x179   : > { %2529 = vmatpush1.bf16.msra.mxu0 %v1198_v50  ;;  %3141 = vmatpush1.bf16.msra.mxu1 %v1200_v51  ;;  %v841_v50 = vld [vmem:[%s7382_s25 + $0x4d8] sm:$0xff]  ;;  %v1679_v51 = vld [vmem:[%s7380_s20 + $0x108] sm:$0xff] }
 0x17a   : > { %2530 = vmatprep.subr.bf16.mxu0 %v1207_v54  ;;  %3142 = vmatprep.subr.bf16.mxu1 %v1209_v55  ;;  %v1683_v54 = vld [vmem:[%s7380_s20 + $0x128] sm:$0xff]  ;;  %v1238_v55 = vunpack.c.h.s8.bf16 %v830_v28 }
 0x17b   : > { %2417 = vmatprep.mubr.bf16.mxu0 %v8371_v56  ;;  %3029 = vmatprep.mubr.bf16.mxu1 %v8371_v56  ;;  %v8413_v3 = vcombine.high %v1679_v51, %v1683_v54 }
 0x17d   : > { %2531 = vmatpush1.bf16.msra.mxu0 %v1206_v59  ;;  %3143 = vmatpush1.bf16.msra.mxu1 %v1208_v60  ;;  %v1249_v59 = vunpack.c.l.s8.bf16 %v841_v50  ;;  %v838_v60 = vld [vmem:[%s7382_s25 + $0x4c0] sm:$0xff] }
 0x17e   : > { %2532 = vmatprep.subr.bf16.mxu0 %v1215_v1  ;;  %3144 = vmatprep.subr.bf16.mxu1 %v1217_v2  ;;  %v840_v1 = vld [vmem:[%s7382_s25 + $0x4d0] sm:$0xff]  ;;  %v8411_v2 = vcombine.low %v1671_v0, %v1675_v23  ;;  %v1246_v4 = vunpack.c.l.s8.bf16 %v838_v60  ;;  %v1254_v21 = vunpack.c.h.s8.bf16 %v838_v60  ;;  %v846_v23 = vld [vmem:[%s7382_s25 + $0x500] sm:$0xff] }
 0x17f   : > { %v1248_v6 = vunpack.c.l.s8.bf16 %v840_v1  ;;  %v1262_v33 = vunpack.c.l.s8.bf16 %v846_v23  ;;  %v856_v60 = vld [vmem:[%s7382_s25 + $0x550] sm:$0xff] }
 0x180   : > { %2418 = vmatmul.mubr.bf16.gmra.mrb[4].mxu0 %v8383_v8  ;;  %3030 = vmatmul.mubr.bf16.gmra.mrb[4].mxu1 %v8383_v8 }
 0x181   : > { %2533 = vmatpush1.bf16.msra.mxu0 %v1214_v11  ;;  %3145 = vmatpush1.bf16.msra.mxu1 %v1216_v12  ;;  %v1257_v11 = vunpack.c.h.s8.bf16 %v841_v50  ;;  %v847_v12 = vld [vmem:[%s7382_s25 + $0x508] sm:$0xff] }
 0x182   : > { %2427 = vmatprep.mubr.bf16.mxu0 %v8385_v14  ;;  %3039 = vmatprep.mubr.bf16.mxu1 %v8385_v14  ;;  %v1695_v50 = vld [vmem:[%s7380_s20 + $0x188] sm:$0xff] }
 0x183   : > { %2534 = vmatprep.subr.bf16.mxu0 %v1223_v15  ;;  %3146 = vmatprep.subr.bf16.mxu1 %v1225_v16  ;;  %v849_v15 = vld [vmem:[%s7382_s25 + $0x518] sm:$0xff]  ;;  %v1687_v16 = vld [vmem:[%s7380_s20 + $0x148] sm:$0xff] }
 0x184   : > { %v1265_v0 = vunpack.c.l.s8.bf16 %v849_v15  ;;  %v8427_v28 = vcombine.high %v1687_v16, %v1691_v19 }
 0x185   : > { %2535 = vmatpush1.bf16.msra.mxu0 %v1222_v22  ;;  %3147 = vmatpush1.bf16.msra.mxu1 %v1224_v63  ;;  %v1256_v22 = vunpack.c.h.s8.bf16 %v840_v1  ;;  %v1263_v63 = vunpack.c.l.s8.bf16 %v847_v12  ;;  %v8439_v1 = vcombine.low %v1687_v16, %v1691_v19  ;;  %v865_v16 = vld [vmem:[%s7382_s25 + $0x598] sm:$0xff]  ;;  %v1703_v19 = vld [vmem:[%s7380_s20 + $0x1c8] sm:$0xff] }
 0x186   : > { %2536 = vmatprep.subr.bf16.mxu0 %v1231_v24  ;;  %3148 = vmatprep.subr.bf16.mxu1 %v1233_v27  ;;  %v848_v24 = vld [vmem:[%s7382_s25 + $0x510] sm:$0xff]  ;;  %v8425_v27 = vcombine.low %v1679_v51, %v1683_v54  ;;  %v1699_v51 = vld [vmem:[%s7380_s20 + $0x1a8] sm:$0xff]  ;;  %v1270_v54 = vunpack.c.h.s8.bf16 %v846_v23  ;;  %v1297_v23 = vunpack.c.l.s8.bf16 %v865_v16 }
 0x188   : > { %2428 = vmatmul.mubr.bf16.gmra.mrb[8].mxu0 %v8397_v36  ;;  %3040 = vmatmul.mubr.bf16.gmra.mrb[8].mxu1 %v8397_v36 }
 0x189   : > { %2437 = vmatprep.mubr.bf16.mxu0 %v8399_v39  ;;  %3049 = vmatprep.mubr.bf16.mxu1 %v8399_v39 }
 0x18a   : > { %2537 = vmatpush1.bf16.msra.mxu0 %v1230_v40  ;;  %3149 = vmatpush1.bf16.msra.mxu1 %v1232_v43  ;;  %v1264_v40 = vunpack.c.l.s8.bf16 %v848_v24  ;;  %v1271_v43 = vunpack.c.h.s8.bf16 %v847_v12  ;;  %v1289_v12 = vunpack.c.h.s8.bf16 %v857_v49 }
 0x18b   : > { %2538 = vmatprep.subr.bf16.mxu0 %v1239_v44  ;;  %3150 = vmatprep.subr.bf16.mxu1 %v1241_v48  ;;  %v1273_v44 = vunpack.c.h.s8.bf16 %v849_v15  ;;  %v855_v48 = vld [vmem:[%s7382_s25 + $0x548] sm:$0xff] }
 0x18c   : > { %v863_v15 = vld [vmem:[%s7382_s25 + $0x588] sm:$0xff] }
 0x18e   : > { %2539 = vmatpush1.bf16.msra.mxu0 %v1238_v55  ;;  %3151 = vmatpush1.bf16.msra.mxu1 %v1240_v57  ;;  %v1272_v55 = vunpack.c.h.s8.bf16 %v848_v24  ;;  %v1279_v57 = vunpack.c.l.s8.bf16 %v855_v48  ;;  %v862_v24 = vld [vmem:[%s7382_s25 + $0x580] sm:$0xff] }
 0x18f   : > { %2540 = vmatprep.subr.bf16.mxu0 %v1247_v58  ;;  %3152 = vmatprep.subr.bf16.mxu1 %v1249_v59  ;;  %v1281_v58 = vunpack.c.l.s8.bf16 %v857_v49  ;;  %v854_v59 = vld [vmem:[%s7382_s25 + $0x540] sm:$0xff]  ;;  %v1303_v49 = vunpack.c.h.s8.bf16 %v863_v15 }
 0x190   : > { %2438 = vmatmul.mubr.bf16.gmra.mrb[12].mxu0 %v8411_v2  ;;  %3050 = vmatmul.mubr.bf16.gmra.mrb[12].mxu1 %v8411_v2 }
 0x191   : > { %2447 = vmatprep.mubr.bf16.mxu0 %v8413_v3  ;;  %3059 = vmatprep.mubr.bf16.mxu1 %v8413_v3 }
 0x192   : > { %2541 = vmatpush1.bf16.msra.mxu0 %v1246_v4  ;;  %3153 = vmatpush1.bf16.msra.mxu1 %v1248_v6  ;;  %v8441_v4 = vcombine.high %v1695_v50, %v1699_v51  ;;  %v1278_v6 = vunpack.c.l.s8.bf16 %v854_v59 }
 0x193   : > { %2542 = vmatprep.subr.bf16.mxu0 %v1255_v7  ;;  %3154 = vmatprep.subr.bf16.mxu1 %v1257_v11  ;;  %v1280_v7 = vunpack.c.l.s8.bf16 %v856_v60  ;;  %v1287_v11 = vunpack.c.h.s8.bf16 %v855_v48 }
 0x196   : > { %2543 = vmatpush1.bf16.msra.mxu0 %v1254_v21  ;;  %3155 = vmatpush1.bf16.msra.mxu1 %v1256_v22  ;;  %v1707_v21 = vld [vmem:[%s7380_s20 + $0x1e8] sm:$0xff]  ;;  %v1286_v22 = vunpack.c.h.s8.bf16 %v854_v59 }
 0x197   : > { %2544 = vmatprep.subr.bf16.mxu0 %v1263_v63  ;;  %3156 = vmatprep.subr.bf16.mxu1 %v1265_v0  ;;  %v1288_v63 = vunpack.c.h.s8.bf16 %v856_v60  ;;  %v1295_v0 = vunpack.c.l.s8.bf16 %v863_v15 }
 0x198   : > { %2448 = vmatmul.mubr.bf16.gmra.mrb[16].mxu0 %v8425_v27  ;;  %3060 = vmatmul.mubr.bf16.gmra.mrb[16].mxu1 %v8425_v27 }
 0x199   : > { %2457 = vmatprep.mubr.bf16.mxu0 %v8427_v28  ;;  %3069 = vmatprep.mubr.bf16.mxu1 %v8427_v28 }
 0x19a   : > { %2545 = vmatpush1.bf16.msra.mxu0 %v1262_v33  ;;  %3157 = vmatpush1.bf16.msra.mxu1 %v1264_v40  ;;  %v864_v33 = vld [vmem:[%s7382_s25 + $0x590] sm:$0xff]  ;;  %v8453_v40 = vcombine.low %v1695_v50, %v1699_v51  ;;  %v871_v50 = vld [vmem:[%s7382_s25 + $0x5c8] sm:$0xff]  ;;  %v873_v51 = vld [vmem:[%s7382_s25 + $0x5d8] sm:$0xff] }
 0x19b   : > { %2546 = vmatprep.subr.bf16.mxu0 %v1271_v43  ;;  %3158 = vmatprep.subr.bf16.mxu1 %v1273_v44  ;;  %v8455_v43 = vcombine.high %v1703_v19, %v1707_v21  ;;  %v1294_v44 = vunpack.c.l.s8.bf16 %v862_v24  ;;  %v1296_v48 = vunpack.c.l.s8.bf16 %v864_v33  ;;  %v1304_v59 = vunpack.c.h.s8.bf16 %v864_v33 }
 0x19c   : > { %v1311_v60 = vunpack.c.l.s8.bf16 %v871_v50 }
 0x19e   : > { %2547 = vmatpush1.bf16.msra.mxu0 %v1270_v54  ;;  %3159 = vmatpush1.bf16.msra.mxu1 %v1272_v55  ;;  %v1305_v54 = vunpack.c.h.s8.bf16 %v865_v16  ;;  %v1711_v55 = vld [vmem:[%s7380_s20 + $0x208] sm:$0xff] }
 0x19f   : > { %2548 = vmatprep.subr.bf16.mxu0 %v1279_v57  ;;  %3160 = vmatprep.subr.bf16.mxu1 %v1281_v58  ;;  %v1715_v57 = vld [vmem:[%s7380_s20 + $0x228] sm:$0xff]  ;;  %v1302_v58 = vunpack.c.h.s8.bf16 %v862_v24 }
 0x1a0   : > { %2458 = vmatmul.mubr.bf16.gmra.mrb[20].mxu0 %v8439_v1  ;;  %3070 = vmatmul.mubr.bf16.gmra.mrb[20].mxu1 %v8439_v1  ;;  %v8469_v15 = vcombine.high %v1711_v55, %v1715_v57  ;;  %v1723_v24 = vld [vmem:[%s7380_s20 + $0x268] sm:$0xff] }
 0x1a1   : > { %2467 = vmatprep.mubr.bf16.mxu0 %v8441_v4  ;;  %3079 = vmatprep.mubr.bf16.mxu1 %v8441_v4 }
 0x1a2   : > { %2549 = vmatpush1.bf16.msra.mxu0 %v1278_v6  ;;  %3161 = vmatpush1.bf16.msra.mxu1 %v1280_v7  ;;  %v1313_v6 = vunpack.c.l.s8.bf16 %v873_v51  ;;  %v870_v7 = vld [vmem:[%s7382_s25 + $0x5c0] sm:$0xff] }
 0x1a3   : > { %2550 = vmatprep.subr.bf16.mxu0 %v1287_v11  ;;  %3162 = vmatprep.subr.bf16.mxu1 %v1289_v12  ;;  %v872_v11 = vld [vmem:[%s7382_s25 + $0x5d0] sm:$0xff]  ;;  %v8467_v12 = vcombine.low %v1703_v19, %v1707_v21  ;;  %v1310_v16 = vunpack.c.l.s8.bf16 %v870_v7  ;;  %v8477_v19 = vld [vmem:[%s7382_s25 + $0x618] sm:$0xff]  ;;  %v1719_v21 = vld [vmem:[%s7380_s20 + $0x248] sm:$0xff]  ;;  %v1318_v33 = vunpack.c.h.s8.bf16 %v870_v7 }
 0x1a6   : > { %2551 = vmatpush1.bf16.msra.mxu0 %v1286_v22  ;;  %3163 = vmatpush1.bf16.msra.mxu1 %v1288_v63  ;;  %v1312_v22 = vunpack.c.l.s8.bf16 %v872_v11  ;;  %v1319_v63 = vunpack.c.h.s8.bf16 %v871_v50  ;;  %v8487_v50 = vcombine.high %v1719_v21, %v1723_v24 }
 0x1a7   : > { %2552 = vmatprep.subr.bf16.mxu0 %v1295_v0  ;;  %3164 = vmatprep.subr.bf16.mxu1 %v1297_v23  ;;  %v1321_v0 = vunpack.c.h.s8.bf16 %v873_v51  ;;  %v8474_v23 = vld [vmem:[%s7382_s25 + $0x608] sm:$0xff] }
 0x1a8   : > { %2468 = vmatmul.mubr.bf16.gmra.mrb[24].mxu0 %v8453_v40  ;;  %3080 = vmatmul.mubr.bf16.gmra.mrb[24].mxu1 %v8453_v40  ;;  %v1727_v51 = vld [vmem:[%s7380_s20 + $0x288] sm:$0xff] }
 0x1a9   : > { %2477 = vmatprep.mubr.bf16.mxu0 %v8455_v43  ;;  %3089 = vmatprep.mubr.bf16.mxu1 %v8455_v43 }
 0x1aa   : > { %2553 = vmatpush1.bf16.msra.mxu0 %v1294_v44  ;;  %3165 = vmatpush1.bf16.msra.mxu1 %v1296_v48  ;;  %v1320_v44 = vunpack.c.h.s8.bf16 %v872_v11  ;;  %v1327_v48 = vunpack.c.l.s8.bf16 %v8474_v23  ;;  %v1648_v11 = vld [vmem:[%s7380_s20 + $0x10] sm:$0xff] }
 0x1ab   : > { %2554 = vmatprep.subr.bf16.mxu0 %v1303_v49  ;;  %3166 = vmatprep.subr.bf16.mxu1 %v1305_v54  ;;  %v1329_v49 = vunpack.c.l.s8.bf16 %v8477_v19  ;;  %v8485_v54 = vcombine.low %v1711_v55, %v1715_v57  ;;  %v1731_v55 = vld [vmem:[%s7380_s20 + $0x2a8] sm:$0xff]  ;;  %v8495_v57 = vcombine.low %v1719_v21, %v1723_v24  ;;  %v880_v21 = vld [vmem:[%s7382_s25 + $0x610] sm:$0xff] }
 0x1ad   : > { %12082 = vst [vmem:[#allocation6_spill] sm:$0xff] %v8495_v57 }
 0x1ae   : > { %2555 = vmatpush1.bf16.msra.mxu0 %v1302_v58  ;;  %3167 = vmatpush1.bf16.msra.mxu1 %v1304_v59  ;;  %v8497_v58 = vcombine.high %v1727_v51, %v1731_v55  ;;  %v1735_v59 = vld [vmem:[%s7380_s20 + $0x2c8] sm:$0xff] }
 0x1af   : > { %2556 = vmatprep.subr.bf16.mxu0 %v1311_v60  ;;  %3168 = vmatprep.subr.bf16.mxu1 %v1313_v6  ;;  %v1739_v60 = vld [vmem:[%s7380_s20 + $0x2e8] sm:$0xff]  ;;  %v8505_v6 = vcombine.low %v1727_v51, %v1731_v55  ;;  %v1335_v51 = vunpack.c.h.s8.bf16 %v8474_v23  ;;  %v1337_v55 = vunpack.c.h.s8.bf16 %v8477_v19  ;;  %v888_v19 = vld [vmem:[%s7382_s25 + $0x650] sm:$0xff] }
 0x1b0   : > { %2478 = vmatmul.mubr.bf16.gmra.mrb[28].mxu0 %v8467_v12  ;;  %3090 = vmatmul.mubr.bf16.gmra.mrb[28].mxu1 %v8467_v12  ;;  %12083 = vst [vmem:[#allocation7_spill] sm:$0xff] %v8497_v58  ;;  %v8507_v7 = vcombine.high %v1735_v59, %v1739_v60 }
 0x1b1   : > { %2487 = vmatprep.mubr.bf16.mxu0 %v8469_v15  ;;  %3099 = vmatprep.mubr.bf16.mxu1 %v8469_v15  ;;  %12084 = vst [vmem:[#allocation8_spill] sm:$0xff] %v8505_v6 }
 0x1b2   : > { %2557 = vmatpush1.bf16.msra.mxu0 %v1310_v16  ;;  %3169 = vmatpush1.bf16.msra.mxu1 %v1312_v22  ;;  %12085 = vst [vmem:[#allocation9_spill] sm:$0xff] %v8507_v7  ;;  %v1652_v16 = vld [vmem:[%s7380_s20 + $0x30] sm:$0xff]  ;;  %v8515_v22 = vcombine.low %v1735_v59, %v1739_v60  ;;  %v887_v60 = vld [vmem:[%s7382_s25 + $0x648] sm:$0xff] }
 0x1b3   : > { %2558 = vmatprep.subr.bf16.mxu0 %v1319_v63  ;;  %3170 = vmatprep.subr.bf16.mxu1 %v1321_v0  ;;  %v8517_v63 = vcombine.high %v1648_v11, %v1652_v16  ;;  %v878_v0 = vld [vmem:[%s7382_s25 + $0x600] sm:$0xff]  ;;  %v8525_v24 = vcombine.low %v1648_v11, %v1652_v16  ;;  %v1336_v16 = vunpack.c.h.s8.bf16 %v880_v21  ;;  %v1343_v23 = vunpack.c.l.s8.bf16 %v887_v60 }
 0x1b4   : > { %12086 = vst [vmem:[#allocation10_spill] sm:$0xff] %v8515_v22  ;;  %v1334_v11 = vunpack.c.h.s8.bf16 %v878_v0 }
 0x1b5   : > { %12087 = vst [vmem:[#allocation11_spill] sm:$0xff] %v8517_v63  ;;  %12088 = vst [vmem:[#allocation12_spill] sm:$0xff] %v8525_v24 }
 0x1b6   : > { %2559 = vmatpush1.bf16.msra.mxu0 %v1318_v33  ;;  %3171 = vmatpush1.bf16.msra.mxu1 %v1320_v44  ;;  %v1656_v33 = vld [vmem:[%s7380_s20 + $0x50] sm:$0xff] }
 0x1b7   : > { %2681 = vmatprep.subr.bf16.mxu0 %v1327_v48  ;;  %3293 = vmatprep.subr.bf16.mxu1 %v1329_v49  ;;  %v1660_v44 = vld [vmem:[%s7380_s20 + $0x70] sm:$0xff]  ;;  %v1326_v48 = vunpack.c.l.s8.bf16 %v878_v0  ;;  %v1328_v49 = vunpack.c.l.s8.bf16 %v880_v21  ;;  %v1344_v21 = vunpack.c.l.s8.bf16 %v888_v19 }
 0x1b8   : > { %2488 = vmatmul.mubr.bf16.gmra.mrb[32].mxu0 %v8485_v54  ;;  %3100 = vmatmul.mubr.bf16.gmra.mrb[32].mxu1 %v8485_v54  ;;  %v8531_v59 = vcombine.high %v1656_v33, %v1660_v44 }
 0x1b9   : > { %2497 = vmatprep.mubr.bf16.mxu0 %v8487_v50  ;;  %3109 = vmatprep.mubr.bf16.mxu1 %v8487_v50 }
 0x1ba   : > { %12089 = vst [vmem:[#allocation13_spill] sm:$0xff] %v8531_v59 }
 0x1c0   : > { %2498 = vmatmul.mubr.bf16.gmra.mrb[36].mxu0 %v8495_v57  ;;  %3110 = vmatmul.mubr.bf16.gmra.mrb[36].mxu1 %v8495_v57  ;;  %v8543_v57 = vcombine.low %v1656_v33, %v1660_v44  ;;  %v1352_v44 = vunpack.c.h.s8.bf16 %v888_v19 }
 0x1c1   : > { %2507 = vmatprep.mubr.bf16.mxu0 %v8497_v58  ;;  %3119 = vmatprep.mubr.bf16.mxu1 %v8497_v58  ;;  %v1668_v58 = vld [vmem:[%s7380_s20 + $0xb0] sm:$0xff] }
 0x1c2   : > { %12090 = vst [vmem:[#allocation14_spill] sm:$0xff] %v8543_v57 }
 0x1c8   : > { %2508 = vmatmul.mubr.bf16.gmra.mrb[40].mxu0 %v8505_v6  ;;  %3120 = vmatmul.mubr.bf16.gmra.mrb[40].mxu1 %v8505_v6  ;;  %v1664_v6 = vld [vmem:[%s7380_s20 + $0x90] sm:$0xff] }
 0x1c9   : > { %2517 = vmatprep.mubr.bf16.mxu0 %v8507_v7  ;;  %3129 = vmatprep.mubr.bf16.mxu1 %v8507_v7  ;;  %v886_v7 = vld [vmem:[%s7382_s25 + $0x640] sm:$0xff] }
 0x1ca   : > { %v1342_v0 = vunpack.c.l.s8.bf16 %v886_v7  ;;  %v1350_v33 = vunpack.c.h.s8.bf16 %v886_v7 }
 0x1d0   : > { %2518 = vmatmul.mubr.bf16.gmra.mrb[44].mxu0 %v8515_v22  ;;  %3130 = vmatmul.mubr.bf16.gmra.mrb[44].mxu1 %v8515_v22  ;;  %v889_v22 = vld [vmem:[%s7382_s25 + $0x658] sm:$0xff] }
 0x1d1   : > { %2560 = vmatprep.mubr.bf16.mxu0 %v8517_v63  ;;  %3172 = vmatprep.mubr.bf16.mxu1 %v8517_v63  ;;  %v1345_v63 = vunpack.c.l.s8.bf16 %v889_v22 }
 0x1d8   : > { %2561 = vmatmul.mubr.bf16.vlgmr.msra.gmra.mrb[0].mxu0 %v8525_v24  ;;  %3173 = vmatmul.mubr.bf16.vlgmr.msra.gmra.mrb[0].mxu1 %v8525_v24  ;;  %v897_v24 = vld [vmem:[%s7382_s25 + $0x698] sm:$0xff] }
 0x1d9   : > { %2682 = vmatpush1.bf16.msra.mxu0 %v1326_v48  ;;  %3294 = vmatpush1.bf16.msra.mxu1 %v1328_v49  ;;  %v8545_v48 = vcombine.high %v1664_v6, %v1668_v58  ;;  %v1351_v49 = vunpack.c.h.s8.bf16 %v887_v60 }
 0x1da   : > { %2683 = vmatprep.subr.bf16.mxu0 %v1335_v51  ;;  %3295 = vmatprep.subr.bf16.mxu1 %v1337_v55  ;;  %v1353_v51 = vunpack.c.h.s8.bf16 %v889_v22  ;;  %v895_v55 = vld [vmem:[%s7382_s25 + $0x688] sm:$0xff]  ;;  %v1361_v22 = vunpack.c.l.s8.bf16 %v897_v24 }
 0x1db   : > { %2570 = vmatprep.mubr.bf16.mxu0 %v8531_v59  ;;  %3182 = vmatprep.mubr.bf16.mxu1 %v8531_v59  ;;  %12091 = vst [vmem:[#allocation15_spill] sm:$0xff] %v8545_v48  ;;  %v1359_v60 = vunpack.c.l.s8.bf16 %v895_v55  ;;  %v8557_v59 = vcombine.low %v1664_v6, %v1668_v58  ;;  %v903_v58 = vld [vmem:[%s7382_s25 + $0x6c8] sm:$0xff]  ;;  %v905_v6 = vld [vmem:[%s7382_s25 + $0x6d8] sm:$0xff] }
 0x1dd   : > { %2684 = vmatpush1.bf16.msra.mxu0 %v1334_v11  ;;  %3296 = vmatpush1.bf16.msra.mxu1 %v1336_v16  ;;  %v1676_v11 = vld [vmem:[%s7380_s20 + $0xf0] sm:$0xff]  ;;  %v894_v16 = vld [vmem:[%s7382_s25 + $0x680] sm:$0xff]  ;;  %12092 = vst [vmem:[#allocation16_spill] sm:$0xff] %v8557_v59 }
 0x1de   : > { %2685 = vmatprep.subr.bf16.mxu0 %v1343_v23  ;;  %3297 = vmatprep.subr.bf16.mxu1 %v1345_v63  ;;  %v1672_v63 = vld [vmem:[%s7380_s20 + $0xd0] sm:$0xff]  ;;  %v1358_v19 = vunpack.c.l.s8.bf16 %v894_v16 }
 0x1df   : > { %v896_v23 = vld [vmem:[%s7382_s25 + $0x690] sm:$0xff]  ;;  %v8559_v7 = vcombine.high %v1672_v63, %v1676_v11 }
 0x1e0   : > { %2571 = vmatmul.mubr.bf16.gmra.mrb[4].mxu0 %v8543_v57  ;;  %3183 = vmatmul.mubr.bf16.gmra.mrb[4].mxu1 %v8543_v57 }
 0x1e1   : > { %2686 = vmatpush1.bf16.msra.mxu0 %v1342_v0  ;;  %3298 = vmatpush1.bf16.msra.mxu1 %v1344_v21  ;;  %12093 = vst [vmem:[#allocation17_spill] sm:$0xff] %v8559_v7  ;;  %v1360_v0 = vunpack.c.l.s8.bf16 %v896_v23  ;;  %v1367_v21 = vunpack.c.h.s8.bf16 %v895_v55  ;;  %v1377_v55 = vunpack.c.l.s8.bf16 %v905_v6 }
 0x1e2   : > { %2580 = vmatprep.mubr.bf16.mxu0 %v8545_v48  ;;  %3192 = vmatprep.mubr.bf16.mxu1 %v8545_v48  ;;  %v1369_v48 = vunpack.c.h.s8.bf16 %v897_v24  ;;  %v1375_v24 = vunpack.c.l.s8.bf16 %v903_v58 }
 0x1e3   : > { %2687 = vmatprep.subr.bf16.mxu0 %v1351_v49  ;;  %3299 = vmatprep.subr.bf16.mxu1 %v1353_v51  ;;  %v1680_v49 = vld [vmem:[%s7380_s20 + $0x110] sm:$0xff] }
 0x1e4   : > { %v1684_v51 = vld [vmem:[%s7380_s20 + $0x130] sm:$0xff] }
 0x1e5   : > { %2688 = vmatpush1.bf16.msra.mxu0 %v1350_v33  ;;  %3300 = vmatpush1.bf16.msra.mxu1 %v1352_v44  ;;  %v1366_v33 = vunpack.c.h.s8.bf16 %v894_v16  ;;  %v1368_v44 = vunpack.c.h.s8.bf16 %v896_v23  ;;  %v8573_v57 = vcombine.high %v1680_v49, %v1684_v51  ;;  %v1383_v16 = vunpack.c.h.s8.bf16 %v903_v58  ;;  %v1688_v23 = vld [vmem:[%s7380_s20 + $0x150] sm:$0xff] }
 0x1e6   : > { %2689 = vmatprep.subr.bf16.mxu0 %v1359_v60  ;;  %3301 = vmatprep.subr.bf16.mxu1 %v1361_v22  ;;  %v902_v60 = vld [vmem:[%s7382_s25 + $0x6c0] sm:$0xff]  ;;  %v904_v22 = vld [vmem:[%s7382_s25 + $0x6d0] sm:$0xff] }
 0x1e7   : > { %12095 = vst [vmem:[#allocation19_spill] sm:$0xff] %v8573_v57 }
 0x1e8   : > { %2581 = vmatmul.mubr.bf16.gmra.mrb[8].mxu0 %v8557_v59  ;;  %3193 = vmatmul.mubr.bf16.gmra.mrb[8].mxu1 %v8557_v59  ;;  %v8571_v59 = vcombine.low %v1672_v63, %v1676_v11  ;;  %v911_v63 = vld [vmem:[%s7382_s25 + $0x708] sm:$0xff]  ;;  %v913_v11 = vld [vmem:[%s7382_s25 + $0x718] sm:$0xff] }
 0x1e9   : > { %2590 = vmatprep.mubr.bf16.mxu0 %v8559_v7  ;;  %3202 = vmatprep.mubr.bf16.mxu1 %v8559_v7  ;;  %v1391_v58 = vunpack.c.l.s8.bf16 %v911_v63 }
 0x1ea   : > { %2690 = vmatpush1.bf16.msra.mxu0 %v1358_v19  ;;  %3302 = vmatpush1.bf16.msra.mxu1 %v1360_v0  ;;  %12094 = vst [vmem:[#allocation18_spill] sm:$0xff] %v8571_v59  ;;  %v1374_v19 = vunpack.c.l.s8.bf16 %v902_v60  ;;  %v1376_v0 = vunpack.c.l.s8.bf16 %v904_v22 }
 0x1eb   : > { %2691 = vmatprep.subr.bf16.mxu0 %v1367_v21  ;;  %3303 = vmatprep.subr.bf16.mxu1 %v1369_v48  ;;  %v1385_v48 = vunpack.c.h.s8.bf16 %v905_v6  ;;  %v1692_v21 = vld [vmem:[%s7380_s20 + $0x170] sm:$0xff]  ;;  %v1393_v6 = vunpack.c.l.s8.bf16 %v913_v11 }
 0x1ec   : > { %v8587_v7 = vcombine.high %v1688_v23, %v1692_v21 }
 0x1ee   : > { %2692 = vmatpush1.bf16.msra.mxu0 %v1366_v33  ;;  %3304 = vmatpush1.bf16.msra.mxu1 %v1368_v44  ;;  %v1382_v33 = vunpack.c.h.s8.bf16 %v902_v60  ;;  %v1384_v44 = vunpack.c.h.s8.bf16 %v904_v22  ;;  %12097 = vst [vmem:[#allocation21_spill] sm:$0xff] %v8587_v7  ;;  %v1399_v60 = vunpack.c.h.s8.bf16 %v911_v63  ;;  %v1401_v22 = vunpack.c.h.s8.bf16 %v913_v11 }
 0x1ef   : > { %2693 = vmatprep.subr.bf16.mxu0 %v1375_v24  ;;  %3305 = vmatprep.subr.bf16.mxu1 %v1377_v55  ;;  %v910_v24 = vld [vmem:[%s7382_s25 + $0x700] sm:$0xff]  ;;  %v912_v55 = vld [vmem:[%s7382_s25 + $0x710] sm:$0xff] }
 0x1f0   : > { %2591 = vmatmul.mubr.bf16.gmra.mrb[12].mxu0 %v8571_v59  ;;  %3203 = vmatmul.mubr.bf16.gmra.mrb[12].mxu1 %v8571_v59  ;;  %v8585_v59 = vcombine.low %v1680_v49, %v1684_v51  ;;  %v919_v49 = vld [vmem:[%s7382_s25 + $0x748] sm:$0xff]  ;;  %v921_v51 = vld [vmem:[%s7382_s25 + $0x758] sm:$0xff] }
 0x1f1   : > { %2600 = vmatprep.mubr.bf16.mxu0 %v8573_v57  ;;  %3212 = vmatprep.mubr.bf16.mxu1 %v8573_v57  ;;  %v1407_v63 = vunpack.c.l.s8.bf16 %v919_v49  ;;  %v1409_v11 = vunpack.c.l.s8.bf16 %v921_v51 }
 0x1f2   : > { %2694 = vmatpush1.bf16.msra.mxu0 %v1374_v19  ;;  %3306 = vmatpush1.bf16.msra.mxu1 %v1376_v0  ;;  %12096 = vst [vmem:[#allocation20_spill] sm:$0xff] %v8585_v59  ;;  %v1390_v19 = vunpack.c.l.s8.bf16 %v910_v24  ;;  %v1392_v0 = vunpack.c.l.s8.bf16 %v912_v55 }
 0x1f3   : > { %2695 = vmatprep.subr.bf16.mxu0 %v1383_v16  ;;  %3307 = vmatprep.subr.bf16.mxu1 %v1385_v48  ;;  %v1696_v16 = vld [vmem:[%s7380_s20 + $0x190] sm:$0xff] }
 0x1f4   : > { %v1700_v48 = vld [vmem:[%s7380_s20 + $0x1b0] sm:$0xff] }
 0x1f5   : > { %v8601_v57 = vcombine.high %v1696_v16, %v1700_v48 }
 0x1f6   : > { %2696 = vmatpush1.bf16.msra.mxu0 %v1382_v33  ;;  %3308 = vmatpush1.bf16.msra.mxu1 %v1384_v44  ;;  %v1398_v33 = vunpack.c.h.s8.bf16 %v910_v24  ;;  %v1400_v44 = vunpack.c.h.s8.bf16 %v912_v55  ;;  %v1415_v24 = vunpack.c.h.s8.bf16 %v919_v49  ;;  %v1417_v55 = vunpack.c.h.s8.bf16 %v921_v51 }
 0x1f7   : > { %2697 = vmatprep.subr.bf16.mxu0 %v1391_v58  ;;  %3309 = vmatprep.subr.bf16.mxu1 %v1393_v6  ;;  %v918_v58 = vld [vmem:[%s7382_s25 + $0x740] sm:$0xff]  ;;  %v920_v6 = vld [vmem:[%s7382_s25 + $0x750] sm:$0xff]  ;;  %12099 = vst [vmem:[#allocation23_spill] sm:$0xff] %v8601_v57 }
 0x1f8   : > { %2601 = vmatmul.mubr.bf16.gmra.mrb[16].mxu0 %v8585_v59  ;;  %3213 = vmatmul.mubr.bf16.gmra.mrb[16].mxu1 %v8585_v59  ;;  %v8599_v59 = vcombine.low %v1688_v23, %v1692_v21  ;;  %v927_v23 = vld [vmem:[%s7382_s25 + $0x788] sm:$0xff]  ;;  %v929_v21 = vld [vmem:[%s7382_s25 + $0x798] sm:$0xff] }
 0x1f9   : > { %2610 = vmatprep.mubr.bf16.mxu0 %v8587_v7  ;;  %3222 = vmatprep.mubr.bf16.mxu1 %v8587_v7  ;;  %v1423_v49 = vunpack.c.l.s8.bf16 %v927_v23  ;;  %v1425_v51 = vunpack.c.l.s8.bf16 %v929_v21 }
 0x1fa   : > { %2698 = vmatpush1.bf16.msra.mxu0 %v1390_v19  ;;  %3310 = vmatpush1.bf16.msra.mxu1 %v1392_v0  ;;  %12098 = vst [vmem:[#allocation22_spill] sm:$0xff] %v8599_v59  ;;  %v1406_v19 = vunpack.c.l.s8.bf16 %v918_v58  ;;  %v1408_v0 = vunpack.c.l.s8.bf16 %v920_v6 }
 0x1fb   : > { %2699 = vmatprep.subr.bf16.mxu0 %v1399_v60  ;;  %3311 = vmatprep.subr.bf16.mxu1 %v1401_v22  ;;  %v1704_v60 = vld [vmem:[%s7380_s20 + $0x1d0] sm:$0xff] }
 0x1fc   : > { %v1708_v22 = vld [vmem:[%s7380_s20 + $0x1f0] sm:$0xff] }
 0x1fd   : > { %v8615_v7 = vcombine.high %v1704_v60, %v1708_v22 }
 0x1fe   : > { %2700 = vmatpush1.bf16.msra.mxu0 %v1398_v33  ;;  %3312 = vmatpush1.bf16.msra.mxu1 %v1400_v44  ;;  %v1414_v33 = vunpack.c.h.s8.bf16 %v918_v58  ;;  %v1416_v44 = vunpack.c.h.s8.bf16 %v920_v6  ;;  %v1431_v58 = vunpack.c.h.s8.bf16 %v927_v23  ;;  %v1433_v6 = vunpack.c.h.s8.bf16 %v929_v21 }
 0x1ff   : > { %2701 = vmatprep.subr.bf16.mxu0 %v1407_v63  ;;  %3313 = vmatprep.subr.bf16.mxu1 %v1409_v11  ;;  %v926_v63 = vld [vmem:[%s7382_s25 + $0x780] sm:$0xff]  ;;  %v928_v11 = vld [vmem:[%s7382_s25 + $0x790] sm:$0xff]  ;;  %12101 = vst [vmem:[#allocation25_spill] sm:$0xff] %v8615_v7 }
 0x200   : > { %2611 = vmatmul.mubr.bf16.gmra.mrb[20].mxu0 %v8599_v59  ;;  %3223 = vmatmul.mubr.bf16.gmra.mrb[20].mxu1 %v8599_v59  ;;  %v8613_v59 = vcombine.low %v1696_v16, %v1700_v48  ;;  %v935_v16 = vld [vmem:[%s7382_s25 + $0x7c8] sm:$0xff]  ;;  %v937_v48 = vld [vmem:[%s7382_s25 + $0x7d8] sm:$0xff] }
 0x201   : > { %2620 = vmatprep.mubr.bf16.mxu0 %v8601_v57  ;;  %3232 = vmatprep.mubr.bf16.mxu1 %v8601_v57  ;;  %v1439_v23 = vunpack.c.l.s8.bf16 %v935_v16  ;;  %v1441_v21 = vunpack.c.l.s8.bf16 %v937_v48 }
 0x202   : > { %2702 = vmatpush1.bf16.msra.mxu0 %v1406_v19  ;;  %3314 = vmatpush1.bf16.msra.mxu1 %v1408_v0  ;;  %12100 = vst [vmem:[#allocation24_spill] sm:$0xff] %v8613_v59  ;;  %v1422_v19 = vunpack.c.l.s8.bf16 %v926_v63  ;;  %v1424_v0 = vunpack.c.l.s8.bf16 %v928_v11 }
 0x203   : > { %2703 = vmatprep.subr.bf16.mxu0 %v1415_v24  ;;  %3315 = vmatprep.subr.bf16.mxu1 %v1417_v55  ;;  %v1712_v24 = vld [vmem:[%s7380_s20 + $0x210] sm:$0xff] }
 0x204   : > { %v1716_v55 = vld [vmem:[%s7380_s20 + $0x230] sm:$0xff] }
 0x205   : > { %v8629_v57 = vcombine.high %v1712_v24, %v1716_v55 }
 0x206   : > { %2704 = vmatpush1.bf16.msra.mxu0 %v1414_v33  ;;  %3316 = vmatpush1.bf16.msra.mxu1 %v1416_v44  ;;  %v1430_v33 = vunpack.c.h.s8.bf16 %v926_v63  ;;  %v1432_v44 = vunpack.c.h.s8.bf16 %v928_v11  ;;  %v1447_v63 = vunpack.c.h.s8.bf16 %v935_v16  ;;  %v1449_v11 = vunpack.c.h.s8.bf16 %v937_v48 }
 0x207   : > { %2705 = vmatprep.subr.bf16.mxu0 %v1423_v49  ;;  %3317 = vmatprep.subr.bf16.mxu1 %v1425_v51  ;;  %v934_v49 = vld [vmem:[%s7382_s25 + $0x7c0] sm:$0xff]  ;;  %v936_v51 = vld [vmem:[%s7382_s25 + $0x7d0] sm:$0xff]  ;;  %12103 = vst [vmem:[#allocation27_spill] sm:$0xff] %v8629_v57 }
 0x208   : > { %2621 = vmatmul.mubr.bf16.gmra.mrb[24].mxu0 %v8613_v59  ;;  %3233 = vmatmul.mubr.bf16.gmra.mrb[24].mxu1 %v8613_v59  ;;  %v8627_v59 = vcombine.low %v1704_v60, %v1708_v22  ;;  %v8637_v60 = vld [vmem:[%s7382_s25 + $0x38] sm:$0xff]  ;;  %v1720_v22 = vld [vmem:[%s7380_s20 + $0x250] sm:$0xff]  ;;  %v1448_v16 = vunpack.c.h.s8.bf16 %v936_v51 }
 0x209   : > { %2630 = vmatprep.mubr.bf16.mxu0 %v8615_v7  ;;  %3242 = vmatprep.mubr.bf16.mxu1 %v8615_v7 }
 0x20a   : > { %2706 = vmatpush1.bf16.msra.mxu0 %v1422_v19  ;;  %3318 = vmatpush1.bf16.msra.mxu1 %v1424_v0  ;;  %12102 = vst [vmem:[#allocation26_spill] sm:$0xff] %v8627_v59  ;;  %v1438_v19 = vunpack.c.l.s8.bf16 %v934_v49  ;;  %v1440_v0 = vunpack.c.l.s8.bf16 %v936_v51 }
 0x20b   : > { %2707 = vmatprep.subr.bf16.mxu0 %v1431_v58  ;;  %3319 = vmatprep.subr.bf16.mxu1 %v1433_v6  ;;  %v8634_v58 = vld [vmem:[%s7382_s25 + $0x28] sm:$0xff]  ;;  %v1724_v6 = vld [vmem:[%s7380_s20 + $0x270] sm:$0xff] }
 0x20c   : > { %v947_v48 = vunpack.c.l.s8.bf16 %v8634_v58 }
 0x20e   : > { %2708 = vmatpush1.bf16.msra.mxu0 %v1430_v33  ;;  %3320 = vmatpush1.bf16.msra.mxu1 %v1432_v44  ;;  %v1446_v33 = vunpack.c.h.s8.bf16 %v934_v49  ;;  %v949_v44 = vunpack.c.l.s8.bf16 %v8637_v60  ;;  %v1728_v49 = vld [vmem:[%s7380_s20 + $0x290] sm:$0xff] }
 0x20f   : > { %2709 = vmatprep.subr.bf16.mxu0 %v1439_v23  ;;  %3321 = vmatprep.subr.bf16.mxu1 %v1441_v21  ;;  %v8645_v23 = vcombine.low %v1712_v24, %v1716_v55  ;;  %v8647_v21 = vcombine.high %v1720_v22, %v1724_v6  ;;  %v1732_v24 = vld [vmem:[%s7380_s20 + $0x2b0] sm:$0xff]  ;;  %v8655_v55 = vcombine.low %v1720_v22, %v1724_v6  ;;  %v1649_v22 = vld [vmem:[%s7380_s20 + $0x18] sm:$0xff] }
 0x210   : > { %2631 = vmatmul.mubr.bf16.gmra.mrb[28].mxu0 %v8627_v59  ;;  %3243 = vmatmul.mubr.bf16.gmra.mrb[28].mxu1 %v8627_v59  ;;  %v8657_v51 = vcombine.high %v1728_v49, %v1732_v24  ;;  %v1653_v6 = vld [vmem:[%s7380_s20 + $0x38] sm:$0xff] }
 0x211   : > { %2640 = vmatprep.mubr.bf16.mxu0 %v8629_v57  ;;  %3252 = vmatprep.mubr.bf16.mxu1 %v8629_v57  ;;  %12104 = vst [vmem:[#allocation28_spill] sm:$0xff] %v8645_v23  ;;  %12105 = vst [vmem:[#allocation29_spill] sm:$0xff] %v8647_v21  ;;  %v1665_v57 = vld [vmem:[%s7380_s20 + $0x98] sm:$0xff] }
 0x212   : > { %2710 = vmatpush1.bf16.msra.mxu0 %v1438_v19  ;;  %3322 = vmatpush1.bf16.msra.mxu1 %v1440_v0  ;;  %12106 = vst [vmem:[#allocation30_spill] sm:$0xff] %v8655_v55  ;;  %12107 = vst [vmem:[#allocation31_spill] sm:$0xff] %v8657_v51  ;;  %v1736_v19 = vld [vmem:[%s7380_s20 + $0x2d0] sm:$0xff]  ;;  %v1669_v59 = vld [vmem:[%s7380_s20 + $0xb8] sm:$0xff] }
 0x213   : > { %2711 = vmatprep.subr.bf16.mxu0 %v1447_v63  ;;  %3323 = vmatprep.subr.bf16.mxu1 %v1449_v11  ;;  %v1740_v0 = vld [vmem:[%s7380_s20 + $0x2f0] sm:$0xff]  ;;  %v8665_v63 = vcombine.low %v1728_v49, %v1732_v24  ;;  %v8685_v49 = vcombine.low %v1649_v22, %v1653_v6  ;;  %v1657_v24 = vld [vmem:[%s7380_s20 + $0x58] sm:$0xff] }
 0x214   : > { %v8667_v11 = vcombine.high %v1736_v19, %v1740_v0 }
 0x215   : > { %12108 = vst [vmem:[#allocation32_spill] sm:$0xff] %v8665_v63  ;;  %12112 = vst [vmem:[#allocation36_spill] sm:$0xff] %v8685_v49 }
 0x216   : > { %2712 = vmatpush1.bf16.msra.mxu0 %v1446_v33  ;;  %3324 = vmatpush1.bf16.msra.mxu1 %v1448_v16  ;;  %12109 = vst [vmem:[#allocation33_spill] sm:$0xff] %v8667_v11  ;;  %v8675_v33 = vcombine.low %v1736_v19, %v1740_v0  ;;  %v8677_v16 = vcombine.high %v1649_v22, %v1653_v6 }
 0x217   : > { %3446 = vmatprep.subr.bf16.mxu0 %v947_v48  ;;  %4058 = vmatprep.subr.bf16.mxu1 %v949_v44  ;;  %v690_v48 = vld [vmem:[%s7382_s25 + $0x20] sm:$0xff]  ;;  %v692_v44 = vld [vmem:[%s7382_s25 + $0x30] sm:$0xff] }
 0x218   : > { %2641 = vmatmul.mubr.bf16.gmra.mrb[32].mxu0 %v8645_v23  ;;  %3253 = vmatmul.mubr.bf16.gmra.mrb[32].mxu1 %v8645_v23  ;;  %12110 = vst [vmem:[#allocation34_spill] sm:$0xff] %v8675_v33  ;;  %12111 = vst [vmem:[#allocation35_spill] sm:$0xff] %v8677_v16  ;;  %v946_v19 = vunpack.c.l.s8.bf16 %v690_v48  ;;  %v948_v0 = vunpack.c.l.s8.bf16 %v692_v44  ;;  %v954_v22 = vunpack.c.h.s8.bf16 %v690_v48  ;;  %v956_v6 = vunpack.c.h.s8.bf16 %v692_v44  ;;  %v698_v23 = vld [vmem:[%s7382_s25 + $0x60] sm:$0xff] }
 0x219   : > { %2650 = vmatprep.mubr.bf16.mxu0 %v8647_v21  ;;  %3262 = vmatprep.mubr.bf16.mxu1 %v8647_v21  ;;  %v701_v21 = vld [vmem:[%s7382_s25 + $0x78] sm:$0xff]  ;;  %v962_v48 = vunpack.c.l.s8.bf16 %v698_v23 }
 0x220   : > { %2651 = vmatmul.mubr.bf16.gmra.mrb[36].mxu0 %v8655_v55  ;;  %3263 = vmatmul.mubr.bf16.gmra.mrb[36].mxu1 %v8655_v55 }
 0x221   : > { %2660 = vmatprep.mubr.bf16.mxu0 %v8657_v51  ;;  %3272 = vmatprep.mubr.bf16.mxu1 %v8657_v51  ;;  %v957_v51 = vunpack.c.h.s8.bf16 %v8637_v60  ;;  %v700_v60 = vld [vmem:[%s7382_s25 + $0x70] sm:$0xff] }
 0x222   : > { %v964_v44 = vunpack.c.l.s8.bf16 %v700_v60 }
 0x228   : > { %2661 = vmatmul.mubr.bf16.gmra.mrb[40].mxu0 %v8665_v63  ;;  %3273 = vmatmul.mubr.bf16.gmra.mrb[40].mxu1 %v8665_v63  ;;  %v955_v63 = vunpack.c.h.s8.bf16 %v8634_v58 }
 0x229   : > { %2670 = vmatprep.mubr.bf16.mxu0 %v8667_v11  ;;  %3282 = vmatprep.mubr.bf16.mxu1 %v8667_v11  ;;  %v1661_v11 = vld [vmem:[%s7380_s20 + $0x78] sm:$0xff] }
 0x22a   : > { %v8691_v55 = vcombine.high %v1657_v24, %v1661_v11  ;;  %v8703_v7 = vcombine.low %v1657_v24, %v1661_v11  ;;  %v970_v11 = vunpack.c.h.s8.bf16 %v698_v23  ;;  %v972_v24 = vunpack.c.h.s8.bf16 %v700_v60 }
 0x22c   : > { %12113 = vst [vmem:[#allocation37_spill] sm:$0xff] %v8691_v55  ;;  %12114 = vst [vmem:[#allocation38_spill] sm:$0xff] %v8703_v7 }
 0x230   : > { %2671 = vmatmul.mubr.bf16.gmra.mrb[44].mxu0 %v8675_v33  ;;  %3283 = vmatmul.mubr.bf16.gmra.mrb[44].mxu1 %v8675_v33  ;;  %v699_v33 = vld [vmem:[%s7382_s25 + $0x68] sm:$0xff] }
 0x231   : > { %2713 = vmatprep.mubr.bf16.mxu0 %v8677_v16  ;;  %3325 = vmatprep.mubr.bf16.mxu1 %v8677_v16  ;;  %v963_v58 = vunpack.c.l.s8.bf16 %v699_v33  ;;  %v965_v16 = vunpack.c.l.s8.bf16 %v701_v21 }
 0x238   : > { %2714 = vmatmul.mubr.bf16.vlgmr.msra.gmra.mrb[0].mxu0 %v8685_v49  ;;  %3326 = vmatmul.mubr.bf16.vlgmr.msra.gmra.mrb[0].mxu1 %v8685_v49  ;;  %v709_v49 = vld [vmem:[%s7382_s25 + $0xb8] sm:$0xff] }
 0x239   : > { %3447 = vmatpush1.bf16.msra.mxu0 %v946_v19  ;;  %4059 = vmatpush1.bf16.msra.mxu1 %v948_v0  ;;  %v973_v19 = vunpack.c.h.s8.bf16 %v701_v21  ;;  %v707_v0 = vld [vmem:[%s7382_s25 + $0xa8] sm:$0xff]  ;;  %v981_v21 = vunpack.c.l.s8.bf16 %v709_v49 }
 0x23a   : > { %3448 = vmatprep.subr.bf16.mxu0 %v955_v63  ;;  %4060 = vmatprep.subr.bf16.mxu1 %v957_v51  ;;  %v8705_v51 = vcombine.high %v1665_v57, %v1669_v59  ;;  %v971_v63 = vunpack.c.h.s8.bf16 %v699_v33  ;;  %v979_v33 = vunpack.c.l.s8.bf16 %v707_v0 }
 0x23b   : > { %2723 = vmatprep.mubr.bf16.mxu0 %v8691_v55  ;;  %3335 = vmatprep.mubr.bf16.mxu1 %v8691_v55  ;;  %v8717_v55 = vcombine.low %v1665_v57, %v1669_v59  ;;  %v715_v57 = vld [vmem:[%s7382_s25 + $0xe8] sm:$0xff]  ;;  %v717_v59 = vld [vmem:[%s7382_s25 + $0xf8] sm:$0xff] }
 0x23c   : > { %12115 = vst [vmem:[#allocation39_spill] sm:$0xff] %v8705_v51 }
 0x23d   : > { %3449 = vmatpush1.bf16.msra.mxu0 %v954_v22  ;;  %4061 = vmatpush1.bf16.msra.mxu1 %v956_v6  ;;  %v1677_v22 = vld [vmem:[%s7380_s20 + $0xf8] sm:$0xff]  ;;  %v706_v6 = vld [vmem:[%s7382_s25 + $0xa0] sm:$0xff]  ;;  %12116 = vst [vmem:[#allocation40_spill] sm:$0xff] %v8717_v55 }
 0x23e   : > { %3450 = vmatprep.subr.bf16.mxu0 %v963_v58  ;;  %4062 = vmatprep.subr.bf16.mxu1 %v965_v16  ;;  %v1673_v16 = vld [vmem:[%s7380_s20 + $0xd8] sm:$0xff]  ;;  %v708_v58 = vld [vmem:[%s7382_s25 + $0xb0] sm:$0xff]  ;;  %v978_v60 = vunpack.c.l.s8.bf16 %v706_v6 }
 0x23f   : > { %v8719_v23 = vcombine.high %v1673_v16, %v1677_v22 }
 0x240   : > { %2724 = vmatmul.mubr.bf16.gmra.mrb[4].mxu0 %v8703_v7  ;;  %3336 = vmatmul.mubr.bf16.gmra.mrb[4].mxu1 %v8703_v7 }
 0x241   : > { %3451 = vmatpush1.bf16.msra.mxu0 %v962_v48  ;;  %4063 = vmatpush1.bf16.msra.mxu1 %v964_v44  ;;  %12117 = vst [vmem:[#allocation41_spill] sm:$0xff] %v8719_v23  ;;  %v980_v48 = vunpack.c.l.s8.bf16 %v708_v58  ;;  %v987_v44 = vunpack.c.h.s8.bf16 %v707_v0  ;;  %v997_v0 = vunpack.c.l.s8.bf16 %v717_v59 }
 0x242   : > { %2733 = vmatprep.mubr.bf16.mxu0 %v8705_v51  ;;  %3345 = vmatprep.mubr.bf16.mxu1 %v8705_v51  ;;  %v989_v51 = vunpack.c.h.s8.bf16 %v709_v49  ;;  %v995_v49 = vunpack.c.l.s8.bf16 %v715_v57 }
 0x243   : > { %3452 = vmatprep.subr.bf16.mxu0 %v971_v63  ;;  %4064 = vmatprep.subr.bf16.mxu1 %v973_v19  ;;  %v1681_v63 = vld [vmem:[%s7380_s20 + $0x118] sm:$0xff] }
 0x244   : > { %v1685_v19 = vld [vmem:[%s7380_s20 + $0x138] sm:$0xff] }
 0x245   : > { %3453 = vmatpush1.bf16.msra.mxu0 %v970_v11  ;;  %4065 = vmatpush1.bf16.msra.mxu1 %v972_v24  ;;  %v986_v11 = vunpack.c.h.s8.bf16 %v706_v6  ;;  %v988_v24 = vunpack.c.h.s8.bf16 %v708_v58  ;;  %v8733_v7 = vcombine.high %v1681_v63, %v1685_v19  ;;  %v1003_v6 = vunpack.c.h.s8.bf16 %v715_v57  ;;  %v1689_v58 = vld [vmem:[%s7380_s20 + $0x158] sm:$0xff] }
 0x246   : > { %3454 = vmatprep.subr.bf16.mxu0 %v979_v33  ;;  %4066 = vmatprep.subr.bf16.mxu1 %v981_v21  ;;  %v714_v33 = vld [vmem:[%s7382_s25 + $0xe0] sm:$0xff]  ;;  %v716_v21 = vld [vmem:[%s7382_s25 + $0xf0] sm:$0xff] }
 0x247   : > { %12119 = vst [vmem:[#allocation43_spill] sm:$0xff] %v8733_v7 }
 0x248   : > { %2734 = vmatmul.mubr.bf16.gmra.mrb[8].mxu0 %v8717_v55  ;;  %3346 = vmatmul.mubr.bf16.gmra.mrb[8].mxu1 %v8717_v55  ;;  %v8731_v55 = vcombine.low %v1673_v16, %v1677_v22  ;;  %v723_v16 = vld [vmem:[%s7382_s25 + $0x128] sm:$0xff]  ;;  %v725_v22 = vld [vmem:[%s7382_s25 + $0x138] sm:$0xff] }
 0x249   : > { %2743 = vmatprep.mubr.bf16.mxu0 %v8719_v23  ;;  %3355 = vmatprep.mubr.bf16.mxu1 %v8719_v23  ;;  %v1011_v57 = vunpack.c.l.s8.bf16 %v723_v16 }
 0x24a   : > { %3455 = vmatpush1.bf16.msra.mxu0 %v978_v60  ;;  %4067 = vmatpush1.bf16.msra.mxu1 %v980_v48  ;;  %12118 = vst [vmem:[#allocation42_spill] sm:$0xff] %v8731_v55  ;;  %v994_v60 = vunpack.c.l.s8.bf16 %v714_v33  ;;  %v996_v48 = vunpack.c.l.s8.bf16 %v716_v21 }
 0x24b   : > { %3456 = vmatprep.subr.bf16.mxu0 %v987_v44  ;;  %4068 = vmatprep.subr.bf16.mxu1 %v989_v51  ;;  %v1005_v51 = vunpack.c.h.s8.bf16 %v717_v59  ;;  %v1693_v44 = vld [vmem:[%s7380_s20 + $0x178] sm:$0xff]  ;;  %v1013_v59 = vunpack.c.l.s8.bf16 %v725_v22 }
 0x24c   : > { %v8747_v23 = vcombine.high %v1689_v58, %v1693_v44 }
 0x24e   : > { %3457 = vmatpush1.bf16.msra.mxu0 %v986_v11  ;;  %4069 = vmatpush1.bf16.msra.mxu1 %v988_v24  ;;  %v1002_v11 = vunpack.c.h.s8.bf16 %v714_v33  ;;  %v1004_v24 = vunpack.c.h.s8.bf16 %v716_v21  ;;  %12121 = vst [vmem:[#allocation45_spill] sm:$0xff] %v8747_v23  ;;  %v1019_v33 = vunpack.c.h.s8.bf16 %v723_v16  ;;  %v1021_v21 = vunpack.c.h.s8.bf16 %v725_v22 }
 0x24f   : > { %3458 = vmatprep.subr.bf16.mxu0 %v995_v49  ;;  %4070 = vmatprep.subr.bf16.mxu1 %v997_v0  ;;  %v722_v49 = vld [vmem:[%s7382_s25 + $0x120] sm:$0xff]  ;;  %v724_v0 = vld [vmem:[%s7382_s25 + $0x130] sm:$0xff] }
 0x250   : > { %2744 = vmatmul.mubr.bf16.gmra.mrb[12].mxu0 %v8731_v55  ;;  %3356 = vmatmul.mubr.bf16.gmra.mrb[12].mxu1 %v8731_v55  ;;  %v8745_v55 = vcombine.low %v1681_v63, %v1685_v19  ;;  %v731_v63 = vld [vmem:[%s7382_s25 + $0x168] sm:$0xff]  ;;  %v733_v19 = vld [vmem:[%s7382_s25 + $0x178] sm:$0xff] }
 0x251   : > { %2753 = vmatprep.mubr.bf16.mxu0 %v8733_v7  ;;  %3365 = vmatprep.mubr.bf16.mxu1 %v8733_v7  ;;  %v1027_v16 = vunpack.c.l.s8.bf16 %v731_v63  ;;  %v1029_v22 = vunpack.c.l.s8.bf16 %v733_v19 }
 0x252   : > { %3459 = vmatpush1.bf16.msra.mxu0 %v994_v60  ;;  %4071 = vmatpush1.bf16.msra.mxu1 %v996_v48  ;;  %12120 = vst [vmem:[#allocation44_spill] sm:$0xff] %v8745_v55  ;;  %v1010_v60 = vunpack.c.l.s8.bf16 %v722_v49  ;;  %v1012_v48 = vunpack.c.l.s8.bf16 %v724_v0 }
 0x253   : > { %3460 = vmatprep.subr.bf16.mxu0 %v1003_v6  ;;  %4072 = vmatprep.subr.bf16.mxu1 %v1005_v51  ;;  %v1697_v6 = vld [vmem:[%s7380_s20 + $0x198] sm:$0xff] }
 0x254   : > { %v1701_v51 = vld [vmem:[%s7380_s20 + $0x1b8] sm:$0xff] }
 0x255   : > { %v8761_v7 = vcombine.high %v1697_v6, %v1701_v51 }
 0x256   : > { %3461 = vmatpush1.bf16.msra.mxu0 %v1002_v11  ;;  %4073 = vmatpush1.bf16.msra.mxu1 %v1004_v24  ;;  %v1018_v11 = vunpack.c.h.s8.bf16 %v722_v49  ;;  %v1020_v24 = vunpack.c.h.s8.bf16 %v724_v0  ;;  %v1035_v49 = vunpack.c.h.s8.bf16 %v731_v63  ;;  %v1037_v0 = vunpack.c.h.s8.bf16 %v733_v19 }
 0x257   : > { %3462 = vmatprep.subr.bf16.mxu0 %v1011_v57  ;;  %4074 = vmatprep.subr.bf16.mxu1 %v1013_v59  ;;  %v730_v57 = vld [vmem:[%s7382_s25 + $0x160] sm:$0xff]  ;;  %v732_v59 = vld [vmem:[%s7382_s25 + $0x170] sm:$0xff]  ;;  %12123 = vst [vmem:[#allocation47_spill] sm:$0xff] %v8761_v7 }
 0x258   : > { %2754 = vmatmul.mubr.bf16.gmra.mrb[16].mxu0 %v8745_v55  ;;  %3366 = vmatmul.mubr.bf16.gmra.mrb[16].mxu1 %v8745_v55  ;;  %v8759_v55 = vcombine.low %v1689_v58, %v1693_v44  ;;  %v739_v58 = vld [vmem:[%s7382_s25 + $0x1a8] sm:$0xff]  ;;  %v741_v44 = vld [vmem:[%s7382_s25 + $0x1b8] sm:$0xff] }
 0x259   : > { %2763 = vmatprep.mubr.bf16.mxu0 %v8747_v23  ;;  %3375 = vmatprep.mubr.bf16.mxu1 %v8747_v23  ;;  %v1043_v63 = vunpack.c.l.s8.bf16 %v739_v58  ;;  %v1045_v19 = vunpack.c.l.s8.bf16 %v741_v44 }
 0x25a   : > { %3463 = vmatpush1.bf16.msra.mxu0 %v1010_v60  ;;  %4075 = vmatpush1.bf16.msra.mxu1 %v1012_v48  ;;  %12122 = vst [vmem:[#allocation46_spill] sm:$0xff] %v8759_v55  ;;  %v1026_v60 = vunpack.c.l.s8.bf16 %v730_v57  ;;  %v1028_v48 = vunpack.c.l.s8.bf16 %v732_v59 }
 0x25b   : > { %3464 = vmatprep.subr.bf16.mxu0 %v1019_v33  ;;  %4076 = vmatprep.subr.bf16.mxu1 %v1021_v21  ;;  %v1705_v33 = vld [vmem:[%s7380_s20 + $0x1d8] sm:$0xff] }
 0x25c   : > { %v1709_v21 = vld [vmem:[%s7380_s20 + $0x1f8] sm:$0xff] }
 0x25d   : > { %v8775_v23 = vcombine.high %v1705_v33, %v1709_v21 }
 0x25e   : > { %3465 = vmatpush1.bf16.msra.mxu0 %v1018_v11  ;;  %4077 = vmatpush1.bf16.msra.mxu1 %v1020_v24  ;;  %v1034_v11 = vunpack.c.h.s8.bf16 %v730_v57  ;;  %v1036_v24 = vunpack.c.h.s8.bf16 %v732_v59  ;;  %v1051_v57 = vunpack.c.h.s8.bf16 %v739_v58  ;;  %v1053_v59 = vunpack.c.h.s8.bf16 %v741_v44 }
 0x25f   : > { %3466 = vmatprep.subr.bf16.mxu0 %v1027_v16  ;;  %4078 = vmatprep.subr.bf16.mxu1 %v1029_v22  ;;  %v738_v16 = vld [vmem:[%s7382_s25 + $0x1a0] sm:$0xff]  ;;  %v740_v22 = vld [vmem:[%s7382_s25 + $0x1b0] sm:$0xff] }
 0x260   : > { %2764 = vmatmul.mubr.bf16.gmra.mrb[20].mxu0 %v8759_v55  ;;  %3376 = vmatmul.mubr.bf16.gmra.mrb[20].mxu1 %v8759_v55  ;;  %v8773_v55 = vcombine.low %v1697_v6, %v1701_v51  ;;  %v747_v6 = vld [vmem:[%s7382_s25 + $0x1e8] sm:$0xff]  ;;  %v749_v51 = vld [vmem:[%s7382_s25 + $0x1f8] sm:$0xff] }
 0x261   : > { %2773 = vmatprep.mubr.bf16.mxu0 %v8761_v7  ;;  %3385 = vmatprep.mubr.bf16.mxu1 %v8761_v7  ;;  %v1059_v58 = vunpack.c.l.s8.bf16 %v747_v6  ;;  %v1061_v44 = vunpack.c.l.s8.bf16 %v749_v51 }
 0x262   : > { %3467 = vmatpush1.bf16.msra.mxu0 %v1026_v60  ;;  %4079 = vmatpush1.bf16.msra.mxu1 %v1028_v48  ;;  %12124 = vst [vmem:[#allocation48_spill] sm:$0xff] %v8773_v55  ;;  %v1042_v60 = vunpack.c.l.s8.bf16 %v738_v16  ;;  %v1044_v48 = vunpack.c.l.s8.bf16 %v740_v22 }
 0x263   : > { %3468 = vmatprep.subr.bf16.mxu0 %v1035_v49  ;;  %4080 = vmatprep.subr.bf16.mxu1 %v1037_v0  ;;  %v1713_v49 = vld [vmem:[%s7380_s20 + $0x218] sm:$0xff] }
 0x264   : > { %v1717_v0 = vld [vmem:[%s7380_s20 + $0x238] sm:$0xff] }
 0x265   : > { %v8789_v7 = vcombine.high %v1713_v49, %v1717_v0 }
 0x266   : > { %3469 = vmatpush1.bf16.msra.mxu0 %v1034_v11  ;;  %4081 = vmatpush1.bf16.msra.mxu1 %v1036_v24  ;;  %v1050_v11 = vunpack.c.h.s8.bf16 %v738_v16  ;;  %v1052_v24 = vunpack.c.h.s8.bf16 %v740_v22  ;;  %v1067_v16 = vunpack.c.h.s8.bf16 %v747_v6  ;;  %v1069_v22 = vunpack.c.h.s8.bf16 %v749_v51 }
 0x267   : > { %3470 = vmatprep.subr.bf16.mxu0 %v1043_v63  ;;  %4082 = vmatprep.subr.bf16.mxu1 %v1045_v19  ;;  %v746_v63 = vld [vmem:[%s7382_s25 + $0x1e0] sm:$0xff]  ;;  %v748_v19 = vld [vmem:[%s7382_s25 + $0x1f0] sm:$0xff] }
 0x268   : > { %2774 = vmatmul.mubr.bf16.gmra.mrb[24].mxu0 %v8773_v55  ;;  %3386 = vmatmul.mubr.bf16.gmra.mrb[24].mxu1 %v8773_v55  ;;  %v8787_v55 = vcombine.low %v1705_v33, %v1709_v21  ;;  %v1721_v33 = vld [vmem:[%s7380_s20 + $0x258] sm:$0xff] }
 0x269   : > { %2783 = vmatprep.mubr.bf16.mxu0 %v8775_v23  ;;  %3395 = vmatprep.mubr.bf16.mxu1 %v8775_v23  ;;  %v1725_v21 = vld [vmem:[%s7380_s20 + $0x278] sm:$0xff] }
 0x26a   : > { %3471 = vmatpush1.bf16.msra.mxu0 %v1042_v60  ;;  %4083 = vmatpush1.bf16.msra.mxu1 %v1044_v48  ;;  %v1058_v60 = vunpack.c.l.s8.bf16 %v746_v63  ;;  %v1060_v48 = vunpack.c.l.s8.bf16 %v748_v19 }
 0x26b   : > { %3472 = vmatprep.subr.bf16.mxu0 %v1051_v57  ;;  %4084 = vmatprep.subr.bf16.mxu1 %v1053_v59  ;;  %v755_v57 = vld [vmem:[%s7382_s25 + $0x228] sm:$0xff]  ;;  %v757_v59 = vld [vmem:[%s7382_s25 + $0x238] sm:$0xff] }
 0x26c   : > { %v1075_v6 = vunpack.c.l.s8.bf16 %v755_v57  ;;  %v1077_v51 = vunpack.c.l.s8.bf16 %v757_v59 }
 0x26e   : > { %3473 = vmatpush1.bf16.msra.mxu0 %v1050_v11  ;;  %4085 = vmatpush1.bf16.msra.mxu1 %v1052_v24  ;;  %v1066_v11 = vunpack.c.h.s8.bf16 %v746_v63  ;;  %v1068_v24 = vunpack.c.h.s8.bf16 %v748_v19  ;;  %v1729_v63 = vld [vmem:[%s7380_s20 + $0x298] sm:$0xff] }
 0x26f   : > { %3474 = vmatprep.subr.bf16.mxu0 %v1059_v58  ;;  %4086 = vmatprep.subr.bf16.mxu1 %v1061_v44  ;;  %v8799_v58 = vcombine.low %v1713_v49, %v1717_v0  ;;  %v8801_v44 = vcombine.high %v1721_v33, %v1725_v21  ;;  %v1733_v19 = vld [vmem:[%s7380_s20 + $0x2b8] sm:$0xff]  ;;  %v8809_v49 = vcombine.low %v1721_v33, %v1725_v21  ;;  %v754_v21 = vld [vmem:[%s7382_s25 + $0x220] sm:$0xff] }
 0x270   : > { %2784 = vmatmul.mubr.bf16.gmra.mrb[28].mxu0 %v8787_v55  ;;  %3396 = vmatmul.mubr.bf16.gmra.mrb[28].mxu1 %v8787_v55  ;;  %v8811_v0 = vcombine.high %v1729_v63, %v1733_v19 }
 0x271   : > { %2793 = vmatprep.mubr.bf16.mxu0 %v8789_v7  ;;  %3405 = vmatprep.mubr.bf16.mxu1 %v8789_v7 }
 0x272   : > { %3475 = vmatpush1.bf16.msra.mxu0 %v1058_v60  ;;  %4087 = vmatpush1.bf16.msra.mxu1 %v1060_v48  ;;  %12125 = vst [vmem:[#allocation49_spill] sm:$0xff] %v8811_v0  ;;  %v1737_v60 = vld [vmem:[%s7380_s20 + $0x2d8] sm:$0xff] }
 0x273   : > { %3476 = vmatprep.subr.bf16.mxu0 %v1067_v16  ;;  %4088 = vmatprep.subr.bf16.mxu1 %v1069_v22  ;;  %v1741_v48 = vld [vmem:[%s7380_s20 + $0x2f8] sm:$0xff]  ;;  %v8819_v16 = vcombine.low %v1729_v63, %v1733_v19  ;;  %v1085_v63 = vunpack.c.h.s8.bf16 %v757_v59  ;;  %v763_v19 = vld [vmem:[%s7382_s25 + $0x268] sm:$0xff] }
 0x274   : > { %v8821_v22 = vcombine.high %v1737_v60, %v1741_v48  ;;  %v8827_v33 = vcombine.low %v1737_v60, %v1741_v48  ;;  %v1082_v60 = vunpack.c.h.s8.bf16 %v754_v21  ;;  %v1099_v59 = vunpack.c.h.s8.bf16 %v763_v19 }
 0x275   : > { %12126 = vst [vmem:[#allocation50_spill] sm:$0xff] %v8819_v16 }
 0x276   : > { %3477 = vmatpush1.bf16.msra.mxu0 %v1066_v11  ;;  %4089 = vmatpush1.bf16.msra.mxu1 %v1068_v24  ;;  %12127 = vst [vmem:[#allocation51_spill] sm:$0xff] %v8821_v22  ;;  %12128 = vst [vmem:[#allocation52_spill] sm:$0xff] %v8827_v33  ;;  %v756_v11 = vld [vmem:[%s7382_s25 + $0x230] sm:$0xff]  ;;  %v1074_v24 = vunpack.c.l.s8.bf16 %v754_v21 }
 0x277   : > { %3599 = vmatprep.subr.bf16.mxu0 %v1075_v6  ;;  %4211 = vmatprep.subr.bf16.mxu1 %v1077_v51  ;;  %v1076_v6 = vunpack.c.l.s8.bf16 %v756_v11  ;;  %v1083_v51 = vunpack.c.h.s8.bf16 %v755_v57  ;;  %v1084_v48 = vunpack.c.h.s8.bf16 %v756_v11  ;;  %v771_v11 = vld [vmem:[%s7382_s25 + $0x2a8] sm:$0xff] }
 0x278   : > { %2794 = vmatmul.mubr.bf16.gmra.mrb[32].mxu0 %v8799_v58  ;;  %3406 = vmatmul.mubr.bf16.gmra.mrb[32].mxu1 %v8799_v58 }
 0x279   : > { %2803 = vmatprep.mubr.bf16.mxu0 %v8801_v44  ;;  %3415 = vmatprep.mubr.bf16.mxu1 %v8801_v44 }
 0x280   : > { %2804 = vmatmul.mubr.bf16.gmra.mrb[36].mxu0 %v8809_v49  ;;  %3416 = vmatmul.mubr.bf16.gmra.mrb[36].mxu1 %v8809_v49 }
 0x281   : > { %2813 = vmatprep.mubr.bf16.mxu0 %v8811_v0  ;;  %3425 = vmatprep.mubr.bf16.mxu1 %v8811_v0  ;;  %v764_v0 = vld [vmem:[%s7382_s25 + $0x270] sm:$0xff] }
 0x288   : > { %2814 = vmatmul.mubr.bf16.gmra.mrb[40].mxu0 %v8819_v16  ;;  %3426 = vmatmul.mubr.bf16.gmra.mrb[40].mxu1 %v8819_v16  ;;  %v762_v16 = vld [vmem:[%s7382_s25 + $0x260] sm:$0xff] }
 0x289   : > { %2823 = vmatprep.mubr.bf16.mxu0 %v8821_v22  ;;  %3435 = vmatprep.mubr.bf16.mxu1 %v8821_v22  ;;  %v765_v22 = vld [vmem:[%s7382_s25 + $0x278] sm:$0xff]  ;;  %v1090_v57 = vunpack.c.l.s8.bf16 %v762_v16 }
 0x28a   : > { %v1101_v21 = vunpack.c.h.s8.bf16 %v765_v22 }
 0x290   : > { %2824 = vmatmul.mubr.bf16.gmra.mrb[44].mxu0 %v8827_v33  ;;  %3436 = vmatmul.mubr.bf16.gmra.mrb[44].mxu1 %v8827_v33  ;;  %v1093_v33 = vunpack.c.l.s8.bf16 %v765_v22  ;;  %v770_v22 = vld [vmem:[%s7382_s25 + $0x2a0] sm:$0xff] }
 0x291   : > { %3478 = vmatprep.mubr.bf16.mxu0 %v8177_v5  ;;  %4090 = vmatprep.mubr.bf16.mxu1 %v8177_v5  ;;  %v1091_v5 = vunpack.c.l.s8.bf16 %v763_v19 }
 0x298   : > { %3479 = vmatmul.mubr.bf16.vlgmr.msra.gmra.mrb[48].mxu0 %v8207_v13  ;;  %4091 = vmatmul.mubr.bf16.vlgmr.msra.gmra.mrb[48].mxu1 %v8207_v13  ;;  %v1092_v13 = vunpack.c.l.s8.bf16 %v764_v0 }
 0x299   : > { %3600 = vmatpush1.bf16.msra.mxu0 %v1074_v24  ;;  %4212 = vmatpush1.bf16.msra.mxu1 %v1076_v6  ;;  %v773_v24 = vld [vmem:[%s7382_s25 + $0x2b8] sm:$0xff]  ;;  %v1098_v6 = vunpack.c.h.s8.bf16 %v762_v16  ;;  %v1115_v16 = vunpack.c.h.s8.bf16 %v771_v11 }
 0x29a   : > { %3601 = vmatprep.subr.bf16.mxu0 %v1083_v51  ;;  %4213 = vmatprep.subr.bf16.mxu1 %v1085_v63  ;;  %v1107_v51 = vunpack.c.l.s8.bf16 %v771_v11  ;;  %v772_v63 = vld [vmem:[%s7382_s25 + $0x2b0] sm:$0xff] }
 0x29b   : > { %3488 = vmatprep.mubr.bf16.mxu0 %v8211_v20  ;;  %4100 = vmatprep.mubr.bf16.mxu1 %v8211_v20  ;;  %v1100_v20 = vunpack.c.h.s8.bf16 %v764_v0  ;;  %v1108_v19 = vunpack.c.l.s8.bf16 %v772_v63  ;;  %v1117_v0 = vunpack.c.h.s8.bf16 %v773_v24 }
 0x29d   : > { %3602 = vmatpush1.bf16.msra.mxu0 %v1082_v60  ;;  %4214 = vmatpush1.bf16.msra.mxu1 %v1084_v48  ;;  %v781_v60 = vld [vmem:[%s7382_s25 + $0x2f8] sm:$0xff]  ;;  %v1114_v48 = vunpack.c.h.s8.bf16 %v770_v22 }
 0x29e   : > { %3603 = vmatprep.subr.bf16.mxu0 %v1091_v5  ;;  %4215 = vmatprep.subr.bf16.mxu1 %v1093_v33  ;;  %v1109_v33 = vunpack.c.l.s8.bf16 %v773_v24  ;;  %v1116_v5 = vunpack.c.h.s8.bf16 %v772_v63 }
 0x2a0   : > { %3489 = vmatmul.mubr.bf16.gmra.mrb[52].mxu0 %v8223_v29  ;;  %4101 = vmatmul.mubr.bf16.gmra.mrb[52].mxu1 %v8223_v29  ;;  %v1106_v29 = vunpack.c.l.s8.bf16 %v770_v22 }
 0x2a1   : > { %3604 = vmatpush1.bf16.msra.mxu0 %v1090_v57  ;;  %4216 = vmatpush1.bf16.msra.mxu1 %v1092_v13  ;;  %v1125_v13 = vunpack.c.l.s8.bf16 %v781_v60 }
 0x2a2   : > { %3498 = vmatprep.mubr.bf16.mxu0 %v8225_v32  ;;  %4110 = vmatprep.mubr.bf16.mxu1 %v8225_v32  ;;  %v779_v32 = vld [vmem:[%s7382_s25 + $0x2e8] sm:$0xff] }
 0x2a3   : > { %3605 = vmatprep.subr.bf16.mxu0 %v1099_v59  ;;  %4217 = vmatprep.subr.bf16.mxu1 %v1101_v21  ;;  %v1123_v57 = vunpack.c.l.s8.bf16 %v779_v32  ;;  %v778_v59 = vld [vmem:[%s7382_s25 + $0x2e0] sm:$0xff]  ;;  %v780_v21 = vld [vmem:[%s7382_s25 + $0x2f0] sm:$0xff]  ;;  %v1131_v24 = vunpack.c.h.s8.bf16 %v779_v32  ;;  %v795_v32 = vld [vmem:[%s7382_s25 + $0x368] sm:$0xff] }
 0x2a4   : > { %v1124_v11 = vunpack.c.l.s8.bf16 %v780_v21 }
 0x2a5   : > { %3606 = vmatpush1.bf16.msra.mxu0 %v1098_v6  ;;  %4218 = vmatpush1.bf16.msra.mxu1 %v1100_v20  ;;  %v787_v6 = vld [vmem:[%s7382_s25 + $0x328] sm:$0xff]  ;;  %v789_v20 = vld [vmem:[%s7382_s25 + $0x338] sm:$0xff] }
 0x2a6   : > { %3607 = vmatprep.subr.bf16.mxu0 %v1107_v51  ;;  %4219 = vmatprep.subr.bf16.mxu1 %v1109_v33  ;;  %v1130_v51 = vunpack.c.h.s8.bf16 %v778_v59  ;;  %v1132_v33 = vunpack.c.h.s8.bf16 %v780_v21  ;;  %v1139_v22 = vunpack.c.l.s8.bf16 %v787_v6  ;;  %v1141_v63 = vunpack.c.l.s8.bf16 %v789_v20  ;;  %v796_v21 = vld [vmem:[%s7382_s25 + $0x370] sm:$0xff] }
 0x2a8   : > { %3499 = vmatmul.mubr.bf16.gmra.mrb[56].mxu0 %v8237_v45  ;;  %4111 = vmatmul.mubr.bf16.gmra.mrb[56].mxu1 %v8237_v45  ;;  %v1122_v45 = vunpack.c.l.s8.bf16 %v778_v59  ;;  %v794_v59 = vld [vmem:[%s7382_s25 + $0x360] sm:$0xff] }
 0x2a9   : > { %3508 = vmatprep.mubr.bf16.mxu0 %v8239_v46  ;;  %4120 = vmatprep.mubr.bf16.mxu1 %v8239_v46  ;;  %v1133_v46 = vunpack.c.h.s8.bf16 %v781_v60  ;;  %v797_v60 = vld [vmem:[%s7382_s25 + $0x378] sm:$0xff] }
 0x2aa   : > { %3608 = vmatpush1.bf16.msra.mxu0 %v1106_v29  ;;  %4220 = vmatpush1.bf16.msra.mxu1 %v1108_v19  ;;  %v786_v29 = vld [vmem:[%s7382_s25 + $0x320] sm:$0xff]  ;;  %v788_v19 = vld [vmem:[%s7382_s25 + $0x330] sm:$0xff] }
 0x2ab   : > { %3609 = vmatprep.subr.bf16.mxu0 %v1115_v16  ;;  %4221 = vmatprep.subr.bf16.mxu1 %v1117_v0  ;;  %v1140_v16 = vunpack.c.l.s8.bf16 %v788_v19  ;;  %v1147_v0 = vunpack.c.h.s8.bf16 %v787_v6  ;;  %v1162_v6 = vunpack.c.h.s8.bf16 %v794_v59 }
 0x2ae   : > { %3610 = vmatpush1.bf16.msra.mxu0 %v1114_v48  ;;  %4222 = vmatpush1.bf16.msra.mxu1 %v1116_v5  ;;  %v1146_v48 = vunpack.c.h.s8.bf16 %v786_v29  ;;  %v1148_v5 = vunpack.c.h.s8.bf16 %v788_v19 }
 0x2af   : > { %3611 = vmatprep.subr.bf16.mxu0 %v1123_v57  ;;  %4223 = vmatprep.subr.bf16.mxu1 %v1125_v13  ;;  %v1155_v57 = vunpack.c.l.s8.bf16 %v795_v32  ;;  %v1157_v13 = vunpack.c.l.s8.bf16 %v797_v60 }
 0x2b0   : > { %3509 = vmatmul.mubr.bf16.gmra.mrb[60].mxu0 %v8251_v61  ;;  %4121 = vmatmul.mubr.bf16.gmra.mrb[60].mxu1 %v8251_v61  ;;  %v1138_v61 = vunpack.c.l.s8.bf16 %v786_v29 }
 0x2b1   : > { %3518 = vmatprep.mubr.bf16.mxu0 %v8253_v62  ;;  %4130 = vmatprep.mubr.bf16.mxu1 %v8253_v62  ;;  %v1149_v62 = vunpack.c.h.s8.bf16 %v789_v20  ;;  %v1164_v20 = vunpack.c.h.s8.bf16 %v796_v21 }
 0x2b2   : > { %3612 = vmatpush1.bf16.msra.mxu0 %v1122_v45  ;;  %4224 = vmatpush1.bf16.msra.mxu1 %v1124_v11  ;;  %v1156_v45 = vunpack.c.l.s8.bf16 %v796_v21  ;;  %v1163_v11 = vunpack.c.h.s8.bf16 %v795_v32  ;;  %v821_v21 = vld [vmem:[%s7382_s25 + $0x438] sm:$0xff] }
 0x2b3   : > { %3613 = vmatprep.subr.bf16.mxu0 %v1131_v24  ;;  %4225 = vmatprep.subr.bf16.mxu1 %v1133_v46  ;;  %v803_v24 = vld [vmem:[%s7382_s25 + $0x3a8] sm:$0xff]  ;;  %v805_v46 = vld [vmem:[%s7382_s25 + $0x3b8] sm:$0xff] }
 0x2b4   : > { %v1179_v19 = vunpack.c.h.s8.bf16 %v803_v24 }
 0x2b6   : > { %3614 = vmatpush1.bf16.msra.mxu0 %v1130_v51  ;;  %4226 = vmatpush1.bf16.msra.mxu1 %v1132_v33  ;;  %v1171_v51 = vunpack.c.l.s8.bf16 %v803_v24  ;;  %v1173_v33 = vunpack.c.l.s8.bf16 %v805_v46  ;;  %v829_v24 = vld [vmem:[%s7382_s25 + $0x478] sm:$0xff] }
 0x2b7   : > { %3615 = vmatprep.subr.bf16.mxu0 %v1139_v22  ;;  %4227 = vmatprep.subr.bf16.mxu1 %v1141_v63  ;;  %v802_v22 = vld [vmem:[%s7382_s25 + $0x3a0] sm:$0xff]  ;;  %v804_v63 = vld [vmem:[%s7382_s25 + $0x3b0] sm:$0xff] }
 0x2b8   : > { %3519 = vmatmul.mubr.bf16.gmra.mrb[64].mxu0 %v8265_v17  ;;  %4131 = vmatmul.mubr.bf16.gmra.mrb[64].mxu1 %v8265_v17  ;;  %v1154_v17 = vunpack.c.l.s8.bf16 %v794_v59  ;;  %v1172_v29 = vunpack.c.l.s8.bf16 %v804_v63  ;;  %v819_v59 = vld [vmem:[%s7382_s25 + $0x428] sm:$0xff] }
 0x2b9   : > { %3528 = vmatprep.mubr.bf16.mxu0 %v8267_v18  ;;  %4140 = vmatprep.mubr.bf16.mxu1 %v8267_v18  ;;  %v1165_v18 = vunpack.c.h.s8.bf16 %v797_v60 }
 0x2ba   : > { %3616 = vmatpush1.bf16.msra.mxu0 %v1138_v61  ;;  %4228 = vmatpush1.bf16.msra.mxu1 %v1140_v16  ;;  %v811_v61 = vld [vmem:[%s7382_s25 + $0x3e8] sm:$0xff]  ;;  %v813_v16 = vld [vmem:[%s7382_s25 + $0x3f8] sm:$0xff] }
 0x2bb   : > { %3617 = vmatprep.subr.bf16.mxu0 %v1147_v0  ;;  %4229 = vmatprep.subr.bf16.mxu1 %v1149_v62  ;;  %v1178_v0 = vunpack.c.h.s8.bf16 %v802_v22  ;;  %v1180_v62 = vunpack.c.h.s8.bf16 %v804_v63  ;;  %v1187_v32 = vunpack.c.l.s8.bf16 %v811_v61  ;;  %v1189_v60 = vunpack.c.l.s8.bf16 %v813_v16  ;;  %v835_v63 = vld [vmem:[%s7382_s25 + $0x4a8] sm:$0xff] }
 0x2be   : > { %3618 = vmatpush1.bf16.msra.mxu0 %v1146_v48  ;;  %4230 = vmatpush1.bf16.msra.mxu1 %v1148_v5  ;;  %v810_v48 = vld [vmem:[%s7382_s25 + $0x3e0] sm:$0xff]  ;;  %v812_v5 = vld [vmem:[%s7382_s25 + $0x3f0] sm:$0xff] }
 0x2bf   : > { %3619 = vmatprep.subr.bf16.mxu0 %v1155_v57  ;;  %4231 = vmatprep.subr.bf16.mxu1 %v1157_v13  ;;  %v1188_v57 = vunpack.c.l.s8.bf16 %v812_v5  ;;  %v1195_v13 = vunpack.c.h.s8.bf16 %v811_v61  ;;  %v834_v61 = vld [vmem:[%s7382_s25 + $0x4a0] sm:$0xff] }
 0x2c0   : > { %3529 = vmatmul.mubr.bf16.gmra.mrb[68].mxu0 %v8279_v34  ;;  %4141 = vmatmul.mubr.bf16.gmra.mrb[68].mxu1 %v8279_v34  ;;  %v1170_v34 = vunpack.c.l.s8.bf16 %v802_v22  ;;  %v1229_v22 = vunpack.c.h.s8.bf16 %v829_v24 }
 0x2c1   : > { %3538 = vmatprep.mubr.bf16.mxu0 %v8281_v35  ;;  %4150 = vmatprep.mubr.bf16.mxu1 %v8281_v35  ;;  %v1181_v35 = vunpack.c.h.s8.bf16 %v805_v46  ;;  %v1221_v46 = vunpack.c.l.s8.bf16 %v829_v24 }
 0x2c2   : > { %3620 = vmatpush1.bf16.msra.mxu0 %v1154_v17  ;;  %4232 = vmatpush1.bf16.msra.mxu1 %v1156_v45  ;;  %v1194_v17 = vunpack.c.h.s8.bf16 %v810_v48  ;;  %v1196_v45 = vunpack.c.h.s8.bf16 %v812_v5  ;;  %v1456_v5 = vld [vmem:[%s11985_s3 + $0x10] sm:$0xff] }
 0x2c3   : > { %3621 = vmatprep.subr.bf16.mxu0 %v1163_v11  ;;  %4233 = vmatprep.subr.bf16.mxu1 %v1165_v18  ;;  %v1203_v11 = vunpack.c.l.s8.bf16 %v819_v59  ;;  %v1205_v18 = vunpack.c.l.s8.bf16 %v821_v21 }
 0x2c6   : > { %3622 = vmatpush1.bf16.msra.mxu0 %v1162_v6  ;;  %4234 = vmatpush1.bf16.msra.mxu1 %v1164_v20  ;;  %v826_v6 = vld [vmem:[%s7382_s25 + $0x460] sm:$0xff]  ;;  %v828_v20 = vld [vmem:[%s7382_s25 + $0x470] sm:$0xff] }
 0x2c7   : > { %3623 = vmatprep.subr.bf16.mxu0 %v1171_v51  ;;  %4235 = vmatprep.subr.bf16.mxu1 %v1173_v33  ;;  %v1218_v51 = vunpack.c.l.s8.bf16 %v826_v6 }
 0x2c8   : > { %3539 = vmatmul.mubr.bf16.gmra.mrb[72].mxu0 %v8293_v52  ;;  %4151 = vmatmul.mubr.bf16.gmra.mrb[72].mxu1 %v8293_v52  ;;  %v1186_v52 = vunpack.c.l.s8.bf16 %v810_v48  ;;  %v1454_v48 = vld [vmem:[%s11985_s3] sm:$0xff] }
 0x2c9   : > { %3548 = vmatprep.mubr.bf16.mxu0 %v8295_v53  ;;  %4160 = vmatprep.mubr.bf16.mxu1 %v8295_v53  ;;  %v1197_v53 = vunpack.c.h.s8.bf16 %v813_v16  ;;  %v836_v16 = vld [vmem:[%s7382_s25 + $0x4b0] sm:$0xff] }
 0x2ca   : > { %3624 = vmatpush1.bf16.msra.mxu0 %v1170_v34  ;;  %4236 = vmatpush1.bf16.msra.mxu1 %v1172_v29  ;;  %v837_v34 = vld [vmem:[%s7382_s25 + $0x4b8] sm:$0xff]  ;;  %v1226_v29 = vunpack.c.h.s8.bf16 %v826_v6 }
 0x2cb   : > { %3625 = vmatprep.subr.bf16.mxu0 %v1179_v19  ;;  %4237 = vmatprep.subr.bf16.mxu1 %v1181_v35  ;;  %v1235_v19 = vunpack.c.l.s8.bf16 %v835_v63  ;;  %v1237_v35 = vunpack.c.l.s8.bf16 %v837_v34 }
 0x2ce   : > { %3626 = vmatpush1.bf16.msra.mxu0 %v1178_v0  ;;  %4238 = vmatpush1.bf16.msra.mxu1 %v1180_v62  ;;  %v1236_v0 = vunpack.c.l.s8.bf16 %v836_v16  ;;  %v1243_v62 = vunpack.c.h.s8.bf16 %v835_v63 }
 0x2cf   : > { %3627 = vmatprep.subr.bf16.mxu0 %v1187_v32  ;;  %4239 = vmatprep.subr.bf16.mxu1 %v1189_v60  ;;  %v1245_v32 = vunpack.c.h.s8.bf16 %v837_v34  ;;  %v8937_v60 = vld [vmem:[%s7382_s25 + $0x4f8] sm:$0xff] }
 0x2d0   : > { %3549 = vmatmul.mubr.bf16.gmra.mrb[76].mxu0 %v8307_v9  ;;  %4161 = vmatmul.mubr.bf16.gmra.mrb[76].mxu1 %v8307_v9  ;;  %v818_v9 = vld [vmem:[%s7382_s25 + $0x420] sm:$0xff]  ;;  %v1261_v34 = vunpack.c.h.s8.bf16 %v8937_v60 }
 0x2d1   : > { %3558 = vmatprep.mubr.bf16.mxu0 %v8309_v10  ;;  %4170 = vmatprep.mubr.bf16.mxu1 %v8309_v10  ;;  %v820_v10 = vld [vmem:[%s7382_s25 + $0x430] sm:$0xff] }
 0x2d2   : > { %3628 = vmatpush1.bf16.msra.mxu0 %v1186_v52  ;;  %4240 = vmatpush1.bf16.msra.mxu1 %v1188_v57  ;;  %v1457_v52 = vld [vmem:[%s11985_s3 + $0x18] sm:$0xff]  ;;  %v1462_v57 = vld [vmem:[%s11985_s3 + $0x40] sm:$0xff] }
 0x2d3   : > { %3629 = vmatprep.subr.bf16.mxu0 %v1195_v13  ;;  %4241 = vmatprep.subr.bf16.mxu1 %v1197_v53  ;;  %v1242_v13 = vunpack.c.h.s8.bf16 %v834_v61  ;;  %v1244_v53 = vunpack.c.h.s8.bf16 %v836_v16  ;;  %v1478_v16 = vld [vmem:[%s11985_s3 + $0xc0] sm:$0xff] }
 0x2d6   : > { %3630 = vmatpush1.bf16.msra.mxu0 %v1194_v17  ;;  %4242 = vmatpush1.bf16.msra.mxu1 %v1196_v45  ;;  %v1253_v45 = vunpack.c.l.s8.bf16 %v8937_v60 }
 0x2d7   : > { %3752 = vmatprep.subr.bf16.mxu0 %v1203_v11  ;;  %4364 = vmatprep.subr.bf16.mxu1 %v1205_v18  ;;  %v8962_v11 = vld [vmem:[%s7382_s25 + $0x4e0] sm:$0xff]  ;;  %v8965_v18 = vld [vmem:[%s7382_s25 + $0x4f0] sm:$0xff] }
 0x2d8   : > { %3559 = vmatmul.mubr.bf16.gmra.mrb[80].mxu0 %v8325_v25  ;;  %4171 = vmatmul.mubr.bf16.gmra.mrb[80].mxu1 %v8325_v25  ;;  %v1202_v25 = vunpack.c.l.s8.bf16 %v818_v9 }
 0x2d9   : > { %3568 = vmatprep.mubr.bf16.mxu0 %v8327_v26  ;;  %4180 = vmatprep.mubr.bf16.mxu1 %v8327_v26  ;;  %v1204_v26 = vunpack.c.l.s8.bf16 %v820_v10 }
 0x2e0   : > { %3569 = vmatmul.mubr.bf16.gmra.mrb[84].mxu0 %v8335_v30  ;;  %4181 = vmatmul.mubr.bf16.gmra.mrb[84].mxu1 %v8335_v30  ;;  %v1211_v30 = vunpack.c.h.s8.bf16 %v819_v59 }
 0x2e1   : > { %3578 = vmatprep.mubr.bf16.mxu0 %v8337_v31  ;;  %4190 = vmatprep.mubr.bf16.mxu1 %v8337_v31  ;;  %v1213_v31 = vunpack.c.h.s8.bf16 %v821_v21 }
 0x2e8   : > { %3579 = vmatmul.mubr.bf16.gmra.mrb[88].mxu0 %v8345_v37  ;;  %4191 = vmatmul.mubr.bf16.gmra.mrb[88].mxu1 %v8345_v37  ;;  %v827_v37 = vld [vmem:[%s7382_s25 + $0x468] sm:$0xff] }
 0x2e9   : > { %3588 = vmatprep.mubr.bf16.mxu0 %v8347_v38  ;;  %4200 = vmatprep.mubr.bf16.mxu1 %v8347_v38  ;;  %v1210_v38 = vunpack.c.h.s8.bf16 %v818_v9  ;;  %v1227_v33 = vunpack.c.h.s8.bf16 %v827_v37 }
 0x2f0   : > { %3589 = vmatmul.mubr.bf16.gmra.mrb[92].mxu0 %v8355_v41  ;;  %4201 = vmatmul.mubr.bf16.gmra.mrb[92].mxu1 %v8355_v41  ;;  %v1212_v41 = vunpack.c.h.s8.bf16 %v820_v10 }
 0x2f1   : > { %3631 = vmatprep.mubr.bf16.mxu0 %v8357_v42  ;;  %4243 = vmatprep.mubr.bf16.mxu1 %v8357_v42  ;;  %v1219_v42 = vunpack.c.l.s8.bf16 %v827_v37 }
 0x2f8   : > { %3632 = vmatmul.mubr.bf16.vlgmr.msra.gmra.mrb[48].mxu0 %v8365_v47  ;;  %4244 = vmatmul.mubr.bf16.vlgmr.msra.gmra.mrb[48].mxu1 %v8365_v47  ;;  %v1220_v47 = vunpack.c.l.s8.bf16 %v828_v20 }
 0x2f9   : > { %3753 = vmatpush1.bf16.msra.mxu0 %v1202_v25  ;;  %4365 = vmatpush1.bf16.msra.mxu1 %v1204_v26 }
 0x2fa   : > { %3754 = vmatprep.subr.bf16.mxu0 %v1211_v30  ;;  %4366 = vmatprep.subr.bf16.mxu1 %v1213_v31  ;;  %v1463_v30 = vld [vmem:[%s11985_s3 + $0x48] sm:$0xff]  ;;  %v1465_v31 = vld [vmem:[%s11985_s3 + $0x58] sm:$0xff] }
 0x2fb   : > { %3641 = vmatprep.mubr.bf16.mxu0 %v8371_v56  ;;  %4253 = vmatprep.mubr.bf16.mxu1 %v8371_v56  ;;  %v1228_v56 = vunpack.c.h.s8.bf16 %v828_v20 }
 0x2fd   : > { %3755 = vmatpush1.bf16.msra.mxu0 %v1210_v38  ;;  %4367 = vmatpush1.bf16.msra.mxu1 %v1212_v41 }
 0x2fe   : > { %3756 = vmatprep.subr.bf16.mxu0 %v1219_v42  ;;  %4368 = vmatprep.subr.bf16.mxu1 %v1221_v46 }
 0x300   : > { %3642 = vmatmul.mubr.bf16.gmra.mrb[52].mxu0 %v8383_v8  ;;  %4254 = vmatmul.mubr.bf16.gmra.mrb[52].mxu1 %v8383_v8  ;;  %v1234_v8 = vunpack.c.l.s8.bf16 %v834_v61  ;;  %v1473_v61 = vld [vmem:[%s11985_s3 + $0x98] sm:$0xff] }
 0x301   : > { %3757 = vmatpush1.bf16.msra.mxu0 %v1218_v51  ;;  %4369 = vmatpush1.bf16.msra.mxu1 %v1220_v47  ;;  %v1250_v51 = vunpack.c.l.s8.bf16 %v8962_v11  ;;  %v1252_v47 = vunpack.c.l.s8.bf16 %v8965_v18 }
 0x302   : > { %3651 = vmatprep.mubr.bf16.mxu0 %v8385_v14  ;;  %4263 = vmatprep.mubr.bf16.mxu1 %v8385_v14  ;;  %v8934_v14 = vld [vmem:[%s7382_s25 + $0x4e8] sm:$0xff] }
 0x303   : > { %3758 = vmatprep.subr.bf16.mxu0 %v1227_v33  ;;  %4370 = vmatprep.subr.bf16.mxu1 %v1229_v22  ;;  %v1251_v17 = vunpack.c.l.s8.bf16 %v8934_v14  ;;  %v1259_v63 = vunpack.c.h.s8.bf16 %v8934_v14 }
 0x305   : > { %3759 = vmatpush1.bf16.msra.mxu0 %v1226_v29  ;;  %4371 = vmatpush1.bf16.msra.mxu1 %v1228_v56  ;;  %v8998_v29 = vld [vmem:[%s7382_s25 + $0x528] sm:$0xff]  ;;  %v9001_v56 = vld [vmem:[%s7382_s25 + $0x538] sm:$0xff] }
 0x306   : > { %3760 = vmatprep.subr.bf16.mxu0 %v1235_v19  ;;  %4372 = vmatprep.subr.bf16.mxu1 %v1237_v35  ;;  %v1470_v19 = vld [vmem:[%s11985_s3 + $0x80] sm:$0xff]  ;;  %v1471_v35 = vld [vmem:[%s11985_s3 + $0x88] sm:$0xff]  ;;  %v1267_v14 = vunpack.c.l.s8.bf16 %v8998_v29  ;;  %v1269_v60 = vunpack.c.l.s8.bf16 %v9001_v56 }
 0x308   : > { %3652 = vmatmul.mubr.bf16.gmra.mrb[56].mxu0 %v8397_v36  ;;  %4264 = vmatmul.mubr.bf16.gmra.mrb[56].mxu1 %v8397_v36  ;;  %v1455_v36 = vld [vmem:[%s11985_s3 + $0x8] sm:$0xff] }
 0x309   : > { %3661 = vmatprep.mubr.bf16.mxu0 %v8399_v39  ;;  %4273 = vmatprep.mubr.bf16.mxu1 %v8399_v39  ;;  %v1464_v39 = vld [vmem:[%s11985_s3 + $0x50] sm:$0xff] }
 0x30a   : > { %3761 = vmatpush1.bf16.msra.mxu0 %v1234_v8  ;;  %4373 = vmatpush1.bf16.msra.mxu1 %v1236_v0  ;;  %v1258_v8 = vunpack.c.h.s8.bf16 %v8962_v11  ;;  %v1260_v0 = vunpack.c.h.s8.bf16 %v8965_v18 }
 0x30b   : > { %v2715_v59 = vpop.f32.mrb[0].mxu0  ;;  %v3327_v21 = vpop.f32.mrb[0].mxu1  ;;  %3762 = vmatprep.subr.bf16.mxu0 %v1243_v62  ;;  %4374 = vmatprep.subr.bf16.mxu1 %v1245_v32  ;;  %v1480_v32 = vld [vmem:[%s11985_s3 + $0xd0] sm:$0xff] }
 0x30c   : > { %v4670_v9 = vadd.f32 %v2715_v59, %v1454_v48  ;;  %v4672_v10 = vadd.f32 %v3327_v21, %v1456_v5  ;;  %v2717_v25 = vpop.f32.mrb[1].mxu0  ;;  %v3329_v26 = vpop.f32.mrb[1].mxu1  ;;  %v9034_v48 = vld [vmem:[%s7382_s25 + $0x520] sm:$0xff]  ;;  %v9037_v5 = vld [vmem:[%s7382_s25 + $0x530] sm:$0xff]  ;;  %v1481_v59 = vld [vmem:[%s11985_s3 + $0xd8] sm:$0xff] }
 0x30d   : > { %v4671_v37 = vadd.f32 %v2717_v25, %v1455_v36  ;;  %v4673_v24 = vadd.f32 %v3329_v26, %v1457_v52  ;;  %v2719_v38 = vpop.f32.mrb[2].mxu0  ;;  %v3331_v41 = vpop.f32.mrb[2].mxu1  ;;  %v1266_v25 = vunpack.c.l.s8.bf16 %v9034_v48  ;;  %v1268_v26 = vunpack.c.l.s8.bf16 %v9037_v5 }
 0x30e   : > { %4862 = vst [vmem:[%s11985_s3] sm:$0xff] %v4670_v9  ;;  %4864 = vst [vmem:[%s11985_s3 + $0x10] sm:$0xff] %v4672_v10  ;;  %v4678_v42 = vadd.f32 %v2719_v38, %v1462_v57  ;;  %v4680_v46 = vadd.f32 %v3331_v41, %v1464_v39  ;;  %v2721_v6 = vpop.f32.mrb[3].mxu0  ;;  %v3333_v20 = vpop.f32.mrb[3].mxu1  ;;  %3763 = vmatpush1.bf16.msra.mxu0 %v1242_v13  ;;  %4375 = vmatpush1.bf16.msra.mxu1 %v1244_v53  ;;  %v1479_v53 = vld [vmem:[%s11985_s3 + $0xc8] sm:$0xff]  ;;  %v9073_v41 = vld [vmem:[%s7382_s25 + $0x578] sm:$0xff] }
 0x30f   : > { %4863 = vst [vmem:[%s11985_s3 + $0x8] sm:$0xff] %v4671_v37  ;;  %4865 = vst [vmem:[%s11985_s3 + $0x18] sm:$0xff] %v4673_v24  ;;  %v4679_v33 = vadd.f32 %v2721_v6, %v1463_v30  ;;  %v4681_v22 = vadd.f32 %v3333_v20, %v1465_v31  ;;  %3764 = vmatprep.subr.bf16.mxu0 %v1251_v17  ;;  %4376 = vmatprep.subr.bf16.mxu1 %v1253_v45  ;;  %v1275_v37 = vunpack.c.h.s8.bf16 %v8998_v29  ;;  %v9070_v38 = vld [vmem:[%s7382_s25 + $0x568] sm:$0xff]  ;;  %v1489_v6 = vld [vmem:[%s11985_s3 + $0x118] sm:$0xff] }
 0x310   : > { %4870 = vst [vmem:[%s11985_s3 + $0x40] sm:$0xff] %v4678_v42  ;;  %4872 = vst [vmem:[%s11985_s3 + $0x50] sm:$0xff] %v4680_v46  ;;  %3662 = vmatmul.mubr.bf16.gmra.mrb[60].mxu0 %v8411_v2  ;;  %4274 = vmatmul.mubr.bf16.gmra.mrb[60].mxu1 %v8411_v2  ;;  %v1472_v2 = vld [vmem:[%s11985_s3 + $0x90] sm:$0xff]  ;;  %v1277_v24 = vunpack.c.h.s8.bf16 %v9001_v56  ;;  %v1486_v42 = vld [vmem:[%s11985_s3 + $0x100] sm:$0xff] }
 0x311   : > { %4871 = vst [vmem:[%s11985_s3 + $0x48] sm:$0xff] %v4679_v33  ;;  %4873 = vst [vmem:[%s11985_s3 + $0x58] sm:$0xff] %v4681_v22  ;;  %3671 = vmatprep.mubr.bf16.mxu0 %v8413_v3  ;;  %4283 = vmatprep.mubr.bf16.mxu1 %v8413_v3  ;;  %v1487_v46 = vld [vmem:[%s11985_s3 + $0x108] sm:$0xff]  ;;  %v1494_v20 = vld [vmem:[%s11985_s3 + $0x140] sm:$0xff] }
 0x312   : > { %3765 = vmatpush1.bf16.msra.mxu0 %v1250_v51  ;;  %4377 = vmatpush1.bf16.msra.mxu1 %v1252_v47  ;;  %v1274_v51 = vunpack.c.h.s8.bf16 %v9034_v48  ;;  %v1276_v47 = vunpack.c.h.s8.bf16 %v9037_v5  ;;  %v1496_v22 = vld [vmem:[%s11985_s3 + $0x150] sm:$0xff]  ;;  %v9106_v29 = vld [vmem:[%s7382_s25 + $0x560] sm:$0xff] }
 0x313   : > { %v2725_v3 = vpop.f32.mrb[4].mxu0  ;;  %v3337_v62 = vpop.f32.mrb[4].mxu1  ;;  %3766 = vmatprep.subr.bf16.mxu0 %v1259_v63  ;;  %4378 = vmatprep.subr.bf16.mxu1 %v1261_v34  ;;  %v1283_v63 = vunpack.c.l.s8.bf16 %v9070_v38  ;;  %v1285_v34 = vunpack.c.l.s8.bf16 %v9073_v41  ;;  %v9109_v56 = vld [vmem:[%s7382_s25 + $0x570] sm:$0xff] }
 0x314   : > { %v4686_v36 = vadd.f32 %v2725_v3, %v1470_v19  ;;  %v4688_v52 = vadd.f32 %v3337_v62, %v1472_v2  ;;  %v2727_v57 = vpop.f32.mrb[5].mxu0  ;;  %v3339_v13 = vpop.f32.mrb[5].mxu1 }
 0x315   : > { %v4687_v21 = vadd.f32 %v2727_v57, %v1471_v35  ;;  %v4689_v39 = vadd.f32 %v3339_v13, %v1473_v61  ;;  %v2729_v17 = vpop.f32.mrb[6].mxu0  ;;  %v3341_v45 = vpop.f32.mrb[6].mxu1 }
 0x316   : > { %4878 = vst [vmem:[%s11985_s3 + $0x80] sm:$0xff] %v4686_v36  ;;  %4880 = vst [vmem:[%s11985_s3 + $0x90] sm:$0xff] %v4688_v52  ;;  %v4694_v11 = vadd.f32 %v2729_v17, %v1478_v16  ;;  %v4696_v18 = vadd.f32 %v3341_v45, %v1480_v32  ;;  %v2731_v9 = vpop.f32.mrb[7].mxu0  ;;  %v3343_v10 = vpop.f32.mrb[7].mxu1  ;;  %3767 = vmatpush1.bf16.msra.mxu0 %v1258_v8  ;;  %4379 = vmatpush1.bf16.msra.mxu1 %v1260_v0  ;;  %v1495_v16 = vld [vmem:[%s11985_s3 + $0x148] sm:$0xff]  ;;  %v1497_v8 = vld [vmem:[%s11985_s3 + $0x158] sm:$0xff]  ;;  %v1282_v36 = vunpack.c.l.s8.bf16 %v9106_v29 }
 0x317   : > { %4879 = vst [vmem:[%s11985_s3 + $0x88] sm:$0xff] %v4687_v21  ;;  %4881 = vst [vmem:[%s11985_s3 + $0x98] sm:$0xff] %v4689_v39  ;;  %v4695_v30 = vadd.f32 %v2731_v9, %v1479_v53  ;;  %v4697_v31 = vadd.f32 %v3343_v10, %v1481_v59  ;;  %3768 = vmatprep.subr.bf16.mxu0 %v1267_v14  ;;  %4380 = vmatprep.subr.bf16.mxu1 %v1269_v60  ;;  %v1284_v52 = vunpack.c.l.s8.bf16 %v9109_v56  ;;  %v9142_v21 = vld [vmem:[%s7382_s25 + $0x5a8] sm:$0xff]  ;;  %v9145_v39 = vld [vmem:[%s7382_s25 + $0x5b8] sm:$0xff] }
 0x318   : > { %4886 = vst [vmem:[%s11985_s3 + $0xc0] sm:$0xff] %v4694_v11  ;;  %4888 = vst [vmem:[%s11985_s3 + $0xd0] sm:$0xff] %v4696_v18  ;;  %3672 = vmatmul.mubr.bf16.gmra.mrb[64].mxu0 %v8425_v27  ;;  %4284 = vmatmul.mubr.bf16.gmra.mrb[64].mxu1 %v8425_v27  ;;  %v1488_v27 = vld [vmem:[%s11985_s3 + $0x110] sm:$0xff]  ;;  %v1291_v53 = vunpack.c.h.s8.bf16 %v9070_v38  ;;  %v1293_v59 = vunpack.c.h.s8.bf16 %v9073_v41  ;;  %v1502_v17 = vld [vmem:[%s11985_s3 + $0x180] sm:$0xff]  ;;  %v1290_v9 = vunpack.c.h.s8.bf16 %v9106_v29  ;;  %v1292_v10 = vunpack.c.h.s8.bf16 %v9109_v56 }
 0x319   : > { %4887 = vst [vmem:[%s11985_s3 + $0xc8] sm:$0xff] %v4695_v30  ;;  %4889 = vst [vmem:[%s11985_s3 + $0xd8] sm:$0xff] %v4697_v31  ;;  %3681 = vmatprep.mubr.bf16.mxu0 %v8427_v28  ;;  %4293 = vmatprep.mubr.bf16.mxu1 %v8427_v28  ;;  %v1503_v45 = vld [vmem:[%s11985_s3 + $0x188] sm:$0xff]  ;;  %v1505_v11 = vld [vmem:[%s11985_s3 + $0x198] sm:$0xff]  ;;  %v1299_v30 = vunpack.c.l.s8.bf16 %v9142_v21  ;;  %v1301_v31 = vunpack.c.l.s8.bf16 %v9145_v39 }
 0x31a   : > { %3769 = vmatpush1.bf16.msra.mxu0 %v1266_v25  ;;  %4381 = vmatpush1.bf16.msra.mxu1 %v1268_v26  ;;  %v1510_v18 = vld [vmem:[%s11985_s3 + $0x1c0] sm:$0xff]  ;;  %v1512_v26 = vld [vmem:[%s11985_s3 + $0x1d0] sm:$0xff] }
 0x31b   : > { %v2735_v28 = vpop.f32.mrb[8].mxu0  ;;  %v3347_v33 = vpop.f32.mrb[8].mxu1  ;;  %3770 = vmatprep.subr.bf16.mxu0 %v1275_v37  ;;  %4382 = vmatprep.subr.bf16.mxu1 %v1277_v24  ;;  %v9178_v37 = vld [vmem:[%s7382_s25 + $0x5a0] sm:$0xff]  ;;  %v9181_v24 = vld [vmem:[%s7382_s25 + $0x5b0] sm:$0xff] }
 0x31c   : > { %v4702_v19 = vadd.f32 %v2735_v28, %v1486_v42  ;;  %v4704_v2 = vadd.f32 %v3347_v33, %v1488_v27  ;;  %v2737_v35 = vpop.f32.mrb[9].mxu0  ;;  %v3349_v61 = vpop.f32.mrb[9].mxu1  ;;  %v1298_v29 = vunpack.c.l.s8.bf16 %v9178_v37  ;;  %v1300_v56 = vunpack.c.l.s8.bf16 %v9181_v24 }
 0x31d   : > { %v4703_v0 = vadd.f32 %v2737_v35, %v1487_v46  ;;  %v4705_v3 = vadd.f32 %v3349_v61, %v1489_v6  ;;  %v2739_v62 = vpop.f32.mrb[10].mxu0  ;;  %v3351_v32 = vpop.f32.mrb[10].mxu1  ;;  %v1511_v46 = vld [vmem:[%s11985_s3 + $0x1c8] sm:$0xff]  ;;  %v1513_v6 = vld [vmem:[%s11985_s3 + $0x1d8] sm:$0xff]  ;;  %v1307_v35 = vunpack.c.h.s8.bf16 %v9142_v21  ;;  %v1309_v61 = vunpack.c.h.s8.bf16 %v9145_v39 }
 0x31e   : > { %4894 = vst [vmem:[%s11985_s3 + $0x100] sm:$0xff] %v4702_v19  ;;  %4896 = vst [vmem:[%s11985_s3 + $0x110] sm:$0xff] %v4704_v2  ;;  %v4710_v14 = vadd.f32 %v2739_v62, %v1494_v20  ;;  %v4712_v60 = vadd.f32 %v3351_v32, %v1496_v22  ;;  %v2741_v48 = vpop.f32.mrb[11].mxu0  ;;  %v3353_v5 = vpop.f32.mrb[11].mxu1  ;;  %3771 = vmatpush1.bf16.msra.mxu0 %v1274_v51  ;;  %4383 = vmatpush1.bf16.msra.mxu1 %v1276_v47  ;;  %v1521_v62 = vld [vmem:[%s11985_s3 + $0x218] sm:$0xff]  ;;  %v1526_v32 = vld [vmem:[%s11985_s3 + $0x240] sm:$0xff] }
 0x31f   : > { %4895 = vst [vmem:[%s11985_s3 + $0x108] sm:$0xff] %v4703_v0  ;;  %4897 = vst [vmem:[%s11985_s3 + $0x118] sm:$0xff] %v4705_v3  ;;  %v4711_v57 = vadd.f32 %v2741_v48, %v1495_v16  ;;  %v4713_v13 = vadd.f32 %v3353_v5, %v1497_v8  ;;  %3772 = vmatprep.subr.bf16.mxu0 %v1283_v63  ;;  %4384 = vmatprep.subr.bf16.mxu1 %v1285_v34  ;;  %v9214_v16 = vld [vmem:[%s7382_s25 + $0x5e8] sm:$0xff]  ;;  %v9217_v8 = vld [vmem:[%s7382_s25 + $0x5f8] sm:$0xff] }
 0x320   : > { %4902 = vst [vmem:[%s11985_s3 + $0x140] sm:$0xff] %v4710_v14  ;;  %4904 = vst [vmem:[%s11985_s3 + $0x150] sm:$0xff] %v4712_v60  ;;  %3682 = vmatmul.mubr.bf16.gmra.mrb[68].mxu0 %v8439_v1  ;;  %4294 = vmatmul.mubr.bf16.gmra.mrb[68].mxu1 %v8439_v1  ;;  %v1504_v1 = vld [vmem:[%s11985_s3 + $0x190] sm:$0xff]  ;;  %v1518_v0 = vld [vmem:[%s11985_s3 + $0x200] sm:$0xff]  ;;  %v1306_v14 = vunpack.c.h.s8.bf16 %v9178_v37  ;;  %v1308_v60 = vunpack.c.h.s8.bf16 %v9181_v24 }
 0x321   : > { %4903 = vst [vmem:[%s11985_s3 + $0x148] sm:$0xff] %v4711_v57  ;;  %4905 = vst [vmem:[%s11985_s3 + $0x158] sm:$0xff] %v4713_v13  ;;  %3691 = vmatprep.mubr.bf16.mxu0 %v8441_v4  ;;  %4303 = vmatprep.mubr.bf16.mxu1 %v8441_v4  ;;  %v1519_v3 = vld [vmem:[%s11985_s3 + $0x208] sm:$0xff]  ;;  %v1528_v5 = vld [vmem:[%s11985_s3 + $0x250] sm:$0xff] }
 0x322   : > { %3773 = vmatpush1.bf16.msra.mxu0 %v1282_v36  ;;  %4385 = vmatpush1.bf16.msra.mxu1 %v1284_v52  ;;  %v1315_v36 = vunpack.c.l.s8.bf16 %v9214_v16  ;;  %v1317_v52 = vunpack.c.l.s8.bf16 %v9217_v8  ;;  %v9250_v57 = vld [vmem:[%s7382_s25 + $0x5e0] sm:$0xff]  ;;  %v9253_v13 = vld [vmem:[%s7382_s25 + $0x5f0] sm:$0xff] }
 0x323   : > { %v2745_v4 = vpop.f32.mrb[12].mxu0  ;;  %v3357_v25 = vpop.f32.mrb[12].mxu1  ;;  %3774 = vmatprep.subr.bf16.mxu0 %v1291_v53  ;;  %4386 = vmatprep.subr.bf16.mxu1 %v1293_v59 }
 0x324   : > { %v4718_v38 = vadd.f32 %v2745_v4, %v1502_v17  ;;  %v4720_v41 = vadd.f32 %v3357_v25, %v1504_v1  ;;  %v2747_v42 = vpop.f32.mrb[13].mxu0  ;;  %v3359_v27 = vpop.f32.mrb[13].mxu1  ;;  %v1527_v17 = vld [vmem:[%s11985_s3 + $0x248] sm:$0xff]  ;;  %v1529_v1 = vld [vmem:[%s11985_s3 + $0x258] sm:$0xff] }
 0x325   : > { %v4719_v20 = vadd.f32 %v2747_v42, %v1503_v45  ;;  %v4721_v51 = vadd.f32 %v3359_v27, %v1505_v11  ;;  %v2749_v47 = vpop.f32.mrb[14].mxu0  ;;  %v3361_v28 = vpop.f32.mrb[14].mxu1  ;;  %v9286_v42 = vld [vmem:[%s7382_s25 + $0x628] sm:$0xff]  ;;  %v9289_v27 = vld [vmem:[%s7382_s25 + $0x638] sm:$0xff] }
 0x326   : > { %4910 = vst [vmem:[%s11985_s3 + $0x180] sm:$0xff] %v4718_v38  ;;  %4912 = vst [vmem:[%s11985_s3 + $0x190] sm:$0xff] %v4720_v41  ;;  %v4726_v33 = vadd.f32 %v2749_v47, %v1510_v18  ;;  %v4728_v22 = vadd.f32 %v3361_v28, %v1512_v26  ;;  %v2751_v63 = vpop.f32.mrb[15].mxu0  ;;  %v3363_v34 = vpop.f32.mrb[15].mxu1  ;;  %3775 = vmatpush1.bf16.msra.mxu0 %v1290_v9  ;;  %4387 = vmatpush1.bf16.msra.mxu1 %v1292_v10  ;;  %v1323_v38 = vunpack.c.h.s8.bf16 %v9214_v16 }
 0x327   : > { %4911 = vst [vmem:[%s11985_s3 + $0x188] sm:$0xff] %v4719_v20  ;;  %4913 = vst [vmem:[%s11985_s3 + $0x198] sm:$0xff] %v4721_v51  ;;  %v4727_v19 = vadd.f32 %v2751_v63, %v1511_v46  ;;  %v4729_v2 = vadd.f32 %v3363_v34, %v1513_v6  ;;  %3776 = vmatprep.subr.bf16.mxu0 %v1299_v30  ;;  %4388 = vmatprep.subr.bf16.mxu1 %v1301_v31  ;;  %v1314_v30 = vunpack.c.l.s8.bf16 %v9250_v57  ;;  %v1534_v46 = vld [vmem:[%s11985_s3 + $0x280] sm:$0xff]  ;;  %v1535_v6 = vld [vmem:[%s11985_s3 + $0x288] sm:$0xff] }
 0x328   : > { %4918 = vst [vmem:[%s11985_s3 + $0x1c0] sm:$0xff] %v4726_v33  ;;  %4920 = vst [vmem:[%s11985_s3 + $0x1d0] sm:$0xff] %v4728_v22  ;;  %3692 = vmatmul.mubr.bf16.gmra.mrb[72].mxu0 %v8453_v40  ;;  %4304 = vmatmul.mubr.bf16.gmra.mrb[72].mxu1 %v8453_v40  ;;  %v1520_v40 = vld [vmem:[%s11985_s3 + $0x210] sm:$0xff]  ;;  %v1316_v31 = vunpack.c.l.s8.bf16 %v9253_v13  ;;  %v1325_v41 = vunpack.c.h.s8.bf16 %v9217_v8  ;;  %v1537_v20 = vld [vmem:[%s11985_s3 + $0x298] sm:$0xff]  ;;  %v1322_v51 = vunpack.c.h.s8.bf16 %v9250_v57  ;;  %v1324_v47 = vunpack.c.h.s8.bf16 %v9253_v13 }
 0x329   : > { %4919 = vst [vmem:[%s11985_s3 + $0x1c8] sm:$0xff] %v4727_v19  ;;  %4921 = vst [vmem:[%s11985_s3 + $0x1d8] sm:$0xff] %v4729_v2  ;;  %3701 = vmatprep.mubr.bf16.mxu0 %v8455_v43  ;;  %4313 = vmatprep.mubr.bf16.mxu1 %v8455_v43  ;;  %v1544_v22 = vld [vmem:[%s11985_s3 + $0x2d0] sm:$0xff]  ;;  %v1331_v63 = vunpack.c.l.s8.bf16 %v9286_v42  ;;  %v1333_v34 = vunpack.c.l.s8.bf16 %v9289_v27  ;;  %v1558_v13 = vld [vmem:[%s11985_s3 + $0x340] sm:$0xff] }
 0x32a   : > { %3777 = vmatpush1.bf16.msra.mxu0 %v1298_v29  ;;  %4389 = vmatpush1.bf16.msra.mxu1 %v1300_v56 }
 0x32b   : > { %v2755_v43 = vpop.f32.mrb[16].mxu0  ;;  %v3367_v48 = vpop.f32.mrb[16].mxu1  ;;  %3778 = vmatprep.subr.bf16.mxu0 %v1307_v35  ;;  %4390 = vmatprep.subr.bf16.mxu1 %v1309_v61  ;;  %v1543_v35 = vld [vmem:[%s11985_s3 + $0x2c8] sm:$0xff]  ;;  %v1545_v61 = vld [vmem:[%s11985_s3 + $0x2d8] sm:$0xff] }
 0x32c   : > { %v4734_v53 = vadd.f32 %v2755_v43, %v1518_v0  ;;  %v4736_v59 = vadd.f32 %v3367_v48, %v1520_v40  ;;  %v2757_v21 = vpop.f32.mrb[17].mxu0  ;;  %v3369_v39 = vpop.f32.mrb[17].mxu1  ;;  %v1550_v48 = vld [vmem:[%s11985_s3 + $0x300] sm:$0xff] }
 0x32d   : > { %v4735_v45 = vadd.f32 %v2757_v21, %v1519_v3  ;;  %v4737_v11 = vadd.f32 %v3369_v39, %v1521_v62  ;;  %v2759_v18 = vpop.f32.mrb[18].mxu0  ;;  %v3371_v9 = vpop.f32.mrb[18].mxu1 }
 0x32e   : > { %4926 = vst [vmem:[%s11985_s3 + $0x200] sm:$0xff] %v4734_v53  ;;  %4928 = vst [vmem:[%s11985_s3 + $0x210] sm:$0xff] %v4736_v59  ;;  %v4742_v10 = vadd.f32 %v2759_v18, %v1526_v32  ;;  %v4744_v4 = vadd.f32 %v3371_v9, %v1528_v5  ;;  %v2761_v25 = vpop.f32.mrb[19].mxu0  ;;  %v3373_v26 = vpop.f32.mrb[19].mxu1  ;;  %3779 = vmatpush1.bf16.msra.mxu0 %v1306_v14  ;;  %4391 = vmatpush1.bf16.msra.mxu1 %v1308_v60  ;;  %v1552_v5 = vld [vmem:[%s11985_s3 + $0x310] sm:$0xff] }
 0x32f   : > { %4927 = vst [vmem:[%s11985_s3 + $0x208] sm:$0xff] %v4735_v45  ;;  %4929 = vst [vmem:[%s11985_s3 + $0x218] sm:$0xff] %v4737_v11  ;;  %v4743_v37 = vadd.f32 %v2761_v25, %v1527_v17  ;;  %v4745_v24 = vadd.f32 %v3373_v26, %v1529_v1  ;;  %3780 = vmatprep.subr.bf16.mxu0 %v1315_v36  ;;  %4392 = vmatprep.subr.bf16.mxu1 %v1317_v52  ;;  %v1553_v36 = vld [vmem:[%s11985_s3 + $0x318] sm:$0xff]  ;;  %v1560_v53 = vld [vmem:[%s11985_s3 + $0x350] sm:$0xff] }
 0x330   : > { %4934 = vst [vmem:[%s11985_s3 + $0x240] sm:$0xff] %v4742_v10  ;;  %4936 = vst [vmem:[%s11985_s3 + $0x250] sm:$0xff] %v4744_v4  ;;  %3702 = vmatmul.mubr.bf16.gmra.mrb[76].mxu0 %v8467_v12  ;;  %4314 = vmatmul.mubr.bf16.gmra.mrb[76].mxu1 %v8467_v12  ;;  %v1536_v12 = vld [vmem:[%s11985_s3 + $0x290] sm:$0xff]  ;;  %v1559_v17 = vld [vmem:[%s11985_s3 + $0x348] sm:$0xff] }
 0x331   : > { %4935 = vst [vmem:[%s11985_s3 + $0x248] sm:$0xff] %v4743_v37  ;;  %4937 = vst [vmem:[%s11985_s3 + $0x258] sm:$0xff] %v4745_v24  ;;  %3711 = vmatprep.mubr.bf16.mxu0 %v8469_v15  ;;  %4323 = vmatprep.mubr.bf16.mxu1 %v8469_v15  ;;  %v1542_v15 = vld [vmem:[%s11985_s3 + $0x2c0] sm:$0xff]  ;;  %v1561_v1 = vld [vmem:[%s11985_s3 + $0x358] sm:$0xff] }
 0x332   : > { %3781 = vmatpush1.bf16.msra.mxu0 %v1314_v30  ;;  %4393 = vmatpush1.bf16.msra.mxu1 %v1316_v31  ;;  %v12129_v37 = vld [vmem:[#allocation6_spill] sm:$0xff] }
 0x333   : > { %v2765_v28 = vpop.f32.mrb[20].mxu0  ;;  %v3377_v33 = vpop.f32.mrb[20].mxu1  ;;  %3782 = vmatprep.subr.bf16.mxu0 %v1323_v38  ;;  %4394 = vmatprep.subr.bf16.mxu1 %v1325_v41  ;;  %v1566_v24 = vld [vmem:[%s11985_s3 + $0x380] sm:$0xff]  ;;  %v1568_v38 = vld [vmem:[%s11985_s3 + $0x390] sm:$0xff]  ;;  %v12130_v41 = vld [vmem:[#allocation7_spill] sm:$0xff] }
 0x334   : > { %v4750_v29 = vadd.f32 %v2765_v28, %v1534_v46  ;;  %v4752_v56 = vadd.f32 %v3377_v33, %v1536_v12  ;;  %v2767_v19 = vpop.f32.mrb[21].mxu0  ;;  %v3379_v2 = vpop.f32.mrb[21].mxu1  ;;  %v1567_v46 = vld [vmem:[%s11985_s3 + $0x388] sm:$0xff]  ;;  %v1569_v12 = vld [vmem:[%s11985_s3 + $0x398] sm:$0xff] }
 0x335   : > { %v4751_v16 = vadd.f32 %v2767_v19, %v1535_v6  ;;  %v4753_v8 = vadd.f32 %v3379_v2, %v1537_v20  ;;  %v2769_v0 = vpop.f32.mrb[22].mxu0  ;;  %v3381_v40 = vpop.f32.mrb[22].mxu1 }
 0x336   : > { %4942 = vst [vmem:[%s11985_s3 + $0x280] sm:$0xff] %v4750_v29  ;;  %4944 = vst [vmem:[%s11985_s3 + $0x290] sm:$0xff] %v4752_v56  ;;  %v4758_v3 = vadd.f32 %v2769_v0, %v1542_v15  ;;  %v4760_v62 = vadd.f32 %v3381_v40, %v1544_v22  ;;  %v2771_v32 = vpop.f32.mrb[23].mxu0  ;;  %v3383_v14 = vpop.f32.mrb[23].mxu1  ;;  %3783 = vmatpush1.bf16.msra.mxu0 %v1322_v51  ;;  %4395 = vmatpush1.bf16.msra.mxu1 %v1324_v47  ;;  %v1574_v51 = vld [vmem:[%s11985_s3 + $0x3c0] sm:$0xff]  ;;  %v1576_v47 = vld [vmem:[%s11985_s3 + $0x3d0] sm:$0xff] }
 0x337   : > { %4943 = vst [vmem:[%s11985_s3 + $0x288] sm:$0xff] %v4751_v16  ;;  %4945 = vst [vmem:[%s11985_s3 + $0x298] sm:$0xff] %v4753_v8  ;;  %v4759_v60 = vadd.f32 %v2771_v32, %v1543_v35  ;;  %v4761_v43 = vadd.f32 %v3383_v14, %v1545_v61  ;;  %3905 = vmatprep.subr.bf16.mxu0 %v1331_v63  ;;  %4517 = vmatprep.subr.bf16.mxu1 %v1333_v34  ;;  %v1575_v63 = vld [vmem:[%s11985_s3 + $0x3c8] sm:$0xff]  ;;  %v1577_v34 = vld [vmem:[%s11985_s3 + $0x3d8] sm:$0xff] }
 0x338   : > { %4950 = vst [vmem:[%s11985_s3 + $0x2c0] sm:$0xff] %v4758_v3  ;;  %4952 = vst [vmem:[%s11985_s3 + $0x2d0] sm:$0xff] %v4760_v62  ;;  %3712 = vmatmul.mubr.bf16.gmra.mrb[80].mxu0 %v8485_v54  ;;  %4324 = vmatmul.mubr.bf16.gmra.mrb[80].mxu1 %v8485_v54  ;;  %v1551_v54 = vld [vmem:[%s11985_s3 + $0x308] sm:$0xff]  ;;  %v12131_v3 = vld [vmem:[#allocation8_spill] sm:$0xff] }
 0x339   : > { %4951 = vst [vmem:[%s11985_s3 + $0x2c8] sm:$0xff] %v4759_v60  ;;  %4953 = vst [vmem:[%s11985_s3 + $0x2d8] sm:$0xff] %v4761_v43  ;;  %3721 = vmatprep.mubr.bf16.mxu0 %v8487_v50  ;;  %4333 = vmatprep.mubr.bf16.mxu1 %v8487_v50  ;;  %v1582_v62 = vld [vmem:[%s11985_s3 + $0x400] sm:$0xff]  ;;  %v1584_v32 = vld [vmem:[%s11985_s3 + $0x410] sm:$0xff] }
 0x33a   : > { %v12132_v14 = vld [vmem:[#allocation9_spill] sm:$0xff]  ;;  %v1583_v60 = vld [vmem:[%s11985_s3 + $0x408] sm:$0xff] }
 0x33b   : > { %v2775_v52 = vpop.f32.mrb[24].mxu0  ;;  %v3387_v57 = vpop.f32.mrb[24].mxu1  ;;  %v1585_v43 = vld [vmem:[%s11985_s3 + $0x418] sm:$0xff] }
 0x33c   : > { %v4766_v59 = vadd.f32 %v2775_v52, %v1550_v48  ;;  %v4768_v50 = vadd.f32 %v3387_v57, %v1552_v5  ;;  %v2777_v21 = vpop.f32.mrb[25].mxu0  ;;  %v3389_v39 = vpop.f32.mrb[25].mxu1 }
 0x33d   : > { %v4767_v45 = vadd.f32 %v2777_v21, %v1551_v54  ;;  %v4769_v11 = vadd.f32 %v3389_v39, %v1553_v36  ;;  %v2779_v18 = vpop.f32.mrb[26].mxu0  ;;  %v3391_v9 = vpop.f32.mrb[26].mxu1  ;;  %v1590_v54 = vld [vmem:[%s11985_s3 + $0x440] sm:$0xff]  ;;  %v1592_v36 = vld [vmem:[%s11985_s3 + $0x450] sm:$0xff] }
 0x33e   : > { %4958 = vst [vmem:[%s11985_s3 + $0x300] sm:$0xff] %v4766_v59  ;;  %4960 = vst [vmem:[%s11985_s3 + $0x310] sm:$0xff] %v4768_v50  ;;  %v4774_v10 = vadd.f32 %v2779_v18, %v1558_v13  ;;  %v4776_v4 = vadd.f32 %v3391_v9, %v1560_v53  ;;  %v2781_v25 = vpop.f32.mrb[27].mxu0  ;;  %v3393_v26 = vpop.f32.mrb[27].mxu1  ;;  %v1591_v59 = vld [vmem:[%s11985_s3 + $0x448] sm:$0xff]  ;;  %v1593_v50 = vld [vmem:[%s11985_s3 + $0x458] sm:$0xff] }
 0x33f   : > { %4959 = vst [vmem:[%s11985_s3 + $0x308] sm:$0xff] %v4767_v45  ;;  %4961 = vst [vmem:[%s11985_s3 + $0x318] sm:$0xff] %v4769_v11  ;;  %v4775_v30 = vadd.f32 %v2781_v25, %v1559_v17  ;;  %v4777_v31 = vadd.f32 %v3393_v26, %v1561_v1  ;;  %v12133_v25 = vld [vmem:[#allocation10_spill] sm:$0xff] }
 0x340   : > { %4966 = vst [vmem:[%s11985_s3 + $0x340] sm:$0xff] %v4774_v10  ;;  %4968 = vst [vmem:[%s11985_s3 + $0x350] sm:$0xff] %v4776_v4  ;;  %3722 = vmatmul.mubr.bf16.gmra.mrb[84].mxu0 %v12129_v37  ;;  %4334 = vmatmul.mubr.bf16.gmra.mrb[84].mxu1 %v12129_v37  ;;  %v1598_v26 = vld [vmem:[%s11985_s3 + $0x480] sm:$0xff]  ;;  %v12134_v37 = vld [vmem:[#allocation11_spill] sm:$0xff] }
 0x341   : > { %4967 = vst [vmem:[%s11985_s3 + $0x348] sm:$0xff] %v4775_v30  ;;  %4969 = vst [vmem:[%s11985_s3 + $0x358] sm:$0xff] %v4777_v31  ;;  %3731 = vmatprep.mubr.bf16.mxu0 %v12130_v41  ;;  %4343 = vmatprep.mubr.bf16.mxu1 %v12130_v41  ;;  %v1600_v30 = vld [vmem:[%s11985_s3 + $0x490] sm:$0xff]  ;;  %v1599_v31 = vld [vmem:[%s11985_s3 + $0x488] sm:$0xff] }
 0x342   : > { %v9527_v41 = vld [vmem:[%s7382_s25 + $0x630] sm:$0xff] }
 0x343   : > { %v2785_v6 = vpop.f32.mrb[28].mxu0  ;;  %v3397_v20 = vpop.f32.mrb[28].mxu1 }
 0x344   : > { %v4782_v28 = vadd.f32 %v2785_v6, %v1566_v24  ;;  %v4784_v33 = vadd.f32 %v3397_v20, %v1568_v38  ;;  %v2787_v15 = vpop.f32.mrb[29].mxu0  ;;  %v3399_v22 = vpop.f32.mrb[29].mxu1  ;;  %v1601_v24 = vld [vmem:[%s11985_s3 + $0x498] sm:$0xff]  ;;  %v9524_v38 = vld [vmem:[%s7382_s25 + $0x620] sm:$0xff]  ;;  %v1608_v20 = vld [vmem:[%s11985_s3 + $0x4d0] sm:$0xff] }
 0x345   : > { %v4783_v29 = vadd.f32 %v2787_v15, %v1567_v46  ;;  %v4785_v56 = vadd.f32 %v3399_v22, %v1569_v12  ;;  %v2789_v19 = vpop.f32.mrb[30].mxu0  ;;  %v3401_v2 = vpop.f32.mrb[30].mxu1  ;;  %v1606_v6 = vld [vmem:[%s11985_s3 + $0x4c0] sm:$0xff]  ;;  %v1607_v15 = vld [vmem:[%s11985_s3 + $0x4c8] sm:$0xff]  ;;  %v1609_v22 = vld [vmem:[%s11985_s3 + $0x4d8] sm:$0xff] }
 0x346   : > { %4974 = vst [vmem:[%s11985_s3 + $0x380] sm:$0xff] %v4782_v28  ;;  %4976 = vst [vmem:[%s11985_s3 + $0x390] sm:$0xff] %v4784_v33  ;;  %v4790_v35 = vadd.f32 %v2789_v19, %v1574_v51  ;;  %v4792_v61 = vadd.f32 %v3401_v2, %v1576_v47  ;;  %v2791_v16 = vpop.f32.mrb[31].mxu0  ;;  %v3403_v8 = vpop.f32.mrb[31].mxu1  ;;  %v1330_v19 = vunpack.c.l.s8.bf16 %v9524_v38  ;;  %v1332_v2 = vunpack.c.l.s8.bf16 %v9527_v41 }
 0x347   : > { %4975 = vst [vmem:[%s11985_s3 + $0x388] sm:$0xff] %v4783_v29  ;;  %4977 = vst [vmem:[%s11985_s3 + $0x398] sm:$0xff] %v4785_v56  ;;  %v4791_v0 = vadd.f32 %v2791_v16, %v1575_v63  ;;  %v4793_v40 = vadd.f32 %v3403_v8, %v1577_v34 }
 0x348   : > { %4982 = vst [vmem:[%s11985_s3 + $0x3c0] sm:$0xff] %v4790_v35  ;;  %4984 = vst [vmem:[%s11985_s3 + $0x3d0] sm:$0xff] %v4792_v61  ;;  %3732 = vmatmul.mubr.bf16.gmra.mrb[88].mxu0 %v12131_v3  ;;  %4344 = vmatmul.mubr.bf16.gmra.mrb[88].mxu1 %v12131_v3 }
 0x349   : > { %4983 = vst [vmem:[%s11985_s3 + $0x3c8] sm:$0xff] %v4791_v0  ;;  %4985 = vst [vmem:[%s11985_s3 + $0x3d8] sm:$0xff] %v4793_v40  ;;  %3741 = vmatprep.mubr.bf16.mxu0 %v12132_v14  ;;  %4353 = vmatprep.mubr.bf16.mxu1 %v12132_v14  ;;  %v1339_v0 = vunpack.c.h.s8.bf16 %v9286_v42  ;;  %v1341_v40 = vunpack.c.h.s8.bf16 %v9289_v27  ;;  %v9561_v14 = vld [vmem:[%s7382_s25 + $0x678] sm:$0xff]  ;;  %v12135_v42 = vld [vmem:[#allocation12_spill] sm:$0xff] }
 0x34a   : > { %v1614_v27 = vld [vmem:[%s11985_s3 + $0x500] sm:$0xff] }
 0x34b   : > { %v2795_v48 = vpop.f32.mrb[32].mxu0  ;;  %v3407_v5 = vpop.f32.mrb[32].mxu1 }
 0x34c   : > { %v4798_v52 = vadd.f32 %v2795_v48, %v1582_v62  ;;  %v4800_v57 = vadd.f32 %v3407_v5, %v1584_v32  ;;  %v2797_v13 = vpop.f32.mrb[33].mxu0  ;;  %v3409_v53 = vpop.f32.mrb[33].mxu1  ;;  %v9558_v32 = vld [vmem:[%s7382_s25 + $0x668] sm:$0xff]  ;;  %v1338_v48 = vunpack.c.h.s8.bf16 %v9524_v38  ;;  %v1340_v5 = vunpack.c.h.s8.bf16 %v9527_v41 }
 0x34d   : > { %v4799_v21 = vadd.f32 %v2797_v13, %v1583_v60  ;;  %v4801_v39 = vadd.f32 %v3409_v53, %v1585_v43  ;;  %v2799_v17 = vpop.f32.mrb[34].mxu0  ;;  %v3411_v1 = vpop.f32.mrb[34].mxu1  ;;  %v1616_v60 = vld [vmem:[%s11985_s3 + $0x510] sm:$0xff]  ;;  %v1615_v43 = vld [vmem:[%s11985_s3 + $0x508] sm:$0xff] }
 0x34e   : > { %4990 = vst [vmem:[%s11985_s3 + $0x400] sm:$0xff] %v4798_v52  ;;  %4992 = vst [vmem:[%s11985_s3 + $0x410] sm:$0xff] %v4800_v57  ;;  %v4806_v45 = vadd.f32 %v2799_v17, %v1590_v54  ;;  %v4808_v11 = vadd.f32 %v3411_v1, %v1592_v36  ;;  %v2801_v18 = vpop.f32.mrb[35].mxu0  ;;  %v3413_v9 = vpop.f32.mrb[35].mxu1  ;;  %v1617_v54 = vld [vmem:[%s11985_s3 + $0x518] sm:$0xff]  ;;  %v1347_v36 = vunpack.c.l.s8.bf16 %v9558_v32  ;;  %v1349_v52 = vunpack.c.l.s8.bf16 %v9561_v14  ;;  %v9594_v57 = vld [vmem:[%s7382_s25 + $0x660] sm:$0xff] }
 0x34f   : > { %4991 = vst [vmem:[%s11985_s3 + $0x408] sm:$0xff] %v4799_v21  ;;  %4993 = vst [vmem:[%s11985_s3 + $0x418] sm:$0xff] %v4801_v39  ;;  %v4807_v10 = vadd.f32 %v2801_v18, %v1591_v59  ;;  %v4809_v4 = vadd.f32 %v3413_v9, %v1593_v50  ;;  %v9597_v13 = vld [vmem:[%s7382_s25 + $0x670] sm:$0xff]  ;;  %v1622_v50 = vld [vmem:[%s11985_s3 + $0x540] sm:$0xff] }
 0x350   : > { %4998 = vst [vmem:[%s11985_s3 + $0x440] sm:$0xff] %v4806_v45  ;;  %5000 = vst [vmem:[%s11985_s3 + $0x450] sm:$0xff] %v4808_v11  ;;  %3742 = vmatmul.mubr.bf16.gmra.mrb[92].mxu0 %v12133_v25  ;;  %4354 = vmatmul.mubr.bf16.gmra.mrb[92].mxu1 %v12133_v25  ;;  %v1624_v21 = vld [vmem:[%s11985_s3 + $0x550] sm:$0xff]  ;;  %v12136_v39 = vld [vmem:[#allocation13_spill] sm:$0xff] }
 0x351   : > { %4999 = vst [vmem:[%s11985_s3 + $0x448] sm:$0xff] %v4807_v10  ;;  %5001 = vst [vmem:[%s11985_s3 + $0x458] sm:$0xff] %v4809_v4  ;;  %3784 = vmatprep.mubr.bf16.mxu0 %v12134_v37  ;;  %4396 = vmatprep.mubr.bf16.mxu1 %v12134_v37  ;;  %v1623_v18 = vld [vmem:[%s11985_s3 + $0x548] sm:$0xff]  ;;  %v1625_v9 = vld [vmem:[%s11985_s3 + $0x558] sm:$0xff] }
 0x353   : > { %v2805_v46 = vpop.f32.mrb[36].mxu0  ;;  %v3417_v12 = vpop.f32.mrb[36].mxu1 }
 0x354   : > { %v4814_v51 = vadd.f32 %v2805_v46, %v1598_v26  ;;  %v4816_v47 = vadd.f32 %v3417_v12, %v1600_v30  ;;  %v2807_v28 = vpop.f32.mrb[37].mxu0  ;;  %v3419_v33 = vpop.f32.mrb[37].mxu1  ;;  %v1346_v30 = vunpack.c.l.s8.bf16 %v9594_v57 }
 0x355   : > { %v4815_v63 = vadd.f32 %v2807_v28, %v1599_v31  ;;  %v4817_v34 = vadd.f32 %v3419_v33, %v1601_v24  ;;  %v2809_v29 = vpop.f32.mrb[38].mxu0  ;;  %v3421_v56 = vpop.f32.mrb[38].mxu1  ;;  %v1348_v31 = vunpack.c.l.s8.bf16 %v9597_v13  ;;  %v12137_v28 = vld [vmem:[#allocation14_spill] sm:$0xff] }
 0x356   : > { %5006 = vst [vmem:[%s11985_s3 + $0x480] sm:$0xff] %v4814_v51  ;;  %5008 = vst [vmem:[%s11985_s3 + $0x490] sm:$0xff] %v4816_v47  ;;  %v4822_v35 = vadd.f32 %v2809_v29, %v1606_v6  ;;  %v4824_v61 = vadd.f32 %v3421_v56, %v1608_v20  ;;  %v2811_v16 = vpop.f32.mrb[39].mxu0  ;;  %v3423_v8 = vpop.f32.mrb[39].mxu1  ;;  %v1355_v6 = vunpack.c.h.s8.bf16 %v9558_v32  ;;  %v1357_v20 = vunpack.c.h.s8.bf16 %v9561_v14  ;;  %v9630_v51 = vld [vmem:[%s7382_s25 + $0x6a8] sm:$0xff]  ;;  %v9633_v47 = vld [vmem:[%s7382_s25 + $0x6b8] sm:$0xff] }
 0x357   : > { %5007 = vst [vmem:[%s11985_s3 + $0x488] sm:$0xff] %v4815_v63  ;;  %5009 = vst [vmem:[%s11985_s3 + $0x498] sm:$0xff] %v4817_v34  ;;  %v4823_v3 = vadd.f32 %v2811_v16, %v1607_v15  ;;  %v4825_v62 = vadd.f32 %v3423_v8, %v1609_v22  ;;  %v1630_v33 = vld [vmem:[%s11985_s3 + $0x580] sm:$0xff]  ;;  %v1632_v15 = vld [vmem:[%s11985_s3 + $0x590] sm:$0xff]  ;;  %v1354_v22 = vunpack.c.h.s8.bf16 %v9594_v57  ;;  %v1356_v63 = vunpack.c.h.s8.bf16 %v9597_v13 }
 0x358   : > { %5014 = vst [vmem:[%s11985_s3 + $0x4c0] sm:$0xff] %v4822_v35  ;;  %5016 = vst [vmem:[%s11985_s3 + $0x4d0] sm:$0xff] %v4824_v61  ;;  %3785 = vmatmul.mubr.bf16.vlgmr.msra.gmra.mrb[48].mxu0 %v12135_v42  ;;  %4397 = vmatmul.mubr.bf16.vlgmr.msra.gmra.mrb[48].mxu1 %v12135_v42  ;;  %v1631_v34 = vld [vmem:[%s11985_s3 + $0x588] sm:$0xff]  ;;  %v1633_v29 = vld [vmem:[%s11985_s3 + $0x598] sm:$0xff]  ;;  %v1365_v35 = vunpack.c.l.s8.bf16 %v9633_v47 }
 0x359   : > { %5015 = vst [vmem:[%s11985_s3 + $0x4c8] sm:$0xff] %v4823_v3  ;;  %5017 = vst [vmem:[%s11985_s3 + $0x4d8] sm:$0xff] %v4825_v62  ;;  %3906 = vmatpush1.bf16.msra.mxu0 %v1330_v19  ;;  %4518 = vmatpush1.bf16.msra.mxu1 %v1332_v2  ;;  %v1638_v56 = vld [vmem:[%s11985_s3 + $0x5c0] sm:$0xff]  ;;  %v12138_v19 = vld [vmem:[#allocation15_spill] sm:$0xff]  ;;  %v1363_v2 = vunpack.c.l.s8.bf16 %v9630_v51 }
 0x35a   : > { %3907 = vmatprep.subr.bf16.mxu0 %v1339_v0  ;;  %4519 = vmatprep.subr.bf16.mxu1 %v1341_v40  ;;  %v1640_v8 = vld [vmem:[%s11985_s3 + $0x5d0] sm:$0xff]  ;;  %v898_v0 = vld [vmem:[%s7382_s25 + $0x6a0] sm:$0xff]  ;;  %v1639_v42 = vld [vmem:[%s11985_s3 + $0x5c8] sm:$0xff] }
 0x35b   : > { %v2815_v53 = vpop.f32.mrb[40].mxu0  ;;  %v3427_v59 = vpop.f32.mrb[40].mxu1  ;;  %3794 = vmatprep.mubr.bf16.mxu0 %v12136_v39  ;;  %4406 = vmatprep.mubr.bf16.mxu1 %v12136_v39  ;;  %v900_v40 = vld [vmem:[%s7382_s25 + $0x6b0] sm:$0xff]  ;;  %v1362_v13 = vunpack.c.l.s8.bf16 %v898_v0  ;;  %v1373_v39 = vunpack.c.h.s8.bf16 %v9633_v47 }
 0x35c   : > { %v4830_v17 = vadd.f32 %v2815_v53, %v1614_v27  ;;  %v4832_v1 = vadd.f32 %v3427_v59, %v1616_v60  ;;  %v2817_v45 = vpop.f32.mrb[41].mxu0  ;;  %v3429_v11 = vpop.f32.mrb[41].mxu1  ;;  %v1641_v27 = vld [vmem:[%s11985_s3 + $0x5d8] sm:$0xff]  ;;  %v1364_v53 = vunpack.c.l.s8.bf16 %v900_v40 }
 0x35d   : > { %v4831_v10 = vadd.f32 %v2817_v45, %v1615_v43  ;;  %v4833_v4 = vadd.f32 %v3429_v11, %v1617_v54  ;;  %v2819_v25 = vpop.f32.mrb[42].mxu0  ;;  %v3431_v26 = vpop.f32.mrb[42].mxu1  ;;  %3908 = vmatpush1.bf16.msra.mxu0 %v1338_v48  ;;  %4520 = vmatpush1.bf16.msra.mxu1 %v1340_v5  ;;  %v909_v45 = vld [vmem:[%s7382_s25 + $0x6f8] sm:$0xff] }
 0x35e   : > { %5022 = vst [vmem:[%s11985_s3 + $0x500] sm:$0xff] %v4830_v17  ;;  %5024 = vst [vmem:[%s11985_s3 + $0x510] sm:$0xff] %v4832_v1  ;;  %v4838_v37 = vadd.f32 %v2819_v25, %v1622_v50  ;;  %v4840_v24 = vadd.f32 %v3431_v26, %v1624_v21  ;;  %v2821_v38 = vpop.f32.mrb[43].mxu0  ;;  %v3433_v41 = vpop.f32.mrb[43].mxu1  ;;  %3909 = vmatprep.subr.bf16.mxu0 %v1347_v36  ;;  %4521 = vmatprep.subr.bf16.mxu1 %v1349_v52  ;;  %v1371_v21 = vunpack.c.h.s8.bf16 %v9630_v51  ;;  %v12139_v17 = vld [vmem:[#allocation16_spill] sm:$0xff]  ;;  %v907_v1 = vld [vmem:[%s7382_s25 + $0x6e8] sm:$0xff] }
 0x35f   : > { %5023 = vst [vmem:[%s11985_s3 + $0x508] sm:$0xff] %v4831_v10  ;;  %5025 = vst [vmem:[%s11985_s3 + $0x518] sm:$0xff] %v4833_v4  ;;  %v4839_v46 = vadd.f32 %v2821_v38, %v1623_v18  ;;  %v4841_v12 = vadd.f32 %v3433_v41, %v1625_v9  ;;  %v12140_v11 = vld [vmem:[#allocation17_spill] sm:$0xff]  ;;  %v1370_v18 = vunpack.c.h.s8.bf16 %v898_v0  ;;  %v1372_v9 = vunpack.c.h.s8.bf16 %v900_v40  ;;  %v906_v25 = vld [vmem:[%s7382_s25 + $0x6e0] sm:$0xff] }
 0x360   : > { %5030 = vst [vmem:[%s11985_s3 + $0x540] sm:$0xff] %v4838_v37  ;;  %5032 = vst [vmem:[%s11985_s3 + $0x550] sm:$0xff] %v4840_v24  ;;  %3795 = vmatmul.mubr.bf16.gmra.mrb[52].mxu0 %v12137_v28  ;;  %4407 = vmatmul.mubr.bf16.gmra.mrb[52].mxu1 %v12137_v28  ;;  %v1379_v10 = vunpack.c.l.s8.bf16 %v907_v1  ;;  %v1381_v4 = vunpack.c.l.s8.bf16 %v909_v45  ;;  %v908_v26 = vld [vmem:[%s7382_s25 + $0x6f0] sm:$0xff]  ;;  %v1387_v37 = vunpack.c.h.s8.bf16 %v907_v1  ;;  %v1389_v24 = vunpack.c.h.s8.bf16 %v909_v45  ;;  %v12141_v38 = vld [vmem:[#allocation18_spill] sm:$0xff] }
 0x361   : > { %5031 = vst [vmem:[%s11985_s3 + $0x548] sm:$0xff] %v4839_v46  ;;  %5033 = vst [vmem:[%s11985_s3 + $0x558] sm:$0xff] %v4841_v12  ;;  %3910 = vmatpush1.bf16.msra.mxu0 %v1346_v30  ;;  %4522 = vmatpush1.bf16.msra.mxu1 %v1348_v31  ;;  %v1378_v30 = vunpack.c.l.s8.bf16 %v906_v25  ;;  %v1380_v31 = vunpack.c.l.s8.bf16 %v908_v26  ;;  %v915_v41 = vld [vmem:[%s7382_s25 + $0x728] sm:$0xff]  ;;  %v917_v46 = vld [vmem:[%s7382_s25 + $0x738] sm:$0xff] }
 0x362   : > { %3804 = vmatprep.mubr.bf16.mxu0 %v12138_v19  ;;  %4416 = vmatprep.mubr.bf16.mxu1 %v12138_v19  ;;  %v12142_v12 = vld [vmem:[#allocation19_spill] sm:$0xff]  ;;  %v1395_v51 = vunpack.c.l.s8.bf16 %v915_v41  ;;  %v1397_v47 = vunpack.c.l.s8.bf16 %v917_v46  ;;  %v914_v28 = vld [vmem:[%s7382_s25 + $0x720] sm:$0xff]  ;;  %v925_v19 = vld [vmem:[%s7382_s25 + $0x778] sm:$0xff] }
 0x363   : > { %v2825_v61 = vpop.f32.mrb[44].mxu0  ;;  %v3437_v16 = vpop.f32.mrb[44].mxu1  ;;  %3911 = vmatprep.subr.bf16.mxu0 %v1355_v6  ;;  %4523 = vmatprep.subr.bf16.mxu1 %v1357_v20  ;;  %v1386_v6 = vunpack.c.h.s8.bf16 %v906_v25  ;;  %v1388_v20 = vunpack.c.h.s8.bf16 %v908_v26  ;;  %v922_v0 = vld [vmem:[%s7382_s25 + $0x760] sm:$0xff]  ;;  %v924_v40 = vld [vmem:[%s7382_s25 + $0x770] sm:$0xff]  ;;  %v12148_v1 = vld [vmem:[#allocation25_spill] sm:$0xff] }
 0x364   : > { %v4846_v3 = vadd.f32 %v2825_v61, %v1630_v33  ;;  %v4848_v62 = vadd.f32 %v3437_v16, %v1632_v15  ;;  %v2827_v32 = vpop.f32.mrb[45].mxu0  ;;  %v3439_v14 = vpop.f32.mrb[45].mxu1  ;;  %v916_v33 = vld [vmem:[%s7382_s25 + $0x730] sm:$0xff]  ;;  %v1394_v15 = vunpack.c.l.s8.bf16 %v914_v28 }
 0x365   : > { %v4847_v60 = vadd.f32 %v2827_v32, %v1631_v34  ;;  %v4849_v43 = vadd.f32 %v3439_v14, %v1633_v29  ;;  %v2829_v48 = vpop.f32.mrb[46].mxu0  ;;  %v3441_v5 = vpop.f32.mrb[46].mxu1  ;;  %3912 = vmatpush1.bf16.msra.mxu0 %v1354_v22  ;;  %4524 = vmatpush1.bf16.msra.mxu1 %v1356_v63  ;;  %v1396_v22 = vunpack.c.l.s8.bf16 %v916_v33  ;;  %v1403_v63 = vunpack.c.h.s8.bf16 %v915_v41  ;;  %v12143_v29 = vld [vmem:[#allocation20_spill] sm:$0xff] }
 0x366   : > { %5038 = vst [vmem:[%s11985_s3 + $0x580] sm:$0xff] %v4846_v3  ;;  %5040 = vst [vmem:[%s11985_s3 + $0x590] sm:$0xff] %v4848_v62  ;;  %v4854_v54 = vadd.f32 %v2829_v48, %v1638_v56  ;;  %v4856_v36 = vadd.f32 %v3441_v5, %v1640_v8  ;;  %v2831_v52 = vpop.f32.mrb[47].mxu0  ;;  %v3443_v57 = vpop.f32.mrb[47].mxu1  ;;  %3913 = vmatprep.subr.bf16.mxu0 %v1363_v2  ;;  %4525 = vmatprep.subr.bf16.mxu1 %v1365_v35  ;;  %v1405_v34 = vunpack.c.h.s8.bf16 %v917_v46  ;;  %v923_v56 = vld [vmem:[%s7382_s25 + $0x768] sm:$0xff]  ;;  %v12144_v2 = vld [vmem:[#allocation21_spill] sm:$0xff] }
 0x367   : > { %5039 = vst [vmem:[%s11985_s3 + $0x588] sm:$0xff] %v4847_v60  ;;  %5041 = vst [vmem:[%s11985_s3 + $0x598] sm:$0xff] %v4849_v43  ;;  %v4855_v59 = vadd.f32 %v2831_v52, %v1639_v42  ;;  %v4857_v50 = vadd.f32 %v3443_v57, %v1641_v27  ;;  %v1402_v35 = vunpack.c.h.s8.bf16 %v914_v28  ;;  %v1404_v61 = vunpack.c.h.s8.bf16 %v916_v33  ;;  %v12145_v42 = vld [vmem:[#allocation22_spill] sm:$0xff]  ;;  %v931_v27 = vld [vmem:[%s7382_s25 + $0x7a8] sm:$0xff] }
 0x368   : > { %5046 = vst [vmem:[%s11985_s3 + $0x5c0] sm:$0xff] %v4854_v54  ;;  %5048 = vst [vmem:[%s11985_s3 + $0x5d0] sm:$0xff] %v4856_v36  ;;  %3805 = vmatmul.mubr.bf16.gmra.mrb[56].mxu0 %v12139_v17  ;;  %4417 = vmatmul.mubr.bf16.gmra.mrb[56].mxu1 %v12139_v17  ;;  %v1411_v16 = vunpack.c.l.s8.bf16 %v923_v56  ;;  %v1413_v8 = vunpack.c.l.s8.bf16 %v925_v19  ;;  %v1410_v3 = vunpack.c.l.s8.bf16 %v922_v0  ;;  %v1412_v62 = vunpack.c.l.s8.bf16 %v924_v40  ;;  %v933_v60 = vld [vmem:[%s7382_s25 + $0x7b8] sm:$0xff]  ;;  %v12146_v43 = vld [vmem:[#allocation23_spill] sm:$0xff] }
 0x369   : > { %5047 = vst [vmem:[%s11985_s3 + $0x5c8] sm:$0xff] %v4855_v59  ;;  %5049 = vst [vmem:[%s11985_s3 + $0x5d8] sm:$0xff] %v4857_v50  ;;  %3814 = vmatprep.mubr.bf16.mxu0 %v12140_v11  ;;  %4426 = vmatprep.mubr.bf16.mxu1 %v12140_v11  ;;  %v1419_v32 = vunpack.c.h.s8.bf16 %v923_v56  ;;  %v1421_v14 = vunpack.c.h.s8.bf16 %v925_v19  ;;  %v1418_v48 = vunpack.c.h.s8.bf16 %v922_v0  ;;  %v1420_v5 = vunpack.c.h.s8.bf16 %v924_v40  ;;  %v930_v52 = vld [vmem:[%s7382_s25 + $0x7a0] sm:$0xff]  ;;  %v932_v57 = vld [vmem:[%s7382_s25 + $0x7b0] sm:$0xff] }
 0x36a   : > { %3914 = vmatpush1.bf16.msra.mxu0 %v1362_v13  ;;  %4526 = vmatpush1.bf16.msra.mxu1 %v1364_v53  ;;  %v1427_v54 = vunpack.c.l.s8.bf16 %v931_v27  ;;  %v1429_v36 = vunpack.c.l.s8.bf16 %v933_v60  ;;  %v1426_v13 = vunpack.c.l.s8.bf16 %v930_v52  ;;  %v1428_v53 = vunpack.c.l.s8.bf16 %v932_v57  ;;  %v941_v17 = vld [vmem:[%s7382_s25 + $0x7f8] sm:$0xff]  ;;  %v12151_v46 = vld [vmem:[#allocation28_spill] sm:$0xff]  ;;  %v12157_v28 = vld [vmem:[#allocation34_spill] sm:$0xff] }
 0x36b   : > { %3915 = vmatprep.subr.bf16.mxu0 %v1371_v21  ;;  %4527 = vmatprep.subr.bf16.mxu1 %v1373_v39  ;;  %v1435_v59 = vunpack.c.h.s8.bf16 %v931_v27  ;;  %v1437_v50 = vunpack.c.h.s8.bf16 %v933_v60  ;;  %v12147_v21 = vld [vmem:[#allocation24_spill] sm:$0xff]  ;;  %v939_v39 = vld [vmem:[%s7382_s25 + $0x7e8] sm:$0xff]  ;;  %v1434_v45 = vunpack.c.h.s8.bf16 %v930_v52  ;;  %v1436_v11 = vunpack.c.h.s8.bf16 %v932_v57  ;;  %v12164_v56 = vld [vmem:[#allocation41_spill] sm:$0xff] }
 0x36c   : > { %v12158_v33 = vld [vmem:[#allocation35_spill] sm:$0xff]  ;;  %v12165_v19 = vld [vmem:[#allocation42_spill] sm:$0xff]  ;;  %v12171_v0 = vld [vmem:[#allocation48_spill] sm:$0xff] }
 0x36d   : > { %v1459_v40 = vld [vmem:[%s11985_s3 + $0x28] sm:$0xff] }
 0x36e   : > { %3916 = vmatpush1.bf16.msra.mxu0 %v1370_v18  ;;  %4528 = vmatpush1.bf16.msra.mxu1 %v1372_v9  ;;  %v1443_v18 = vunpack.c.l.s8.bf16 %v939_v39  ;;  %v1445_v9 = vunpack.c.l.s8.bf16 %v941_v17 }
 0x36f   : > { %3917 = vmatprep.subr.bf16.mxu0 %v1379_v10  ;;  %4529 = vmatprep.subr.bf16.mxu1 %v1381_v4  ;;  %v938_v10 = vld [vmem:[%s7382_s25 + $0x7e0] sm:$0xff]  ;;  %v940_v4 = vld [vmem:[%s7382_s25 + $0x7f0] sm:$0xff] }
 0x370   : > { %3815 = vmatmul.mubr.bf16.gmra.mrb[60].mxu0 %v12141_v38  ;;  %4427 = vmatmul.mubr.bf16.gmra.mrb[60].mxu1 %v12141_v38  ;;  %v1442_v25 = vunpack.c.l.s8.bf16 %v938_v10  ;;  %v1444_v26 = vunpack.c.l.s8.bf16 %v940_v4  ;;  %v1450_v38 = vunpack.c.h.s8.bf16 %v938_v10  ;;  %v1452_v41 = vunpack.c.h.s8.bf16 %v940_v4  ;;  %v1482_v4 = vld [vmem:[%s11985_s3 + $0xe0] sm:$0xff] }
 0x371   : > { %3824 = vmatprep.mubr.bf16.mxu0 %v12142_v12  ;;  %4436 = vmatprep.mubr.bf16.mxu1 %v12142_v12  ;;  %v12152_v12 = vld [vmem:[#allocation29_spill] sm:$0xff] }
 0x372   : > { %3918 = vmatpush1.bf16.msra.mxu0 %v1378_v30  ;;  %4530 = vmatpush1.bf16.msra.mxu1 %v1380_v31  ;;  %v1451_v30 = vunpack.c.h.s8.bf16 %v939_v39  ;;  %v1453_v31 = vunpack.c.h.s8.bf16 %v941_v17 }
 0x373   : > { %3919 = vmatprep.subr.bf16.mxu0 %v1387_v37  ;;  %4531 = vmatprep.subr.bf16.mxu1 %v1389_v24  ;;  %v12149_v37 = vld [vmem:[#allocation26_spill] sm:$0xff]  ;;  %v12150_v24 = vld [vmem:[#allocation27_spill] sm:$0xff] }
 0x376   : > { %3920 = vmatpush1.bf16.msra.mxu0 %v1386_v6  ;;  %4532 = vmatpush1.bf16.msra.mxu1 %v1388_v20  ;;  %v12153_v6 = vld [vmem:[#allocation30_spill] sm:$0xff]  ;;  %v12154_v20 = vld [vmem:[#allocation31_spill] sm:$0xff] }
 0x377   : > { %3921 = vmatprep.subr.bf16.mxu0 %v1395_v51  ;;  %4533 = vmatprep.subr.bf16.mxu1 %v1397_v47  ;;  %v12155_v51 = vld [vmem:[#allocation32_spill] sm:$0xff]  ;;  %v12156_v47 = vld [vmem:[#allocation33_spill] sm:$0xff] }
 0x378   : > { %3825 = vmatmul.mubr.bf16.gmra.mrb[64].mxu0 %v12143_v29  ;;  %4437 = vmatmul.mubr.bf16.gmra.mrb[64].mxu1 %v12143_v29  ;;  %v12163_v29 = vld [vmem:[#allocation40_spill] sm:$0xff] }
 0x379   : > { %3834 = vmatprep.mubr.bf16.mxu0 %v12144_v2  ;;  %4446 = vmatprep.mubr.bf16.mxu1 %v12144_v2  ;;  %v12166_v2 = vld [vmem:[#allocation43_spill] sm:$0xff] }
 0x37a   : > { %3922 = vmatpush1.bf16.msra.mxu0 %v1394_v15  ;;  %4534 = vmatpush1.bf16.msra.mxu1 %v1396_v22  ;;  %v12159_v15 = vld [vmem:[#allocation36_spill] sm:$0xff]  ;;  %v12160_v22 = vld [vmem:[#allocation37_spill] sm:$0xff] }
 0x37b   : > { %3923 = vmatprep.subr.bf16.mxu0 %v1403_v63  ;;  %4535 = vmatprep.subr.bf16.mxu1 %v1405_v34  ;;  %v12161_v63 = vld [vmem:[#allocation38_spill] sm:$0xff]  ;;  %v12162_v34 = vld [vmem:[#allocation39_spill] sm:$0xff] }
 0x37e   : > { %3924 = vmatpush1.bf16.msra.mxu0 %v1402_v35  ;;  %4536 = vmatpush1.bf16.msra.mxu1 %v1404_v61  ;;  %v12167_v35 = vld [vmem:[#allocation44_spill] sm:$0xff]  ;;  %v12168_v61 = vld [vmem:[#allocation45_spill] sm:$0xff] }
 0x37f   : > { %3925 = vmatprep.subr.bf16.mxu0 %v1411_v16  ;;  %4537 = vmatprep.subr.bf16.mxu1 %v1413_v8  ;;  %v12169_v16 = vld [vmem:[#allocation46_spill] sm:$0xff]  ;;  %v12170_v8 = vld [vmem:[#allocation47_spill] sm:$0xff] }
 0x380   : > { %3835 = vmatmul.mubr.bf16.gmra.mrb[68].mxu0 %v12145_v42  ;;  %4447 = vmatmul.mubr.bf16.gmra.mrb[68].mxu1 %v12145_v42  ;;  %v1468_v42 = vld [vmem:[%s11985_s3 + $0x70] sm:$0xff] }
 0x381   : > { %3844 = vmatprep.mubr.bf16.mxu0 %v12146_v43  ;;  %4456 = vmatprep.mubr.bf16.mxu1 %v12146_v43 }
 0x382   : > { %3926 = vmatpush1.bf16.msra.mxu0 %v1410_v3  ;;  %4538 = vmatpush1.bf16.msra.mxu1 %v1412_v62  ;;  %v1461_v3 = vld [vmem:[%s11985_s3 + $0x38] sm:$0xff] }
 0x383   : > { %3927 = vmatprep.subr.bf16.mxu0 %v1419_v32  ;;  %4539 = vmatprep.subr.bf16.mxu1 %v1421_v14  ;;  %v1466_v14 = vld [vmem:[%s11985_s3 + $0x60] sm:$0xff] }
 0x386   : > { %3928 = vmatpush1.bf16.msra.mxu0 %v1418_v48  ;;  %4540 = vmatpush1.bf16.msra.mxu1 %v1420_v5  ;;  %v1467_v5 = vld [vmem:[%s11985_s3 + $0x68] sm:$0xff] }
 0x387   : > { %3929 = vmatprep.subr.bf16.mxu0 %v1427_v54  ;;  %4541 = vmatprep.subr.bf16.mxu1 %v1429_v36  ;;  %v1469_v54 = vld [vmem:[%s11985_s3 + $0x78] sm:$0xff] }
 0x388   : > { %3845 = vmatmul.mubr.bf16.gmra.mrb[72].mxu0 %v12147_v21  ;;  %4457 = vmatmul.mubr.bf16.gmra.mrb[72].mxu1 %v12147_v21 }
 0x389   : > { %3854 = vmatprep.mubr.bf16.mxu0 %v12148_v1  ;;  %4466 = vmatprep.mubr.bf16.mxu1 %v12148_v1  ;;  %v1474_v1 = vld [vmem:[%s11985_s3 + $0xa0] sm:$0xff] }
 0x38a   : > { %3930 = vmatpush1.bf16.msra.mxu0 %v1426_v13  ;;  %4542 = vmatpush1.bf16.msra.mxu1 %v1428_v53 }
 0x38b   : > { %3931 = vmatprep.subr.bf16.mxu0 %v1435_v59  ;;  %4543 = vmatprep.subr.bf16.mxu1 %v1437_v50 }
 0x38e   : > { %3932 = vmatpush1.bf16.msra.mxu0 %v1434_v45  ;;  %4544 = vmatpush1.bf16.msra.mxu1 %v1436_v11  ;;  %v1476_v45 = vld [vmem:[%s11985_s3 + $0xb0] sm:$0xff]  ;;  %v1475_v11 = vld [vmem:[%s11985_s3 + $0xa8] sm:$0xff] }
 0x38f   : > { %3933 = vmatprep.subr.bf16.mxu0 %v1443_v18  ;;  %4545 = vmatprep.subr.bf16.mxu1 %v1445_v9  ;;  %v1477_v18 = vld [vmem:[%s11985_s3 + $0xb8] sm:$0xff] }
 0x390   : > { %3855 = vmatmul.mubr.bf16.gmra.mrb[76].mxu0 %v12149_v37  ;;  %4467 = vmatmul.mubr.bf16.gmra.mrb[76].mxu1 %v12149_v37 }
 0x391   : > { %3864 = vmatprep.mubr.bf16.mxu0 %v12150_v24  ;;  %4476 = vmatprep.mubr.bf16.mxu1 %v12150_v24  ;;  %v1483_v24 = vld [vmem:[%s11985_s3 + $0xe8] sm:$0xff] }
 0x392   : > { %3934 = vmatpush1.bf16.msra.mxu0 %v1442_v25  ;;  %4546 = vmatpush1.bf16.msra.mxu1 %v1444_v26  ;;  %v1484_v25 = vld [vmem:[%s11985_s3 + $0xf0] sm:$0xff] }
 0x393   : > { %3935 = vmatprep.subr.bf16.mxu0 %v1451_v30  ;;  %4547 = vmatprep.subr.bf16.mxu1 %v1453_v31 }
 0x396   : > { %3936 = vmatpush1.bf16.msra.mxu0 %v1450_v38  ;;  %4548 = vmatpush1.bf16.msra.mxu1 %v1452_v41  ;;  %v1485_v38 = vld [vmem:[%s11985_s3 + $0xf8] sm:$0xff] }
 0x398   : > { %3865 = vmatmul.mubr.bf16.gmra.mrb[80].mxu0 %v12151_v46  ;;  %4477 = vmatmul.mubr.bf16.gmra.mrb[80].mxu1 %v12151_v46 }
 0x399   : > { %3874 = vmatprep.mubr.bf16.mxu0 %v12152_v12  ;;  %4486 = vmatprep.mubr.bf16.mxu1 %v12152_v12 }
 0x3a0   : > { %3875 = vmatmul.mubr.bf16.gmra.mrb[84].mxu0 %v12153_v6  ;;  %4487 = vmatmul.mubr.bf16.gmra.mrb[84].mxu1 %v12153_v6 }
 0x3a1   : > { %3884 = vmatprep.mubr.bf16.mxu0 %v12154_v20  ;;  %4496 = vmatprep.mubr.bf16.mxu1 %v12154_v20 }
 0x3a8   : > { %3885 = vmatmul.mubr.bf16.gmra.mrb[88].mxu0 %v12155_v51  ;;  %4497 = vmatmul.mubr.bf16.gmra.mrb[88].mxu1 %v12155_v51 }
 0x3a9   : > { %3894 = vmatprep.mubr.bf16.mxu0 %v12156_v47  ;;  %4506 = vmatprep.mubr.bf16.mxu1 %v12156_v47 }
 0x3b0   : > { %3895 = vmatmul.mubr.bf16.gmra.mrb[92].mxu0 %v12157_v28  ;;  %4507 = vmatmul.mubr.bf16.gmra.mrb[92].mxu1 %v12157_v28 }
 0x3b1   : > { %3937 = vmatprep.mubr.bf16.mxu0 %v12158_v33  ;;  %4549 = vmatprep.mubr.bf16.mxu1 %v12158_v33 }
 0x3b8   : > { %3938 = vmatmul.mubr.bf16.vlgmr.msra.gmra.mrb[48].mxu0 %v12159_v15  ;;  %4550 = vmatmul.mubr.bf16.vlgmr.msra.gmra.mrb[48].mxu1 %v12159_v15 }
 0x3b9   : > { %3947 = vmatprep.mubr.bf16.mxu0 %v12160_v22  ;;  %4559 = vmatprep.mubr.bf16.mxu1 %v12160_v22  ;;  %v1490_v22 = vld [vmem:[%s11985_s3 + $0x120] sm:$0xff] }
 0x3c0   : > { %3948 = vmatmul.mubr.bf16.gmra.mrb[52].mxu0 %v12161_v63  ;;  %4560 = vmatmul.mubr.bf16.gmra.mrb[52].mxu1 %v12161_v63  ;;  %v1492_v63 = vld [vmem:[%s11985_s3 + $0x130] sm:$0xff] }
 0x3c1   : > { %3957 = vmatprep.mubr.bf16.mxu0 %v12162_v34  ;;  %4569 = vmatprep.mubr.bf16.mxu1 %v12162_v34  ;;  %v1491_v34 = vld [vmem:[%s11985_s3 + $0x128] sm:$0xff] }
 0x3c8   : > { %3958 = vmatmul.mubr.bf16.gmra.mrb[56].mxu0 %v12163_v29  ;;  %4570 = vmatmul.mubr.bf16.gmra.mrb[56].mxu1 %v12163_v29  ;;  %v1493_v29 = vld [vmem:[%s11985_s3 + $0x138] sm:$0xff] }
 0x3c9   : > { %3967 = vmatprep.mubr.bf16.mxu0 %v12164_v56  ;;  %4579 = vmatprep.mubr.bf16.mxu1 %v12164_v56 }
 0x3d0   : > { %3968 = vmatmul.mubr.bf16.gmra.mrb[60].mxu0 %v12165_v19  ;;  %4580 = vmatmul.mubr.bf16.gmra.mrb[60].mxu1 %v12165_v19 }
 0x3d1   : > { %3977 = vmatprep.mubr.bf16.mxu0 %v12166_v2  ;;  %4589 = vmatprep.mubr.bf16.mxu1 %v12166_v2  ;;  %v1498_v2 = vld [vmem:[%s11985_s3 + $0x160] sm:$0xff] }
 0x3d8   : > { %3978 = vmatmul.mubr.bf16.gmra.mrb[64].mxu0 %v12167_v35  ;;  %4590 = vmatmul.mubr.bf16.gmra.mrb[64].mxu1 %v12167_v35  ;;  %v1500_v35 = vld [vmem:[%s11985_s3 + $0x170] sm:$0xff] }
 0x3d9   : > { %3987 = vmatprep.mubr.bf16.mxu0 %v12168_v61  ;;  %4599 = vmatprep.mubr.bf16.mxu1 %v12168_v61 }
 0x3e0   : > { %3988 = vmatmul.mubr.bf16.gmra.mrb[68].mxu0 %v12169_v16  ;;  %4600 = vmatmul.mubr.bf16.gmra.mrb[68].mxu1 %v12169_v16 }
 0x3e1   : > { %3997 = vmatprep.mubr.bf16.mxu0 %v12170_v8  ;;  %4609 = vmatprep.mubr.bf16.mxu1 %v12170_v8 }
 0x3e8   : > { %3998 = vmatmul.mubr.bf16.gmra.mrb[72].mxu0 %v12171_v0  ;;  %4610 = vmatmul.mubr.bf16.gmra.mrb[72].mxu1 %v12171_v0 }
 0x3e9   : > { %4007 = vmatprep.mubr.bf16.mxu0 %v8775_v23  ;;  %4619 = vmatprep.mubr.bf16.mxu1 %v8775_v23  ;;  %v12172_v23 = vld [vmem:[#allocation49_spill] sm:$0xff] }
 0x3f0   : > { %4008 = vmatmul.mubr.bf16.gmra.mrb[76].mxu0 %v8787_v55  ;;  %4620 = vmatmul.mubr.bf16.gmra.mrb[76].mxu1 %v8787_v55  ;;  %v12173_v55 = vld [vmem:[#allocation50_spill] sm:$0xff] }
 0x3f1   : > { %4017 = vmatprep.mubr.bf16.mxu0 %v8789_v7  ;;  %4629 = vmatprep.mubr.bf16.mxu1 %v8789_v7  ;;  %v12174_v7 = vld [vmem:[#allocation51_spill] sm:$0xff] }
 0x3f8   : > { %4018 = vmatmul.mubr.bf16.gmra.mrb[80].mxu0 %v8799_v58  ;;  %4630 = vmatmul.mubr.bf16.gmra.mrb[80].mxu1 %v8799_v58  ;;  %v12175_v58 = vld [vmem:[#allocation52_spill] sm:$0xff] }
 0x3f9   : > { %4027 = vmatprep.mubr.bf16.mxu0 %v8801_v44  ;;  %4639 = vmatprep.mubr.bf16.mxu1 %v8801_v44  ;;  %v1458_v44 = vld [vmem:[%s11985_s3 + $0x20] sm:$0xff] }
 0x400   : > { %4028 = vmatmul.mubr.bf16.gmra.mrb[84].mxu0 %v8809_v49  ;;  %4640 = vmatmul.mubr.bf16.gmra.mrb[84].mxu1 %v8809_v49  ;;  %v1460_v49 = vld [vmem:[%s11985_s3 + $0x30] sm:$0xff] }
 0x401   : > { %4037 = vmatprep.mubr.bf16.mxu0 %v12172_v23  ;;  %4649 = vmatprep.mubr.bf16.mxu1 %v12172_v23  ;;  %v1499_v23 = vld [vmem:[%s11985_s3 + $0x168] sm:$0xff] }
 0x408   : > { %4038 = vmatmul.mubr.bf16.gmra.mrb[88].mxu0 %v12173_v55  ;;  %4650 = vmatmul.mubr.bf16.gmra.mrb[88].mxu1 %v12173_v55  ;;  %v1501_v55 = vld [vmem:[%s11985_s3 + $0x178] sm:$0xff] }
 0x409   : > { %4047 = vmatprep.mubr.bf16.mxu0 %v12174_v7  ;;  %4659 = vmatprep.mubr.bf16.mxu1 %v12174_v7 }
 0x410   : > { %4048 = vmatmul.mubr.bf16.gmra.mrb[92].mxu0 %v12175_v58  ;;  %4660 = vmatmul.mubr.bf16.gmra.mrb[92].mxu1 %v12175_v58 }
 0x48b   : > { %v3939_v62 = vpop.f32.mrb[48].mxu0  ;;  %v4551_v32 = vpop.f32.mrb[48].mxu1 }
 0x48c   : > { %v4674_v27 = vadd.f32 %v3939_v62, %v1458_v44  ;;  %v4676_v60 = vadd.f32 %v4551_v32, %v1460_v49  ;;  %v3941_v43 = vpop.f32.mrb[49].mxu0  ;;  %v4553_v48 = vpop.f32.mrb[49].mxu1 }
 0x48d   : > { %v4675_v36 = vadd.f32 %v3941_v43, %v1459_v40  ;;  %v4677_v52 = vadd.f32 %v4553_v48, %v1461_v3  ;;  %v3943_v57 = vpop.f32.mrb[50].mxu0  ;;  %v4555_v13 = vpop.f32.mrb[50].mxu1  ;;  %v1507_v43 = vld [vmem:[%s11985_s3 + $0x1a8] sm:$0xff]  ;;  %v1509_v48 = vld [vmem:[%s11985_s3 + $0x1b8] sm:$0xff] }
 0x48e   : > { %4866 = vst [vmem:[%s11985_s3 + $0x20] sm:$0xff] %v4674_v27  ;;  %4868 = vst [vmem:[%s11985_s3 + $0x30] sm:$0xff] %v4676_v60  ;;  %v4682_v53 = vadd.f32 %v3943_v57, %v1466_v14  ;;  %v4684_v59 = vadd.f32 %v4555_v13, %v1468_v42  ;;  %v3945_v50 = vpop.f32.mrb[51].mxu0  ;;  %v4557_v21 = vpop.f32.mrb[51].mxu1  ;;  %v1506_v27 = vld [vmem:[%s11985_s3 + $0x1a0] sm:$0xff]  ;;  %v1508_v60 = vld [vmem:[%s11985_s3 + $0x1b0] sm:$0xff] }
 0x48f   : > { %4867 = vst [vmem:[%s11985_s3 + $0x28] sm:$0xff] %v4675_v36  ;;  %4869 = vst [vmem:[%s11985_s3 + $0x38] sm:$0xff] %v4677_v52  ;;  %v4683_v39 = vadd.f32 %v3945_v50, %v1467_v5  ;;  %v4685_v17 = vadd.f32 %v4557_v21, %v1469_v54  ;;  %v1514_v36 = vld [vmem:[%s11985_s3 + $0x1e0] sm:$0xff]  ;;  %v1516_v52 = vld [vmem:[%s11985_s3 + $0x1f0] sm:$0xff] }
 0x490   : > { %4874 = vst [vmem:[%s11985_s3 + $0x60] sm:$0xff] %v4682_v53  ;;  %4876 = vst [vmem:[%s11985_s3 + $0x70] sm:$0xff] %v4684_v59  ;;  %v1515_v50 = vld [vmem:[%s11985_s3 + $0x1e8] sm:$0xff]  ;;  %v1517_v21 = vld [vmem:[%s11985_s3 + $0x1f8] sm:$0xff] }
 0x491   : > { %4875 = vst [vmem:[%s11985_s3 + $0x68] sm:$0xff] %v4683_v39  ;;  %4877 = vst [vmem:[%s11985_s3 + $0x78] sm:$0xff] %v4685_v17 }
 0x493   : > { %v3949_v9 = vpop.f32.mrb[52].mxu0  ;;  %v4561_v10 = vpop.f32.mrb[52].mxu1 }
 0x494   : > { %v4690_v26 = vadd.f32 %v3949_v9, %v1474_v1  ;;  %v4692_v30 = vadd.f32 %v4561_v10, %v1476_v45  ;;  %v3951_v31 = vpop.f32.mrb[53].mxu0  ;;  %v4563_v37 = vpop.f32.mrb[53].mxu1 }
 0x495   : > { %v4691_v41 = vadd.f32 %v3951_v31, %v1475_v11  ;;  %v4693_v46 = vadd.f32 %v4563_v37, %v1477_v18  ;;  %v3953_v12 = vpop.f32.mrb[54].mxu0  ;;  %v4565_v6 = vpop.f32.mrb[54].mxu1  ;;  %v1523_v31 = vld [vmem:[%s11985_s3 + $0x228] sm:$0xff]  ;;  %v1525_v37 = vld [vmem:[%s11985_s3 + $0x238] sm:$0xff] }
 0x496   : > { %4882 = vst [vmem:[%s11985_s3 + $0xa0] sm:$0xff] %v4690_v26  ;;  %4884 = vst [vmem:[%s11985_s3 + $0xb0] sm:$0xff] %v4692_v30  ;;  %v4698_v20 = vadd.f32 %v3953_v12, %v1482_v4  ;;  %v4700_v51 = vadd.f32 %v4565_v6, %v1484_v25  ;;  %v3955_v47 = vpop.f32.mrb[55].mxu0  ;;  %v4567_v28 = vpop.f32.mrb[55].mxu1  ;;  %v1522_v26 = vld [vmem:[%s11985_s3 + $0x220] sm:$0xff]  ;;  %v1524_v30 = vld [vmem:[%s11985_s3 + $0x230] sm:$0xff] }
 0x497   : > { %4883 = vst [vmem:[%s11985_s3 + $0xa8] sm:$0xff] %v4691_v41  ;;  %4885 = vst [vmem:[%s11985_s3 + $0xb8] sm:$0xff] %v4693_v46  ;;  %v4699_v33 = vadd.f32 %v3955_v47, %v1483_v24  ;;  %v4701_v15 = vadd.f32 %v4567_v28, %v1485_v38  ;;  %v1530_v41 = vld [vmem:[%s11985_s3 + $0x260] sm:$0xff]  ;;  %v1532_v46 = vld [vmem:[%s11985_s3 + $0x270] sm:$0xff] }
 0x498   : > { %4890 = vst [vmem:[%s11985_s3 + $0xe0] sm:$0xff] %v4698_v20  ;;  %4892 = vst [vmem:[%s11985_s3 + $0xf0] sm:$0xff] %v4700_v51  ;;  %v1531_v47 = vld [vmem:[%s11985_s3 + $0x268] sm:$0xff]  ;;  %v1533_v28 = vld [vmem:[%s11985_s3 + $0x278] sm:$0xff] }
 0x499   : > { %4891 = vst [vmem:[%s11985_s3 + $0xe8] sm:$0xff] %v4699_v33  ;;  %4893 = vst [vmem:[%s11985_s3 + $0xf8] sm:$0xff] %v4701_v15 }
 0x49b   : > { %v3959_v56 = vpop.f32.mrb[56].mxu0  ;;  %v4571_v19 = vpop.f32.mrb[56].mxu1 }
 0x49c   : > { %v4706_v61 = vadd.f32 %v3959_v56, %v1490_v22  ;;  %v4708_v16 = vadd.f32 %v4571_v19, %v1492_v63  ;;  %v3961_v8 = vpop.f32.mrb[57].mxu0  ;;  %v4573_v0 = vpop.f32.mrb[57].mxu1 }
 0x49d   : > { %v4707_v7 = vadd.f32 %v3961_v8, %v1491_v34  ;;  %v4709_v58 = vadd.f32 %v4573_v0, %v1493_v29  ;;  %v3963_v44 = vpop.f32.mrb[58].mxu0  ;;  %v4575_v49 = vpop.f32.mrb[58].mxu1  ;;  %v1539_v8 = vld [vmem:[%s11985_s3 + $0x2a8] sm:$0xff]  ;;  %v1541_v0 = vld [vmem:[%s11985_s3 + $0x2b8] sm:$0xff] }
 0x49e   : > { %4898 = vst [vmem:[%s11985_s3 + $0x120] sm:$0xff] %v4706_v61  ;;  %4900 = vst [vmem:[%s11985_s3 + $0x130] sm:$0xff] %v4708_v16  ;;  %v4714_v40 = vadd.f32 %v3963_v44, %v1498_v2  ;;  %v4716_v3 = vadd.f32 %v4575_v49, %v1500_v35  ;;  %v3965_v62 = vpop.f32.mrb[59].mxu0  ;;  %v4577_v32 = vpop.f32.mrb[59].mxu1  ;;  %v1538_v61 = vld [vmem:[%s11985_s3 + $0x2a0] sm:$0xff]  ;;  %v1540_v16 = vld [vmem:[%s11985_s3 + $0x2b0] sm:$0xff] }
 0x49f   : > { %4899 = vst [vmem:[%s11985_s3 + $0x128] sm:$0xff] %v4707_v7  ;;  %4901 = vst [vmem:[%s11985_s3 + $0x138] sm:$0xff] %v4709_v58  ;;  %v4715_v14 = vadd.f32 %v3965_v62, %v1499_v23  ;;  %v4717_v42 = vadd.f32 %v4577_v32, %v1501_v55  ;;  %v1546_v7 = vld [vmem:[%s11985_s3 + $0x2e0] sm:$0xff]  ;;  %v1548_v58 = vld [vmem:[%s11985_s3 + $0x2f0] sm:$0xff] }
 0x4a0   : > { %4906 = vst [vmem:[%s11985_s3 + $0x160] sm:$0xff] %v4714_v40  ;;  %4908 = vst [vmem:[%s11985_s3 + $0x170] sm:$0xff] %v4716_v3  ;;  %v1547_v62 = vld [vmem:[%s11985_s3 + $0x2e8] sm:$0xff]  ;;  %v1549_v32 = vld [vmem:[%s11985_s3 + $0x2f8] sm:$0xff] }
 0x4a1   : > { %4907 = vst [vmem:[%s11985_s3 + $0x168] sm:$0xff] %v4715_v14  ;;  %4909 = vst [vmem:[%s11985_s3 + $0x178] sm:$0xff] %v4717_v42 }
 0x4a3   : > { %v3969_v5 = vpop.f32.mrb[60].mxu0  ;;  %v4581_v54 = vpop.f32.mrb[60].mxu1 }
 0x4a4   : > { %v4722_v57 = vadd.f32 %v3969_v5, %v1506_v27  ;;  %v4724_v13 = vadd.f32 %v4581_v54, %v1508_v60  ;;  %v3971_v53 = vpop.f32.mrb[61].mxu0  ;;  %v4583_v59 = vpop.f32.mrb[61].mxu1 }
 0x4a5   : > { %v4723_v39 = vadd.f32 %v3971_v53, %v1507_v43  ;;  %v4725_v17 = vadd.f32 %v4583_v59, %v1509_v48  ;;  %v3973_v1 = vpop.f32.mrb[62].mxu0  ;;  %v4585_v45 = vpop.f32.mrb[62].mxu1  ;;  %v1555_v53 = vld [vmem:[%s11985_s3 + $0x328] sm:$0xff]  ;;  %v1557_v59 = vld [vmem:[%s11985_s3 + $0x338] sm:$0xff] }
 0x4a6   : > { %4914 = vst [vmem:[%s11985_s3 + $0x1a0] sm:$0xff] %v4722_v57  ;;  %4916 = vst [vmem:[%s11985_s3 + $0x1b0] sm:$0xff] %v4724_v13  ;;  %v4730_v11 = vadd.f32 %v3973_v1, %v1514_v36  ;;  %v4732_v18 = vadd.f32 %v4585_v45, %v1516_v52  ;;  %v3975_v9 = vpop.f32.mrb[63].mxu0  ;;  %v4587_v10 = vpop.f32.mrb[63].mxu1  ;;  %v1554_v57 = vld [vmem:[%s11985_s3 + $0x320] sm:$0xff]  ;;  %v1556_v13 = vld [vmem:[%s11985_s3 + $0x330] sm:$0xff] }
 0x4a7   : > { %4915 = vst [vmem:[%s11985_s3 + $0x1a8] sm:$0xff] %v4723_v39  ;;  %4917 = vst [vmem:[%s11985_s3 + $0x1b8] sm:$0xff] %v4725_v17  ;;  %v4731_v4 = vadd.f32 %v3975_v9, %v1515_v50  ;;  %v4733_v25 = vadd.f32 %v4587_v10, %v1517_v21  ;;  %v1562_v39 = vld [vmem:[%s11985_s3 + $0x360] sm:$0xff]  ;;  %v1564_v17 = vld [vmem:[%s11985_s3 + $0x370] sm:$0xff] }
 0x4a8   : > { %4922 = vst [vmem:[%s11985_s3 + $0x1e0] sm:$0xff] %v4730_v11  ;;  %4924 = vst [vmem:[%s11985_s3 + $0x1f0] sm:$0xff] %v4732_v18  ;;  %v1563_v9 = vld [vmem:[%s11985_s3 + $0x368] sm:$0xff]  ;;  %v1565_v10 = vld [vmem:[%s11985_s3 + $0x378] sm:$0xff] }
 0x4a9   : > { %4923 = vst [vmem:[%s11985_s3 + $0x1e8] sm:$0xff] %v4731_v4  ;;  %4925 = vst [vmem:[%s11985_s3 + $0x1f8] sm:$0xff] %v4733_v25 }
 0x4ab   : > { %v3979_v24 = vpop.f32.mrb[64].mxu0  ;;  %v4591_v38 = vpop.f32.mrb[64].mxu1 }
 0x4ac   : > { %v4738_v12 = vadd.f32 %v3979_v24, %v1522_v26  ;;  %v4740_v6 = vadd.f32 %v4591_v38, %v1524_v30  ;;  %v3981_v20 = vpop.f32.mrb[65].mxu0  ;;  %v4593_v51 = vpop.f32.mrb[65].mxu1 }
 0x4ad   : > { %v4739_v33 = vadd.f32 %v3981_v20, %v1523_v31  ;;  %v4741_v15 = vadd.f32 %v4593_v51, %v1525_v37  ;;  %v3983_v22 = vpop.f32.mrb[66].mxu0  ;;  %v4595_v63 = vpop.f32.mrb[66].mxu1  ;;  %v1571_v20 = vld [vmem:[%s11985_s3 + $0x3a8] sm:$0xff]  ;;  %v1573_v51 = vld [vmem:[%s11985_s3 + $0x3b8] sm:$0xff] }
 0x4ae   : > { %4930 = vst [vmem:[%s11985_s3 + $0x220] sm:$0xff] %v4738_v12  ;;  %4932 = vst [vmem:[%s11985_s3 + $0x230] sm:$0xff] %v4740_v6  ;;  %v4746_v34 = vadd.f32 %v3983_v22, %v1530_v41  ;;  %v4748_v29 = vadd.f32 %v4595_v63, %v1532_v46  ;;  %v3985_v56 = vpop.f32.mrb[67].mxu0  ;;  %v4597_v19 = vpop.f32.mrb[67].mxu1  ;;  %v1570_v12 = vld [vmem:[%s11985_s3 + $0x3a0] sm:$0xff]  ;;  %v1572_v6 = vld [vmem:[%s11985_s3 + $0x3b0] sm:$0xff] }
 0x4af   : > { %4931 = vst [vmem:[%s11985_s3 + $0x228] sm:$0xff] %v4739_v33  ;;  %4933 = vst [vmem:[%s11985_s3 + $0x238] sm:$0xff] %v4741_v15  ;;  %v4747_v2 = vadd.f32 %v3985_v56, %v1531_v47  ;;  %v4749_v35 = vadd.f32 %v4597_v19, %v1533_v28  ;;  %v1578_v33 = vld [vmem:[%s11985_s3 + $0x3e0] sm:$0xff]  ;;  %v1580_v15 = vld [vmem:[%s11985_s3 + $0x3f0] sm:$0xff] }
 0x4b0   : > { %4938 = vst [vmem:[%s11985_s3 + $0x260] sm:$0xff] %v4746_v34  ;;  %4940 = vst [vmem:[%s11985_s3 + $0x270] sm:$0xff] %v4748_v29  ;;  %v1579_v56 = vld [vmem:[%s11985_s3 + $0x3e8] sm:$0xff]  ;;  %v1581_v19 = vld [vmem:[%s11985_s3 + $0x3f8] sm:$0xff] }
 0x4b1   : > { %4939 = vst [vmem:[%s11985_s3 + $0x268] sm:$0xff] %v4747_v2  ;;  %4941 = vst [vmem:[%s11985_s3 + $0x278] sm:$0xff] %v4749_v35 }
 0x4b3   : > { %v3989_v23 = vpop.f32.mrb[68].mxu0  ;;  %v4601_v55 = vpop.f32.mrb[68].mxu1 }
 0x4b4   : > { %v4754_v44 = vadd.f32 %v3989_v23, %v1538_v61  ;;  %v4756_v49 = vadd.f32 %v4601_v55, %v1540_v16  ;;  %v3991_v40 = vpop.f32.mrb[69].mxu0  ;;  %v4603_v3 = vpop.f32.mrb[69].mxu1 }
 0x4b5   : > { %v4755_v14 = vadd.f32 %v3991_v40, %v1539_v8  ;;  %v4757_v42 = vadd.f32 %v4603_v3, %v1541_v0  ;;  %v3993_v27 = vpop.f32.mrb[70].mxu0  ;;  %v4605_v60 = vpop.f32.mrb[70].mxu1  ;;  %v1587_v40 = vld [vmem:[%s11985_s3 + $0x428] sm:$0xff]  ;;  %v1589_v3 = vld [vmem:[%s11985_s3 + $0x438] sm:$0xff] }
 0x4b6   : > { %4946 = vst [vmem:[%s11985_s3 + $0x2a0] sm:$0xff] %v4754_v44  ;;  %4948 = vst [vmem:[%s11985_s3 + $0x2b0] sm:$0xff] %v4756_v49  ;;  %v4762_v43 = vadd.f32 %v3993_v27, %v1546_v7  ;;  %v4764_v48 = vadd.f32 %v4605_v60, %v1548_v58  ;;  %v3995_v5 = vpop.f32.mrb[71].mxu0  ;;  %v4607_v54 = vpop.f32.mrb[71].mxu1  ;;  %v1586_v44 = vld [vmem:[%s11985_s3 + $0x420] sm:$0xff]  ;;  %v1588_v49 = vld [vmem:[%s11985_s3 + $0x430] sm:$0xff] }
 0x4b7   : > { %4947 = vst [vmem:[%s11985_s3 + $0x2a8] sm:$0xff] %v4755_v14  ;;  %4949 = vst [vmem:[%s11985_s3 + $0x2b8] sm:$0xff] %v4757_v42  ;;  %v4763_v36 = vadd.f32 %v3995_v5, %v1547_v62  ;;  %v4765_v52 = vadd.f32 %v4607_v54, %v1549_v32  ;;  %v1594_v14 = vld [vmem:[%s11985_s3 + $0x460] sm:$0xff]  ;;  %v1596_v42 = vld [vmem:[%s11985_s3 + $0x470] sm:$0xff] }
 0x4b8   : > { %4954 = vst [vmem:[%s11985_s3 + $0x2e0] sm:$0xff] %v4762_v43  ;;  %4956 = vst [vmem:[%s11985_s3 + $0x2f0] sm:$0xff] %v4764_v48  ;;  %v1595_v5 = vld [vmem:[%s11985_s3 + $0x468] sm:$0xff]  ;;  %v1597_v54 = vld [vmem:[%s11985_s3 + $0x478] sm:$0xff] }
 0x4b9   : > { %4955 = vst [vmem:[%s11985_s3 + $0x2e8] sm:$0xff] %v4763_v36  ;;  %4957 = vst [vmem:[%s11985_s3 + $0x2f8] sm:$0xff] %v4765_v52 }
 0x4bb   : > { %v3999_v50 = vpop.f32.mrb[72].mxu0  ;;  %v4611_v21 = vpop.f32.mrb[72].mxu1 }
 0x4bc   : > { %v4770_v1 = vadd.f32 %v3999_v50, %v1554_v57  ;;  %v4772_v45 = vadd.f32 %v4611_v21, %v1556_v13  ;;  %v4001_v11 = vpop.f32.mrb[73].mxu0  ;;  %v4613_v18 = vpop.f32.mrb[73].mxu1 }
 0x4bd   : > { %v4771_v4 = vadd.f32 %v4001_v11, %v1555_v53  ;;  %v4773_v25 = vadd.f32 %v4613_v18, %v1557_v59  ;;  %v4003_v26 = vpop.f32.mrb[74].mxu0  ;;  %v4615_v30 = vpop.f32.mrb[74].mxu1  ;;  %v1603_v11 = vld [vmem:[%s11985_s3 + $0x4a8] sm:$0xff]  ;;  %v1605_v18 = vld [vmem:[%s11985_s3 + $0x4b8] sm:$0xff] }
 0x4be   : > { %4962 = vst [vmem:[%s11985_s3 + $0x320] sm:$0xff] %v4770_v1  ;;  %4964 = vst [vmem:[%s11985_s3 + $0x330] sm:$0xff] %v4772_v45  ;;  %v4778_v31 = vadd.f32 %v4003_v26, %v1562_v39  ;;  %v4780_v37 = vadd.f32 %v4615_v30, %v1564_v17  ;;  %v4005_v24 = vpop.f32.mrb[75].mxu0  ;;  %v4617_v38 = vpop.f32.mrb[75].mxu1  ;;  %v1602_v1 = vld [vmem:[%s11985_s3 + $0x4a0] sm:$0xff]  ;;  %v1604_v45 = vld [vmem:[%s11985_s3 + $0x4b0] sm:$0xff] }
 0x4bf   : > { %4963 = vst [vmem:[%s11985_s3 + $0x328] sm:$0xff] %v4771_v4  ;;  %4965 = vst [vmem:[%s11985_s3 + $0x338] sm:$0xff] %v4773_v25  ;;  %v4779_v41 = vadd.f32 %v4005_v24, %v1563_v9  ;;  %v4781_v46 = vadd.f32 %v4617_v38, %v1565_v10  ;;  %v1610_v4 = vld [vmem:[%s11985_s3 + $0x4e0] sm:$0xff]  ;;  %v1612_v25 = vld [vmem:[%s11985_s3 + $0x4f0] sm:$0xff] }
 0x4c0   : > { %4970 = vst [vmem:[%s11985_s3 + $0x360] sm:$0xff] %v4778_v31  ;;  %4972 = vst [vmem:[%s11985_s3 + $0x370] sm:$0xff] %v4780_v37  ;;  %v1611_v24 = vld [vmem:[%s11985_s3 + $0x4e8] sm:$0xff]  ;;  %v1613_v38 = vld [vmem:[%s11985_s3 + $0x4f8] sm:$0xff] }
 0x4c1   : > { %4971 = vst [vmem:[%s11985_s3 + $0x368] sm:$0xff] %v4779_v41  ;;  %4973 = vst [vmem:[%s11985_s3 + $0x378] sm:$0xff] %v4781_v46 }
 0x4c3   : > { %v4009_v47 = vpop.f32.mrb[76].mxu0  ;;  %v4621_v28 = vpop.f32.mrb[76].mxu1 }
 0x4c4   : > { %v4786_v22 = vadd.f32 %v4009_v47, %v1570_v12  ;;  %v4788_v63 = vadd.f32 %v4621_v28, %v1572_v6  ;;  %v4011_v34 = vpop.f32.mrb[77].mxu0  ;;  %v4623_v29 = vpop.f32.mrb[77].mxu1 }
 0x4c5   : > { %v4787_v2 = vadd.f32 %v4011_v34, %v1571_v20  ;;  %v4789_v35 = vadd.f32 %v4623_v29, %v1573_v51  ;;  %v4013_v61 = vpop.f32.mrb[78].mxu0  ;;  %v4625_v16 = vpop.f32.mrb[78].mxu1  ;;  %v1619_v34 = vld [vmem:[%s11985_s3 + $0x528] sm:$0xff]  ;;  %v1621_v29 = vld [vmem:[%s11985_s3 + $0x538] sm:$0xff] }
 0x4c6   : > { %4978 = vst [vmem:[%s11985_s3 + $0x3a0] sm:$0xff] %v4786_v22  ;;  %4980 = vst [vmem:[%s11985_s3 + $0x3b0] sm:$0xff] %v4788_v63  ;;  %v4794_v8 = vadd.f32 %v4013_v61, %v1578_v33  ;;  %v4796_v0 = vadd.f32 %v4625_v16, %v1580_v15  ;;  %v4015_v23 = vpop.f32.mrb[79].mxu0  ;;  %v4627_v55 = vpop.f32.mrb[79].mxu1  ;;  %v1618_v22 = vld [vmem:[%s11985_s3 + $0x520] sm:$0xff]  ;;  %v1620_v63 = vld [vmem:[%s11985_s3 + $0x530] sm:$0xff] }
 0x4c7   : > { %4979 = vst [vmem:[%s11985_s3 + $0x3a8] sm:$0xff] %v4787_v2  ;;  %4981 = vst [vmem:[%s11985_s3 + $0x3b8] sm:$0xff] %v4789_v35  ;;  %v4795_v7 = vadd.f32 %v4015_v23, %v1579_v56  ;;  %v4797_v58 = vadd.f32 %v4627_v55, %v1581_v19  ;;  %v1626_v2 = vld [vmem:[%s11985_s3 + $0x560] sm:$0xff]  ;;  %v1628_v35 = vld [vmem:[%s11985_s3 + $0x570] sm:$0xff] }
 0x4c8   : > { %4986 = vst [vmem:[%s11985_s3 + $0x3e0] sm:$0xff] %v4794_v8  ;;  %4988 = vst [vmem:[%s11985_s3 + $0x3f0] sm:$0xff] %v4796_v0  ;;  %v1627_v23 = vld [vmem:[%s11985_s3 + $0x568] sm:$0xff]  ;;  %v1629_v55 = vld [vmem:[%s11985_s3 + $0x578] sm:$0xff] }
 0x4c9   : > { %4987 = vst [vmem:[%s11985_s3 + $0x3e8] sm:$0xff] %v4795_v7  ;;  %4989 = vst [vmem:[%s11985_s3 + $0x3f8] sm:$0xff] %v4797_v58 }
 0x4cb   : > { %v4019_v62 = vpop.f32.mrb[80].mxu0  ;;  %v4631_v32 = vpop.f32.mrb[80].mxu1 }
 0x4cc   : > { %v4802_v27 = vadd.f32 %v4019_v62, %v1586_v44  ;;  %v4804_v60 = vadd.f32 %v4631_v32, %v1588_v49  ;;  %v4021_v43 = vpop.f32.mrb[81].mxu0  ;;  %v4633_v48 = vpop.f32.mrb[81].mxu1 }
 0x4cd   : > { %v4803_v36 = vadd.f32 %v4021_v43, %v1587_v40  ;;  %v4805_v52 = vadd.f32 %v4633_v48, %v1589_v3  ;;  %v4023_v57 = vpop.f32.mrb[82].mxu0  ;;  %v4635_v13 = vpop.f32.mrb[82].mxu1  ;;  %v1635_v43 = vld [vmem:[%s11985_s3 + $0x5a8] sm:$0xff]  ;;  %v1637_v48 = vld [vmem:[%s11985_s3 + $0x5b8] sm:$0xff] }
 0x4ce   : > { %4994 = vst [vmem:[%s11985_s3 + $0x420] sm:$0xff] %v4802_v27  ;;  %4996 = vst [vmem:[%s11985_s3 + $0x430] sm:$0xff] %v4804_v60  ;;  %v4810_v53 = vadd.f32 %v4023_v57, %v1594_v14  ;;  %v4812_v59 = vadd.f32 %v4635_v13, %v1596_v42  ;;  %v4025_v50 = vpop.f32.mrb[83].mxu0  ;;  %v4637_v21 = vpop.f32.mrb[83].mxu1  ;;  %v1634_v27 = vld [vmem:[%s11985_s3 + $0x5a0] sm:$0xff]  ;;  %v1636_v60 = vld [vmem:[%s11985_s3 + $0x5b0] sm:$0xff] }
 0x4cf   : > { %4995 = vst [vmem:[%s11985_s3 + $0x428] sm:$0xff] %v4803_v36  ;;  %4997 = vst [vmem:[%s11985_s3 + $0x438] sm:$0xff] %v4805_v52  ;;  %v4811_v39 = vadd.f32 %v4025_v50, %v1595_v5  ;;  %v4813_v17 = vadd.f32 %v4637_v21, %v1597_v54  ;;  %v1642_v36 = vld [vmem:[%s11985_s3 + $0x5e0] sm:$0xff]  ;;  %v1644_v52 = vld [vmem:[%s11985_s3 + $0x5f0] sm:$0xff] }
 0x4d0   : > { %5002 = vst [vmem:[%s11985_s3 + $0x460] sm:$0xff] %v4810_v53  ;;  %5004 = vst [vmem:[%s11985_s3 + $0x470] sm:$0xff] %v4812_v59  ;;  %v1643_v50 = vld [vmem:[%s11985_s3 + $0x5e8] sm:$0xff]  ;;  %v1645_v21 = vld [vmem:[%s11985_s3 + $0x5f8] sm:$0xff] }
 0x4d1   : > { %5003 = vst [vmem:[%s11985_s3 + $0x468] sm:$0xff] %v4811_v39  ;;  %5005 = vst [vmem:[%s11985_s3 + $0x478] sm:$0xff] %v4813_v17 }
 0x4d3   : > { %v4029_v9 = vpop.f32.mrb[84].mxu0  ;;  %v4641_v10 = vpop.f32.mrb[84].mxu1 }
 0x4d4   : > { %v4818_v26 = vadd.f32 %v4029_v9, %v1602_v1  ;;  %v4820_v30 = vadd.f32 %v4641_v10, %v1604_v45  ;;  %v4031_v31 = vpop.f32.mrb[85].mxu0  ;;  %v4643_v37 = vpop.f32.mrb[85].mxu1 }
 0x4d5   : > { %v4819_v41 = vadd.f32 %v4031_v31, %v1603_v11  ;;  %v4821_v46 = vadd.f32 %v4643_v37, %v1605_v18  ;;  %v4033_v12 = vpop.f32.mrb[86].mxu0  ;;  %v4645_v6 = vpop.f32.mrb[86].mxu1  ;;  %v5250_v31 = vld [vmem:[%s11984_s2] ss:$2 sm:$0xff] (!%p6346_p7)  ;;  %v6347_v37 = vld [vmem:[%s11984_s2 + $0x1] ss:$2 sm:$0xff] (!%p6346_p7) }
 0x4d6   : > { %5010 = vst [vmem:[%s11985_s3 + $0x4a0] sm:$0xff] %v4818_v26  ;;  %5012 = vst [vmem:[%s11985_s3 + $0x4b0] sm:$0xff] %v4820_v30  ;;  %v4826_v20 = vadd.f32 %v4033_v12, %v1610_v4  ;;  %v4828_v51 = vadd.f32 %v4645_v6, %v1612_v25  ;;  %v4035_v47 = vpop.f32.mrb[87].mxu0  ;;  %v4647_v28 = vpop.f32.mrb[87].mxu1  ;;  %v5252_v26 = vlaneseq (!%p6346_p7)  ;;  %v5058_v12 = vld [vmem:[%s11985_s3] sm:$0xff] (!%p6346_p7)  ;;  %v5059_v6 = vld [vmem:[%s11985_s3 + $0x8] sm:$0xff] (!%p6346_p7) }
 0x4d7   : > { %5011 = vst [vmem:[%s11985_s3 + $0x4a8] sm:$0xff] %v4819_v41  ;;  %5013 = vst [vmem:[%s11985_s3 + $0x4b8] sm:$0xff] %v4821_v46  ;;  %v4827_v33 = vadd.f32 %v4035_v47, %v1611_v24  ;;  %v4829_v15 = vadd.f32 %v4647_v28, %v1613_v38 }
 0x4d8   : > { %5018 = vst [vmem:[%s11985_s3 + $0x4e0] sm:$0xff] %v4826_v20  ;;  %5020 = vst [vmem:[%s11985_s3 + $0x4f0] sm:$0xff] %v4828_v51  ;;  %v5253_v30 = vshrl.u32 (!%p6346_p7), %v5252_v26, 7 }
 0x4d9   : > { %5019 = vst [vmem:[%s11985_s3 + $0x4e8] sm:$0xff] %v4827_v33  ;;  %5021 = vst [vmem:[%s11985_s3 + $0x4f8] sm:$0xff] %v4829_v15 }
 0x4da   : > { %v5254_v24 = vsub.s32 (!%p6346_p7), 0, %v5253_v30  ;;  %v5258_v38 = vsub.s32 (!%p6346_p7), 1, %v5253_v30  ;;  %v5262_v41 = vsub.s32 (!%p6346_p7), 2, %v5253_v30  ;;  %v5266_v46 = vsub.s32 (!%p6346_p7), 3, %v5253_v30 }
 0x4db   : > { %v4039_v56 = vpop.f32.mrb[88].mxu0  ;;  %v4651_v19 = vpop.f32.mrb[88].mxu1  ;;  %v5270_v20 = vsub.s32 (!%p6346_p7), 4, %v5253_v30  ;;  %v5274_v51 = vsub.s32 (!%p6346_p7), 5, %v5253_v30  ;;  %v5278_v47 = vsub.s32 (!%p6346_p7), 6, %v5253_v30  ;;  %v5282_v28 = vsub.s32 (!%p6346_p7), 7, %v5253_v30 }
 0x4dc   : > { %v4834_v61 = vadd.f32 %v4039_v56, %v1618_v22  ;;  %v4836_v16 = vadd.f32 %v4651_v19, %v1620_v63  ;;  %v4041_v8 = vpop.f32.mrb[89].mxu0  ;;  %v4653_v0 = vpop.f32.mrb[89].mxu1  ;;  %v10402_v33 = vrot.slane (!%p6346_p7), %v5250_v31, %v5254_v24  ;;  %v10404_v15 = vrot.slane (!%p6346_p7), %v6347_v37, %v5254_v24 }
 0x4dd   : > { %v4835_v7 = vadd.f32 %v4041_v8, %v1619_v34  ;;  %v4837_v58 = vadd.f32 %v4653_v0, %v1621_v29  ;;  %v4043_v44 = vpop.f32.mrb[90].mxu0  ;;  %v4655_v49 = vpop.f32.mrb[90].mxu1  ;;  %v10406_v22 = vrot.slane (!%p6346_p7), %v5250_v31, %v5258_v38  ;;  %v10408_v63 = vrot.slane (!%p6346_p7), %v6347_v37, %v5258_v38  ;;  %v5060_v34 = vld [vmem:[%s11985_s3 + $0x10] sm:$0xff] (!%p6346_p7)  ;;  %v5061_v29 = vld [vmem:[%s11985_s3 + $0x18] sm:$0xff] (!%p6346_p7) }
 0x4de   : > { %5026 = vst [vmem:[%s11985_s3 + $0x520] sm:$0xff] %v4834_v61  ;;  %5028 = vst [vmem:[%s11985_s3 + $0x530] sm:$0xff] %v4836_v16  ;;  %v4842_v40 = vadd.f32 %v4043_v44, %v1626_v2  ;;  %v4844_v3 = vadd.f32 %v4655_v49, %v1628_v35  ;;  %v4045_v62 = vpop.f32.mrb[91].mxu0  ;;  %v4657_v32 = vpop.f32.mrb[91].mxu1  ;;  %v10416_v56 = vrot.slane (!%p6346_p7), %v5250_v31, %v5262_v41  ;;  %v5062_v61 = vld [vmem:[%s11985_s3 + $0x20] sm:$0xff] (!%p6346_p7) }
 0x4df   : > { %5027 = vst [vmem:[%s11985_s3 + $0x528] sm:$0xff] %v4835_v7  ;;  %5029 = vst [vmem:[%s11985_s3 + $0x538] sm:$0xff] %v4837_v58  ;;  %v4843_v14 = vadd.f32 %v4045_v62, %v1627_v23  ;;  %v4845_v42 = vadd.f32 %v4657_v32, %v1629_v55  ;;  %v10418_v19 = vrot.slane (!%p6346_p7), %v6347_v37, %v5262_v41  ;;  %v5063_v55 = vld [vmem:[%s11985_s3 + $0x28] sm:$0xff] (!%p6346_p7) }
 0x4e0   : > { %5034 = vst [vmem:[%s11985_s3 + $0x560] sm:$0xff] %v4842_v40  ;;  %5036 = vst [vmem:[%s11985_s3 + $0x570] sm:$0xff] %v4844_v3  ;;  %v10420_v2 = vrot.slane (!%p6346_p7), %v5250_v31, %v5266_v46  ;;  %v10422_v35 = vrot.slane (!%p6346_p7), %v6347_v37, %v5266_v46  ;;  %v5292_v16 = vmul.f32 (!%p6346_p7), %v10402_v33, %v5058_v12  ;;  %v5064_v40 = vld [vmem:[%s11985_s3 + $0x30] sm:$0xff] (!%p6346_p7) }
 0x4e1   : > { %5035 = vst [vmem:[%s11985_s3 + $0x568] sm:$0xff] %v4843_v14  ;;  %5037 = vst [vmem:[%s11985_s3 + $0x578] sm:$0xff] %v4845_v42  ;;  %v5293_v8 = vmul.f32 (!%p6346_p7), %v10406_v22, %v5059_v6  ;;  %v10429_v0 = vrot.slane (!%p6346_p7), %v5250_v31, %v5270_v20  ;;  %v10431_v23 = vrot.slane (!%p6346_p7), %v6347_v37, %v5270_v20 }
 0x4e2   : > { %v5294_v7 = vmul.f32 (!%p6346_p7), %v10416_v56, %v5060_v34  ;;  %v5295_v58 = vmul.f32 (!%p6346_p7), %v10420_v2, %v5061_v29  ;;  %v10438_v44 = vrot.slane (!%p6346_p7), %v5250_v31, %v5274_v51  ;;  %v10440_v49 = vrot.slane (!%p6346_p7), %v6347_v37, %v5274_v51  ;;  %v5073_v51 = vld [vmem:[%s11985_s3 + $0x78] sm:$0xff] (!%p6346_p7) }
 0x4e3   : > { %v4049_v5 = vpop.f32.mrb[92].mxu0  ;;  %v4661_v54 = vpop.f32.mrb[92].mxu1  ;;  %5057 = sbr.rel (%p6346_p7) target bundleno = 1402 (0x57a), region = 67  ;;  %v5527_v3 = vadd.f32 (!%p6346_p7), %v10404_v15, %v5292_v16  ;;  %v5528_v62 = vadd.f32 (!%p6346_p7), %v10408_v63, %v5293_v8  ;;  %v5296_v32 = vmul.f32 (!%p6346_p7), %v10429_v0, %v5062_v61  ;;  %v10448_v14 = vrot.slane (!%p6346_p7), %v5250_v31, %v5278_v47  ;;  %v5074_v61 = vld [vmem:[%s11985_s3 + $0x80] sm:$0xff] (!%p6346_p7)  ;;  %v5075_v16 = vld [vmem:[%s11985_s3 + $0x88] sm:$0xff] (!%p6346_p7)  ;;  %v5076_v8 = vld [vmem:[%s11985_s3 + $0x90] sm:$0xff] (!%p6346_p7) }
 0x4e4   : > { %v4850_v57 = vadd.f32 %v4049_v5, %v1634_v27  ;;  %v4852_v13 = vadd.f32 %v4661_v54, %v1636_v60  ;;  %v4051_v53 = vpop.f32.mrb[93].mxu0  ;;  %v4663_v59 = vpop.f32.mrb[93].mxu1  ;;  %v5529_v42 = vadd.f32 (!%p6346_p7), %v10418_v19, %v5294_v7  ;;  %v5530_v27 = vadd.f32 (!%p6346_p7), %v10422_v35, %v5295_v58 }
 0x4e5   : > { %v4851_v39 = vadd.f32 %v4051_v53, %v1635_v43  ;;  %v4853_v17 = vadd.f32 %v4663_v59, %v1637_v48  ;;  %v4053_v1 = vpop.f32.mrb[94].mxu0  ;;  %v4665_v45 = vpop.f32.mrb[94].mxu1  ;;  %v5297_v60 = vmul.f32 (!%p6346_p7), %v10438_v44, %v5063_v55  ;;  %v10453_v43 = vrot.slane (!%p6346_p7), %v6347_v37, %v5278_v47  ;;  %v5066_v48 = vld [vmem:[%s11985_s3 + $0x40] sm:$0xff] (!%p6346_p7)  ;;  %v5068_v53 = vld [vmem:[%s11985_s3 + $0x50] sm:$0xff] (!%p6346_p7) }
 0x4e6   : > { %5042 = vst [vmem:[%s11985_s3 + $0x5a0] sm:$0xff] %v4850_v57  ;;  %5044 = vst [vmem:[%s11985_s3 + $0x5b0] sm:$0xff] %v4852_v13  ;;  %v4858_v11 = vadd.f32 %v4053_v1, %v1642_v36  ;;  %v4860_v18 = vadd.f32 %v4665_v45, %v1644_v52  ;;  %v4055_v9 = vpop.f32.mrb[95].mxu0  ;;  %v4667_v10 = vpop.f32.mrb[95].mxu1  ;;  %v5719_v5 = vmax.f32 (!%p6346_p7), %v5527_v3, 0.0  ;;  %v5720_v54 = vmax.f32 (!%p6346_p7), %v5528_v62, 0.0 }
 0x4e7   : > { %5043 = vst [vmem:[%s11985_s3 + $0x5a8] sm:$0xff] %v4851_v39  ;;  %5045 = vst [vmem:[%s11985_s3 + $0x5b8] sm:$0xff] %v4853_v17  ;;  %v4859_v4 = vadd.f32 %v4055_v9, %v1643_v50  ;;  %v4861_v25 = vadd.f32 %v4667_v10, %v1645_v21  ;;  %v5531_v36 = vadd.f32 (!%p6346_p7), %v10431_v23, %v5296_v32  ;;  %v5065_v57 = vld [vmem:[%s11985_s3 + $0x38] sm:$0xff] (!%p6346_p7)  ;;  %v5067_v13 = vld [vmem:[%s11985_s3 + $0x48] sm:$0xff] (!%p6346_p7)  ;;  %v5721_v59 = vmax.f32 (!%p6346_p7), %v5529_v42, 0.0 }
 0x4e8   : > { %5050 = vst [vmem:[%s11985_s3 + $0x5e0] sm:$0xff] %v4858_v11  ;;  %5052 = vst [vmem:[%s11985_s3 + $0x5f0] sm:$0xff] %v4860_v18  ;;  %v5298_v52 = vmul.f32 (!%p6346_p7), %v10448_v14, %v5064_v40  ;;  %v5722_v50 = vmax.f32 (!%p6346_p7), %v5530_v27, 0.0  ;;  %v5532_v21 = vadd.f32 (!%p6346_p7), %v10440_v49, %v5297_v60  ;;  %v10470_v39 = vrot.slane (!%p6346_p7), %v5250_v31, %v5282_v28  ;;  %v5069_v17 = vld [vmem:[%s11985_s3 + $0x58] sm:$0xff] (!%p6346_p7)  ;;  %v5070_v1 = vld [vmem:[%s11985_s3 + $0x60] sm:$0xff] (!%p6346_p7) }
 0x4e9   : > { %5051 = vst [vmem:[%s11985_s3 + $0x5e8] sm:$0xff] %v4859_v4  ;;  %5053 = vst [vmem:[%s11985_s3 + $0x5f8] sm:$0xff] %v4861_v25  ;;  %v5723_v45 = vmax.f32 (!%p6346_p7), %v5531_v36, 0.0  ;;  %v10485_v18 = vrot.slane (!%p6346_p7), %v6347_v37, %v5282_v28  ;;  %v5300_v9 = vmul.f32 (!%p6346_p7), %v10402_v33, %v5066_v48  ;;  %v5071_v10 = vld [vmem:[%s11985_s3 + $0x68] sm:$0xff] (!%p6346_p7)  ;;  %v5301_v26 = vmul.f32 (!%p6346_p7), %v10406_v22, %v5067_v13  ;;  %v5072_v31 = vld [vmem:[%s11985_s3 + $0x70] sm:$0xff] (!%p6346_p7) }
 0x4ea   : > { %5911 = vst [vmem:[%s11985_s3] sm:$0xff] %v5719_v5  ;;  %5912 = vst [vmem:[%s11985_s3 + $0x8] sm:$0xff] %v5720_v54  ;;  %v5533_v11 = vadd.f32 %v10453_v43, %v5298_v52  ;;  %v5724_v4 = vmax.f32 %v5532_v21, 0.0  ;;  %v5299_v25 = vmul.f32 %v10470_v39, %v5065_v57  ;;  %v5302_v30 = vmul.f32 %v10416_v56, %v5068_v53  ;;  %v5077_v3 = vld [vmem:[%s11985_s3 + $0x98] sm:$0xff]  ;;  %v5078_v62 = vld [vmem:[%s11985_s3 + $0xa0] sm:$0xff] }
 0x4eb   : > { %5913 = vst [vmem:[%s11985_s3 + $0x10] sm:$0xff] %v5721_v59  ;;  %5914 = vst [vmem:[%s11985_s3 + $0x18] sm:$0xff] %v5722_v50  ;;  %v5535_v24 = vadd.f32 %v10404_v15, %v5300_v9  ;;  %v5303_v38 = vmul.f32 %v10420_v2, %v5069_v17  ;;  %v5304_v41 = vmul.f32 %v10429_v0, %v5070_v1  ;;  %v5079_v48 = vld [vmem:[%s11985_s3 + $0xa8] sm:$0xff]  ;;  %v5080_v57 = vld [vmem:[%s11985_s3 + $0xb0] sm:$0xff] }
 0x4ec   : > { %5915 = vst [vmem:[%s11985_s3 + $0x20] sm:$0xff] %v5723_v45  ;;  %v5725_v37 = vmax.f32 %v5533_v11, 0.0  ;;  %5916 = vst [vmem:[%s11985_s3 + $0x28] sm:$0xff] %v5724_v4  ;;  %v5534_v46 = vadd.f32 %v10485_v18, %v5299_v25  ;;  %v5536_v12 = vadd.f32 %v10408_v63, %v5301_v26  ;;  %v5537_v6 = vadd.f32 %v10418_v19, %v5302_v30  ;;  %v5081_v11 = vld [vmem:[%s11985_s3 + $0xb8] sm:$0xff]  ;;  %v5082_v26 = vld [vmem:[%s11985_s3 + $0xc0] sm:$0xff] }
 0x4ed   : > { %v5305_v20 = vmul.f32 %v10438_v44, %v5071_v10  ;;  %v5727_v47 = vmax.f32 %v5535_v24, 0.0  ;;  %v5538_v28 = vadd.f32 %v10422_v35, %v5303_v38  ;;  %v5539_v34 = vadd.f32 %v10431_v23, %v5304_v41  ;;  %v5083_v30 = vld [vmem:[%s11985_s3 + $0xc8] sm:$0xff] }
 0x4ee   : > { %5917 = vst [vmem:[%s11985_s3 + $0x30] sm:$0xff] %v5725_v37  ;;  %v5306_v29 = vmul.f32 %v10448_v14, %v5072_v31  ;;  %v5726_v55 = vmax.f32 %v5534_v46, 0.0  ;;  %v5728_v7 = vmax.f32 %v5536_v12, 0.0  ;;  %v5729_v58 = vmax.f32 %v5537_v6, 0.0  ;;  %v5084_v31 = vld [vmem:[%s11985_s3 + $0xd0] sm:$0xff]  ;;  %v5085_v46 = vld [vmem:[%s11985_s3 + $0xd8] sm:$0xff] }
 0x4ef   : > { %v5540_v40 = vadd.f32 %v10440_v49, %v5305_v20  ;;  %5919 = vst [vmem:[%s11985_s3 + $0x40] sm:$0xff] %v5727_v47  ;;  %v5730_v32 = vmax.f32 %v5538_v28, 0.0  ;;  %v5731_v42 = vmax.f32 %v5539_v34, 0.0  ;;  %v5307_v60 = vmul.f32 %v10470_v39, %v5073_v51  ;;  %v5086_v12 = vld [vmem:[%s11985_s3 + $0xe0] sm:$0xff]  ;;  %v5087_v28 = vld [vmem:[%s11985_s3 + $0xe8] sm:$0xff] }
 0x4f0   : > { %v5541_v27 = vadd.f32 %v10453_v43, %v5306_v29  ;;  %5918 = vst [vmem:[%s11985_s3 + $0x38] sm:$0xff] %v5726_v55  ;;  %5920 = vst [vmem:[%s11985_s3 + $0x48] sm:$0xff] %v5728_v7  ;;  %v5308_v54 = vmul.f32 %v10402_v33, %v5074_v61  ;;  %v5309_v36 = vmul.f32 %v10406_v22, %v5075_v16 }
 0x4f1   : > { %5921 = vst [vmem:[%s11985_s3 + $0x50] sm:$0xff] %v5729_v58  ;;  %v5732_v5 = vmax.f32 %v5540_v40, 0.0  ;;  %v5310_v52 = vmul.f32 %v10416_v56, %v5076_v8  ;;  %5922 = vst [vmem:[%s11985_s3 + $0x58] sm:$0xff] %v5730_v32  ;;  %v5542_v53 = vadd.f32 %v10485_v18, %v5307_v60  ;;  %v5311_v59 = vmul.f32 %v10420_v2, %v5077_v3  ;;  %v5088_v8 = vld [vmem:[%s11985_s3 + $0xf0] sm:$0xff] }
 0x4f2   : > { %5923 = vst [vmem:[%s11985_s3 + $0x60] sm:$0xff] %v5731_v42  ;;  %v5733_v13 = vmax.f32 %v5541_v27, 0.0  ;;  %v5312_v50 = vmul.f32 %v10429_v0, %v5078_v62  ;;  %v5543_v21 = vadd.f32 %v10404_v15, %v5308_v54  ;;  %v5544_v17 = vadd.f32 %v10408_v63, %v5309_v36  ;;  %v5089_v27 = vld [vmem:[%s11985_s3 + $0xf8] sm:$0xff]  ;;  %v5090_v36 = vld [vmem:[%s11985_s3 + $0x100] sm:$0xff] }
 0x4f3   : > { %5924 = vst [vmem:[%s11985_s3 + $0x68] sm:$0xff] %v5732_v5  ;;  %v5545_v1 = vadd.f32 %v10418_v19, %v5310_v52  ;;  %v5313_v45 = vmul.f32 %v10438_v44, %v5079_v48  ;;  %v5734_v9 = vmax.f32 %v5542_v53, 0.0  ;;  %v5546_v10 = vadd.f32 %v10422_v35, %v5311_v59  ;;  %v5091_v52 = vld [vmem:[%s11985_s3 + $0x108] sm:$0xff] }
 0x4f4   : > { %5925 = vst [vmem:[%s11985_s3 + $0x70] sm:$0xff] %v5733_v13  ;;  %v5547_v4 = vadd.f32 %v10431_v23, %v5312_v50  ;;  %v5314_v25 = vmul.f32 %v10448_v14, %v5080_v57  ;;  %v5735_v37 = vmax.f32 %v5543_v21, 0.0  ;;  %v5736_v24 = vmax.f32 %v5544_v17, 0.0  ;;  %v5092_v57 = vld [vmem:[%s11985_s3 + $0x110] sm:$0xff]  ;;  %v5093_v21 = vld [vmem:[%s11985_s3 + $0x118] sm:$0xff]  ;;  %v5094_v17 = vld [vmem:[%s11985_s3 + $0x120] sm:$0xff] }
 0x4f5   : > { %v5737_v38 = vmax.f32 %v5545_v1, 0.0  ;;  %v5548_v41 = vadd.f32 %v10440_v49, %v5313_v45  ;;  %5926 = vst [vmem:[%s11985_s3 + $0x78] sm:$0xff] %v5734_v9  ;;  %v5738_v6 = vmax.f32 %v5546_v10, 0.0  ;;  %v5315_v47 = vmul.f32 %v10470_v39, %v5081_v11  ;;  %v5095_v10 = vld [vmem:[%s11985_s3 + $0x128] sm:$0xff] }
 0x4f6   : > { %v5739_v20 = vmax.f32 %v5547_v4, 0.0  ;;  %v5549_v51 = vadd.f32 %v10453_v43, %v5314_v25  ;;  %5927 = vst [vmem:[%s11985_s3 + $0x80] sm:$0xff] %v5735_v37  ;;  %5928 = vst [vmem:[%s11985_s3 + $0x88] sm:$0xff] %v5736_v24  ;;  %v5316_v29 = vmul.f32 %v10402_v33, %v5082_v26  ;;  %v5317_v61 = vmul.f32 %v10406_v22, %v5083_v30 }
 0x4f7   : > { %5929 = vst [vmem:[%s11985_s3 + $0x90] sm:$0xff] %v5737_v38  ;;  %v5740_v34 = vmax.f32 %v5548_v41, 0.0  ;;  %v5318_v16 = vmul.f32 %v10416_v56, %v5084_v31  ;;  %5930 = vst [vmem:[%s11985_s3 + $0x98] sm:$0xff] %v5738_v6  ;;  %v5550_v7 = vadd.f32 %v10485_v18, %v5315_v47  ;;  %v5319_v58 = vmul.f32 %v10420_v2, %v5085_v46  ;;  %v5096_v31 = vld [vmem:[%s11985_s3 + $0x130] sm:$0xff] }
 0x4f8   : > { %5931 = vst [vmem:[%s11985_s3 + $0xa0] sm:$0xff] %v5739_v20  ;;  %v5741_v55 = vmax.f32 %v5549_v51, 0.0  ;;  %v5320_v40 = vmul.f32 %v10429_v0, %v5086_v12  ;;  %v5551_v3 = vadd.f32 %v10404_v15, %v5316_v29  ;;  %v5552_v62 = vadd.f32 %v10408_v63, %v5317_v61  ;;  %v5097_v51 = vld [vmem:[%s11985_s3 + $0x138] sm:$0xff]  ;;  %v5098_v61 = vld [vmem:[%s11985_s3 + $0x140] sm:$0xff] }
 0x4f9   : > { %5932 = vst [vmem:[%s11985_s3 + $0xa8] sm:$0xff] %v5740_v34  ;;  %v5553_v32 = vadd.f32 %v10418_v19, %v5318_v16  ;;  %v5321_v42 = vmul.f32 %v10438_v44, %v5087_v28  ;;  %v5742_v60 = vmax.f32 %v5550_v7, 0.0  ;;  %v5554_v48 = vadd.f32 %v10422_v35, %v5319_v58  ;;  %v5099_v16 = vld [vmem:[%s11985_s3 + $0x148] sm:$0xff] }
 0x4fa   : > { %5933 = vst [vmem:[%s11985_s3 + $0xb0] sm:$0xff] %v5741_v55  ;;  %v5555_v5 = vadd.f32 %v10431_v23, %v5320_v40  ;;  %v5322_v54 = vmul.f32 %v10448_v14, %v5088_v8  ;;  %v5743_v13 = vmax.f32 %v5551_v3, 0.0  ;;  %v5744_v53 = vmax.f32 %v5552_v62, 0.0  ;;  %v5100_v8 = vld [vmem:[%s11985_s3 + $0x150] sm:$0xff]  ;;  %v5101_v3 = vld [vmem:[%s11985_s3 + $0x158] sm:$0xff]  ;;  %v5102_v62 = vld [vmem:[%s11985_s3 + $0x160] sm:$0xff] }
 0x4fb   : > { %v5745_v59 = vmax.f32 %v5553_v32, 0.0  ;;  %v5556_v50 = vadd.f32 %v10440_v49, %v5321_v42  ;;  %5934 = vst [vmem:[%s11985_s3 + $0xb8] sm:$0xff] %v5742_v60  ;;  %v5746_v1 = vmax.f32 %v5554_v48, 0.0  ;;  %v5323_v9 = vmul.f32 %v10470_v39, %v5089_v27  ;;  %v5103_v48 = vld [vmem:[%s11985_s3 + $0x168] sm:$0xff] }
 0x4fc   : > { %v5747_v45 = vmax.f32 %v5555_v5, 0.0  ;;  %v5557_v11 = vadd.f32 %v10453_v43, %v5322_v54  ;;  %5935 = vst [vmem:[%s11985_s3 + $0xc0] sm:$0xff] %v5743_v13  ;;  %5936 = vst [vmem:[%s11985_s3 + $0xc8] sm:$0xff] %v5744_v53  ;;  %v5324_v25 = vmul.f32 %v10402_v33, %v5090_v36  ;;  %v5325_v26 = vmul.f32 %v10406_v22, %v5091_v52 }
 0x4fd   : > { %5937 = vst [vmem:[%s11985_s3 + $0xd0] sm:$0xff] %v5745_v59  ;;  %v5748_v4 = vmax.f32 %v5556_v50, 0.0  ;;  %v5326_v30 = vmul.f32 %v10416_v56, %v5092_v57  ;;  %5938 = vst [vmem:[%s11985_s3 + $0xd8] sm:$0xff] %v5746_v1  ;;  %v5558_v24 = vadd.f32 %v10485_v18, %v5323_v9  ;;  %v5327_v38 = vmul.f32 %v10420_v2, %v5093_v21  ;;  %v5104_v57 = vld [vmem:[%s11985_s3 + $0x170] sm:$0xff] }
 0x4fe   : > { %5939 = vst [vmem:[%s11985_s3 + $0xe0] sm:$0xff] %v5747_v45  ;;  %v5749_v37 = vmax.f32 %v5557_v11, 0.0  ;;  %v5328_v41 = vmul.f32 %v10429_v0, %v5094_v17  ;;  %v5559_v46 = vadd.f32 %v10404_v15, %v5324_v25  ;;  %v5560_v12 = vadd.f32 %v10408_v63, %v5325_v26  ;;  %v5105_v11 = vld [vmem:[%s11985_s3 + $0x178] sm:$0xff]  ;;  %v5106_v26 = vld [vmem:[%s11985_s3 + $0x180] sm:$0xff] }
 0x4ff   : > { %5940 = vst [vmem:[%s11985_s3 + $0xe8] sm:$0xff] %v5748_v4  ;;  %v5561_v6 = vadd.f32 %v10418_v19, %v5326_v30  ;;  %v5329_v20 = vmul.f32 %v10438_v44, %v5095_v10  ;;  %v5750_v47 = vmax.f32 %v5558_v24, 0.0  ;;  %v5562_v28 = vadd.f32 %v10422_v35, %v5327_v38  ;;  %v5107_v30 = vld [vmem:[%s11985_s3 + $0x188] sm:$0xff] }
 0x500   : > { %5941 = vst [vmem:[%s11985_s3 + $0xf0] sm:$0xff] %v5749_v37  ;;  %v5563_v34 = vadd.f32 %v10431_v23, %v5328_v41  ;;  %v5330_v29 = vmul.f32 %v10448_v14, %v5096_v31  ;;  %v5751_v55 = vmax.f32 %v5559_v46, 0.0  ;;  %v5752_v7 = vmax.f32 %v5560_v12, 0.0  ;;  %v5108_v31 = vld [vmem:[%s11985_s3 + $0x190] sm:$0xff]  ;;  %v5109_v46 = vld [vmem:[%s11985_s3 + $0x198] sm:$0xff]  ;;  %v5110_v12 = vld [vmem:[%s11985_s3 + $0x1a0] sm:$0xff] }
 0x501   : > { %v5753_v58 = vmax.f32 %v5561_v6, 0.0  ;;  %v5564_v40 = vadd.f32 %v10440_v49, %v5329_v20  ;;  %5942 = vst [vmem:[%s11985_s3 + $0xf8] sm:$0xff] %v5750_v47  ;;  %v5754_v32 = vmax.f32 %v5562_v28, 0.0  ;;  %v5331_v60 = vmul.f32 %v10470_v39, %v5097_v51  ;;  %v5111_v28 = vld [vmem:[%s11985_s3 + $0x1a8] sm:$0xff] }
 0x502   : > { %v5755_v42 = vmax.f32 %v5563_v34, 0.0  ;;  %v5565_v27 = vadd.f32 %v10453_v43, %v5330_v29  ;;  %5943 = vst [vmem:[%s11985_s3 + $0x100] sm:$0xff] %v5751_v55  ;;  %5944 = vst [vmem:[%s11985_s3 + $0x108] sm:$0xff] %v5752_v7  ;;  %v5332_v54 = vmul.f32 %v10402_v33, %v5098_v61  ;;  %v5333_v36 = vmul.f32 %v10406_v22, %v5099_v16 }
 0x503   : > { %5945 = vst [vmem:[%s11985_s3 + $0x110] sm:$0xff] %v5753_v58  ;;  %v5756_v5 = vmax.f32 %v5564_v40, 0.0  ;;  %v5334_v52 = vmul.f32 %v10416_v56, %v5100_v8  ;;  %5946 = vst [vmem:[%s11985_s3 + $0x118] sm:$0xff] %v5754_v32  ;;  %v5566_v53 = vadd.f32 %v10485_v18, %v5331_v60  ;;  %v5335_v59 = vmul.f32 %v10420_v2, %v5101_v3  ;;  %v5112_v8 = vld [vmem:[%s11985_s3 + $0x1b0] sm:$0xff] }
 0x504   : > { %5947 = vst [vmem:[%s11985_s3 + $0x120] sm:$0xff] %v5755_v42  ;;  %v5757_v13 = vmax.f32 %v5565_v27, 0.0  ;;  %v5336_v50 = vmul.f32 %v10429_v0, %v5102_v62  ;;  %v5567_v21 = vadd.f32 %v10404_v15, %v5332_v54  ;;  %v5568_v17 = vadd.f32 %v10408_v63, %v5333_v36  ;;  %v5113_v27 = vld [vmem:[%s11985_s3 + $0x1b8] sm:$0xff]  ;;  %v5114_v36 = vld [vmem:[%s11985_s3 + $0x1c0] sm:$0xff] }
 0x505   : > { %5948 = vst [vmem:[%s11985_s3 + $0x128] sm:$0xff] %v5756_v5  ;;  %v5569_v1 = vadd.f32 %v10418_v19, %v5334_v52  ;;  %v5337_v45 = vmul.f32 %v10438_v44, %v5103_v48  ;;  %v5758_v9 = vmax.f32 %v5566_v53, 0.0  ;;  %v5570_v10 = vadd.f32 %v10422_v35, %v5335_v59  ;;  %v5115_v52 = vld [vmem:[%s11985_s3 + $0x1c8] sm:$0xff] }
 0x506   : > { %5949 = vst [vmem:[%s11985_s3 + $0x130] sm:$0xff] %v5757_v13  ;;  %v5571_v4 = vadd.f32 %v10431_v23, %v5336_v50  ;;  %v5338_v25 = vmul.f32 %v10448_v14, %v5104_v57  ;;  %v5759_v37 = vmax.f32 %v5567_v21, 0.0  ;;  %v5760_v24 = vmax.f32 %v5568_v17, 0.0  ;;  %v5116_v57 = vld [vmem:[%s11985_s3 + $0x1d0] sm:$0xff]  ;;  %v5117_v21 = vld [vmem:[%s11985_s3 + $0x1d8] sm:$0xff]  ;;  %v5118_v17 = vld [vmem:[%s11985_s3 + $0x1e0] sm:$0xff] }
 0x507   : > { %v5761_v38 = vmax.f32 %v5569_v1, 0.0  ;;  %v5572_v41 = vadd.f32 %v10440_v49, %v5337_v45  ;;  %5950 = vst [vmem:[%s11985_s3 + $0x138] sm:$0xff] %v5758_v9  ;;  %v5762_v6 = vmax.f32 %v5570_v10, 0.0  ;;  %v5339_v47 = vmul.f32 %v10470_v39, %v5105_v11  ;;  %v5119_v10 = vld [vmem:[%s11985_s3 + $0x1e8] sm:$0xff] }
 0x508   : > { %v5763_v20 = vmax.f32 %v5571_v4, 0.0  ;;  %v5573_v51 = vadd.f32 %v10453_v43, %v5338_v25  ;;  %5951 = vst [vmem:[%s11985_s3 + $0x140] sm:$0xff] %v5759_v37  ;;  %5952 = vst [vmem:[%s11985_s3 + $0x148] sm:$0xff] %v5760_v24  ;;  %v5340_v29 = vmul.f32 %v10402_v33, %v5106_v26  ;;  %v5341_v61 = vmul.f32 %v10406_v22, %v5107_v30 }
 0x509   : > { %5953 = vst [vmem:[%s11985_s3 + $0x150] sm:$0xff] %v5761_v38  ;;  %v5764_v34 = vmax.f32 %v5572_v41, 0.0  ;;  %v5342_v16 = vmul.f32 %v10416_v56, %v5108_v31  ;;  %5954 = vst [vmem:[%s11985_s3 + $0x158] sm:$0xff] %v5762_v6  ;;  %v5574_v7 = vadd.f32 %v10485_v18, %v5339_v47  ;;  %v5343_v58 = vmul.f32 %v10420_v2, %v5109_v46  ;;  %v5120_v31 = vld [vmem:[%s11985_s3 + $0x1f0] sm:$0xff] }
 0x50a   : > { %5955 = vst [vmem:[%s11985_s3 + $0x160] sm:$0xff] %v5763_v20  ;;  %v5765_v55 = vmax.f32 %v5573_v51, 0.0  ;;  %v5344_v40 = vmul.f32 %v10429_v0, %v5110_v12  ;;  %v5575_v3 = vadd.f32 %v10404_v15, %v5340_v29  ;;  %v5576_v62 = vadd.f32 %v10408_v63, %v5341_v61  ;;  %v5121_v51 = vld [vmem:[%s11985_s3 + $0x1f8] sm:$0xff]  ;;  %v5122_v61 = vld [vmem:[%s11985_s3 + $0x200] sm:$0xff] }
 0x50b   : > { %5956 = vst [vmem:[%s11985_s3 + $0x168] sm:$0xff] %v5764_v34  ;;  %v5577_v32 = vadd.f32 %v10418_v19, %v5342_v16  ;;  %v5345_v42 = vmul.f32 %v10438_v44, %v5111_v28  ;;  %v5766_v60 = vmax.f32 %v5574_v7, 0.0  ;;  %v5578_v48 = vadd.f32 %v10422_v35, %v5343_v58  ;;  %v5123_v16 = vld [vmem:[%s11985_s3 + $0x208] sm:$0xff] }
 0x50c   : > { %5957 = vst [vmem:[%s11985_s3 + $0x170] sm:$0xff] %v5765_v55  ;;  %v5579_v5 = vadd.f32 %v10431_v23, %v5344_v40  ;;  %v5346_v54 = vmul.f32 %v10448_v14, %v5112_v8  ;;  %v5767_v13 = vmax.f32 %v5575_v3, 0.0  ;;  %v5768_v53 = vmax.f32 %v5576_v62, 0.0  ;;  %v5124_v8 = vld [vmem:[%s11985_s3 + $0x210] sm:$0xff]  ;;  %v5125_v3 = vld [vmem:[%s11985_s3 + $0x218] sm:$0xff]  ;;  %v5126_v62 = vld [vmem:[%s11985_s3 + $0x220] sm:$0xff] }
 0x50d   : > { %v5769_v59 = vmax.f32 %v5577_v32, 0.0  ;;  %v5580_v50 = vadd.f32 %v10440_v49, %v5345_v42  ;;  %5958 = vst [vmem:[%s11985_s3 + $0x178] sm:$0xff] %v5766_v60  ;;  %v5770_v1 = vmax.f32 %v5578_v48, 0.0  ;;  %v5347_v9 = vmul.f32 %v10470_v39, %v5113_v27  ;;  %v5127_v48 = vld [vmem:[%s11985_s3 + $0x228] sm:$0xff] }
 0x50e   : > { %v5771_v45 = vmax.f32 %v5579_v5, 0.0  ;;  %v5581_v11 = vadd.f32 %v10453_v43, %v5346_v54  ;;  %5959 = vst [vmem:[%s11985_s3 + $0x180] sm:$0xff] %v5767_v13  ;;  %5960 = vst [vmem:[%s11985_s3 + $0x188] sm:$0xff] %v5768_v53  ;;  %v5348_v25 = vmul.f32 %v10402_v33, %v5114_v36  ;;  %v5349_v26 = vmul.f32 %v10406_v22, %v5115_v52 }
 0x50f   : > { %5961 = vst [vmem:[%s11985_s3 + $0x190] sm:$0xff] %v5769_v59  ;;  %v5772_v4 = vmax.f32 %v5580_v50, 0.0  ;;  %v5350_v30 = vmul.f32 %v10416_v56, %v5116_v57  ;;  %5962 = vst [vmem:[%s11985_s3 + $0x198] sm:$0xff] %v5770_v1  ;;  %v5582_v24 = vadd.f32 %v10485_v18, %v5347_v9  ;;  %v5351_v38 = vmul.f32 %v10420_v2, %v5117_v21  ;;  %v5128_v57 = vld [vmem:[%s11985_s3 + $0x230] sm:$0xff] }
 0x510   : > { %5963 = vst [vmem:[%s11985_s3 + $0x1a0] sm:$0xff] %v5771_v45  ;;  %v5773_v37 = vmax.f32 %v5581_v11, 0.0  ;;  %v5352_v41 = vmul.f32 %v10429_v0, %v5118_v17  ;;  %v5583_v46 = vadd.f32 %v10404_v15, %v5348_v25  ;;  %v5584_v12 = vadd.f32 %v10408_v63, %v5349_v26  ;;  %v5129_v11 = vld [vmem:[%s11985_s3 + $0x238] sm:$0xff]  ;;  %v5130_v26 = vld [vmem:[%s11985_s3 + $0x240] sm:$0xff] }
 0x511   : > { %5964 = vst [vmem:[%s11985_s3 + $0x1a8] sm:$0xff] %v5772_v4  ;;  %v5585_v6 = vadd.f32 %v10418_v19, %v5350_v30  ;;  %v5353_v20 = vmul.f32 %v10438_v44, %v5119_v10  ;;  %v5774_v47 = vmax.f32 %v5582_v24, 0.0  ;;  %v5586_v28 = vadd.f32 %v10422_v35, %v5351_v38  ;;  %v5131_v30 = vld [vmem:[%s11985_s3 + $0x248] sm:$0xff] }
 0x512   : > { %5965 = vst [vmem:[%s11985_s3 + $0x1b0] sm:$0xff] %v5773_v37  ;;  %v5587_v34 = vadd.f32 %v10431_v23, %v5352_v41  ;;  %v5354_v29 = vmul.f32 %v10448_v14, %v5120_v31  ;;  %v5775_v55 = vmax.f32 %v5583_v46, 0.0  ;;  %v5776_v7 = vmax.f32 %v5584_v12, 0.0  ;;  %v5132_v31 = vld [vmem:[%s11985_s3 + $0x250] sm:$0xff]  ;;  %v5133_v46 = vld [vmem:[%s11985_s3 + $0x258] sm:$0xff]  ;;  %v5134_v12 = vld [vmem:[%s11985_s3 + $0x260] sm:$0xff] }
 0x513   : > { %v5777_v58 = vmax.f32 %v5585_v6, 0.0  ;;  %v5588_v40 = vadd.f32 %v10440_v49, %v5353_v20  ;;  %5966 = vst [vmem:[%s11985_s3 + $0x1b8] sm:$0xff] %v5774_v47  ;;  %v5778_v32 = vmax.f32 %v5586_v28, 0.0  ;;  %v5355_v60 = vmul.f32 %v10470_v39, %v5121_v51  ;;  %v5135_v28 = vld [vmem:[%s11985_s3 + $0x268] sm:$0xff] }
 0x514   : > { %v5779_v42 = vmax.f32 %v5587_v34, 0.0  ;;  %v5589_v27 = vadd.f32 %v10453_v43, %v5354_v29  ;;  %5967 = vst [vmem:[%s11985_s3 + $0x1c0] sm:$0xff] %v5775_v55  ;;  %5968 = vst [vmem:[%s11985_s3 + $0x1c8] sm:$0xff] %v5776_v7  ;;  %v5356_v54 = vmul.f32 %v10402_v33, %v5122_v61  ;;  %v5357_v36 = vmul.f32 %v10406_v22, %v5123_v16 }
 0x515   : > { %5969 = vst [vmem:[%s11985_s3 + $0x1d0] sm:$0xff] %v5777_v58  ;;  %v5780_v5 = vmax.f32 %v5588_v40, 0.0  ;;  %v5358_v52 = vmul.f32 %v10416_v56, %v5124_v8  ;;  %5970 = vst [vmem:[%s11985_s3 + $0x1d8] sm:$0xff] %v5778_v32  ;;  %v5590_v53 = vadd.f32 %v10485_v18, %v5355_v60  ;;  %v5359_v59 = vmul.f32 %v10420_v2, %v5125_v3  ;;  %v5136_v8 = vld [vmem:[%s11985_s3 + $0x270] sm:$0xff] }
 0x516   : > { %5971 = vst [vmem:[%s11985_s3 + $0x1e0] sm:$0xff] %v5779_v42  ;;  %v5781_v13 = vmax.f32 %v5589_v27, 0.0  ;;  %v5360_v50 = vmul.f32 %v10429_v0, %v5126_v62  ;;  %v5591_v21 = vadd.f32 %v10404_v15, %v5356_v54  ;;  %v5592_v17 = vadd.f32 %v10408_v63, %v5357_v36  ;;  %v5137_v27 = vld [vmem:[%s11985_s3 + $0x278] sm:$0xff]  ;;  %v5138_v36 = vld [vmem:[%s11985_s3 + $0x280] sm:$0xff] }
 0x517   : > { %5972 = vst [vmem:[%s11985_s3 + $0x1e8] sm:$0xff] %v5780_v5  ;;  %v5593_v1 = vadd.f32 %v10418_v19, %v5358_v52  ;;  %v5361_v45 = vmul.f32 %v10438_v44, %v5127_v48  ;;  %v5782_v9 = vmax.f32 %v5590_v53, 0.0  ;;  %v5594_v10 = vadd.f32 %v10422_v35, %v5359_v59  ;;  %v5139_v52 = vld [vmem:[%s11985_s3 + $0x288] sm:$0xff] }
 0x518   : > { %5973 = vst [vmem:[%s11985_s3 + $0x1f0] sm:$0xff] %v5781_v13  ;;  %v5595_v4 = vadd.f32 %v10431_v23, %v5360_v50  ;;  %v5362_v25 = vmul.f32 %v10448_v14, %v5128_v57  ;;  %v5783_v37 = vmax.f32 %v5591_v21, 0.0  ;;  %v5784_v24 = vmax.f32 %v5592_v17, 0.0  ;;  %v5140_v57 = vld [vmem:[%s11985_s3 + $0x290] sm:$0xff]  ;;  %v5141_v21 = vld [vmem:[%s11985_s3 + $0x298] sm:$0xff]  ;;  %v5142_v17 = vld [vmem:[%s11985_s3 + $0x2a0] sm:$0xff] }
 0x519   : > { %v5785_v38 = vmax.f32 %v5593_v1, 0.0  ;;  %v5596_v41 = vadd.f32 %v10440_v49, %v5361_v45  ;;  %5974 = vst [vmem:[%s11985_s3 + $0x1f8] sm:$0xff] %v5782_v9  ;;  %v5786_v6 = vmax.f32 %v5594_v10, 0.0  ;;  %v5363_v47 = vmul.f32 %v10470_v39, %v5129_v11  ;;  %v5143_v10 = vld [vmem:[%s11985_s3 + $0x2a8] sm:$0xff] }
 0x51a   : > { %v5787_v20 = vmax.f32 %v5595_v4, 0.0  ;;  %v5597_v51 = vadd.f32 %v10453_v43, %v5362_v25  ;;  %5975 = vst [vmem:[%s11985_s3 + $0x200] sm:$0xff] %v5783_v37  ;;  %5976 = vst [vmem:[%s11985_s3 + $0x208] sm:$0xff] %v5784_v24  ;;  %v5364_v29 = vmul.f32 %v10402_v33, %v5130_v26  ;;  %v5365_v61 = vmul.f32 %v10406_v22, %v5131_v30 }
 0x51b   : > { %5977 = vst [vmem:[%s11985_s3 + $0x210] sm:$0xff] %v5785_v38  ;;  %v5788_v34 = vmax.f32 %v5596_v41, 0.0  ;;  %v5366_v16 = vmul.f32 %v10416_v56, %v5132_v31  ;;  %5978 = vst [vmem:[%s11985_s3 + $0x218] sm:$0xff] %v5786_v6  ;;  %v5598_v7 = vadd.f32 %v10485_v18, %v5363_v47  ;;  %v5367_v58 = vmul.f32 %v10420_v2, %v5133_v46  ;;  %v5144_v31 = vld [vmem:[%s11985_s3 + $0x2b0] sm:$0xff] }
 0x51c   : > { %5979 = vst [vmem:[%s11985_s3 + $0x220] sm:$0xff] %v5787_v20  ;;  %v5789_v55 = vmax.f32 %v5597_v51, 0.0  ;;  %v5368_v40 = vmul.f32 %v10429_v0, %v5134_v12  ;;  %v5599_v3 = vadd.f32 %v10404_v15, %v5364_v29  ;;  %v5600_v62 = vadd.f32 %v10408_v63, %v5365_v61  ;;  %v5145_v51 = vld [vmem:[%s11985_s3 + $0x2b8] sm:$0xff]  ;;  %v5146_v61 = vld [vmem:[%s11985_s3 + $0x2c0] sm:$0xff] }
 0x51d   : > { %5980 = vst [vmem:[%s11985_s3 + $0x228] sm:$0xff] %v5788_v34  ;;  %v5601_v32 = vadd.f32 %v10418_v19, %v5366_v16  ;;  %v5369_v42 = vmul.f32 %v10438_v44, %v5135_v28  ;;  %v5790_v60 = vmax.f32 %v5598_v7, 0.0  ;;  %v5602_v48 = vadd.f32 %v10422_v35, %v5367_v58  ;;  %v5147_v16 = vld [vmem:[%s11985_s3 + $0x2c8] sm:$0xff] }
 0x51e   : > { %5981 = vst [vmem:[%s11985_s3 + $0x230] sm:$0xff] %v5789_v55  ;;  %v5603_v5 = vadd.f32 %v10431_v23, %v5368_v40  ;;  %v5370_v54 = vmul.f32 %v10448_v14, %v5136_v8  ;;  %v5791_v13 = vmax.f32 %v5599_v3, 0.0  ;;  %v5792_v53 = vmax.f32 %v5600_v62, 0.0  ;;  %v5148_v8 = vld [vmem:[%s11985_s3 + $0x2d0] sm:$0xff]  ;;  %v5149_v3 = vld [vmem:[%s11985_s3 + $0x2d8] sm:$0xff]  ;;  %v5150_v62 = vld [vmem:[%s11985_s3 + $0x2e0] sm:$0xff] }
 0x51f   : > { %v5793_v59 = vmax.f32 %v5601_v32, 0.0  ;;  %v5604_v50 = vadd.f32 %v10440_v49, %v5369_v42  ;;  %5982 = vst [vmem:[%s11985_s3 + $0x238] sm:$0xff] %v5790_v60  ;;  %v5794_v1 = vmax.f32 %v5602_v48, 0.0  ;;  %v5371_v9 = vmul.f32 %v10470_v39, %v5137_v27  ;;  %v5151_v48 = vld [vmem:[%s11985_s3 + $0x2e8] sm:$0xff] }
 0x520   : > { %v5795_v45 = vmax.f32 %v5603_v5, 0.0  ;;  %v5605_v11 = vadd.f32 %v10453_v43, %v5370_v54  ;;  %5983 = vst [vmem:[%s11985_s3 + $0x240] sm:$0xff] %v5791_v13  ;;  %5984 = vst [vmem:[%s11985_s3 + $0x248] sm:$0xff] %v5792_v53  ;;  %v5372_v25 = vmul.f32 %v10402_v33, %v5138_v36  ;;  %v5373_v26 = vmul.f32 %v10406_v22, %v5139_v52 }
 0x521   : > { %5985 = vst [vmem:[%s11985_s3 + $0x250] sm:$0xff] %v5793_v59  ;;  %v5796_v4 = vmax.f32 %v5604_v50, 0.0  ;;  %v5374_v30 = vmul.f32 %v10416_v56, %v5140_v57  ;;  %5986 = vst [vmem:[%s11985_s3 + $0x258] sm:$0xff] %v5794_v1  ;;  %v5606_v24 = vadd.f32 %v10485_v18, %v5371_v9  ;;  %v5375_v38 = vmul.f32 %v10420_v2, %v5141_v21  ;;  %v5152_v57 = vld [vmem:[%s11985_s3 + $0x2f0] sm:$0xff] }
 0x522   : > { %5987 = vst [vmem:[%s11985_s3 + $0x260] sm:$0xff] %v5795_v45  ;;  %v5797_v37 = vmax.f32 %v5605_v11, 0.0  ;;  %v5376_v41 = vmul.f32 %v10429_v0, %v5142_v17  ;;  %v5607_v46 = vadd.f32 %v10404_v15, %v5372_v25  ;;  %v5608_v12 = vadd.f32 %v10408_v63, %v5373_v26  ;;  %v5153_v11 = vld [vmem:[%s11985_s3 + $0x2f8] sm:$0xff]  ;;  %v5154_v26 = vld [vmem:[%s11985_s3 + $0x300] sm:$0xff] }
 0x523   : > { %5988 = vst [vmem:[%s11985_s3 + $0x268] sm:$0xff] %v5796_v4  ;;  %v5609_v6 = vadd.f32 %v10418_v19, %v5374_v30  ;;  %v5377_v20 = vmul.f32 %v10438_v44, %v5143_v10  ;;  %v5798_v47 = vmax.f32 %v5606_v24, 0.0  ;;  %v5610_v28 = vadd.f32 %v10422_v35, %v5375_v38  ;;  %v5155_v30 = vld [vmem:[%s11985_s3 + $0x308] sm:$0xff] }
 0x524   : > { %5989 = vst [vmem:[%s11985_s3 + $0x270] sm:$0xff] %v5797_v37  ;;  %v5611_v34 = vadd.f32 %v10431_v23, %v5376_v41  ;;  %v5378_v29 = vmul.f32 %v10448_v14, %v5144_v31  ;;  %v5799_v55 = vmax.f32 %v5607_v46, 0.0  ;;  %v5800_v7 = vmax.f32 %v5608_v12, 0.0  ;;  %v5156_v31 = vld [vmem:[%s11985_s3 + $0x310] sm:$0xff]  ;;  %v5157_v46 = vld [vmem:[%s11985_s3 + $0x318] sm:$0xff]  ;;  %v5158_v12 = vld [vmem:[%s11985_s3 + $0x320] sm:$0xff] }
 0x525   : > { %v5801_v58 = vmax.f32 %v5609_v6, 0.0  ;;  %v5612_v40 = vadd.f32 %v10440_v49, %v5377_v20  ;;  %5990 = vst [vmem:[%s11985_s3 + $0x278] sm:$0xff] %v5798_v47  ;;  %v5802_v32 = vmax.f32 %v5610_v28, 0.0  ;;  %v5379_v60 = vmul.f32 %v10470_v39, %v5145_v51  ;;  %v5159_v28 = vld [vmem:[%s11985_s3 + $0x328] sm:$0xff] }
 0x526   : > { %v5803_v42 = vmax.f32 %v5611_v34, 0.0  ;;  %v5613_v27 = vadd.f32 %v10453_v43, %v5378_v29  ;;  %5991 = vst [vmem:[%s11985_s3 + $0x280] sm:$0xff] %v5799_v55  ;;  %5992 = vst [vmem:[%s11985_s3 + $0x288] sm:$0xff] %v5800_v7  ;;  %v5380_v54 = vmul.f32 %v10402_v33, %v5146_v61  ;;  %v5381_v36 = vmul.f32 %v10406_v22, %v5147_v16 }
 0x527   : > { %5993 = vst [vmem:[%s11985_s3 + $0x290] sm:$0xff] %v5801_v58  ;;  %v5804_v5 = vmax.f32 %v5612_v40, 0.0  ;;  %v5382_v52 = vmul.f32 %v10416_v56, %v5148_v8  ;;  %5994 = vst [vmem:[%s11985_s3 + $0x298] sm:$0xff] %v5802_v32  ;;  %v5614_v53 = vadd.f32 %v10485_v18, %v5379_v60  ;;  %v5383_v59 = vmul.f32 %v10420_v2, %v5149_v3  ;;  %v5160_v8 = vld [vmem:[%s11985_s3 + $0x330] sm:$0xff] }
 0x528   : > { %5995 = vst [vmem:[%s11985_s3 + $0x2a0] sm:$0xff] %v5803_v42  ;;  %v5805_v13 = vmax.f32 %v5613_v27, 0.0  ;;  %v5384_v50 = vmul.f32 %v10429_v0, %v5150_v62  ;;  %v5615_v21 = vadd.f32 %v10404_v15, %v5380_v54  ;;  %v5616_v17 = vadd.f32 %v10408_v63, %v5381_v36  ;;  %v5161_v27 = vld [vmem:[%s11985_s3 + $0x338] sm:$0xff]  ;;  %v5162_v36 = vld [vmem:[%s11985_s3 + $0x340] sm:$0xff] }
 0x529   : > { %5996 = vst [vmem:[%s11985_s3 + $0x2a8] sm:$0xff] %v5804_v5  ;;  %v5617_v1 = vadd.f32 %v10418_v19, %v5382_v52  ;;  %v5385_v45 = vmul.f32 %v10438_v44, %v5151_v48  ;;  %v5806_v9 = vmax.f32 %v5614_v53, 0.0  ;;  %v5618_v10 = vadd.f32 %v10422_v35, %v5383_v59  ;;  %v5163_v52 = vld [vmem:[%s11985_s3 + $0x348] sm:$0xff] }
 0x52a   : > { %5997 = vst [vmem:[%s11985_s3 + $0x2b0] sm:$0xff] %v5805_v13  ;;  %v5619_v4 = vadd.f32 %v10431_v23, %v5384_v50  ;;  %v5386_v25 = vmul.f32 %v10448_v14, %v5152_v57  ;;  %v5807_v37 = vmax.f32 %v5615_v21, 0.0  ;;  %v5808_v24 = vmax.f32 %v5616_v17, 0.0  ;;  %v5164_v57 = vld [vmem:[%s11985_s3 + $0x350] sm:$0xff]  ;;  %v5165_v21 = vld [vmem:[%s11985_s3 + $0x358] sm:$0xff]  ;;  %v5166_v17 = vld [vmem:[%s11985_s3 + $0x360] sm:$0xff] }
 0x52b   : > { %v5809_v38 = vmax.f32 %v5617_v1, 0.0  ;;  %v5620_v41 = vadd.f32 %v10440_v49, %v5385_v45  ;;  %5998 = vst [vmem:[%s11985_s3 + $0x2b8] sm:$0xff] %v5806_v9  ;;  %v5810_v6 = vmax.f32 %v5618_v10, 0.0  ;;  %v5387_v47 = vmul.f32 %v10470_v39, %v5153_v11  ;;  %v5167_v10 = vld [vmem:[%s11985_s3 + $0x368] sm:$0xff] }
 0x52c   : > { %v5811_v20 = vmax.f32 %v5619_v4, 0.0  ;;  %v5621_v51 = vadd.f32 %v10453_v43, %v5386_v25  ;;  %5999 = vst [vmem:[%s11985_s3 + $0x2c0] sm:$0xff] %v5807_v37  ;;  %6000 = vst [vmem:[%s11985_s3 + $0x2c8] sm:$0xff] %v5808_v24  ;;  %v5388_v29 = vmul.f32 %v10402_v33, %v5154_v26  ;;  %v5389_v61 = vmul.f32 %v10406_v22, %v5155_v30 }
 0x52d   : > { %6001 = vst [vmem:[%s11985_s3 + $0x2d0] sm:$0xff] %v5809_v38  ;;  %v5812_v34 = vmax.f32 %v5620_v41, 0.0  ;;  %v5390_v16 = vmul.f32 %v10416_v56, %v5156_v31  ;;  %6002 = vst [vmem:[%s11985_s3 + $0x2d8] sm:$0xff] %v5810_v6  ;;  %v5622_v7 = vadd.f32 %v10485_v18, %v5387_v47  ;;  %v5391_v58 = vmul.f32 %v10420_v2, %v5157_v46  ;;  %v5168_v31 = vld [vmem:[%s11985_s3 + $0x370] sm:$0xff] }
 0x52e   : > { %6003 = vst [vmem:[%s11985_s3 + $0x2e0] sm:$0xff] %v5811_v20  ;;  %v5813_v55 = vmax.f32 %v5621_v51, 0.0  ;;  %v5392_v40 = vmul.f32 %v10429_v0, %v5158_v12  ;;  %v5623_v3 = vadd.f32 %v10404_v15, %v5388_v29  ;;  %v5624_v62 = vadd.f32 %v10408_v63, %v5389_v61  ;;  %v5169_v51 = vld [vmem:[%s11985_s3 + $0x378] sm:$0xff]  ;;  %v5170_v61 = vld [vmem:[%s11985_s3 + $0x380] sm:$0xff] }
 0x52f   : > { %6004 = vst [vmem:[%s11985_s3 + $0x2e8] sm:$0xff] %v5812_v34  ;;  %v5625_v32 = vadd.f32 %v10418_v19, %v5390_v16  ;;  %v5393_v42 = vmul.f32 %v10438_v44, %v5159_v28  ;;  %v5814_v60 = vmax.f32 %v5622_v7, 0.0  ;;  %v5626_v48 = vadd.f32 %v10422_v35, %v5391_v58  ;;  %v5171_v16 = vld [vmem:[%s11985_s3 + $0x388] sm:$0xff] }
 0x530   : > { %6005 = vst [vmem:[%s11985_s3 + $0x2f0] sm:$0xff] %v5813_v55  ;;  %v5627_v5 = vadd.f32 %v10431_v23, %v5392_v40  ;;  %v5394_v54 = vmul.f32 %v10448_v14, %v5160_v8  ;;  %v5815_v13 = vmax.f32 %v5623_v3, 0.0  ;;  %v5816_v53 = vmax.f32 %v5624_v62, 0.0  ;;  %v5172_v8 = vld [vmem:[%s11985_s3 + $0x390] sm:$0xff]  ;;  %v5173_v3 = vld [vmem:[%s11985_s3 + $0x398] sm:$0xff]  ;;  %v5174_v62 = vld [vmem:[%s11985_s3 + $0x3a0] sm:$0xff] }
 0x531   : > { %v5817_v59 = vmax.f32 %v5625_v32, 0.0  ;;  %v5628_v50 = vadd.f32 %v10440_v49, %v5393_v42  ;;  %6006 = vst [vmem:[%s11985_s3 + $0x2f8] sm:$0xff] %v5814_v60  ;;  %v5818_v1 = vmax.f32 %v5626_v48, 0.0  ;;  %v5395_v9 = vmul.f32 %v10470_v39, %v5161_v27  ;;  %v5175_v48 = vld [vmem:[%s11985_s3 + $0x3a8] sm:$0xff] }
 0x532   : > { %v5819_v45 = vmax.f32 %v5627_v5, 0.0  ;;  %v5629_v11 = vadd.f32 %v10453_v43, %v5394_v54  ;;  %6007 = vst [vmem:[%s11985_s3 + $0x300] sm:$0xff] %v5815_v13  ;;  %6008 = vst [vmem:[%s11985_s3 + $0x308] sm:$0xff] %v5816_v53  ;;  %v5396_v25 = vmul.f32 %v10402_v33, %v5162_v36  ;;  %v5397_v26 = vmul.f32 %v10406_v22, %v5163_v52 }
 0x533   : > { %6009 = vst [vmem:[%s11985_s3 + $0x310] sm:$0xff] %v5817_v59  ;;  %v5820_v4 = vmax.f32 %v5628_v50, 0.0  ;;  %v5398_v30 = vmul.f32 %v10416_v56, %v5164_v57  ;;  %6010 = vst [vmem:[%s11985_s3 + $0x318] sm:$0xff] %v5818_v1  ;;  %v5630_v24 = vadd.f32 %v10485_v18, %v5395_v9  ;;  %v5399_v38 = vmul.f32 %v10420_v2, %v5165_v21  ;;  %v5176_v57 = vld [vmem:[%s11985_s3 + $0x3b0] sm:$0xff] }
 0x534   : > { %6011 = vst [vmem:[%s11985_s3 + $0x320] sm:$0xff] %v5819_v45  ;;  %v5821_v37 = vmax.f32 %v5629_v11, 0.0  ;;  %v5400_v41 = vmul.f32 %v10429_v0, %v5166_v17  ;;  %v5631_v46 = vadd.f32 %v10404_v15, %v5396_v25  ;;  %v5632_v12 = vadd.f32 %v10408_v63, %v5397_v26  ;;  %v5177_v11 = vld [vmem:[%s11985_s3 + $0x3b8] sm:$0xff]  ;;  %v5178_v26 = vld [vmem:[%s11985_s3 + $0x3c0] sm:$0xff] }
 0x535   : > { %6012 = vst [vmem:[%s11985_s3 + $0x328] sm:$0xff] %v5820_v4  ;;  %v5633_v6 = vadd.f32 %v10418_v19, %v5398_v30  ;;  %v5401_v20 = vmul.f32 %v10438_v44, %v5167_v10  ;;  %v5822_v47 = vmax.f32 %v5630_v24, 0.0  ;;  %v5634_v28 = vadd.f32 %v10422_v35, %v5399_v38  ;;  %v5179_v30 = vld [vmem:[%s11985_s3 + $0x3c8] sm:$0xff] }
 0x536   : > { %6013 = vst [vmem:[%s11985_s3 + $0x330] sm:$0xff] %v5821_v37  ;;  %v5635_v34 = vadd.f32 %v10431_v23, %v5400_v41  ;;  %v5402_v29 = vmul.f32 %v10448_v14, %v5168_v31  ;;  %v5823_v55 = vmax.f32 %v5631_v46, 0.0  ;;  %v5824_v7 = vmax.f32 %v5632_v12, 0.0  ;;  %v5180_v31 = vld [vmem:[%s11985_s3 + $0x3d0] sm:$0xff]  ;;  %v5181_v46 = vld [vmem:[%s11985_s3 + $0x3d8] sm:$0xff]  ;;  %v5182_v12 = vld [vmem:[%s11985_s3 + $0x3e0] sm:$0xff] }
 0x537   : > { %v5825_v58 = vmax.f32 %v5633_v6, 0.0  ;;  %v5636_v40 = vadd.f32 %v10440_v49, %v5401_v20  ;;  %6014 = vst [vmem:[%s11985_s3 + $0x338] sm:$0xff] %v5822_v47  ;;  %v5826_v32 = vmax.f32 %v5634_v28, 0.0  ;;  %v5403_v60 = vmul.f32 %v10470_v39, %v5169_v51  ;;  %v5183_v28 = vld [vmem:[%s11985_s3 + $0x3e8] sm:$0xff] }
 0x538   : > { %v5827_v42 = vmax.f32 %v5635_v34, 0.0  ;;  %v5637_v27 = vadd.f32 %v10453_v43, %v5402_v29  ;;  %6015 = vst [vmem:[%s11985_s3 + $0x340] sm:$0xff] %v5823_v55  ;;  %6016 = vst [vmem:[%s11985_s3 + $0x348] sm:$0xff] %v5824_v7  ;;  %v5404_v54 = vmul.f32 %v10402_v33, %v5170_v61  ;;  %v5405_v36 = vmul.f32 %v10406_v22, %v5171_v16 }
 0x539   : > { %6017 = vst [vmem:[%s11985_s3 + $0x350] sm:$0xff] %v5825_v58  ;;  %v5828_v5 = vmax.f32 %v5636_v40, 0.0  ;;  %v5406_v52 = vmul.f32 %v10416_v56, %v5172_v8  ;;  %6018 = vst [vmem:[%s11985_s3 + $0x358] sm:$0xff] %v5826_v32  ;;  %v5638_v53 = vadd.f32 %v10485_v18, %v5403_v60  ;;  %v5407_v59 = vmul.f32 %v10420_v2, %v5173_v3  ;;  %v5184_v8 = vld [vmem:[%s11985_s3 + $0x3f0] sm:$0xff] }
 0x53a   : > { %6019 = vst [vmem:[%s11985_s3 + $0x360] sm:$0xff] %v5827_v42  ;;  %v5829_v13 = vmax.f32 %v5637_v27, 0.0  ;;  %v5408_v50 = vmul.f32 %v10429_v0, %v5174_v62  ;;  %v5639_v21 = vadd.f32 %v10404_v15, %v5404_v54  ;;  %v5640_v17 = vadd.f32 %v10408_v63, %v5405_v36  ;;  %v5185_v27 = vld [vmem:[%s11985_s3 + $0x3f8] sm:$0xff]  ;;  %v5186_v36 = vld [vmem:[%s11985_s3 + $0x400] sm:$0xff] }
 0x53b   : > { %6020 = vst [vmem:[%s11985_s3 + $0x368] sm:$0xff] %v5828_v5  ;;  %v5641_v1 = vadd.f32 %v10418_v19, %v5406_v52  ;;  %v5409_v45 = vmul.f32 %v10438_v44, %v5175_v48  ;;  %v5830_v9 = vmax.f32 %v5638_v53, 0.0  ;;  %v5642_v10 = vadd.f32 %v10422_v35, %v5407_v59  ;;  %v5187_v52 = vld [vmem:[%s11985_s3 + $0x408] sm:$0xff] }
 0x53c   : > { %6021 = vst [vmem:[%s11985_s3 + $0x370] sm:$0xff] %v5829_v13  ;;  %v5643_v4 = vadd.f32 %v10431_v23, %v5408_v50  ;;  %v5410_v25 = vmul.f32 %v10448_v14, %v5176_v57  ;;  %v5831_v37 = vmax.f32 %v5639_v21, 0.0  ;;  %v5832_v24 = vmax.f32 %v5640_v17, 0.0  ;;  %v5188_v57 = vld [vmem:[%s11985_s3 + $0x410] sm:$0xff]  ;;  %v5189_v21 = vld [vmem:[%s11985_s3 + $0x418] sm:$0xff]  ;;  %v5190_v17 = vld [vmem:[%s11985_s3 + $0x420] sm:$0xff] }
 0x53d   : > { %v5833_v38 = vmax.f32 %v5641_v1, 0.0  ;;  %v5644_v41 = vadd.f32 %v10440_v49, %v5409_v45  ;;  %6022 = vst [vmem:[%s11985_s3 + $0x378] sm:$0xff] %v5830_v9  ;;  %v5834_v6 = vmax.f32 %v5642_v10, 0.0  ;;  %v5411_v47 = vmul.f32 %v10470_v39, %v5177_v11  ;;  %v5191_v10 = vld [vmem:[%s11985_s3 + $0x428] sm:$0xff] }
 0x53e   : > { %v5835_v20 = vmax.f32 %v5643_v4, 0.0  ;;  %v5645_v51 = vadd.f32 %v10453_v43, %v5410_v25  ;;  %6023 = vst [vmem:[%s11985_s3 + $0x380] sm:$0xff] %v5831_v37  ;;  %6024 = vst [vmem:[%s11985_s3 + $0x388] sm:$0xff] %v5832_v24  ;;  %v5412_v29 = vmul.f32 %v10402_v33, %v5178_v26  ;;  %v5413_v61 = vmul.f32 %v10406_v22, %v5179_v30 }
 0x53f   : > { %6025 = vst [vmem:[%s11985_s3 + $0x390] sm:$0xff] %v5833_v38  ;;  %v5836_v34 = vmax.f32 %v5644_v41, 0.0  ;;  %v5414_v16 = vmul.f32 %v10416_v56, %v5180_v31  ;;  %6026 = vst [vmem:[%s11985_s3 + $0x398] sm:$0xff] %v5834_v6  ;;  %v5646_v7 = vadd.f32 %v10485_v18, %v5411_v47  ;;  %v5415_v58 = vmul.f32 %v10420_v2, %v5181_v46  ;;  %v5192_v31 = vld [vmem:[%s11985_s3 + $0x430] sm:$0xff] }
 0x540   : > { %6027 = vst [vmem:[%s11985_s3 + $0x3a0] sm:$0xff] %v5835_v20  ;;  %v5837_v55 = vmax.f32 %v5645_v51, 0.0  ;;  %v5416_v40 = vmul.f32 %v10429_v0, %v5182_v12  ;;  %v5647_v3 = vadd.f32 %v10404_v15, %v5412_v29  ;;  %v5648_v62 = vadd.f32 %v10408_v63, %v5413_v61  ;;  %v5193_v51 = vld [vmem:[%s11985_s3 + $0x438] sm:$0xff]  ;;  %v5194_v61 = vld [vmem:[%s11985_s3 + $0x440] sm:$0xff] }
 0x541   : > { %6028 = vst [vmem:[%s11985_s3 + $0x3a8] sm:$0xff] %v5836_v34  ;;  %v5649_v32 = vadd.f32 %v10418_v19, %v5414_v16  ;;  %v5417_v42 = vmul.f32 %v10438_v44, %v5183_v28  ;;  %v5838_v60 = vmax.f32 %v5646_v7, 0.0  ;;  %v5650_v48 = vadd.f32 %v10422_v35, %v5415_v58  ;;  %v5195_v16 = vld [vmem:[%s11985_s3 + $0x448] sm:$0xff] }
 0x542   : > { %6029 = vst [vmem:[%s11985_s3 + $0x3b0] sm:$0xff] %v5837_v55  ;;  %v5651_v5 = vadd.f32 %v10431_v23, %v5416_v40  ;;  %v5418_v54 = vmul.f32 %v10448_v14, %v5184_v8  ;;  %v5839_v13 = vmax.f32 %v5647_v3, 0.0  ;;  %v5840_v53 = vmax.f32 %v5648_v62, 0.0  ;;  %v5196_v8 = vld [vmem:[%s11985_s3 + $0x450] sm:$0xff]  ;;  %v5197_v3 = vld [vmem:[%s11985_s3 + $0x458] sm:$0xff]  ;;  %v5198_v62 = vld [vmem:[%s11985_s3 + $0x460] sm:$0xff] }
 0x543   : > { %v5841_v59 = vmax.f32 %v5649_v32, 0.0  ;;  %v5652_v50 = vadd.f32 %v10440_v49, %v5417_v42  ;;  %6030 = vst [vmem:[%s11985_s3 + $0x3b8] sm:$0xff] %v5838_v60  ;;  %v5842_v1 = vmax.f32 %v5650_v48, 0.0  ;;  %v5419_v9 = vmul.f32 %v10470_v39, %v5185_v27  ;;  %v5199_v48 = vld [vmem:[%s11985_s3 + $0x468] sm:$0xff] }
 0x544   : > { %v5843_v45 = vmax.f32 %v5651_v5, 0.0  ;;  %v5653_v11 = vadd.f32 %v10453_v43, %v5418_v54  ;;  %6031 = vst [vmem:[%s11985_s3 + $0x3c0] sm:$0xff] %v5839_v13  ;;  %6032 = vst [vmem:[%s11985_s3 + $0x3c8] sm:$0xff] %v5840_v53  ;;  %v5420_v25 = vmul.f32 %v10402_v33, %v5186_v36  ;;  %v5421_v26 = vmul.f32 %v10406_v22, %v5187_v52 }
 0x545   : > { %6033 = vst [vmem:[%s11985_s3 + $0x3d0] sm:$0xff] %v5841_v59  ;;  %v5844_v4 = vmax.f32 %v5652_v50, 0.0  ;;  %v5422_v30 = vmul.f32 %v10416_v56, %v5188_v57  ;;  %6034 = vst [vmem:[%s11985_s3 + $0x3d8] sm:$0xff] %v5842_v1  ;;  %v5654_v24 = vadd.f32 %v10485_v18, %v5419_v9  ;;  %v5423_v38 = vmul.f32 %v10420_v2, %v5189_v21  ;;  %v5200_v57 = vld [vmem:[%s11985_s3 + $0x470] sm:$0xff] }
 0x546   : > { %6035 = vst [vmem:[%s11985_s3 + $0x3e0] sm:$0xff] %v5843_v45  ;;  %v5845_v37 = vmax.f32 %v5653_v11, 0.0  ;;  %v5424_v41 = vmul.f32 %v10429_v0, %v5190_v17  ;;  %v5655_v46 = vadd.f32 %v10404_v15, %v5420_v25  ;;  %v5656_v12 = vadd.f32 %v10408_v63, %v5421_v26  ;;  %v5201_v11 = vld [vmem:[%s11985_s3 + $0x478] sm:$0xff]  ;;  %v5202_v26 = vld [vmem:[%s11985_s3 + $0x480] sm:$0xff] }
 0x547   : > { %6036 = vst [vmem:[%s11985_s3 + $0x3e8] sm:$0xff] %v5844_v4  ;;  %v5657_v6 = vadd.f32 %v10418_v19, %v5422_v30  ;;  %v5425_v20 = vmul.f32 %v10438_v44, %v5191_v10  ;;  %v5846_v47 = vmax.f32 %v5654_v24, 0.0  ;;  %v5658_v28 = vadd.f32 %v10422_v35, %v5423_v38  ;;  %v5203_v30 = vld [vmem:[%s11985_s3 + $0x488] sm:$0xff] }
 0x548   : > { %6037 = vst [vmem:[%s11985_s3 + $0x3f0] sm:$0xff] %v5845_v37  ;;  %v5659_v34 = vadd.f32 %v10431_v23, %v5424_v41  ;;  %v5426_v29 = vmul.f32 %v10448_v14, %v5192_v31  ;;  %v5847_v55 = vmax.f32 %v5655_v46, 0.0  ;;  %v5848_v7 = vmax.f32 %v5656_v12, 0.0  ;;  %v5204_v31 = vld [vmem:[%s11985_s3 + $0x490] sm:$0xff]  ;;  %v5205_v46 = vld [vmem:[%s11985_s3 + $0x498] sm:$0xff]  ;;  %v5206_v12 = vld [vmem:[%s11985_s3 + $0x4a0] sm:$0xff] }
 0x549   : > { %v5849_v58 = vmax.f32 %v5657_v6, 0.0  ;;  %v5660_v40 = vadd.f32 %v10440_v49, %v5425_v20  ;;  %6038 = vst [vmem:[%s11985_s3 + $0x3f8] sm:$0xff] %v5846_v47  ;;  %v5850_v32 = vmax.f32 %v5658_v28, 0.0  ;;  %v5427_v60 = vmul.f32 %v10470_v39, %v5193_v51  ;;  %v5207_v28 = vld [vmem:[%s11985_s3 + $0x4a8] sm:$0xff] }
 0x54a   : > { %v5851_v42 = vmax.f32 %v5659_v34, 0.0  ;;  %v5661_v27 = vadd.f32 %v10453_v43, %v5426_v29  ;;  %6039 = vst [vmem:[%s11985_s3 + $0x400] sm:$0xff] %v5847_v55  ;;  %6040 = vst [vmem:[%s11985_s3 + $0x408] sm:$0xff] %v5848_v7  ;;  %v5428_v54 = vmul.f32 %v10402_v33, %v5194_v61  ;;  %v5429_v36 = vmul.f32 %v10406_v22, %v5195_v16 }
 0x54b   : > { %6041 = vst [vmem:[%s11985_s3 + $0x410] sm:$0xff] %v5849_v58  ;;  %v5852_v5 = vmax.f32 %v5660_v40, 0.0  ;;  %v5430_v52 = vmul.f32 %v10416_v56, %v5196_v8  ;;  %6042 = vst [vmem:[%s11985_s3 + $0x418] sm:$0xff] %v5850_v32  ;;  %v5662_v53 = vadd.f32 %v10485_v18, %v5427_v60  ;;  %v5431_v59 = vmul.f32 %v10420_v2, %v5197_v3  ;;  %v5208_v8 = vld [vmem:[%s11985_s3 + $0x4b0] sm:$0xff] }
 0x54c   : > { %6043 = vst [vmem:[%s11985_s3 + $0x420] sm:$0xff] %v5851_v42  ;;  %v5853_v13 = vmax.f32 %v5661_v27, 0.0  ;;  %v5432_v50 = vmul.f32 %v10429_v0, %v5198_v62  ;;  %v5663_v21 = vadd.f32 %v10404_v15, %v5428_v54  ;;  %v5664_v17 = vadd.f32 %v10408_v63, %v5429_v36  ;;  %v5209_v27 = vld [vmem:[%s11985_s3 + $0x4b8] sm:$0xff]  ;;  %v5210_v36 = vld [vmem:[%s11985_s3 + $0x4c0] sm:$0xff] }
 0x54d   : > { %6044 = vst [vmem:[%s11985_s3 + $0x428] sm:$0xff] %v5852_v5  ;;  %v5665_v1 = vadd.f32 %v10418_v19, %v5430_v52  ;;  %v5433_v45 = vmul.f32 %v10438_v44, %v5199_v48  ;;  %v5854_v9 = vmax.f32 %v5662_v53, 0.0  ;;  %v5666_v10 = vadd.f32 %v10422_v35, %v5431_v59  ;;  %v5211_v52 = vld [vmem:[%s11985_s3 + $0x4c8] sm:$0xff] }
 0x54e   : > { %6045 = vst [vmem:[%s11985_s3 + $0x430] sm:$0xff] %v5853_v13  ;;  %v5667_v4 = vadd.f32 %v10431_v23, %v5432_v50  ;;  %v5434_v25 = vmul.f32 %v10448_v14, %v5200_v57  ;;  %v5855_v37 = vmax.f32 %v5663_v21, 0.0  ;;  %v5856_v24 = vmax.f32 %v5664_v17, 0.0  ;;  %v5212_v57 = vld [vmem:[%s11985_s3 + $0x4d0] sm:$0xff]  ;;  %v5213_v21 = vld [vmem:[%s11985_s3 + $0x4d8] sm:$0xff]  ;;  %v5214_v17 = vld [vmem:[%s11985_s3 + $0x4e0] sm:$0xff] }
 0x54f   : > { %v5857_v38 = vmax.f32 %v5665_v1, 0.0  ;;  %v5668_v41 = vadd.f32 %v10440_v49, %v5433_v45  ;;  %6046 = vst [vmem:[%s11985_s3 + $0x438] sm:$0xff] %v5854_v9  ;;  %v5858_v6 = vmax.f32 %v5666_v10, 0.0  ;;  %v5435_v47 = vmul.f32 %v10470_v39, %v5201_v11  ;;  %v5215_v10 = vld [vmem:[%s11985_s3 + $0x4e8] sm:$0xff] }
 0x550   : > { %v5859_v20 = vmax.f32 %v5667_v4, 0.0  ;;  %v5669_v51 = vadd.f32 %v10453_v43, %v5434_v25  ;;  %6047 = vst [vmem:[%s11985_s3 + $0x440] sm:$0xff] %v5855_v37  ;;  %6048 = vst [vmem:[%s11985_s3 + $0x448] sm:$0xff] %v5856_v24  ;;  %v5436_v29 = vmul.f32 %v10402_v33, %v5202_v26  ;;  %v5437_v61 = vmul.f32 %v10406_v22, %v5203_v30 }
 0x551   : > { %6049 = vst [vmem:[%s11985_s3 + $0x450] sm:$0xff] %v5857_v38  ;;  %v5860_v34 = vmax.f32 %v5668_v41, 0.0  ;;  %v5438_v16 = vmul.f32 %v10416_v56, %v5204_v31  ;;  %6050 = vst [vmem:[%s11985_s3 + $0x458] sm:$0xff] %v5858_v6  ;;  %v5670_v7 = vadd.f32 %v10485_v18, %v5435_v47  ;;  %v5439_v58 = vmul.f32 %v10420_v2, %v5205_v46  ;;  %v5216_v31 = vld [vmem:[%s11985_s3 + $0x4f0] sm:$0xff] }
 0x552   : > { %6051 = vst [vmem:[%s11985_s3 + $0x460] sm:$0xff] %v5859_v20  ;;  %v5861_v55 = vmax.f32 %v5669_v51, 0.0  ;;  %v5440_v40 = vmul.f32 %v10429_v0, %v5206_v12  ;;  %v5671_v3 = vadd.f32 %v10404_v15, %v5436_v29  ;;  %v5672_v62 = vadd.f32 %v10408_v63, %v5437_v61  ;;  %v5217_v51 = vld [vmem:[%s11985_s3 + $0x4f8] sm:$0xff]  ;;  %v5218_v61 = vld [vmem:[%s11985_s3 + $0x500] sm:$0xff] }
 0x553   : > { %6052 = vst [vmem:[%s11985_s3 + $0x468] sm:$0xff] %v5860_v34  ;;  %v5673_v32 = vadd.f32 %v10418_v19, %v5438_v16  ;;  %v5441_v42 = vmul.f32 %v10438_v44, %v5207_v28  ;;  %v5862_v60 = vmax.f32 %v5670_v7, 0.0  ;;  %v5674_v48 = vadd.f32 %v10422_v35, %v5439_v58  ;;  %v5219_v16 = vld [vmem:[%s11985_s3 + $0x508] sm:$0xff] }
 0x554   : > { %6053 = vst [vmem:[%s11985_s3 + $0x470] sm:$0xff] %v5861_v55  ;;  %v5675_v5 = vadd.f32 %v10431_v23, %v5440_v40  ;;  %v5442_v54 = vmul.f32 %v10448_v14, %v5208_v8  ;;  %v5863_v13 = vmax.f32 %v5671_v3, 0.0  ;;  %v5864_v53 = vmax.f32 %v5672_v62, 0.0  ;;  %v5220_v8 = vld [vmem:[%s11985_s3 + $0x510] sm:$0xff]  ;;  %v5221_v3 = vld [vmem:[%s11985_s3 + $0x518] sm:$0xff]  ;;  %v5222_v62 = vld [vmem:[%s11985_s3 + $0x520] sm:$0xff] }
 0x555   : > { %v5865_v59 = vmax.f32 %v5673_v32, 0.0  ;;  %v5676_v50 = vadd.f32 %v10440_v49, %v5441_v42  ;;  %6054 = vst [vmem:[%s11985_s3 + $0x478] sm:$0xff] %v5862_v60  ;;  %v5866_v1 = vmax.f32 %v5674_v48, 0.0  ;;  %v5443_v9 = vmul.f32 %v10470_v39, %v5209_v27  ;;  %v5223_v48 = vld [vmem:[%s11985_s3 + $0x528] sm:$0xff] }
 0x556   : > { %v5867_v45 = vmax.f32 %v5675_v5, 0.0  ;;  %v5677_v11 = vadd.f32 %v10453_v43, %v5442_v54  ;;  %6055 = vst [vmem:[%s11985_s3 + $0x480] sm:$0xff] %v5863_v13  ;;  %6056 = vst [vmem:[%s11985_s3 + $0x488] sm:$0xff] %v5864_v53  ;;  %v5444_v25 = vmul.f32 %v10402_v33, %v5210_v36  ;;  %v5445_v26 = vmul.f32 %v10406_v22, %v5211_v52 }
 0x557   : > { %6057 = vst [vmem:[%s11985_s3 + $0x490] sm:$0xff] %v5865_v59  ;;  %v5868_v4 = vmax.f32 %v5676_v50, 0.0  ;;  %v5446_v30 = vmul.f32 %v10416_v56, %v5212_v57  ;;  %6058 = vst [vmem:[%s11985_s3 + $0x498] sm:$0xff] %v5866_v1  ;;  %v5678_v24 = vadd.f32 %v10485_v18, %v5443_v9  ;;  %v5447_v38 = vmul.f32 %v10420_v2, %v5213_v21  ;;  %v5224_v57 = vld [vmem:[%s11985_s3 + $0x530] sm:$0xff] }
 0x558   : > { %6059 = vst [vmem:[%s11985_s3 + $0x4a0] sm:$0xff] %v5867_v45  ;;  %v5869_v37 = vmax.f32 %v5677_v11, 0.0  ;;  %v5448_v41 = vmul.f32 %v10429_v0, %v5214_v17  ;;  %v5679_v46 = vadd.f32 %v10404_v15, %v5444_v25  ;;  %v5680_v12 = vadd.f32 %v10408_v63, %v5445_v26  ;;  %v5225_v11 = vld [vmem:[%s11985_s3 + $0x538] sm:$0xff]  ;;  %v5226_v26 = vld [vmem:[%s11985_s3 + $0x540] sm:$0xff] }
 0x559   : > { %6060 = vst [vmem:[%s11985_s3 + $0x4a8] sm:$0xff] %v5868_v4  ;;  %v5681_v6 = vadd.f32 %v10418_v19, %v5446_v30  ;;  %v5449_v20 = vmul.f32 %v10438_v44, %v5215_v10  ;;  %v5870_v47 = vmax.f32 %v5678_v24, 0.0  ;;  %v5682_v28 = vadd.f32 %v10422_v35, %v5447_v38  ;;  %v5227_v30 = vld [vmem:[%s11985_s3 + $0x548] sm:$0xff] }
 0x55a   : > { %6061 = vst [vmem:[%s11985_s3 + $0x4b0] sm:$0xff] %v5869_v37  ;;  %v5683_v34 = vadd.f32 %v10431_v23, %v5448_v41  ;;  %v5450_v29 = vmul.f32 %v10448_v14, %v5216_v31  ;;  %v5871_v55 = vmax.f32 %v5679_v46, 0.0  ;;  %v5872_v7 = vmax.f32 %v5680_v12, 0.0  ;;  %v5228_v31 = vld [vmem:[%s11985_s3 + $0x550] sm:$0xff]  ;;  %v5229_v46 = vld [vmem:[%s11985_s3 + $0x558] sm:$0xff]  ;;  %v5230_v12 = vld [vmem:[%s11985_s3 + $0x560] sm:$0xff] }
 0x55b   : > { %v5873_v58 = vmax.f32 %v5681_v6, 0.0  ;;  %v5684_v40 = vadd.f32 %v10440_v49, %v5449_v20  ;;  %6062 = vst [vmem:[%s11985_s3 + $0x4b8] sm:$0xff] %v5870_v47  ;;  %v5874_v32 = vmax.f32 %v5682_v28, 0.0  ;;  %v5451_v60 = vmul.f32 %v10470_v39, %v5217_v51  ;;  %v5231_v28 = vld [vmem:[%s11985_s3 + $0x568] sm:$0xff] }
 0x55c   : > { %v5875_v42 = vmax.f32 %v5683_v34, 0.0  ;;  %v5685_v27 = vadd.f32 %v10453_v43, %v5450_v29  ;;  %6063 = vst [vmem:[%s11985_s3 + $0x4c0] sm:$0xff] %v5871_v55  ;;  %6064 = vst [vmem:[%s11985_s3 + $0x4c8] sm:$0xff] %v5872_v7  ;;  %v5452_v54 = vmul.f32 %v10402_v33, %v5218_v61  ;;  %v5453_v36 = vmul.f32 %v10406_v22, %v5219_v16 }
 0x55d   : > { %6065 = vst [vmem:[%s11985_s3 + $0x4d0] sm:$0xff] %v5873_v58  ;;  %v5876_v5 = vmax.f32 %v5684_v40, 0.0  ;;  %v5454_v52 = vmul.f32 %v10416_v56, %v5220_v8  ;;  %6066 = vst [vmem:[%s11985_s3 + $0x4d8] sm:$0xff] %v5874_v32  ;;  %v5686_v53 = vadd.f32 %v10485_v18, %v5451_v60  ;;  %v5455_v59 = vmul.f32 %v10420_v2, %v5221_v3  ;;  %v5232_v8 = vld [vmem:[%s11985_s3 + $0x570] sm:$0xff] }
 0x55e   : > { %6067 = vst [vmem:[%s11985_s3 + $0x4e0] sm:$0xff] %v5875_v42  ;;  %v5877_v13 = vmax.f32 %v5685_v27, 0.0  ;;  %v5456_v50 = vmul.f32 %v10429_v0, %v5222_v62  ;;  %v5687_v21 = vadd.f32 %v10404_v15, %v5452_v54  ;;  %v5688_v17 = vadd.f32 %v10408_v63, %v5453_v36  ;;  %v5233_v27 = vld [vmem:[%s11985_s3 + $0x578] sm:$0xff]  ;;  %v5234_v36 = vld [vmem:[%s11985_s3 + $0x580] sm:$0xff] }
 0x55f   : > { %6068 = vst [vmem:[%s11985_s3 + $0x4e8] sm:$0xff] %v5876_v5  ;;  %v5689_v1 = vadd.f32 %v10418_v19, %v5454_v52  ;;  %v5457_v45 = vmul.f32 %v10438_v44, %v5223_v48  ;;  %v5878_v9 = vmax.f32 %v5686_v53, 0.0  ;;  %v5690_v10 = vadd.f32 %v10422_v35, %v5455_v59  ;;  %v5235_v52 = vld [vmem:[%s11985_s3 + $0x588] sm:$0xff] }
 0x560   : > { %6069 = vst [vmem:[%s11985_s3 + $0x4f0] sm:$0xff] %v5877_v13  ;;  %v5691_v4 = vadd.f32 %v10431_v23, %v5456_v50  ;;  %v5458_v25 = vmul.f32 %v10448_v14, %v5224_v57  ;;  %v5879_v37 = vmax.f32 %v5687_v21, 0.0  ;;  %v5880_v24 = vmax.f32 %v5688_v17, 0.0  ;;  %v5236_v57 = vld [vmem:[%s11985_s3 + $0x590] sm:$0xff]  ;;  %v5237_v21 = vld [vmem:[%s11985_s3 + $0x598] sm:$0xff]  ;;  %v5238_v17 = vld [vmem:[%s11985_s3 + $0x5a0] sm:$0xff] }
 0x561   : > { %v5881_v38 = vmax.f32 %v5689_v1, 0.0  ;;  %v5692_v41 = vadd.f32 %v10440_v49, %v5457_v45  ;;  %6070 = vst [vmem:[%s11985_s3 + $0x4f8] sm:$0xff] %v5878_v9  ;;  %v5882_v6 = vmax.f32 %v5690_v10, 0.0  ;;  %v5459_v47 = vmul.f32 %v10470_v39, %v5225_v11  ;;  %v5239_v10 = vld [vmem:[%s11985_s3 + $0x5a8] sm:$0xff] }
 0x562   : > { %v5883_v20 = vmax.f32 %v5691_v4, 0.0  ;;  %v5693_v51 = vadd.f32 %v10453_v43, %v5458_v25  ;;  %6071 = vst [vmem:[%s11985_s3 + $0x500] sm:$0xff] %v5879_v37  ;;  %6072 = vst [vmem:[%s11985_s3 + $0x508] sm:$0xff] %v5880_v24  ;;  %v5460_v29 = vmul.f32 %v10402_v33, %v5226_v26  ;;  %v5461_v61 = vmul.f32 %v10406_v22, %v5227_v30 }
 0x563   : > { %6073 = vst [vmem:[%s11985_s3 + $0x510] sm:$0xff] %v5881_v38  ;;  %v5884_v34 = vmax.f32 %v5692_v41, 0.0  ;;  %v5462_v16 = vmul.f32 %v10416_v56, %v5228_v31  ;;  %6074 = vst [vmem:[%s11985_s3 + $0x518] sm:$0xff] %v5882_v6  ;;  %v5694_v7 = vadd.f32 %v10485_v18, %v5459_v47  ;;  %v5463_v58 = vmul.f32 %v10420_v2, %v5229_v46  ;;  %v5240_v31 = vld [vmem:[%s11985_s3 + $0x5b0] sm:$0xff] }
 0x564   : > { %6075 = vst [vmem:[%s11985_s3 + $0x520] sm:$0xff] %v5883_v20  ;;  %v5885_v55 = vmax.f32 %v5693_v51, 0.0  ;;  %v5464_v40 = vmul.f32 %v10429_v0, %v5230_v12  ;;  %v5695_v3 = vadd.f32 %v10404_v15, %v5460_v29  ;;  %v5696_v62 = vadd.f32 %v10408_v63, %v5461_v61  ;;  %v5241_v51 = vld [vmem:[%s11985_s3 + $0x5b8] sm:$0xff]  ;;  %v5242_v61 = vld [vmem:[%s11985_s3 + $0x5c0] sm:$0xff] }
 0x565   : > { %6076 = vst [vmem:[%s11985_s3 + $0x528] sm:$0xff] %v5884_v34  ;;  %v5697_v32 = vadd.f32 %v10418_v19, %v5462_v16  ;;  %v5465_v42 = vmul.f32 %v10438_v44, %v5231_v28  ;;  %v5886_v60 = vmax.f32 %v5694_v7, 0.0  ;;  %v5698_v48 = vadd.f32 %v10422_v35, %v5463_v58  ;;  %v5243_v16 = vld [vmem:[%s11985_s3 + $0x5c8] sm:$0xff] }
 0x566   : > { %6077 = vst [vmem:[%s11985_s3 + $0x530] sm:$0xff] %v5885_v55  ;;  %v5699_v5 = vadd.f32 %v10431_v23, %v5464_v40  ;;  %v5466_v54 = vmul.f32 %v10448_v14, %v5232_v8  ;;  %v5887_v13 = vmax.f32 %v5695_v3, 0.0  ;;  %v5888_v53 = vmax.f32 %v5696_v62, 0.0  ;;  %v5244_v8 = vld [vmem:[%s11985_s3 + $0x5d0] sm:$0xff]  ;;  %v5245_v3 = vld [vmem:[%s11985_s3 + $0x5d8] sm:$0xff]  ;;  %v5246_v62 = vld [vmem:[%s11985_s3 + $0x5e0] sm:$0xff] }
 0x567   : > { %v5889_v59 = vmax.f32 %v5697_v32, 0.0  ;;  %v5700_v50 = vadd.f32 %v10440_v49, %v5465_v42  ;;  %6078 = vst [vmem:[%s11985_s3 + $0x538] sm:$0xff] %v5886_v60  ;;  %v5890_v1 = vmax.f32 %v5698_v48, 0.0  ;;  %v5467_v9 = vmul.f32 %v10470_v39, %v5233_v27  ;;  %v5247_v48 = vld [vmem:[%s11985_s3 + $0x5e8] sm:$0xff] }
 0x568   : > { %v5891_v45 = vmax.f32 %v5699_v5, 0.0  ;;  %v5701_v11 = vadd.f32 %v10453_v43, %v5466_v54  ;;  %6079 = vst [vmem:[%s11985_s3 + $0x540] sm:$0xff] %v5887_v13  ;;  %6080 = vst [vmem:[%s11985_s3 + $0x548] sm:$0xff] %v5888_v53  ;;  %v5468_v25 = vmul.f32 %v10402_v33, %v5234_v36  ;;  %v5469_v26 = vmul.f32 %v10406_v22, %v5235_v52 }
 0x569   : > { %6081 = vst [vmem:[%s11985_s3 + $0x550] sm:$0xff] %v5889_v59  ;;  %v5892_v4 = vmax.f32 %v5700_v50, 0.0  ;;  %v5470_v30 = vmul.f32 %v10416_v56, %v5236_v57  ;;  %6082 = vst [vmem:[%s11985_s3 + $0x558] sm:$0xff] %v5890_v1  ;;  %v5702_v24 = vadd.f32 %v10485_v18, %v5467_v9  ;;  %v5471_v38 = vmul.f32 %v10420_v2, %v5237_v21  ;;  %v5248_v57 = vld [vmem:[%s11985_s3 + $0x5f0] sm:$0xff] }
 0x56a   : > { %6083 = vst [vmem:[%s11985_s3 + $0x560] sm:$0xff] %v5891_v45  ;;  %v5893_v37 = vmax.f32 %v5701_v11, 0.0  ;;  %v5472_v41 = vmul.f32 %v10429_v0, %v5238_v17  ;;  %v5703_v46 = vadd.f32 %v10404_v15, %v5468_v25  ;;  %v5704_v12 = vadd.f32 %v10408_v63, %v5469_v26  ;;  %v5249_v17 = vld [vmem:[%s11985_s3 + $0x5f8] sm:$0xff] }
 0x56b   : > { %6084 = vst [vmem:[%s11985_s3 + $0x568] sm:$0xff] %v5892_v4  ;;  %v5705_v6 = vadd.f32 %v10418_v19, %v5470_v30  ;;  %v5473_v20 = vmul.f32 %v10438_v44, %v5239_v10  ;;  %v5894_v47 = vmax.f32 %v5702_v24, 0.0  ;;  %v5706_v28 = vadd.f32 %v10422_v35, %v5471_v38 }
 0x56c   : > { %6085 = vst [vmem:[%s11985_s3 + $0x570] sm:$0xff] %v5893_v37  ;;  %v5707_v34 = vadd.f32 %v10431_v23, %v5472_v41  ;;  %v5474_v29 = vmul.f32 %v10448_v14, %v5240_v31  ;;  %v5895_v55 = vmax.f32 %v5703_v46, 0.0  ;;  %v5896_v7 = vmax.f32 %v5704_v12, 0.0 }
 0x56d   : > { %v5897_v58 = vmax.f32 %v5705_v6, 0.0  ;;  %v5708_v40 = vadd.f32 %v10440_v49, %v5473_v20  ;;  %6086 = vst [vmem:[%s11985_s3 + $0x578] sm:$0xff] %v5894_v47  ;;  %v5898_v32 = vmax.f32 %v5706_v28, 0.0  ;;  %v5475_v60 = vmul.f32 %v10470_v39, %v5241_v51 }
 0x56e   : > { %v5899_v42 = vmax.f32 %v5707_v34, 0.0  ;;  %v5709_v27 = vadd.f32 %v10453_v43, %v5474_v29  ;;  %6087 = vst [vmem:[%s11985_s3 + $0x580] sm:$0xff] %v5895_v55  ;;  %6088 = vst [vmem:[%s11985_s3 + $0x588] sm:$0xff] %v5896_v7  ;;  %v5476_v54 = vmul.f32 %v10402_v33, %v5242_v61  ;;  %v5477_v36 = vmul.f32 %v10406_v22, %v5243_v16 }
 0x56f   : > { %6089 = vst [vmem:[%s11985_s3 + $0x590] sm:$0xff] %v5897_v58  ;;  %v5900_v5 = vmax.f32 %v5708_v40, 0.0  ;;  %v5478_v52 = vmul.f32 %v10416_v56, %v5244_v8  ;;  %6090 = vst [vmem:[%s11985_s3 + $0x598] sm:$0xff] %v5898_v32  ;;  %v5710_v53 = vadd.f32 %v10485_v18, %v5475_v60  ;;  %v5479_v33 = vmul.f32 %v10420_v2, %v5245_v3 }
 0x570   : > { %6091 = vst [vmem:[%s11985_s3 + $0x5a0] sm:$0xff] %v5899_v42  ;;  %v5901_v13 = vmax.f32 %v5709_v27, 0.0  ;;  %v5480_v22 = vmul.f32 %v10429_v0, %v5246_v62  ;;  %v5711_v56 = vadd.f32 %v10404_v15, %v5476_v54  ;;  %v5712_v59 = vadd.f32 %v10408_v63, %v5477_v36 }
 0x571   : > { %6092 = vst [vmem:[%s11985_s3 + $0x5a8] sm:$0xff] %v5900_v5  ;;  %v5713_v50 = vadd.f32 %v10418_v19, %v5478_v52  ;;  %v5481_v21 = vmul.f32 %v10438_v44, %v5247_v48  ;;  %v5902_v2 = vmax.f32 %v5710_v53, 0.0  ;;  %v5714_v0 = vadd.f32 %v10422_v35, %v5479_v33 }
 0x572   : > { %6093 = vst [vmem:[%s11985_s3 + $0x5b0] sm:$0xff] %v5901_v13  ;;  %v5715_v1 = vadd.f32 %v10431_v23, %v5480_v22  ;;  %v5482_v15 = vmul.f32 %v10448_v14, %v5248_v57  ;;  %v5903_v63 = vmax.f32 %v5711_v56, 0.0  ;;  %v5904_v45 = vmax.f32 %v5712_v59, 0.0 }
 0x573   : > { %v5905_v19 = vmax.f32 %v5713_v50, 0.0  ;;  %v5716_v44 = vadd.f32 %v10440_v49, %v5481_v21  ;;  %6094 = vst [vmem:[%s11985_s3 + $0x5b8] sm:$0xff] %v5902_v2  ;;  %v5906_v11 = vmax.f32 %v5714_v0, 0.0  ;;  %v5483_v4 = vmul.f32 %v10470_v39, %v5249_v17 }
 0x574   : > { %v5907_v9 = vmax.f32 %v5715_v1, 0.0  ;;  %v5717_v10 = vadd.f32 %v10453_v43, %v5482_v15  ;;  %6095 = vst [vmem:[%s11985_s3 + $0x5c0] sm:$0xff] %v5903_v63  ;;  %6096 = vst [vmem:[%s11985_s3 + $0x5c8] sm:$0xff] %v5904_v45 }
 0x575   : > { %6097 = vst [vmem:[%s11985_s3 + $0x5d0] sm:$0xff] %v5905_v19  ;;  %v5908_v35 = vmax.f32 %v5716_v44, 0.0  ;;  %6098 = vst [vmem:[%s11985_s3 + $0x5d8] sm:$0xff] %v5906_v11  ;;  %v5718_v49 = vadd.f32 %v10485_v18, %v5483_v4 }
 0x576   : > { %6099 = vst [vmem:[%s11985_s3 + $0x5e0] sm:$0xff] %v5907_v9  ;;  %v5909_v23 = vmax.f32 %v5717_v10, 0.0 }
 0x577   : > { %6100 = vst [vmem:[%s11985_s3 + $0x5e8] sm:$0xff] %v5908_v35  ;;  %v5910_v14 = vmax.f32 %v5718_v49, 0.0 }
 0x578   : > { %6101 = vst [vmem:[%s11985_s3 + $0x5f0] sm:$0xff] %v5909_v23 }
 0x579   : > { %6102 = vst [vmem:[%s11985_s3 + $0x5f8] sm:$0xff] %v5910_v14 }
 0x57a PF: > { %s16_s17 = sadd.s32 1, %s7064_s17   ;;  %s12176_s12 = smov %s7048_s13 }
 0x57b   : > { %p13_p2 = scmp.ge.s32.totalorder %s16_s17, 52   ;;  %s12177_s13 = smov %s7052_s14 }
 0x57c   : > { %s12178_s14 = smov %s7138_s24  ;;  %s12179_s15 = smov %s7060_s16 }
 0x57d   : > { %s12180_s16 = smov %s12182_s19  ;;  %15 = sbr.rel (!%p13_p2) target bundleno = 4 (0x4), region = 115 }
 0x584   :  { %6136 = vsyncpa [#allocation4], 1 }
 0x585   :  { %6138 = vsyncpa [#allocation4 + $0x1], 1 }

// kernel: bfe_head_forward.3
= control target key start
LH: loop header
LB: loop body
LE: loop exit
PB: predicated region body
PF: predicated region fallthrough
CT: control target
= control target key end

     0   :  { %s5326_s12 = smov 0   ;;  %s5328_s13 = smov 0   ;;  %s6323_s0 = inlined_call_operand.vmem [shape: bf16[48,9216], index: 0, kind: input, shape index: {}]   ;;  %s6324_s1 = inlined_call_operand.vmem [shape: bf16[9216,512], index: 1, kind: input, shape index: {}]   ;;  %s6325_s2 = inlined_call_operand.vmem [shape: f32[2,512], index: 2, kind: input, shape index: {}]   ;;  %s6326_s3 = inlined_call_operand.vmem [shape: f32[48,512], index: 3, kind: output, shape index: {}]  }
   0x1   :  { %s5330_s14 = smov 0   ;;  %s5332_s15 = smov 0  }
   0x2   :  { %s5334_s16 = smov 0  }
   0x3 LB: > { %s25_s17 = sadd.s32 1, %s5299_s15  ;;  %p48_p1 = scmp.ne.s32.totalorder %s5291_s13, %s5287_s12  ;;  %s5303_s16 = sphi %s5334_s16, %s13_s16   ;;  %s5299_s15 = sphi %s5332_s15, %s6330_s15   ;;  %s5295_s14 = sphi %s5330_s14, %s6329_s14   ;;  %s5291_s13 = sphi %s5328_s13, %s6328_s13   ;;  %s5287_s12 = sphi %s5326_s12, %s6327_s12  }
   0x4   : > { %p26_p0 = scmp.ge.s32.totalorder %s25_s17, 6  ;;  %p49_p2 = scmp.eq.s32.totalorder %s5303_s16, 0 }
   0x5   : > { %s41_s19 = sadd.s32 1, %s5291_s13  ;;  %p4038_p5 = scmp.ge.s32.totalorder %s5303_s16, 6 }
   0x6   : > { %s6332_s17 = smov (%p26_p0, %s25_s17), 0  ;;  %p50_p3 = por %p49_p2, %p48_p1 }
   0x7   : > { %s37_s18 = ssub.s32 %s5299_s15, %s6332_s17  ;;  %165 = sbr.rel (%p4038_p5) target bundleno = 37 (0x25), region = 20 }
   0x8   : > { %p39_p4 = scmp.eq.s32.totalorder %s37_s18, 0 }
   0xa   : > { %s5361_s20 = scalar_select %p39_p4, %s5291_s13, %s41_s19  }
   0xe   : > { %168 = sbr.rel (!%p50_p3) target bundleno = 37 (0x25), region = 24  ;;  %s170_s21 = sand.u32 (%p50_p3), 1, %s5291_s13  }
   0xf   : > { %s4470_s22 = smul.u32 (%p50_p3), 48, %s5299_s15 }
  0x10   : > { %s4592_s23 = smul.u32 (%p50_p3), 288, %s170_s21 }
  0x11   : > { %s5369_s26 = scalar_lea.vmem (%p50_p3), %s6323_s0, %s4470_s22 }
  0x12   : > { %v191_v0 = vld [vmem:[%s5369_s26] sm:$0xff] (%p50_p3)  ;;  %v193_v1 = vld [vmem:[%s5369_s26 + $0x8] sm:$0xff] (%p50_p3)  ;;  %v195_v2 = vld [vmem:[%s5369_s26 + $0x10] sm:$0xff] (%p50_p3)  ;;  %s5374_s27 = scalar_lea.vmem (%p50_p3), [#allocation2], %s4592_s23 }
  0x13   : > { %192 = vst [vmem:[%s5374_s27] sm:$0xff] (%p50_p3), %v191_v0  ;;  %194 = vst [vmem:[%s5374_s27 + $0x8] sm:$0xff] (%p50_p3), %v193_v1  ;;  %v197_v3 = vld [vmem:[%s5369_s26 + $0x18] sm:$0xff] (%p50_p3)  ;;  %v199_v4 = vld [vmem:[%s5369_s26 + $0x20] sm:$0xff] (%p50_p3) }
  0x14   : > { %196 = vst [vmem:[%s5374_s27 + $0x10] sm:$0xff] (%p50_p3), %v195_v2  ;;  %v201_v5 = vld [vmem:[%s5369_s26 + $0x28] sm:$0xff] (%p50_p3)  ;;  %198 = vst [vmem:[%s5374_s27 + $0x18] sm:$0xff] (%p50_p3), %v197_v3  ;;  %v203_v6 = vld [vmem:[%s5369_s26 + $0x120] sm:$0xff] (%p50_p3) }
  0x15   : > { %200 = vst [vmem:[%s5374_s27 + $0x20] sm:$0xff] %v199_v4  ;;  %202 = vst [vmem:[%s5374_s27 + $0x28] sm:$0xff] %v201_v5  ;;  %v205_v7 = vld [vmem:[%s5369_s26 + $0x128] sm:$0xff]  ;;  %v207_v8 = vld [vmem:[%s5369_s26 + $0x130] sm:$0xff] }
  0x16   : > { %204 = vst [vmem:[%s5374_s27 + $0x30] sm:$0xff] %v203_v6  ;;  %206 = vst [vmem:[%s5374_s27 + $0x38] sm:$0xff] %v205_v7  ;;  %v209_v9 = vld [vmem:[%s5369_s26 + $0x138] sm:$0xff]  ;;  %v211_v10 = vld [vmem:[%s5369_s26 + $0x140] sm:$0xff] }
  0x17   : > { %208 = vst [vmem:[%s5374_s27 + $0x40] sm:$0xff] %v207_v8  ;;  %v213_v11 = vld [vmem:[%s5369_s26 + $0x148] sm:$0xff]  ;;  %210 = vst [vmem:[%s5374_s27 + $0x48] sm:$0xff] %v209_v9  ;;  %v215_v12 = vld [vmem:[%s5369_s26 + $0x240] sm:$0xff] }
  0x18   : > { %212 = vst [vmem:[%s5374_s27 + $0x50] sm:$0xff] %v211_v10  ;;  %214 = vst [vmem:[%s5374_s27 + $0x58] sm:$0xff] %v213_v11  ;;  %v217_v13 = vld [vmem:[%s5369_s26 + $0x248] sm:$0xff]  ;;  %v219_v14 = vld [vmem:[%s5369_s26 + $0x250] sm:$0xff] }
  0x19   : > { %216 = vst [vmem:[%s5374_s27 + $0x60] sm:$0xff] %v215_v12  ;;  %218 = vst [vmem:[%s5374_s27 + $0x68] sm:$0xff] %v217_v13  ;;  %v221_v15 = vld [vmem:[%s5369_s26 + $0x258] sm:$0xff]  ;;  %v223_v16 = vld [vmem:[%s5369_s26 + $0x260] sm:$0xff] }
  0x1a   : > { %220 = vst [vmem:[%s5374_s27 + $0x70] sm:$0xff] %v219_v14  ;;  %v225_v17 = vld [vmem:[%s5369_s26 + $0x268] sm:$0xff]  ;;  %222 = vst [vmem:[%s5374_s27 + $0x78] sm:$0xff] %v221_v15  ;;  %v227_v18 = vld [vmem:[%s5369_s26 + $0x360] sm:$0xff] }
  0x1b   : > { %224 = vst [vmem:[%s5374_s27 + $0x80] sm:$0xff] %v223_v16  ;;  %226 = vst [vmem:[%s5374_s27 + $0x88] sm:$0xff] %v225_v17  ;;  %v229_v19 = vld [vmem:[%s5369_s26 + $0x368] sm:$0xff]  ;;  %v231_v20 = vld [vmem:[%s5369_s26 + $0x370] sm:$0xff] }
  0x1c   : > { %228 = vst [vmem:[%s5374_s27 + $0x90] sm:$0xff] %v227_v18  ;;  %230 = vst [vmem:[%s5374_s27 + $0x98] sm:$0xff] %v229_v19  ;;  %v233_v21 = vld [vmem:[%s5369_s26 + $0x378] sm:$0xff]  ;;  %v235_v22 = vld [vmem:[%s5369_s26 + $0x380] sm:$0xff] }
  0x1d   : > { %232 = vst [vmem:[%s5374_s27 + $0xa0] sm:$0xff] %v231_v20  ;;  %v237_v23 = vld [vmem:[%s5369_s26 + $0x388] sm:$0xff]  ;;  %234 = vst [vmem:[%s5374_s27 + $0xa8] sm:$0xff] %v233_v21  ;;  %v239_v24 = vld [vmem:[%s5369_s26 + $0x480] sm:$0xff] }
  0x1e   : > { %236 = vst [vmem:[%s5374_s27 + $0xb0] sm:$0xff] %v235_v22  ;;  %238 = vst [vmem:[%s5374_s27 + $0xb8] sm:$0xff] %v237_v23  ;;  %v241_v25 = vld [vmem:[%s5369_s26 + $0x488] sm:$0xff]  ;;  %v243_v26 = vld [vmem:[%s5369_s26 + $0x490] sm:$0xff] }
  0x1f   : > { %240 = vst [vmem:[%s5374_s27 + $0xc0] sm:$0xff] %v239_v24  ;;  %242 = vst [vmem:[%s5374_s27 + $0xc8] sm:$0xff] %v241_v25  ;;  %v245_v27 = vld [vmem:[%s5369_s26 + $0x498] sm:$0xff]  ;;  %v247_v28 = vld [vmem:[%s5369_s26 + $0x4a0] sm:$0xff] }
  0x20   : > { %244 = vst [vmem:[%s5374_s27 + $0xd0] sm:$0xff] %v243_v26  ;;  %v249_v29 = vld [vmem:[%s5369_s26 + $0x4a8] sm:$0xff]  ;;  %246 = vst [vmem:[%s5374_s27 + $0xd8] sm:$0xff] %v245_v27  ;;  %v251_v30 = vld [vmem:[%s5369_s26 + $0x5a0] sm:$0xff] }
  0x21   : > { %248 = vst [vmem:[%s5374_s27 + $0xe0] sm:$0xff] %v247_v28  ;;  %250 = vst [vmem:[%s5374_s27 + $0xe8] sm:$0xff] %v249_v29  ;;  %v253_v31 = vld [vmem:[%s5369_s26 + $0x5a8] sm:$0xff]  ;;  %v255_v32 = vld [vmem:[%s5369_s26 + $0x5b0] sm:$0xff] }
  0x22   : > { %252 = vst [vmem:[%s5374_s27 + $0xf0] sm:$0xff] %v251_v30  ;;  %254 = vst [vmem:[%s5374_s27 + $0xf8] sm:$0xff] %v253_v31  ;;  %v257_v33 = vld [vmem:[%s5369_s26 + $0x5b8] sm:$0xff]  ;;  %v259_v34 = vld [vmem:[%s5369_s26 + $0x5c0] sm:$0xff] }
  0x23   : > { %256 = vst [vmem:[%s5374_s27 + $0x100] sm:$0xff] %v255_v32  ;;  %v261_v35 = vld [vmem:[%s5369_s26 + $0x5c8] sm:$0xff]  ;;  %258 = vst [vmem:[%s5374_s27 + $0x108] sm:$0xff] %v257_v33 }
  0x24   : > { %260 = vst [vmem:[%s5374_s27 + $0x110] sm:$0xff] %v259_v34  ;;  %262 = vst [vmem:[%s5374_s27 + $0x118] sm:$0xff] %v261_v35 }
  0x25 PF: > { %p4040_p6 = scmp.ge.s32.totalorder %s5303_s16, 1  ;;  %p282_p7 = scmp.lt.s32.totalorder %s5303_s16, 7 }
  0x27   : > { %p283_p8 = pnand %p4040_p6, %p282_p7 }
  0x28   : > { %s289_s28 = sand.u32 (!%p283_p8), 1, %s5287_s12   ;;  %s334_s29 = smul.u32 (!%p283_p8), 192, %s5295_s14 }
  0x29   : > { %286 = sbr.rel (%p283_p8) target bundleno = 697 (0x2b9), region = 51  ;;  %p4043_p10 = scmp.ne.s32.totalorder (!%p283_p8), %s5295_s14, 0 }
  0x2a   : > { %s4593_s30 = smul.u32 (!%p283_p8), 288, %s289_s28  ;;  %p336_p9 = scmp.lt.s32.totalorder (!%p283_p8), %s334_s29, 1151 }
  0x2c   : > { %s5454_s8 = scalar_lea.vmem (!%p283_p8), [#allocation2], %s4593_s30 }
  0x30   : > { %s6334_s29 = smov (!%p336_p9, %s334_s29), 1151  ;;  %367 = sbr.rel (%p4043_p10) target bundleno = 62 (0x3e), region = 59 }
  0x31   : > { %s4471_s4 = sshll.u32 %s6334_s29, 4  ;;  %v5305_v36 = vmov (!%p4043_p10), 0.0  }
  0x32   : > { %s5452_s7 = scalar_lea.vmem %s6324_s1, %s4471_s4  ;;  %368 = vst [vmem:[%s6326_s3] sm:$0xff] (!%p4043_p10), %v5305_v36  ;;  %369 = vst [vmem:[%s6326_s3 + $0x8] sm:$0xff] (!%p4043_p10), %v5305_v36 }
  0x33   : > { %370 = vst [vmem:[%s6326_s3 + $0x10] sm:$0xff] (!%p4043_p10), %v5305_v36  ;;  %371 = vst [vmem:[%s6326_s3 + $0x18] sm:$0xff] (!%p4043_p10), %v5305_v36 }
  0x34   : > { %372 = vst [vmem:[%s6326_s3 + $0x20] sm:$0xff] (!%p4043_p10), %v5305_v36  ;;  %373 = vst [vmem:[%s6326_s3 + $0x28] sm:$0xff] (!%p4043_p10), %v5305_v36 }
  0x35   : > { %374 = vst [vmem:[%s6326_s3 + $0x30] sm:$0xff] (!%p4043_p10), %v5305_v36  ;;  %375 = vst [vmem:[%s6326_s3 + $0x38] sm:$0xff] (!%p4043_p10), %v5305_v36 }
  0x36   : > { %376 = vst [vmem:[%s6326_s3 + $0x40] sm:$0xff] (!%p4043_p10), %v5305_v36  ;;  %377 = vst [vmem:[%s6326_s3 + $0x48] sm:$0xff] (!%p4043_p10), %v5305_v36 }
  0x37   : > { %378 = vst [vmem:[%s6326_s3 + $0x50] sm:$0xff] %v5305_v36  ;;  %379 = vst [vmem:[%s6326_s3 + $0x58] sm:$0xff] %v5305_v36 }
  0x38   : > { %380 = vst [vmem:[%s6326_s3 + $0x60] sm:$0xff] %v5305_v36  ;;  %381 = vst [vmem:[%s6326_s3 + $0x68] sm:$0xff] %v5305_v36 }
  0x39   : > { %382 = vst [vmem:[%s6326_s3 + $0x70] sm:$0xff] %v5305_v36  ;;  %383 = vst [vmem:[%s6326_s3 + $0x78] sm:$0xff] %v5305_v36 }
  0x3a   : > { %384 = vst [vmem:[%s6326_s3 + $0x80] sm:$0xff] %v5305_v36  ;;  %385 = vst [vmem:[%s6326_s3 + $0x88] sm:$0xff] %v5305_v36 }
  0x3b   : > { %386 = vst [vmem:[%s6326_s3 + $0x90] sm:$0xff] %v5305_v36  ;;  %387 = vst [vmem:[%s6326_s3 + $0x98] sm:$0xff] %v5305_v36 }
  0x3c   : > { %388 = vst [vmem:[%s6326_s3 + $0xa0] sm:$0xff] %v5305_v36  ;;  %389 = vst [vmem:[%s6326_s3 + $0xa8] sm:$0xff] %v5305_v36 }
  0x3d   : > { %390 = vst [vmem:[%s6326_s3 + $0xb0] sm:$0xff] %v5305_v36  ;;  %391 = vst [vmem:[%s6326_s3 + $0xb8] sm:$0xff] %v5305_v36 }
  0x3e PF: > { %v4635_v37 = vld [vmem:[%s5452_s7 + $0x4] ss:$16 sps:$4 sm:$0xff]   ;;  %v4637_v38 = vld [vmem:[%s5452_s7 + $0xc] ss:$16 sps:$4 sm:$0xff]   ;;  %v4639_v39 = vld [vmem:[%s5452_s7] ss:$16 sps:$4 sm:$0xff]  }
  0x3f   : > { %2936 = vmatprep.subr.bf16.mxu0 %v4635_v37  ;;  %v4640_v40 = vld [vmem:[%s5452_s7 + $0x8] ss:$16 sps:$4 sm:$0xff]   ;;  %3314 = vmatprep.subr.bf16.mxu1 %v4637_v38  ;;  %v4641_v41 = vld [vmem:[%s5452_s7 + $0x24] ss:$16 sps:$4 sm:$0xff]   ;;  %v4643_v42 = vld [vmem:[%s5452_s7 + $0x2c] ss:$16 sps:$4 sm:$0xff]  }
  0x40   : > { %2937 = vmatpush1.bf16.msra.mxu0 %v4639_v39  ;;  %3315 = vmatpush1.bf16.msra.mxu1 %v4640_v40  ;;  %v4645_v43 = vld [vmem:[%s5452_s7 + $0x20] ss:$16 sps:$4 sm:$0xff]   ;;  %v4646_v44 = vld [vmem:[%s5452_s7 + $0x28] ss:$16 sps:$4 sm:$0xff]   ;;  %v4647_v45 = vld [vmem:[%s5452_s7 + $0x44] ss:$16 sps:$4 sm:$0xff]  }
  0x41   : > { %2938 = vmatprep.subr.bf16.mxu0 %v4641_v41  ;;  %3316 = vmatprep.subr.bf16.mxu1 %v4643_v42  ;;  %v4649_v46 = vld [vmem:[%s5452_s7 + $0x4c] ss:$16 sps:$4 sm:$0xff]   ;;  %v4651_v47 = vld [vmem:[%s5452_s7 + $0x40] ss:$16 sps:$4 sm:$0xff]   ;;  %v4652_v48 = vld [vmem:[%s5452_s7 + $0x48] ss:$16 sps:$4 sm:$0xff]  }
  0x42   : > { %v4653_v49 = vld [vmem:[%s5452_s7 + $0x64] ss:$16 sps:$4 sm:$0xff]   ;;  %v4655_v50 = vld [vmem:[%s5452_s7 + $0x6c] ss:$16 sps:$4 sm:$0xff]   ;;  %v4657_v51 = vld [vmem:[%s5452_s7 + $0x60] ss:$16 sps:$4 sm:$0xff]  }
  0x43   : > { %v4658_v52 = vld [vmem:[%s5452_s7 + $0x68] ss:$16 sps:$4 sm:$0xff]   ;;  %v4659_v53 = vld [vmem:[%s5452_s7 + $0x84] ss:$16 sps:$4 sm:$0xff]   ;;  %v4661_v54 = vld [vmem:[%s5452_s7 + $0x8c] ss:$16 sps:$4 sm:$0xff]  }
  0x44   : > { %2939 = vmatpush1.bf16.msra.mxu0 %v4645_v43  ;;  %3317 = vmatpush1.bf16.msra.mxu1 %v4646_v44  ;;  %v4663_v55 = vld [vmem:[%s5452_s7 + $0x80] ss:$16 sps:$4 sm:$0xff]   ;;  %v4664_v56 = vld [vmem:[%s5452_s7 + $0x88] ss:$16 sps:$4 sm:$0xff]   ;;  %v4665_v57 = vld [vmem:[%s5452_s7 + $0xa4] ss:$16 sps:$4 sm:$0xff]  }
  0x45   : > { %2940 = vmatprep.subr.bf16.mxu0 %v4647_v45  ;;  %3318 = vmatprep.subr.bf16.mxu1 %v4649_v46  ;;  %v4667_v58 = vld [vmem:[%s5452_s7 + $0xac] ss:$16 sps:$4 sm:$0xff]   ;;  %v4669_v59 = vld [vmem:[%s5452_s7 + $0xa0] ss:$16 sps:$4 sm:$0xff]   ;;  %v4670_v60 = vld [vmem:[%s5452_s7 + $0xa8] ss:$16 sps:$4 sm:$0xff]  }
  0x46   : > { %v4671_v61 = vld [vmem:[%s5452_s7 + $0xc4] ss:$16 sps:$4 sm:$0xff]   ;;  %v4673_v62 = vld [vmem:[%s5452_s7 + $0xcc] ss:$16 sps:$4 sm:$0xff]   ;;  %v4675_v63 = vld [vmem:[%s5452_s7 + $0xc0] ss:$16 sps:$4 sm:$0xff]  }
  0x47   : > { %v4676_v0 = vld [vmem:[%s5452_s7 + $0xc8] ss:$16 sps:$4 sm:$0xff]   ;;  %v4677_v1 = vld [vmem:[%s5452_s7 + $0xe4] ss:$16 sps:$4 sm:$0xff]   ;;  %v4679_v2 = vld [vmem:[%s5452_s7 + $0xec] ss:$16 sps:$4 sm:$0xff]  }
  0x48   : > { %2941 = vmatpush1.bf16.msra.mxu0 %v4651_v47  ;;  %3319 = vmatpush1.bf16.msra.mxu1 %v4652_v48  ;;  %v4681_v3 = vld [vmem:[%s5452_s7 + $0xe0] ss:$16 sps:$4 sm:$0xff]   ;;  %v4682_v4 = vld [vmem:[%s5452_s7 + $0xe8] ss:$16 sps:$4 sm:$0xff]   ;;  %v4683_v5 = vld [vmem:[%s5452_s7 + $0x104] ss:$16 sps:$4 sm:$0xff]  }
  0x49   : > { %2942 = vmatprep.subr.bf16.mxu0 %v4653_v49  ;;  %3320 = vmatprep.subr.bf16.mxu1 %v4655_v50  ;;  %v4685_v6 = vld [vmem:[%s5452_s7 + $0x10c] ss:$16 sps:$4 sm:$0xff]   ;;  %v4687_v7 = vld [vmem:[%s5452_s7 + $0x100] ss:$16 sps:$4 sm:$0xff]   ;;  %v4688_v8 = vld [vmem:[%s5452_s7 + $0x108] ss:$16 sps:$4 sm:$0xff]  }
  0x4a   : > { %v4689_v9 = vld [vmem:[%s5452_s7 + $0x124] ss:$16 sps:$4 sm:$0xff]   ;;  %v4691_v10 = vld [vmem:[%s5452_s7 + $0x12c] ss:$16 sps:$4 sm:$0xff]   ;;  %v4693_v11 = vld [vmem:[%s5452_s7 + $0x120] ss:$16 sps:$4 sm:$0xff]  }
  0x4b   : > { %v4694_v12 = vld [vmem:[%s5452_s7 + $0x128] ss:$16 sps:$4 sm:$0xff]   ;;  %v4695_v13 = vld [vmem:[%s5452_s7 + $0x144] ss:$16 sps:$4 sm:$0xff]   ;;  %v4697_v14 = vld [vmem:[%s5452_s7 + $0x14c] ss:$16 sps:$4 sm:$0xff]  }
  0x4c   : > { %2943 = vmatpush1.bf16.msra.mxu0 %v4657_v51  ;;  %3321 = vmatpush1.bf16.msra.mxu1 %v4658_v52  ;;  %v4699_v15 = vld [vmem:[%s5452_s7 + $0x140] ss:$16 sps:$4 sm:$0xff]   ;;  %v4700_v16 = vld [vmem:[%s5452_s7 + $0x148] ss:$16 sps:$4 sm:$0xff]   ;;  %v4701_v17 = vld [vmem:[%s5452_s7 + $0x164] ss:$16 sps:$4 sm:$0xff]  }
  0x4d   : > { %2944 = vmatprep.subr.bf16.mxu0 %v4659_v53  ;;  %3322 = vmatprep.subr.bf16.mxu1 %v4661_v54  ;;  %v4703_v18 = vld [vmem:[%s5452_s7 + $0x16c] ss:$16 sps:$4 sm:$0xff]   ;;  %v4705_v19 = vld [vmem:[%s5452_s7 + $0x160] ss:$16 sps:$4 sm:$0xff]   ;;  %v4706_v20 = vld [vmem:[%s5452_s7 + $0x168] ss:$16 sps:$4 sm:$0xff]  }
  0x4e   : > { %v4733_v21 = vld [vmem:[%s5454_s8 + $0x4] ss:$48 sps:$4 sm:$0xff]   ;;  %v4709_v23 = vld [vmem:[%s5452_s7 + $0x18c] ss:$16 sps:$4 sm:$0xff]   ;;  %v4711_v24 = vld [vmem:[%s5452_s7 + $0x180] ss:$16 sps:$4 sm:$0xff]  }
  0x4f   : > { %v4707_v22 = vld [vmem:[%s5452_s7 + $0x184] ss:$16 sps:$4 sm:$0xff]   ;;  %2968 = vmatprep.mubr.bf16.mxu0 %v4733_v21  ;;  %3346 = vmatprep.mubr.bf16.mxu1 %v4733_v21  ;;  %v4712_v25 = vld [vmem:[%s5452_s7 + $0x188] ss:$16 sps:$4 sm:$0xff]   ;;  %v4715_v27 = vld [vmem:[%s5452_s7 + $0x1ac] ss:$16 sps:$4 sm:$0xff]  }
  0x50   : > { %2945 = vmatpush1.bf16.msra.mxu0 %v4663_v55  ;;  %3323 = vmatpush1.bf16.msra.mxu1 %v4664_v56  ;;  %v4713_v26 = vld [vmem:[%s5452_s7 + $0x1a4] ss:$16 sps:$4 sm:$0xff]   ;;  %v4717_v28 = vld [vmem:[%s5452_s7 + $0x1a0] ss:$16 sps:$4 sm:$0xff]   ;;  %v4718_v29 = vld [vmem:[%s5452_s7 + $0x1a8] ss:$16 sps:$4 sm:$0xff]  }
  0x51   : > { %2946 = vmatprep.subr.bf16.mxu0 %v4665_v57  ;;  %3324 = vmatprep.subr.bf16.mxu1 %v4667_v58  ;;  %v4719_v30 = vld [vmem:[%s5452_s7 + $0x1c4] ss:$16 sps:$4 sm:$0xff]   ;;  %v4721_v31 = vld [vmem:[%s5452_s7 + $0x1cc] ss:$16 sps:$4 sm:$0xff]   ;;  %v4723_v32 = vld [vmem:[%s5452_s7 + $0x1c0] ss:$16 sps:$4 sm:$0xff]  }
  0x52   : > { %v4724_v33 = vld [vmem:[%s5452_s7 + $0x1c8] ss:$16 sps:$4 sm:$0xff]   ;;  %v4725_v34 = vld [vmem:[%s5452_s7 + $0x1e4] ss:$16 sps:$4 sm:$0xff]   ;;  %v4727_v35 = vld [vmem:[%s5452_s7 + $0x1ec] ss:$16 sps:$4 sm:$0xff]  }
  0x53   : > { %v4729_v36 = vld [vmem:[%s5452_s7 + $0x1e0] ss:$16 sps:$4 sm:$0xff]   ;;  %v4730_v37 = vld [vmem:[%s5452_s7 + $0x1e8] ss:$16 sps:$4 sm:$0xff]   ;;  %v4736_v38 = vld [vmem:[%s5452_s7 + $0x204] ss:$16 sps:$4 sm:$0xff]  }
  0x54   : > { %2947 = vmatpush1.bf16.msra.mxu0 %v4669_v59  ;;  %3325 = vmatpush1.bf16.msra.mxu1 %v4670_v60  ;;  %v4739_v39 = vld [vmem:[%s5452_s7 + $0x20c] ss:$16 sps:$4 sm:$0xff]   ;;  %v4731_v40 = vld [vmem:[%s5454_s8] ss:$48 sps:$4 sm:$0xff]   ;;  %v4737_v42 = vld [vmem:[%s5452_s7 + $0x208] ss:$16 sps:$4 sm:$0xff]  }
  0x55   : > { %2948 = vmatprep.subr.bf16.mxu0 %v4671_v61  ;;  %3326 = vmatprep.subr.bf16.mxu1 %v4673_v62  ;;  %v4734_v41 = vld [vmem:[%s5452_s7 + $0x200] ss:$16 sps:$4 sm:$0xff]   ;;  %v4742_v43 = vld [vmem:[%s5452_s7 + $0x224] ss:$16 sps:$4 sm:$0xff]   ;;  %v4745_v44 = vld [vmem:[%s5452_s7 + $0x22c] ss:$16 sps:$4 sm:$0xff]  }
  0x56   : > { %v4740_v45 = vld [vmem:[%s5452_s7 + $0x220] ss:$16 sps:$4 sm:$0xff]   ;;  %v4743_v46 = vld [vmem:[%s5452_s7 + $0x228] ss:$16 sps:$4 sm:$0xff]   ;;  %v4748_v47 = vld [vmem:[%s5452_s7 + $0x244] ss:$16 sps:$4 sm:$0xff]  }
  0x57   : > { %v4751_v48 = vld [vmem:[%s5452_s7 + $0x24c] ss:$16 sps:$4 sm:$0xff]   ;;  %v4746_v49 = vld [vmem:[%s5452_s7 + $0x240] ss:$16 sps:$4 sm:$0xff]   ;;  %v4749_v50 = vld [vmem:[%s5452_s7 + $0x248] ss:$16 sps:$4 sm:$0xff]  }
  0x58   : > { %2949 = vmatpush1.bf16.msra.mxu0 %v4675_v63  ;;  %3327 = vmatpush1.bf16.msra.mxu1 %v4676_v0  ;;  %v4754_v51 = vld [vmem:[%s5452_s7 + $0x264] ss:$16 sps:$4 sm:$0xff]   ;;  %v4757_v52 = vld [vmem:[%s5452_s7 + $0x26c] ss:$16 sps:$4 sm:$0xff]   ;;  %v4752_v53 = vld [vmem:[%s5452_s7 + $0x260] ss:$16 sps:$4 sm:$0xff]  }
  0x59   : > { %2950 = vmatprep.subr.bf16.mxu0 %v4677_v1  ;;  %3328 = vmatprep.subr.bf16.mxu1 %v4679_v2  ;;  %v4755_v54 = vld [vmem:[%s5452_s7 + $0x268] ss:$16 sps:$4 sm:$0xff]   ;;  %v4760_v55 = vld [vmem:[%s5452_s7 + $0x284] ss:$16 sps:$4 sm:$0xff]   ;;  %v4763_v57 = vld [vmem:[%s5452_s7 + $0x28c] ss:$16 sps:$4 sm:$0xff]  }
  0x5a   : > { %v4806_v56 = vld [vmem:[%s5454_s8 + $0x64] ss:$48 sps:$4 sm:$0xff]   ;;  %v4758_v58 = vld [vmem:[%s5452_s7 + $0x280] ss:$16 sps:$4 sm:$0xff]   ;;  %v4761_v59 = vld [vmem:[%s5452_s7 + $0x288] ss:$16 sps:$4 sm:$0xff]  }
  0x5b   : > { %v4814_v60 = vld [vmem:[%s5454_s8 + $0x60] ss:$48 sps:$4 sm:$0xff]   ;;  %v4766_v61 = vld [vmem:[%s5452_s7 + $0x2a4] ss:$16 sps:$4 sm:$0xff]   ;;  %v4769_v62 = vld [vmem:[%s5452_s7 + $0x2ac] ss:$16 sps:$4 sm:$0xff]  }
  0x5c   : > { %2951 = vmatpush1.bf16.msra.mxu0 %v4681_v3  ;;  %3329 = vmatpush1.bf16.msra.mxu1 %v4682_v4  ;;  %v4764_v63 = vld [vmem:[%s5452_s7 + $0x2a0] ss:$16 sps:$4 sm:$0xff]   ;;  %v4821_v0 = vld [vmem:[%s5454_s8 + $0xc4] ss:$48 sps:$4 sm:$0xff]   ;;  %v4767_v1 = vld [vmem:[%s5452_s7 + $0x2a8] ss:$16 sps:$4 sm:$0xff]  }
  0x5d   : > { %2952 = vmatprep.subr.bf16.mxu0 %v4683_v5  ;;  %3330 = vmatprep.subr.bf16.mxu1 %v4685_v6  ;;  %v4772_v2 = vld [vmem:[%s5452_s7 + $0x2c4] ss:$16 sps:$4 sm:$0xff]   ;;  %v4775_v3 = vld [vmem:[%s5452_s7 + $0x2cc] ss:$16 sps:$4 sm:$0xff]   ;;  %v4829_v4 = vld [vmem:[%s5454_s8 + $0xc0] ss:$48 sps:$4 sm:$0xff]  }
  0x5e   : > { %v4770_v5 = vld [vmem:[%s5452_s7 + $0x2c0] ss:$16 sps:$4 sm:$0xff]   ;;  %v4773_v6 = vld [vmem:[%s5452_s7 + $0x2c8] ss:$16 sps:$4 sm:$0xff]   ;;  %v4799_v21 = vld [vmem:[%s5452_s7 + $0x34c] ss:$16 sps:$4 sm:$0xff]  }
  0x5f   : > { %p4464_p11 = scmp.ne.s32.totalorder %s5295_s14, 5 }
  0x60   : > { %2953 = vmatpush1.bf16.msra.mxu0 %v4687_v7  ;;  %3331 = vmatpush1.bf16.msra.mxu1 %v4688_v8  ;;  %v4778_v7 = vld [vmem:[%s5452_s7 + $0x2e4] ss:$16 sps:$4 sm:$0xff]   ;;  %v4781_v8 = vld [vmem:[%s5452_s7 + $0x2ec] ss:$16 sps:$4 sm:$0xff]  }
  0x61   : > { %2954 = vmatprep.subr.bf16.mxu0 %v4689_v9  ;;  %3332 = vmatprep.subr.bf16.mxu1 %v4691_v10  ;;  %v4838_v9 = vld [vmem:[%s5454_s8 + $0xc] ss:$48 sps:$4 sm:$0xff]   ;;  %v4776_v10 = vld [vmem:[%s5452_s7 + $0x2e0] ss:$16 sps:$4 sm:$0xff]  }
  0x64   : > { %2955 = vmatpush1.bf16.msra.mxu0 %v4693_v11  ;;  %3333 = vmatpush1.bf16.msra.mxu1 %v4694_v12  ;;  %v4779_v11 = vld [vmem:[%s5452_s7 + $0x2e8] ss:$16 sps:$4 sm:$0xff]   ;;  %v4784_v12 = vld [vmem:[%s5452_s7 + $0x304] ss:$16 sps:$4 sm:$0xff]  }
  0x65   : > { %2956 = vmatprep.subr.bf16.mxu0 %v4695_v13  ;;  %3334 = vmatprep.subr.bf16.mxu1 %v4697_v14  ;;  %v4787_v13 = vld [vmem:[%s5452_s7 + $0x30c] ss:$16 sps:$4 sm:$0xff]   ;;  %v4782_v14 = vld [vmem:[%s5452_s7 + $0x300] ss:$16 sps:$4 sm:$0xff]  }
  0x68   : > { %2957 = vmatpush1.bf16.msra.mxu0 %v4699_v15  ;;  %3335 = vmatpush1.bf16.msra.mxu1 %v4700_v16  ;;  %v4785_v15 = vld [vmem:[%s5452_s7 + $0x308] ss:$16 sps:$4 sm:$0xff]   ;;  %v4790_v16 = vld [vmem:[%s5452_s7 + $0x324] ss:$16 sps:$4 sm:$0xff]  }
  0x69   : > { %2958 = vmatprep.subr.bf16.mxu0 %v4701_v17  ;;  %3336 = vmatprep.subr.bf16.mxu1 %v4703_v18  ;;  %v4793_v17 = vld [vmem:[%s5452_s7 + $0x32c] ss:$16 sps:$4 sm:$0xff]   ;;  %v4788_v18 = vld [vmem:[%s5452_s7 + $0x320] ss:$16 sps:$4 sm:$0xff]  }
  0x6c   : > { %2959 = vmatpush1.bf16.msra.mxu0 %v4705_v19  ;;  %3337 = vmatpush1.bf16.msra.mxu1 %v4706_v20  ;;  %v4791_v19 = vld [vmem:[%s5452_s7 + $0x328] ss:$16 sps:$4 sm:$0xff]   ;;  %v4796_v20 = vld [vmem:[%s5452_s7 + $0x344] ss:$16 sps:$4 sm:$0xff]  }
  0x6d   : > { %2960 = vmatprep.subr.bf16.mxu0 %v4707_v22  ;;  %3338 = vmatprep.subr.bf16.mxu1 %v4709_v23  ;;  %v4794_v22 = vld [vmem:[%s5452_s7 + $0x340] ss:$16 sps:$4 sm:$0xff]   ;;  %v4797_v23 = vld [vmem:[%s5452_s7 + $0x348] ss:$16 sps:$4 sm:$0xff]  }
  0x70   : > { %2961 = vmatpush1.bf16.msra.mxu0 %v4711_v24  ;;  %3339 = vmatpush1.bf16.msra.mxu1 %v4712_v25  ;;  %v4802_v24 = vld [vmem:[%s5452_s7 + $0x364] ss:$16 sps:$4 sm:$0xff]   ;;  %v4805_v25 = vld [vmem:[%s5452_s7 + $0x36c] ss:$16 sps:$4 sm:$0xff]  }
  0x71   : > { %2962 = vmatprep.subr.bf16.mxu0 %v4713_v26  ;;  %3340 = vmatprep.subr.bf16.mxu1 %v4715_v27  ;;  %v4800_v26 = vld [vmem:[%s5452_s7 + $0x360] ss:$16 sps:$4 sm:$0xff]   ;;  %v4803_v27 = vld [vmem:[%s5452_s7 + $0x368] ss:$16 sps:$4 sm:$0xff]  }
  0x74   : > { %2963 = vmatpush1.bf16.msra.mxu0 %v4717_v28  ;;  %3341 = vmatpush1.bf16.msra.mxu1 %v4718_v29  ;;  %v4810_v28 = vld [vmem:[%s5452_s7 + $0x384] ss:$16 sps:$4 sm:$0xff]   ;;  %v4813_v29 = vld [vmem:[%s5452_s7 + $0x38c] ss:$16 sps:$4 sm:$0xff]  }
  0x75   : > { %2964 = vmatprep.subr.bf16.mxu0 %v4719_v30  ;;  %3342 = vmatprep.subr.bf16.mxu1 %v4721_v31  ;;  %v4808_v30 = vld [vmem:[%s5452_s7 + $0x380] ss:$16 sps:$4 sm:$0xff]   ;;  %v4811_v31 = vld [vmem:[%s5452_s7 + $0x388] ss:$16 sps:$4 sm:$0xff]  }
  0x78   : > { %2965 = vmatpush1.bf16.msra.mxu0 %v4723_v32  ;;  %3343 = vmatpush1.bf16.msra.mxu1 %v4724_v33  ;;  %v4817_v32 = vld [vmem:[%s5452_s7 + $0x3a4] ss:$16 sps:$4 sm:$0xff]   ;;  %v4820_v33 = vld [vmem:[%s5452_s7 + $0x3ac] ss:$16 sps:$4 sm:$0xff]  }
  0x79   : > { %2966 = vmatprep.subr.bf16.mxu0 %v4725_v34  ;;  %3344 = vmatprep.subr.bf16.mxu1 %v4727_v35  ;;  %v4815_v34 = vld [vmem:[%s5452_s7 + $0x3a0] ss:$16 sps:$4 sm:$0xff]   ;;  %v4818_v35 = vld [vmem:[%s5452_s7 + $0x3a8] ss:$16 sps:$4 sm:$0xff]  }
  0x7c   : > { %2967 = vmatpush1.bf16.msra.mxu0 %v4729_v36  ;;  %3345 = vmatpush1.bf16.msra.mxu1 %v4730_v37  ;;  %v4825_v36 = vld [vmem:[%s5452_s7 + $0x3c4] ss:$16 sps:$4 sm:$0xff]   ;;  %v4828_v37 = vld [vmem:[%s5452_s7 + $0x3cc] ss:$16 sps:$4 sm:$0xff]  }
  0x7d   : > { %2999 = vmatprep.subr.bf16.mxu0 %v4736_v38  ;;  %3377 = vmatprep.subr.bf16.mxu1 %v4739_v39  ;;  %v4823_v38 = vld [vmem:[%s5452_s7 + $0x3c0] ss:$16 sps:$4 sm:$0xff]   ;;  %v4826_v39 = vld [vmem:[%s5452_s7 + $0x3c8] ss:$16 sps:$4 sm:$0xff]  }
  0x7f   : > { %2969 = vmatmul.mubr.bf16.vlgmr.msra.gmra.mrb[0].mxu0 %v4731_v40  ;;  %3347 = vmatmul.mubr.bf16.vlgmr.msra.gmra.mrb[0].mxu1 %v4731_v40  ;;  %v4832_v40 = vld [vmem:[%s5452_s7 + $0x3e4] ss:$16 sps:$4 sm:$0xff]  }
  0x80   : > { %3000 = vmatpush1.bf16.msra.mxu0 %v4734_v41  ;;  %3378 = vmatpush1.bf16.msra.mxu1 %v4737_v42  ;;  %v4835_v41 = vld [vmem:[%s5452_s7 + $0x3ec] ss:$16 sps:$4 sm:$0xff]   ;;  %v4830_v42 = vld [vmem:[%s5452_s7 + $0x3e0] ss:$16 sps:$4 sm:$0xff]  }
  0x81   : > { %3001 = vmatprep.subr.bf16.mxu0 %v4742_v43  ;;  %3379 = vmatprep.subr.bf16.mxu1 %v4745_v44  ;;  %v4833_v43 = vld [vmem:[%s5452_s7 + $0x3e8] ss:$16 sps:$4 sm:$0xff]   ;;  %v4841_v44 = vld [vmem:[%s5452_s7 + $0x404] ss:$16 sps:$4 sm:$0xff]  }
  0x82   : > { %2978 = vmatprep.mubr.bf16.mxu0 %v4806_v56  ;;  %3356 = vmatprep.mubr.bf16.mxu1 %v4806_v56  ;;  %v4851_v56 = vld [vmem:[%s5452_s7 + $0x440] ss:$16 sps:$4 sm:$0xff]  }
  0x84   : > { %3002 = vmatpush1.bf16.msra.mxu0 %v4740_v45  ;;  %3380 = vmatpush1.bf16.msra.mxu1 %v4743_v46  ;;  %v4844_v45 = vld [vmem:[%s5452_s7 + $0x40c] ss:$16 sps:$4 sm:$0xff]   ;;  %v4836_v46 = vld [vmem:[%s5454_s8 + $0x8] ss:$48 sps:$4 sm:$0xff]  }
  0x85   : > { %3003 = vmatprep.subr.bf16.mxu0 %v4748_v47  ;;  %3381 = vmatprep.subr.bf16.mxu1 %v4751_v48  ;;  %v4839_v47 = vld [vmem:[%s5452_s7 + $0x400] ss:$16 sps:$4 sm:$0xff]   ;;  %v4842_v48 = vld [vmem:[%s5452_s7 + $0x408] ss:$16 sps:$4 sm:$0xff]  }
  0x87   : > { %2979 = vmatmul.mubr.bf16.gmra.mrb[4].mxu0 %v4814_v60  ;;  %3357 = vmatmul.mubr.bf16.gmra.mrb[4].mxu1 %v4814_v60  ;;  %v4862_v60 = vld [vmem:[%s5452_s7 + $0x46c] ss:$16 sps:$4 sm:$0xff]  }
  0x88   : > { %3004 = vmatpush1.bf16.msra.mxu0 %v4746_v49  ;;  %3382 = vmatpush1.bf16.msra.mxu1 %v4749_v50  ;;  %v4847_v49 = vld [vmem:[%s5452_s7 + $0x424] ss:$16 sps:$4 sm:$0xff]   ;;  %v4850_v50 = vld [vmem:[%s5452_s7 + $0x42c] ss:$16 sps:$4 sm:$0xff]  }
  0x89   : > { %3005 = vmatprep.subr.bf16.mxu0 %v4754_v51  ;;  %3383 = vmatprep.subr.bf16.mxu1 %v4757_v52  ;;  %v4911_v51 = vld [vmem:[%s5454_s8 + $0x6c] ss:$48 sps:$4 sm:$0xff]   ;;  %v4845_v52 = vld [vmem:[%s5452_s7 + $0x420] ss:$16 sps:$4 sm:$0xff]  }
  0x8a   : > { %2988 = vmatprep.mubr.bf16.mxu0 %v4821_v0  ;;  %3366 = vmatprep.mubr.bf16.mxu1 %v4821_v0  ;;  %v4865_v0 = vld [vmem:[%s5452_s7 + $0x484] ss:$16 sps:$4 sm:$0xff]  }
  0x8c   : > { %3006 = vmatpush1.bf16.msra.mxu0 %v4752_v53  ;;  %3384 = vmatpush1.bf16.msra.mxu1 %v4755_v54  ;;  %v4848_v53 = vld [vmem:[%s5452_s7 + $0x428] ss:$16 sps:$4 sm:$0xff]   ;;  %v4853_v54 = vld [vmem:[%s5452_s7 + $0x444] ss:$16 sps:$4 sm:$0xff]  }
  0x8d   : > { %3007 = vmatprep.subr.bf16.mxu0 %v4760_v55  ;;  %3385 = vmatprep.subr.bf16.mxu1 %v4763_v57  ;;  %v4856_v55 = vld [vmem:[%s5452_s7 + $0x44c] ss:$16 sps:$4 sm:$0xff]   ;;  %v4854_v57 = vld [vmem:[%s5452_s7 + $0x448] ss:$16 sps:$4 sm:$0xff]  }
  0x8f   : > { %2989 = vmatmul.mubr.bf16.gmra.mrb[8].mxu0 %v4829_v4  ;;  %3367 = vmatmul.mubr.bf16.gmra.mrb[8].mxu1 %v4829_v4  ;;  %v4934_v4 = vld [vmem:[%s5454_s8 + $0xc8] ss:$48 sps:$4 sm:$0xff]  }
  0x90   : > { %3008 = vmatpush1.bf16.msra.mxu0 %v4758_v58  ;;  %3386 = vmatpush1.bf16.msra.mxu1 %v4761_v59  ;;  %v4919_v58 = vld [vmem:[%s5454_s8 + $0x68] ss:$48 sps:$4 sm:$0xff]   ;;  %v4859_v59 = vld [vmem:[%s5452_s7 + $0x464] ss:$16 sps:$4 sm:$0xff]  }
  0x91   : > { %3009 = vmatprep.subr.bf16.mxu0 %v4766_v61  ;;  %3387 = vmatprep.subr.bf16.mxu1 %v4769_v62  ;;  %v4926_v61 = vld [vmem:[%s5454_s8 + $0xcc] ss:$48 sps:$4 sm:$0xff]   ;;  %v4857_v62 = vld [vmem:[%s5452_s7 + $0x460] ss:$16 sps:$4 sm:$0xff]  }
  0x92   : > { %3031 = vmatprep.mubr.bf16.mxu0 %v4838_v9  ;;  %3409 = vmatprep.mubr.bf16.mxu1 %v4838_v9  ;;  %v4872_v9 = vld [vmem:[%s5452_s7 + $0x4a8] ss:$16 sps:$4 sm:$0xff]  }
  0x94   : > { %3010 = vmatpush1.bf16.msra.mxu0 %v4764_v63  ;;  %3388 = vmatpush1.bf16.msra.mxu1 %v4767_v1  ;;  %v4860_v63 = vld [vmem:[%s5452_s7 + $0x468] ss:$16 sps:$4 sm:$0xff]   ;;  %v4868_v1 = vld [vmem:[%s5452_s7 + $0x48c] ss:$16 sps:$4 sm:$0xff]  }
  0x95   : > { %3011 = vmatprep.subr.bf16.mxu0 %v4772_v2  ;;  %3389 = vmatprep.subr.bf16.mxu1 %v4775_v3  ;;  %v4863_v2 = vld [vmem:[%s5452_s7 + $0x480] ss:$16 sps:$4 sm:$0xff]   ;;  %v4866_v3 = vld [vmem:[%s5452_s7 + $0x488] ss:$16 sps:$4 sm:$0xff]  }
  0x98   : > { %3012 = vmatpush1.bf16.msra.mxu0 %v4770_v5  ;;  %3390 = vmatpush1.bf16.msra.mxu1 %v4773_v6  ;;  %v4871_v5 = vld [vmem:[%s5452_s7 + $0x4a4] ss:$16 sps:$4 sm:$0xff]   ;;  %v4874_v6 = vld [vmem:[%s5452_s7 + $0x4ac] ss:$16 sps:$4 sm:$0xff]  }
  0x99   : > { %3013 = vmatprep.subr.bf16.mxu0 %v4778_v7  ;;  %3391 = vmatprep.subr.bf16.mxu1 %v4781_v8  ;;  %v4943_v7 = vld [vmem:[%s5454_s8 + $0x14] ss:$48 sps:$4 sm:$0xff]   ;;  %v4869_v8 = vld [vmem:[%s5452_s7 + $0x4a0] ss:$16 sps:$4 sm:$0xff]  }
  0x9c   : > { %3014 = vmatpush1.bf16.msra.mxu0 %v4776_v10  ;;  %3392 = vmatpush1.bf16.msra.mxu1 %v4779_v11  ;;  %v4877_v10 = vld [vmem:[%s5452_s7 + $0x4c4] ss:$16 sps:$4 sm:$0xff]   ;;  %v4880_v11 = vld [vmem:[%s5452_s7 + $0x4cc] ss:$16 sps:$4 sm:$0xff]  }
  0x9d   : > { %3015 = vmatprep.subr.bf16.mxu0 %v4784_v12  ;;  %3393 = vmatprep.subr.bf16.mxu1 %v4787_v13  ;;  %v4875_v12 = vld [vmem:[%s5452_s7 + $0x4c0] ss:$16 sps:$4 sm:$0xff]   ;;  %v4878_v13 = vld [vmem:[%s5452_s7 + $0x4c8] ss:$16 sps:$4 sm:$0xff]  }
  0xa0   : > { %3016 = vmatpush1.bf16.msra.mxu0 %v4782_v14  ;;  %3394 = vmatpush1.bf16.msra.mxu1 %v4785_v15  ;;  %v4883_v14 = vld [vmem:[%s5452_s7 + $0x4e4] ss:$16 sps:$4 sm:$0xff]   ;;  %v4886_v15 = vld [vmem:[%s5452_s7 + $0x4ec] ss:$16 sps:$4 sm:$0xff]  }
  0xa1   : > { %3017 = vmatprep.subr.bf16.mxu0 %v4790_v16  ;;  %3395 = vmatprep.subr.bf16.mxu1 %v4793_v17  ;;  %v4881_v16 = vld [vmem:[%s5452_s7 + $0x4e0] ss:$16 sps:$4 sm:$0xff]   ;;  %v4884_v17 = vld [vmem:[%s5452_s7 + $0x4e8] ss:$16 sps:$4 sm:$0xff]  }
  0xa4   : > { %3018 = vmatpush1.bf16.msra.mxu0 %v4788_v18  ;;  %3396 = vmatpush1.bf16.msra.mxu1 %v4791_v19  ;;  %v4889_v18 = vld [vmem:[%s5452_s7 + $0x504] ss:$16 sps:$4 sm:$0xff]   ;;  %v4892_v19 = vld [vmem:[%s5452_s7 + $0x50c] ss:$16 sps:$4 sm:$0xff]  }
  0xa5   : > { %3019 = vmatprep.subr.bf16.mxu0 %v4796_v20  ;;  %3397 = vmatprep.subr.bf16.mxu1 %v4799_v21  ;;  %v4887_v20 = vld [vmem:[%s5452_s7 + $0x500] ss:$16 sps:$4 sm:$0xff]   ;;  %v4890_v21 = vld [vmem:[%s5452_s7 + $0x508] ss:$16 sps:$4 sm:$0xff]  }
  0xa8   : > { %3020 = vmatpush1.bf16.msra.mxu0 %v4794_v22  ;;  %3398 = vmatpush1.bf16.msra.mxu1 %v4797_v23  ;;  %v4895_v22 = vld [vmem:[%s5452_s7 + $0x524] ss:$16 sps:$4 sm:$0xff]   ;;  %v4898_v23 = vld [vmem:[%s5452_s7 + $0x52c] ss:$16 sps:$4 sm:$0xff]  }
  0xa9   : > { %3021 = vmatprep.subr.bf16.mxu0 %v4802_v24  ;;  %3399 = vmatprep.subr.bf16.mxu1 %v4805_v25  ;;  %v4893_v24 = vld [vmem:[%s5452_s7 + $0x520] ss:$16 sps:$4 sm:$0xff]   ;;  %v4896_v25 = vld [vmem:[%s5452_s7 + $0x528] ss:$16 sps:$4 sm:$0xff]  }
  0xac   : > { %3022 = vmatpush1.bf16.msra.mxu0 %v4800_v26  ;;  %3400 = vmatpush1.bf16.msra.mxu1 %v4803_v27  ;;  %v4901_v26 = vld [vmem:[%s5452_s7 + $0x544] ss:$16 sps:$4 sm:$0xff]   ;;  %v4904_v27 = vld [vmem:[%s5452_s7 + $0x54c] ss:$16 sps:$4 sm:$0xff]  }
  0xad   : > { %3023 = vmatprep.subr.bf16.mxu0 %v4810_v28  ;;  %3401 = vmatprep.subr.bf16.mxu1 %v4813_v29  ;;  %v4899_v28 = vld [vmem:[%s5452_s7 + $0x540] ss:$16 sps:$4 sm:$0xff]   ;;  %v4902_v29 = vld [vmem:[%s5452_s7 + $0x548] ss:$16 sps:$4 sm:$0xff]  }
  0xb0   : > { %3024 = vmatpush1.bf16.msra.mxu0 %v4808_v30  ;;  %3402 = vmatpush1.bf16.msra.mxu1 %v4811_v31  ;;  %v4907_v30 = vld [vmem:[%s5452_s7 + $0x564] ss:$16 sps:$4 sm:$0xff]   ;;  %v4910_v31 = vld [vmem:[%s5452_s7 + $0x56c] ss:$16 sps:$4 sm:$0xff]  }
  0xb1   : > { %3025 = vmatprep.subr.bf16.mxu0 %v4817_v32  ;;  %3403 = vmatprep.subr.bf16.mxu1 %v4820_v33  ;;  %v4905_v32 = vld [vmem:[%s5452_s7 + $0x560] ss:$16 sps:$4 sm:$0xff]   ;;  %v4908_v33 = vld [vmem:[%s5452_s7 + $0x568] ss:$16 sps:$4 sm:$0xff]  }
  0xb4   : > { %3026 = vmatpush1.bf16.msra.mxu0 %v4815_v34  ;;  %3404 = vmatpush1.bf16.msra.mxu1 %v4818_v35  ;;  %v4915_v34 = vld [vmem:[%s5452_s7 + $0x584] ss:$16 sps:$4 sm:$0xff]   ;;  %v4918_v35 = vld [vmem:[%s5452_s7 + $0x58c] ss:$16 sps:$4 sm:$0xff]  }
  0xb5   : > { %3027 = vmatprep.subr.bf16.mxu0 %v4825_v36  ;;  %3405 = vmatprep.subr.bf16.mxu1 %v4828_v37  ;;  %v4913_v36 = vld [vmem:[%s5452_s7 + $0x580] ss:$16 sps:$4 sm:$0xff]   ;;  %v4916_v37 = vld [vmem:[%s5452_s7 + $0x588] ss:$16 sps:$4 sm:$0xff]  }
  0xb8   : > { %3028 = vmatpush1.bf16.msra.mxu0 %v4823_v38  ;;  %3406 = vmatpush1.bf16.msra.mxu1 %v4826_v39  ;;  %v4922_v38 = vld [vmem:[%s5452_s7 + $0x5a4] ss:$16 sps:$4 sm:$0xff]   ;;  %v4925_v39 = vld [vmem:[%s5452_s7 + $0x5ac] ss:$16 sps:$4 sm:$0xff]  }
  0xb9   : > { %3029 = vmatprep.subr.bf16.mxu0 %v4832_v40  ;;  %3407 = vmatprep.subr.bf16.mxu1 %v4835_v41  ;;  %v4920_v40 = vld [vmem:[%s5452_s7 + $0x5a0] ss:$16 sps:$4 sm:$0xff]   ;;  %v4923_v41 = vld [vmem:[%s5452_s7 + $0x5a8] ss:$16 sps:$4 sm:$0xff]  }
  0xbc   : > { %3030 = vmatpush1.bf16.msra.mxu0 %v4830_v42  ;;  %3408 = vmatpush1.bf16.msra.mxu1 %v4833_v43  ;;  %v4930_v42 = vld [vmem:[%s5452_s7 + $0x5c4] ss:$16 sps:$4 sm:$0xff]   ;;  %v4933_v43 = vld [vmem:[%s5452_s7 + $0x5cc] ss:$16 sps:$4 sm:$0xff]  }
  0xbd   : > { %3062 = vmatprep.subr.bf16.mxu0 %v4841_v44  ;;  %3440 = vmatprep.subr.bf16.mxu1 %v4844_v45  ;;  %v4928_v44 = vld [vmem:[%s5452_s7 + $0x5c0] ss:$16 sps:$4 sm:$0xff]   ;;  %v4931_v45 = vld [vmem:[%s5452_s7 + $0x5c8] ss:$16 sps:$4 sm:$0xff]  }
  0xbf   : > { %3032 = vmatmul.mubr.bf16.vlgmr.msra.gmra.mrb[0].mxu0 %v4836_v46  ;;  %3410 = vmatmul.mubr.bf16.vlgmr.msra.gmra.mrb[0].mxu1 %v4836_v46  ;;  %v4937_v46 = vld [vmem:[%s5452_s7 + $0x5e4] ss:$16 sps:$4 sm:$0xff]  }
  0xc0   : > { %3063 = vmatpush1.bf16.msra.mxu0 %v4839_v47  ;;  %3441 = vmatpush1.bf16.msra.mxu1 %v4842_v48  ;;  %v4940_v47 = vld [vmem:[%s5452_s7 + $0x5ec] ss:$16 sps:$4 sm:$0xff]   ;;  %v4935_v48 = vld [vmem:[%s5452_s7 + $0x5e0] ss:$16 sps:$4 sm:$0xff]  }
  0xc1   : > { %3064 = vmatprep.subr.bf16.mxu0 %v4847_v49  ;;  %3442 = vmatprep.subr.bf16.mxu1 %v4850_v50  ;;  %v4938_v49 = vld [vmem:[%s5452_s7 + $0x5e8] ss:$16 sps:$4 sm:$0xff]   ;;  %v4946_v50 = vld [vmem:[%s5452_s7 + $0x604] ss:$16 sps:$4 sm:$0xff]  }
  0xc2   : > { %3041 = vmatprep.mubr.bf16.mxu0 %v4911_v51  ;;  %3419 = vmatprep.mubr.bf16.mxu1 %v4911_v51  ;;  %v4949_v51 = vld [vmem:[%s5452_s7 + $0x60c] ss:$16 sps:$4 sm:$0xff]  }
  0xc4   : > { %3065 = vmatpush1.bf16.msra.mxu0 %v4845_v52  ;;  %3443 = vmatpush1.bf16.msra.mxu1 %v4848_v53  ;;  %v4941_v52 = vld [vmem:[%s5454_s8 + $0x10] ss:$48 sps:$4 sm:$0xff]  }
  0xc5   : > { %3066 = vmatprep.subr.bf16.mxu0 %v4853_v54  ;;  %3444 = vmatprep.subr.bf16.mxu1 %v4856_v55  ;;  %v4944_v53 = vld [vmem:[%s5452_s7 + $0x600] ss:$16 sps:$4 sm:$0xff]   ;;  %v4947_v54 = vld [vmem:[%s5452_s7 + $0x608] ss:$16 sps:$4 sm:$0xff]   ;;  %v4952_v55 = vld [vmem:[%s5452_s7 + $0x624] ss:$16 sps:$4 sm:$0xff]  }
  0xc7   : > { %3042 = vmatmul.mubr.bf16.gmra.mrb[4].mxu0 %v4919_v58  ;;  %3420 = vmatmul.mubr.bf16.gmra.mrb[4].mxu1 %v4919_v58  ;;  %v4950_v58 = vld [vmem:[%s5452_s7 + $0x620] ss:$16 sps:$4 sm:$0xff]  }
  0xc8   : > { %3067 = vmatpush1.bf16.msra.mxu0 %v4851_v56  ;;  %3445 = vmatpush1.bf16.msra.mxu1 %v4854_v57  ;;  %v4955_v56 = vld [vmem:[%s5452_s7 + $0x62c] ss:$16 sps:$4 sm:$0xff]   ;;  %v5016_v57 = vld [vmem:[%s5454_s8 + $0x74] ss:$48 sps:$4 sm:$0xff]  }
  0xc9   : > { %3068 = vmatprep.subr.bf16.mxu0 %v4859_v59  ;;  %3446 = vmatprep.subr.bf16.mxu1 %v4862_v60  ;;  %v4953_v59 = vld [vmem:[%s5452_s7 + $0x628] ss:$16 sps:$4 sm:$0xff]   ;;  %v4958_v60 = vld [vmem:[%s5452_s7 + $0x644] ss:$16 sps:$4 sm:$0xff]  }
  0xca   : > { %3051 = vmatprep.mubr.bf16.mxu0 %v4926_v61  ;;  %3429 = vmatprep.mubr.bf16.mxu1 %v4926_v61  ;;  %v4961_v61 = vld [vmem:[%s5452_s7 + $0x64c] ss:$16 sps:$4 sm:$0xff]  }
  0xcc   : > { %3069 = vmatpush1.bf16.msra.mxu0 %v4857_v62  ;;  %3447 = vmatpush1.bf16.msra.mxu1 %v4860_v63  ;;  %v4956_v62 = vld [vmem:[%s5452_s7 + $0x640] ss:$16 sps:$4 sm:$0xff]   ;;  %v4959_v63 = vld [vmem:[%s5452_s7 + $0x648] ss:$16 sps:$4 sm:$0xff]  }
  0xcd   : > { %3070 = vmatprep.subr.bf16.mxu0 %v4865_v0  ;;  %3448 = vmatprep.subr.bf16.mxu1 %v4868_v1  ;;  %v5024_v0 = vld [vmem:[%s5454_s8 + $0x70] ss:$48 sps:$4 sm:$0xff]   ;;  %v4964_v1 = vld [vmem:[%s5452_s7 + $0x664] ss:$16 sps:$4 sm:$0xff]  }
  0xcf   : > { %3052 = vmatmul.mubr.bf16.gmra.mrb[8].mxu0 %v4934_v4  ;;  %3430 = vmatmul.mubr.bf16.gmra.mrb[8].mxu1 %v4934_v4  ;;  %v4962_v4 = vld [vmem:[%s5452_s7 + $0x660] ss:$16 sps:$4 sm:$0xff]  }
  0xd0   : > { %3071 = vmatpush1.bf16.msra.mxu0 %v4863_v2  ;;  %3449 = vmatpush1.bf16.msra.mxu1 %v4866_v3  ;;  %v4967_v2 = vld [vmem:[%s5452_s7 + $0x66c] ss:$16 sps:$4 sm:$0xff]   ;;  %v5031_v3 = vld [vmem:[%s5454_s8 + $0xd4] ss:$48 sps:$4 sm:$0xff]  }
  0xd1   : > { %3072 = vmatprep.subr.bf16.mxu0 %v4871_v5  ;;  %3450 = vmatprep.subr.bf16.mxu1 %v4874_v6  ;;  %v4965_v5 = vld [vmem:[%s5452_s7 + $0x668] ss:$16 sps:$4 sm:$0xff]   ;;  %v4970_v6 = vld [vmem:[%s5452_s7 + $0x684] ss:$16 sps:$4 sm:$0xff]  }
  0xd2   : > { %3094 = vmatprep.mubr.bf16.mxu0 %v4943_v7  ;;  %3472 = vmatprep.mubr.bf16.mxu1 %v4943_v7  ;;  %v4973_v7 = vld [vmem:[%s5452_s7 + $0x68c] ss:$16 sps:$4 sm:$0xff]  }
  0xd4   : > { %3073 = vmatpush1.bf16.msra.mxu0 %v4869_v8  ;;  %3451 = vmatpush1.bf16.msra.mxu1 %v4872_v9  ;;  %v4968_v8 = vld [vmem:[%s5452_s7 + $0x680] ss:$16 sps:$4 sm:$0xff]   ;;  %v4971_v9 = vld [vmem:[%s5452_s7 + $0x688] ss:$16 sps:$4 sm:$0xff]  }
  0xd5   : > { %3074 = vmatprep.subr.bf16.mxu0 %v4877_v10  ;;  %3452 = vmatprep.subr.bf16.mxu1 %v4880_v11  ;;  %v5039_v10 = vld [vmem:[%s5454_s8 + $0xd0] ss:$48 sps:$4 sm:$0xff]   ;;  %v4976_v11 = vld [vmem:[%s5452_s7 + $0x6a4] ss:$16 sps:$4 sm:$0xff]  }
  0xd8   : > { %3075 = vmatpush1.bf16.msra.mxu0 %v4875_v12  ;;  %3453 = vmatpush1.bf16.msra.mxu1 %v4878_v13  ;;  %v4979_v12 = vld [vmem:[%s5452_s7 + $0x6ac] ss:$16 sps:$4 sm:$0xff]  }
  0xd9   : > { %3076 = vmatprep.subr.bf16.mxu0 %v4883_v14  ;;  %3454 = vmatprep.subr.bf16.mxu1 %v4886_v15  ;;  %v5048_v13 = vld [vmem:[%s5454_s8 + $0x1c] ss:$48 sps:$4 sm:$0xff]   ;;  %v4974_v14 = vld [vmem:[%s5452_s7 + $0x6a0] ss:$16 sps:$4 sm:$0xff]   ;;  %v4977_v15 = vld [vmem:[%s5452_s7 + $0x6a8] ss:$16 sps:$4 sm:$0xff]  }
  0xdc   : > { %3077 = vmatpush1.bf16.msra.mxu0 %v4881_v16  ;;  %3455 = vmatpush1.bf16.msra.mxu1 %v4884_v17  ;;  %v4982_v16 = vld [vmem:[%s5452_s7 + $0x6c4] ss:$16 sps:$4 sm:$0xff]   ;;  %v4985_v17 = vld [vmem:[%s5452_s7 + $0x6cc] ss:$16 sps:$4 sm:$0xff]  }
  0xdd   : > { %3078 = vmatprep.subr.bf16.mxu0 %v4889_v18  ;;  %3456 = vmatprep.subr.bf16.mxu1 %v4892_v19  ;;  %v4980_v18 = vld [vmem:[%s5452_s7 + $0x6c0] ss:$16 sps:$4 sm:$0xff]   ;;  %v4983_v19 = vld [vmem:[%s5452_s7 + $0x6c8] ss:$16 sps:$4 sm:$0xff]  }
  0xe0   : > { %3079 = vmatpush1.bf16.msra.mxu0 %v4887_v20  ;;  %3457 = vmatpush1.bf16.msra.mxu1 %v4890_v21  ;;  %v4988_v20 = vld [vmem:[%s5452_s7 + $0x6e4] ss:$16 sps:$4 sm:$0xff]   ;;  %v4991_v21 = vld [vmem:[%s5452_s7 + $0x6ec] ss:$16 sps:$4 sm:$0xff]  }
  0xe1   : > { %3080 = vmatprep.subr.bf16.mxu0 %v4895_v22  ;;  %3458 = vmatprep.subr.bf16.mxu1 %v4898_v23  ;;  %v4986_v22 = vld [vmem:[%s5452_s7 + $0x6e0] ss:$16 sps:$4 sm:$0xff]   ;;  %v4989_v23 = vld [vmem:[%s5452_s7 + $0x6e8] ss:$16 sps:$4 sm:$0xff]  }
  0xe4   : > { %3081 = vmatpush1.bf16.msra.mxu0 %v4893_v24  ;;  %3459 = vmatpush1.bf16.msra.mxu1 %v4896_v25  ;;  %v4994_v24 = vld [vmem:[%s5452_s7 + $0x704] ss:$16 sps:$4 sm:$0xff]   ;;  %v4997_v25 = vld [vmem:[%s5452_s7 + $0x70c] ss:$16 sps:$4 sm:$0xff]  }
  0xe5   : > { %3082 = vmatprep.subr.bf16.mxu0 %v4901_v26  ;;  %3460 = vmatprep.subr.bf16.mxu1 %v4904_v27  ;;  %v4992_v26 = vld [vmem:[%s5452_s7 + $0x700] ss:$16 sps:$4 sm:$0xff]   ;;  %v4995_v27 = vld [vmem:[%s5452_s7 + $0x708] ss:$16 sps:$4 sm:$0xff]  }
  0xe8   : > { %3083 = vmatpush1.bf16.msra.mxu0 %v4899_v28  ;;  %3461 = vmatpush1.bf16.msra.mxu1 %v4902_v29  ;;  %v5000_v28 = vld [vmem:[%s5452_s7 + $0x724] ss:$16 sps:$4 sm:$0xff]   ;;  %v5003_v29 = vld [vmem:[%s5452_s7 + $0x72c] ss:$16 sps:$4 sm:$0xff]  }
  0xe9   : > { %3084 = vmatprep.subr.bf16.mxu0 %v4907_v30  ;;  %3462 = vmatprep.subr.bf16.mxu1 %v4910_v31  ;;  %v4998_v30 = vld [vmem:[%s5452_s7 + $0x720] ss:$16 sps:$4 sm:$0xff]   ;;  %v5001_v31 = vld [vmem:[%s5452_s7 + $0x728] ss:$16 sps:$4 sm:$0xff]  }
  0xec   : > { %3085 = vmatpush1.bf16.msra.mxu0 %v4905_v32  ;;  %3463 = vmatpush1.bf16.msra.mxu1 %v4908_v33  ;;  %v5006_v32 = vld [vmem:[%s5452_s7 + $0x744] ss:$16 sps:$4 sm:$0xff]   ;;  %v5009_v33 = vld [vmem:[%s5452_s7 + $0x74c] ss:$16 sps:$4 sm:$0xff]  }
  0xed   : > { %3086 = vmatprep.subr.bf16.mxu0 %v4915_v34  ;;  %3464 = vmatprep.subr.bf16.mxu1 %v4918_v35  ;;  %v5004_v34 = vld [vmem:[%s5452_s7 + $0x740] ss:$16 sps:$4 sm:$0xff]   ;;  %v5007_v35 = vld [vmem:[%s5452_s7 + $0x748] ss:$16 sps:$4 sm:$0xff]  }
  0xf0   : > { %3087 = vmatpush1.bf16.msra.mxu0 %v4913_v36  ;;  %3465 = vmatpush1.bf16.msra.mxu1 %v4916_v37  ;;  %v5012_v36 = vld [vmem:[%s5452_s7 + $0x764] ss:$16 sps:$4 sm:$0xff]   ;;  %v5015_v37 = vld [vmem:[%s5452_s7 + $0x76c] ss:$16 sps:$4 sm:$0xff]  }
  0xf1   : > { %3088 = vmatprep.subr.bf16.mxu0 %v4922_v38  ;;  %3466 = vmatprep.subr.bf16.mxu1 %v4925_v39  ;;  %v5010_v38 = vld [vmem:[%s5452_s7 + $0x760] ss:$16 sps:$4 sm:$0xff]   ;;  %v5013_v39 = vld [vmem:[%s5452_s7 + $0x768] ss:$16 sps:$4 sm:$0xff]  }
  0xf4   : > { %3089 = vmatpush1.bf16.msra.mxu0 %v4920_v40  ;;  %3467 = vmatpush1.bf16.msra.mxu1 %v4923_v41  ;;  %v5020_v40 = vld [vmem:[%s5452_s7 + $0x784] ss:$16 sps:$4 sm:$0xff]   ;;  %v5023_v41 = vld [vmem:[%s5452_s7 + $0x78c] ss:$16 sps:$4 sm:$0xff]  }
  0xf5   : > { %3090 = vmatprep.subr.bf16.mxu0 %v4930_v42  ;;  %3468 = vmatprep.subr.bf16.mxu1 %v4933_v43  ;;  %v5018_v42 = vld [vmem:[%s5452_s7 + $0x780] ss:$16 sps:$4 sm:$0xff]   ;;  %v5021_v43 = vld [vmem:[%s5452_s7 + $0x788] ss:$16 sps:$4 sm:$0xff]  }
  0xf8   : > { %3091 = vmatpush1.bf16.msra.mxu0 %v4928_v44  ;;  %3469 = vmatpush1.bf16.msra.mxu1 %v4931_v45  ;;  %v5027_v44 = vld [vmem:[%s5452_s7 + $0x7a4] ss:$16 sps:$4 sm:$0xff]   ;;  %v5030_v45 = vld [vmem:[%s5452_s7 + $0x7ac] ss:$16 sps:$4 sm:$0xff]  }
  0xf9   : > { %3092 = vmatprep.subr.bf16.mxu0 %v4937_v46  ;;  %3470 = vmatprep.subr.bf16.mxu1 %v4940_v47  ;;  %v5025_v46 = vld [vmem:[%s5452_s7 + $0x7a0] ss:$16 sps:$4 sm:$0xff]   ;;  %v5028_v47 = vld [vmem:[%s5452_s7 + $0x7a8] ss:$16 sps:$4 sm:$0xff]  }
  0xfc   : > { %3093 = vmatpush1.bf16.msra.mxu0 %v4935_v48  ;;  %3471 = vmatpush1.bf16.msra.mxu1 %v4938_v49  ;;  %v5035_v48 = vld [vmem:[%s5452_s7 + $0x7c4] ss:$16 sps:$4 sm:$0xff]   ;;  %v5038_v49 = vld [vmem:[%s5452_s7 + $0x7cc] ss:$16 sps:$4 sm:$0xff]  }
  0xfd   : > { %3125 = vmatprep.subr.bf16.mxu0 %v4946_v50  ;;  %3503 = vmatprep.subr.bf16.mxu1 %v4949_v51  ;;  %v5033_v50 = vld [vmem:[%s5452_s7 + $0x7c0] ss:$16 sps:$4 sm:$0xff]   ;;  %v5036_v51 = vld [vmem:[%s5452_s7 + $0x7c8] ss:$16 sps:$4 sm:$0xff]  }
  0xff   : > { %3095 = vmatmul.mubr.bf16.vlgmr.msra.gmra.mrb[0].mxu0 %v4941_v52  ;;  %3473 = vmatmul.mubr.bf16.vlgmr.msra.gmra.mrb[0].mxu1 %v4941_v52  ;;  %v5042_v52 = vld [vmem:[%s5452_s7 + $0x7e4] ss:$16 sps:$4 sm:$0xff]  }
 0x100   : > { %3126 = vmatpush1.bf16.msra.mxu0 %v4944_v53  ;;  %3504 = vmatpush1.bf16.msra.mxu1 %v4947_v54  ;;  %v5045_v53 = vld [vmem:[%s5452_s7 + $0x7ec] ss:$16 sps:$4 sm:$0xff]   ;;  %v5040_v54 = vld [vmem:[%s5452_s7 + $0x7e0] ss:$16 sps:$4 sm:$0xff]  }
 0x101   : > { %3127 = vmatprep.subr.bf16.mxu0 %v4952_v55  ;;  %3505 = vmatprep.subr.bf16.mxu1 %v4955_v56  ;;  %v5043_v55 = vld [vmem:[%s5452_s7 + $0x7e8] ss:$16 sps:$4 sm:$0xff]   ;;  %v5051_v56 = vld [vmem:[%s5452_s7 + $0x804] ss:$16 sps:$4 sm:$0xff]  }
 0x102   : > { %3104 = vmatprep.mubr.bf16.mxu0 %v5016_v57  ;;  %3482 = vmatprep.mubr.bf16.mxu1 %v5016_v57  ;;  %v5054_v57 = vld [vmem:[%s5452_s7 + $0x80c] ss:$16 sps:$4 sm:$0xff]  }
 0x104   : > { %3128 = vmatpush1.bf16.msra.mxu0 %v4950_v58  ;;  %3506 = vmatpush1.bf16.msra.mxu1 %v4953_v59  ;;  %v5046_v58 = vld [vmem:[%s5454_s8 + $0x18] ss:$48 sps:$4 sm:$0xff]   ;;  %v5049_v59 = vld [vmem:[%s5452_s7 + $0x800] ss:$16 sps:$4 sm:$0xff]  }
 0x105   : > { %3129 = vmatprep.subr.bf16.mxu0 %v4958_v60  ;;  %3507 = vmatprep.subr.bf16.mxu1 %v4961_v61  ;;  %v5052_v60 = vld [vmem:[%s5452_s7 + $0x808] ss:$16 sps:$4 sm:$0xff]   ;;  %v5057_v61 = vld [vmem:[%s5452_s7 + $0x824] ss:$16 sps:$4 sm:$0xff]  }
 0x107   : > { %3105 = vmatmul.mubr.bf16.gmra.mrb[4].mxu0 %v5024_v0  ;;  %3483 = vmatmul.mubr.bf16.gmra.mrb[4].mxu1 %v5024_v0  ;;  %v5055_v0 = vld [vmem:[%s5452_s7 + $0x820] ss:$16 sps:$4 sm:$0xff]  }
 0x108   : > { %3130 = vmatpush1.bf16.msra.mxu0 %v4956_v62  ;;  %3508 = vmatpush1.bf16.msra.mxu1 %v4959_v63  ;;  %v5060_v62 = vld [vmem:[%s5452_s7 + $0x82c] ss:$16 sps:$4 sm:$0xff]  }
 0x109   : > { %3131 = vmatprep.subr.bf16.mxu0 %v4964_v1  ;;  %3509 = vmatprep.subr.bf16.mxu1 %v4967_v2  ;;  %v5121_v63 = vld [vmem:[%s5454_s8 + $0x7c] ss:$48 sps:$4 sm:$0xff]   ;;  %v5058_v1 = vld [vmem:[%s5452_s7 + $0x828] ss:$16 sps:$4 sm:$0xff]   ;;  %v5063_v2 = vld [vmem:[%s5452_s7 + $0x844] ss:$16 sps:$4 sm:$0xff]  }
 0x10a   : > { %3114 = vmatprep.mubr.bf16.mxu0 %v5031_v3  ;;  %3492 = vmatprep.mubr.bf16.mxu1 %v5031_v3  ;;  %v5066_v3 = vld [vmem:[%s5452_s7 + $0x84c] ss:$16 sps:$4 sm:$0xff]  }
 0x10c   : > { %3132 = vmatpush1.bf16.msra.mxu0 %v4962_v4  ;;  %3510 = vmatpush1.bf16.msra.mxu1 %v4965_v5  ;;  %v5061_v4 = vld [vmem:[%s5452_s7 + $0x840] ss:$16 sps:$4 sm:$0xff]   ;;  %v5064_v5 = vld [vmem:[%s5452_s7 + $0x848] ss:$16 sps:$4 sm:$0xff]  }
 0x10d   : > { %3133 = vmatprep.subr.bf16.mxu0 %v4970_v6  ;;  %3511 = vmatprep.subr.bf16.mxu1 %v4973_v7  ;;  %v5129_v6 = vld [vmem:[%s5454_s8 + $0x78] ss:$48 sps:$4 sm:$0xff]   ;;  %v5069_v7 = vld [vmem:[%s5452_s7 + $0x864] ss:$16 sps:$4 sm:$0xff]  }
 0x10f   : > { %3115 = vmatmul.mubr.bf16.gmra.mrb[8].mxu0 %v5039_v10  ;;  %3493 = vmatmul.mubr.bf16.gmra.mrb[8].mxu1 %v5039_v10  ;;  %v5067_v10 = vld [vmem:[%s5452_s7 + $0x860] ss:$16 sps:$4 sm:$0xff]  }
 0x110   : > { %3134 = vmatpush1.bf16.msra.mxu0 %v4968_v8  ;;  %3512 = vmatpush1.bf16.msra.mxu1 %v4971_v9  ;;  %v5072_v8 = vld [vmem:[%s5452_s7 + $0x86c] ss:$16 sps:$4 sm:$0xff]  }
 0x111   : > { %3135 = vmatprep.subr.bf16.mxu0 %v4976_v11  ;;  %3513 = vmatprep.subr.bf16.mxu1 %v4979_v12  ;;  %v5136_v9 = vld [vmem:[%s5454_s8 + $0xdc] ss:$48 sps:$4 sm:$0xff]   ;;  %v5070_v11 = vld [vmem:[%s5452_s7 + $0x868] ss:$16 sps:$4 sm:$0xff]   ;;  %v5075_v12 = vld [vmem:[%s5452_s7 + $0x884] ss:$16 sps:$4 sm:$0xff]  }
 0x112   : > { %3157 = vmatprep.mubr.bf16.mxu0 %v5048_v13  ;;  %3535 = vmatprep.mubr.bf16.mxu1 %v5048_v13  ;;  %v5078_v13 = vld [vmem:[%s5452_s7 + $0x88c] ss:$16 sps:$4 sm:$0xff]  }
 0x114   : > { %3136 = vmatpush1.bf16.msra.mxu0 %v4974_v14  ;;  %3514 = vmatpush1.bf16.msra.mxu1 %v4977_v15  ;;  %v5073_v14 = vld [vmem:[%s5452_s7 + $0x880] ss:$16 sps:$4 sm:$0xff]   ;;  %v5076_v15 = vld [vmem:[%s5452_s7 + $0x888] ss:$16 sps:$4 sm:$0xff]  }
 0x115   : > { %3137 = vmatprep.subr.bf16.mxu0 %v4982_v16  ;;  %3515 = vmatprep.subr.bf16.mxu1 %v4985_v17  ;;  %v5144_v16 = vld [vmem:[%s5454_s8 + $0xd8] ss:$48 sps:$4 sm:$0xff]   ;;  %v5081_v17 = vld [vmem:[%s5452_s7 + $0x8a4] ss:$16 sps:$4 sm:$0xff]  }
 0x118   : > { %3138 = vmatpush1.bf16.msra.mxu0 %v4980_v18  ;;  %3516 = vmatpush1.bf16.msra.mxu1 %v4983_v19  ;;  %v5084_v18 = vld [vmem:[%s5452_s7 + $0x8ac] ss:$16 sps:$4 sm:$0xff]   ;;  %v5153_v19 = vld [vmem:[%s5454_s8 + $0x24] ss:$48 sps:$4 sm:$0xff]  }
 0x119   : > { %3139 = vmatprep.subr.bf16.mxu0 %v4988_v20  ;;  %3517 = vmatprep.subr.bf16.mxu1 %v4991_v21  ;;  %v5079_v20 = vld [vmem:[%s5452_s7 + $0x8a0] ss:$16 sps:$4 sm:$0xff]   ;;  %v5082_v21 = vld [vmem:[%s5452_s7 + $0x8a8] ss:$16 sps:$4 sm:$0xff]  }
 0x11c   : > { %3140 = vmatpush1.bf16.msra.mxu0 %v4986_v22  ;;  %3518 = vmatpush1.bf16.msra.mxu1 %v4989_v23  ;;  %v5087_v22 = vld [vmem:[%s5452_s7 + $0x8c4] ss:$16 sps:$4 sm:$0xff]   ;;  %v5090_v23 = vld [vmem:[%s5452_s7 + $0x8cc] ss:$16 sps:$4 sm:$0xff]  }
 0x11d   : > { %3141 = vmatprep.subr.bf16.mxu0 %v4994_v24  ;;  %3519 = vmatprep.subr.bf16.mxu1 %v4997_v25  ;;  %v5085_v24 = vld [vmem:[%s5452_s7 + $0x8c0] ss:$16 sps:$4 sm:$0xff]   ;;  %v5088_v25 = vld [vmem:[%s5452_s7 + $0x8c8] ss:$16 sps:$4 sm:$0xff]  }
 0x120   : > { %3142 = vmatpush1.bf16.msra.mxu0 %v4992_v26  ;;  %3520 = vmatpush1.bf16.msra.mxu1 %v4995_v27  ;;  %v5093_v26 = vld [vmem:[%s5452_s7 + $0x8e4] ss:$16 sps:$4 sm:$0xff]   ;;  %v5096_v27 = vld [vmem:[%s5452_s7 + $0x8ec] ss:$16 sps:$4 sm:$0xff]  }
 0x121   : > { %3143 = vmatprep.subr.bf16.mxu0 %v5000_v28  ;;  %3521 = vmatprep.subr.bf16.mxu1 %v5003_v29  ;;  %v5091_v28 = vld [vmem:[%s5452_s7 + $0x8e0] ss:$16 sps:$4 sm:$0xff]   ;;  %v5094_v29 = vld [vmem:[%s5452_s7 + $0x8e8] ss:$16 sps:$4 sm:$0xff]  }
 0x124   : > { %3144 = vmatpush1.bf16.msra.mxu0 %v4998_v30  ;;  %3522 = vmatpush1.bf16.msra.mxu1 %v5001_v31  ;;  %v5099_v30 = vld [vmem:[%s5452_s7 + $0x904] ss:$16 sps:$4 sm:$0xff]   ;;  %v5102_v31 = vld [vmem:[%s5452_s7 + $0x90c] ss:$16 sps:$4 sm:$0xff]  }
 0x125   : > { %3145 = vmatprep.subr.bf16.mxu0 %v5006_v32  ;;  %3523 = vmatprep.subr.bf16.mxu1 %v5009_v33  ;;  %v5097_v32 = vld [vmem:[%s5452_s7 + $0x900] ss:$16 sps:$4 sm:$0xff]   ;;  %v5100_v33 = vld [vmem:[%s5452_s7 + $0x908] ss:$16 sps:$4 sm:$0xff]  }
 0x128   : > { %3146 = vmatpush1.bf16.msra.mxu0 %v5004_v34  ;;  %3524 = vmatpush1.bf16.msra.mxu1 %v5007_v35  ;;  %v5105_v34 = vld [vmem:[%s5452_s7 + $0x924] ss:$16 sps:$4 sm:$0xff]   ;;  %v5108_v35 = vld [vmem:[%s5452_s7 + $0x92c] ss:$16 sps:$4 sm:$0xff]  }
 0x129   : > { %3147 = vmatprep.subr.bf16.mxu0 %v5012_v36  ;;  %3525 = vmatprep.subr.bf16.mxu1 %v5015_v37  ;;  %v5103_v36 = vld [vmem:[%s5452_s7 + $0x920] ss:$16 sps:$4 sm:$0xff]   ;;  %v5106_v37 = vld [vmem:[%s5452_s7 + $0x928] ss:$16 sps:$4 sm:$0xff]  }
 0x12c   : > { %3148 = vmatpush1.bf16.msra.mxu0 %v5010_v38  ;;  %3526 = vmatpush1.bf16.msra.mxu1 %v5013_v39  ;;  %v5111_v38 = vld [vmem:[%s5452_s7 + $0x944] ss:$16 sps:$4 sm:$0xff]   ;;  %v5114_v39 = vld [vmem:[%s5452_s7 + $0x94c] ss:$16 sps:$4 sm:$0xff]  }
 0x12d   : > { %3149 = vmatprep.subr.bf16.mxu0 %v5020_v40  ;;  %3527 = vmatprep.subr.bf16.mxu1 %v5023_v41  ;;  %v5109_v40 = vld [vmem:[%s5452_s7 + $0x940] ss:$16 sps:$4 sm:$0xff]   ;;  %v5112_v41 = vld [vmem:[%s5452_s7 + $0x948] ss:$16 sps:$4 sm:$0xff]  }
 0x130   : > { %3150 = vmatpush1.bf16.msra.mxu0 %v5018_v42  ;;  %3528 = vmatpush1.bf16.msra.mxu1 %v5021_v43  ;;  %v5117_v42 = vld [vmem:[%s5452_s7 + $0x964] ss:$16 sps:$4 sm:$0xff]   ;;  %v5120_v43 = vld [vmem:[%s5452_s7 + $0x96c] ss:$16 sps:$4 sm:$0xff]  }
 0x131   : > { %3151 = vmatprep.subr.bf16.mxu0 %v5027_v44  ;;  %3529 = vmatprep.subr.bf16.mxu1 %v5030_v45  ;;  %v5115_v44 = vld [vmem:[%s5452_s7 + $0x960] ss:$16 sps:$4 sm:$0xff]   ;;  %v5118_v45 = vld [vmem:[%s5452_s7 + $0x968] ss:$16 sps:$4 sm:$0xff]  }
 0x134   : > { %3152 = vmatpush1.bf16.msra.mxu0 %v5025_v46  ;;  %3530 = vmatpush1.bf16.msra.mxu1 %v5028_v47  ;;  %v5125_v46 = vld [vmem:[%s5452_s7 + $0x984] ss:$16 sps:$4 sm:$0xff]   ;;  %v5128_v47 = vld [vmem:[%s5452_s7 + $0x98c] ss:$16 sps:$4 sm:$0xff]  }
 0x135   : > { %3153 = vmatprep.subr.bf16.mxu0 %v5035_v48  ;;  %3531 = vmatprep.subr.bf16.mxu1 %v5038_v49  ;;  %v5123_v48 = vld [vmem:[%s5452_s7 + $0x980] ss:$16 sps:$4 sm:$0xff]   ;;  %v5126_v49 = vld [vmem:[%s5452_s7 + $0x988] ss:$16 sps:$4 sm:$0xff]  }
 0x138   : > { %3154 = vmatpush1.bf16.msra.mxu0 %v5033_v50  ;;  %3532 = vmatpush1.bf16.msra.mxu1 %v5036_v51  ;;  %v5132_v50 = vld [vmem:[%s5452_s7 + $0x9a4] ss:$16 sps:$4 sm:$0xff]   ;;  %v5135_v51 = vld [vmem:[%s5452_s7 + $0x9ac] ss:$16 sps:$4 sm:$0xff]  }
 0x139   : > { %3155 = vmatprep.subr.bf16.mxu0 %v5042_v52  ;;  %3533 = vmatprep.subr.bf16.mxu1 %v5045_v53  ;;  %v5130_v52 = vld [vmem:[%s5452_s7 + $0x9a0] ss:$16 sps:$4 sm:$0xff]   ;;  %v5133_v53 = vld [vmem:[%s5452_s7 + $0x9a8] ss:$16 sps:$4 sm:$0xff]  }
 0x13c   : > { %3156 = vmatpush1.bf16.msra.mxu0 %v5040_v54  ;;  %3534 = vmatpush1.bf16.msra.mxu1 %v5043_v55  ;;  %v5140_v54 = vld [vmem:[%s5452_s7 + $0x9c4] ss:$16 sps:$4 sm:$0xff]   ;;  %v5143_v55 = vld [vmem:[%s5452_s7 + $0x9cc] ss:$16 sps:$4 sm:$0xff]  }
 0x13d   : > { %3188 = vmatprep.subr.bf16.mxu0 %v5051_v56  ;;  %3566 = vmatprep.subr.bf16.mxu1 %v5054_v57  ;;  %v5138_v56 = vld [vmem:[%s5452_s7 + $0x9c0] ss:$16 sps:$4 sm:$0xff]   ;;  %v5141_v57 = vld [vmem:[%s5452_s7 + $0x9c8] ss:$16 sps:$4 sm:$0xff]  }
 0x13f   : > { %3158 = vmatmul.mubr.bf16.vlgmr.msra.gmra.mrb[0].mxu0 %v5046_v58  ;;  %3536 = vmatmul.mubr.bf16.vlgmr.msra.gmra.mrb[0].mxu1 %v5046_v58  ;;  %v5147_v58 = vld [vmem:[%s5452_s7 + $0x9e4] ss:$16 sps:$4 sm:$0xff]  }
 0x140   : > { %3189 = vmatpush1.bf16.msra.mxu0 %v5049_v59  ;;  %3567 = vmatpush1.bf16.msra.mxu1 %v5052_v60  ;;  %v5150_v59 = vld [vmem:[%s5452_s7 + $0x9ec] ss:$16 sps:$4 sm:$0xff]   ;;  %v5145_v60 = vld [vmem:[%s5452_s7 + $0x9e0] ss:$16 sps:$4 sm:$0xff]  }
 0x141   : > { %3190 = vmatprep.subr.bf16.mxu0 %v5057_v61  ;;  %3568 = vmatprep.subr.bf16.mxu1 %v5060_v62  ;;  %v5148_v61 = vld [vmem:[%s5452_s7 + $0x9e8] ss:$16 sps:$4 sm:$0xff]   ;;  %v5156_v62 = vld [vmem:[%s5452_s7 + $0xa04] ss:$16 sps:$4 sm:$0xff]  }
 0x142   : > { %3167 = vmatprep.mubr.bf16.mxu0 %v5121_v63  ;;  %3545 = vmatprep.mubr.bf16.mxu1 %v5121_v63  ;;  %v5159_v63 = vld [vmem:[%s5452_s7 + $0xa0c] ss:$16 sps:$4 sm:$0xff]  }
 0x144   : > { %3191 = vmatpush1.bf16.msra.mxu0 %v5055_v0  ;;  %3569 = vmatpush1.bf16.msra.mxu1 %v5058_v1  ;;  %v5151_v0 = vld [vmem:[%s5454_s8 + $0x20] ss:$48 sps:$4 sm:$0xff]  }
 0x145   : > { %3192 = vmatprep.subr.bf16.mxu0 %v5063_v2  ;;  %3570 = vmatprep.subr.bf16.mxu1 %v5066_v3  ;;  %v5154_v1 = vld [vmem:[%s5452_s7 + $0xa00] ss:$16 sps:$4 sm:$0xff]   ;;  %v5157_v2 = vld [vmem:[%s5452_s7 + $0xa08] ss:$16 sps:$4 sm:$0xff]   ;;  %v5162_v3 = vld [vmem:[%s5452_s7 + $0xa24] ss:$16 sps:$4 sm:$0xff]  }
 0x147   : > { %3168 = vmatmul.mubr.bf16.gmra.mrb[4].mxu0 %v5129_v6  ;;  %3546 = vmatmul.mubr.bf16.gmra.mrb[4].mxu1 %v5129_v6  ;;  %v5160_v6 = vld [vmem:[%s5452_s7 + $0xa20] ss:$16 sps:$4 sm:$0xff]  }
 0x148   : > { %3193 = vmatpush1.bf16.msra.mxu0 %v5061_v4  ;;  %3571 = vmatpush1.bf16.msra.mxu1 %v5064_v5  ;;  %v5165_v4 = vld [vmem:[%s5452_s7 + $0xa2c] ss:$16 sps:$4 sm:$0xff]   ;;  %v5226_v5 = vld [vmem:[%s5454_s8 + $0x84] ss:$48 sps:$4 sm:$0xff]  }
 0x149   : > { %3194 = vmatprep.subr.bf16.mxu0 %v5069_v7  ;;  %3572 = vmatprep.subr.bf16.mxu1 %v5072_v8  ;;  %v5163_v7 = vld [vmem:[%s5452_s7 + $0xa28] ss:$16 sps:$4 sm:$0xff]   ;;  %v5168_v8 = vld [vmem:[%s5452_s7 + $0xa44] ss:$16 sps:$4 sm:$0xff]  }
 0x14a   : > { %3177 = vmatprep.mubr.bf16.mxu0 %v5136_v9  ;;  %3555 = vmatprep.mubr.bf16.mxu1 %v5136_v9  ;;  %v5171_v9 = vld [vmem:[%s5452_s7 + $0xa4c] ss:$16 sps:$4 sm:$0xff]  }
 0x14c   : > { %3195 = vmatpush1.bf16.msra.mxu0 %v5067_v10  ;;  %3573 = vmatpush1.bf16.msra.mxu1 %v5070_v11  ;;  %v5228_v10 = vld [vmem:[%s5454_s8 + $0x80] ss:$48 sps:$4 sm:$0xff]  }
 0x14d   : > { %3196 = vmatprep.subr.bf16.mxu0 %v5075_v12  ;;  %3574 = vmatprep.subr.bf16.mxu1 %v5078_v13  ;;  %v5166_v11 = vld [vmem:[%s5452_s7 + $0xa40] ss:$16 sps:$4 sm:$0xff]   ;;  %v5169_v12 = vld [vmem:[%s5452_s7 + $0xa48] ss:$16 sps:$4 sm:$0xff]   ;;  %v5174_v13 = vld [vmem:[%s5452_s7 + $0xa64] ss:$16 sps:$4 sm:$0xff]  }
 0x14f   : > { %3178 = vmatmul.mubr.bf16.gmra.mrb[8].mxu0 %v5144_v16  ;;  %3556 = vmatmul.mubr.bf16.gmra.mrb[8].mxu1 %v5144_v16  ;;  %v5172_v16 = vld [vmem:[%s5452_s7 + $0xa60] ss:$16 sps:$4 sm:$0xff]  }
 0x150   : > { %3197 = vmatpush1.bf16.msra.mxu0 %v5073_v14  ;;  %3575 = vmatpush1.bf16.msra.mxu1 %v5076_v15  ;;  %v5177_v14 = vld [vmem:[%s5452_s7 + $0xa6c] ss:$16 sps:$4 sm:$0xff]   ;;  %v5241_v15 = vld [vmem:[%s5454_s8 + $0xe4] ss:$48 sps:$4 sm:$0xff]  }
 0x151   : > { %3198 = vmatprep.subr.bf16.mxu0 %v5081_v17  ;;  %3576 = vmatprep.subr.bf16.mxu1 %v5084_v18  ;;  %v5175_v17 = vld [vmem:[%s5452_s7 + $0xa68] ss:$16 sps:$4 sm:$0xff]   ;;  %v5180_v18 = vld [vmem:[%s5452_s7 + $0xa84] ss:$16 sps:$4 sm:$0xff]  }
 0x152   : > { %3220 = vmatprep.mubr.bf16.mxu0 %v5153_v19  ;;  %3598 = vmatprep.mubr.bf16.mxu1 %v5153_v19  ;;  %v5183_v19 = vld [vmem:[%s5452_s7 + $0xa8c] ss:$16 sps:$4 sm:$0xff]  }
 0x154   : > { %3199 = vmatpush1.bf16.msra.mxu0 %v5079_v20  ;;  %3577 = vmatpush1.bf16.msra.mxu1 %v5082_v21  ;;  %v5243_v20 = vld [vmem:[%s5454_s8 + $0xe0] ss:$48 sps:$4 sm:$0xff]  }
 0x155   : > { %3200 = vmatprep.subr.bf16.mxu0 %v5087_v22  ;;  %3578 = vmatprep.subr.bf16.mxu1 %v5090_v23  ;;  %v5178_v21 = vld [vmem:[%s5452_s7 + $0xa80] ss:$16 sps:$4 sm:$0xff]   ;;  %v5181_v22 = vld [vmem:[%s5452_s7 + $0xa88] ss:$16 sps:$4 sm:$0xff]   ;;  %v5186_v23 = vld [vmem:[%s5452_s7 + $0xaa4] ss:$16 sps:$4 sm:$0xff]  }
 0x158   : > { %3201 = vmatpush1.bf16.msra.mxu0 %v5085_v24  ;;  %3579 = vmatpush1.bf16.msra.mxu1 %v5088_v25  ;;  %v5189_v24 = vld [vmem:[%s5452_s7 + $0xaac] ss:$16 sps:$4 sm:$0xff]  }
 0x159   : > { %3202 = vmatprep.subr.bf16.mxu0 %v5093_v26  ;;  %3580 = vmatprep.subr.bf16.mxu1 %v5096_v27  ;;  %v5258_v25 = vld [vmem:[%s5454_s8 + $0x2c] ss:$48 sps:$4 sm:$0xff]   ;;  %v5184_v26 = vld [vmem:[%s5452_s7 + $0xaa0] ss:$16 sps:$4 sm:$0xff]   ;;  %v5187_v27 = vld [vmem:[%s5452_s7 + $0xaa8] ss:$16 sps:$4 sm:$0xff]  }
 0x15c   : > { %3203 = vmatpush1.bf16.msra.mxu0 %v5091_v28  ;;  %3581 = vmatpush1.bf16.msra.mxu1 %v5094_v29  ;;  %v5192_v28 = vld [vmem:[%s5452_s7 + $0xac4] ss:$16 sps:$4 sm:$0xff]   ;;  %v5195_v29 = vld [vmem:[%s5452_s7 + $0xacc] ss:$16 sps:$4 sm:$0xff]  }
 0x15d   : > { %3204 = vmatprep.subr.bf16.mxu0 %v5099_v30  ;;  %3582 = vmatprep.subr.bf16.mxu1 %v5102_v31  ;;  %v5190_v30 = vld [vmem:[%s5452_s7 + $0xac0] ss:$16 sps:$4 sm:$0xff]   ;;  %v5193_v31 = vld [vmem:[%s5452_s7 + $0xac8] ss:$16 sps:$4 sm:$0xff]  }
 0x160   : > { %3205 = vmatpush1.bf16.msra.mxu0 %v5097_v32  ;;  %3583 = vmatpush1.bf16.msra.mxu1 %v5100_v33  ;;  %v5198_v32 = vld [vmem:[%s5452_s7 + $0xae4] ss:$16 sps:$4 sm:$0xff]   ;;  %v5201_v33 = vld [vmem:[%s5452_s7 + $0xaec] ss:$16 sps:$4 sm:$0xff]  }
 0x161   : > { %3206 = vmatprep.subr.bf16.mxu0 %v5105_v34  ;;  %3584 = vmatprep.subr.bf16.mxu1 %v5108_v35  ;;  %v5196_v34 = vld [vmem:[%s5452_s7 + $0xae0] ss:$16 sps:$4 sm:$0xff]   ;;  %v5199_v35 = vld [vmem:[%s5452_s7 + $0xae8] ss:$16 sps:$4 sm:$0xff]  }
 0x164   : > { %3207 = vmatpush1.bf16.msra.mxu0 %v5103_v36  ;;  %3585 = vmatpush1.bf16.msra.mxu1 %v5106_v37  ;;  %v5204_v36 = vld [vmem:[%s5452_s7 + $0xb04] ss:$16 sps:$4 sm:$0xff]   ;;  %v5207_v37 = vld [vmem:[%s5452_s7 + $0xb0c] ss:$16 sps:$4 sm:$0xff]  }
 0x165   : > { %3208 = vmatprep.subr.bf16.mxu0 %v5111_v38  ;;  %3586 = vmatprep.subr.bf16.mxu1 %v5114_v39  ;;  %v5202_v38 = vld [vmem:[%s5452_s7 + $0xb00] ss:$16 sps:$4 sm:$0xff]   ;;  %v5205_v39 = vld [vmem:[%s5452_s7 + $0xb08] ss:$16 sps:$4 sm:$0xff]  }
 0x168   : > { %3209 = vmatpush1.bf16.msra.mxu0 %v5109_v40  ;;  %3587 = vmatpush1.bf16.msra.mxu1 %v5112_v41  ;;  %v5210_v40 = vld [vmem:[%s5452_s7 + $0xb24] ss:$16 sps:$4 sm:$0xff]   ;;  %v5213_v41 = vld [vmem:[%s5452_s7 + $0xb2c] ss:$16 sps:$4 sm:$0xff]  }
 0x169   : > { %3210 = vmatprep.subr.bf16.mxu0 %v5117_v42  ;;  %3588 = vmatprep.subr.bf16.mxu1 %v5120_v43  ;;  %v5208_v42 = vld [vmem:[%s5452_s7 + $0xb20] ss:$16 sps:$4 sm:$0xff]   ;;  %v5211_v43 = vld [vmem:[%s5452_s7 + $0xb28] ss:$16 sps:$4 sm:$0xff]  }
 0x16c   : > { %3211 = vmatpush1.bf16.msra.mxu0 %v5115_v44  ;;  %3589 = vmatpush1.bf16.msra.mxu1 %v5118_v45  ;;  %v5216_v44 = vld [vmem:[%s5452_s7 + $0xb44] ss:$16 sps:$4 sm:$0xff]   ;;  %v5219_v45 = vld [vmem:[%s5452_s7 + $0xb4c] ss:$16 sps:$4 sm:$0xff]  }
 0x16d   : > { %3212 = vmatprep.subr.bf16.mxu0 %v5125_v46  ;;  %3590 = vmatprep.subr.bf16.mxu1 %v5128_v47  ;;  %v5214_v46 = vld [vmem:[%s5452_s7 + $0xb40] ss:$16 sps:$4 sm:$0xff]   ;;  %v5217_v47 = vld [vmem:[%s5452_s7 + $0xb48] ss:$16 sps:$4 sm:$0xff]  }
 0x170   : > { %3213 = vmatpush1.bf16.msra.mxu0 %v5123_v48  ;;  %3591 = vmatpush1.bf16.msra.mxu1 %v5126_v49  ;;  %v5222_v48 = vld [vmem:[%s5452_s7 + $0xb64] ss:$16 sps:$4 sm:$0xff]   ;;  %v5225_v49 = vld [vmem:[%s5452_s7 + $0xb6c] ss:$16 sps:$4 sm:$0xff]  }
 0x171   : > { %3214 = vmatprep.subr.bf16.mxu0 %v5132_v50  ;;  %3592 = vmatprep.subr.bf16.mxu1 %v5135_v51  ;;  %v5220_v50 = vld [vmem:[%s5452_s7 + $0xb60] ss:$16 sps:$4 sm:$0xff]   ;;  %v5223_v51 = vld [vmem:[%s5452_s7 + $0xb68] ss:$16 sps:$4 sm:$0xff]  }
 0x174   : > { %3215 = vmatpush1.bf16.msra.mxu0 %v5130_v52  ;;  %3593 = vmatpush1.bf16.msra.mxu1 %v5133_v53  ;;  %v5231_v52 = vld [vmem:[%s5452_s7 + $0xb84] ss:$16 sps:$4 sm:$0xff]   ;;  %v5234_v53 = vld [vmem:[%s5452_s7 + $0xb8c] ss:$16 sps:$4 sm:$0xff]  }
 0x175   : > { %3216 = vmatprep.subr.bf16.mxu0 %v5140_v54  ;;  %3594 = vmatprep.subr.bf16.mxu1 %v5143_v55  ;;  %v5229_v54 = vld [vmem:[%s5452_s7 + $0xb80] ss:$16 sps:$4 sm:$0xff]   ;;  %v5232_v55 = vld [vmem:[%s5452_s7 + $0xb88] ss:$16 sps:$4 sm:$0xff]  }
 0x178   : > { %3217 = vmatpush1.bf16.msra.mxu0 %v5138_v56  ;;  %3595 = vmatpush1.bf16.msra.mxu1 %v5141_v57  ;;  %v5237_v56 = vld [vmem:[%s5452_s7 + $0xba4] ss:$16 sps:$4 sm:$0xff]   ;;  %v5240_v57 = vld [vmem:[%s5452_s7 + $0xbac] ss:$16 sps:$4 sm:$0xff]  }
 0x179   : > { %3218 = vmatprep.subr.bf16.mxu0 %v5147_v58  ;;  %3596 = vmatprep.subr.bf16.mxu1 %v5150_v59  ;;  %v5235_v58 = vld [vmem:[%s5452_s7 + $0xba0] ss:$16 sps:$4 sm:$0xff]   ;;  %v5238_v59 = vld [vmem:[%s5452_s7 + $0xba8] ss:$16 sps:$4 sm:$0xff]  }
 0x17c   : > { %3219 = vmatpush1.bf16.msra.mxu0 %v5145_v60  ;;  %3597 = vmatpush1.bf16.msra.mxu1 %v5148_v61  ;;  %v5246_v60 = vld [vmem:[%s5452_s7 + $0xbc4] ss:$16 sps:$4 sm:$0xff]   ;;  %v5249_v61 = vld [vmem:[%s5452_s7 + $0xbcc] ss:$16 sps:$4 sm:$0xff]  }
 0x17d   : > { %3251 = vmatprep.subr.bf16.mxu0 %v5156_v62  ;;  %3629 = vmatprep.subr.bf16.mxu1 %v5159_v63  ;;  %v5244_v62 = vld [vmem:[%s5452_s7 + $0xbc0] ss:$16 sps:$4 sm:$0xff]   ;;  %v5247_v63 = vld [vmem:[%s5452_s7 + $0xbc8] ss:$16 sps:$4 sm:$0xff]  }
 0x17f   : > { %3221 = vmatmul.mubr.bf16.vlgmr.msra.gmra.mrb[0].mxu0 %v5151_v0  ;;  %3599 = vmatmul.mubr.bf16.vlgmr.msra.gmra.mrb[0].mxu1 %v5151_v0  ;;  %v5252_v0 = vld [vmem:[%s5452_s7 + $0xbe4] ss:$16 sps:$4 sm:$0xff]  }
 0x180   : > { %3252 = vmatpush1.bf16.msra.mxu0 %v5154_v1  ;;  %3630 = vmatpush1.bf16.msra.mxu1 %v5157_v2  ;;  %v5255_v1 = vld [vmem:[%s5452_s7 + $0xbec] ss:$16 sps:$4 sm:$0xff]   ;;  %v5250_v2 = vld [vmem:[%s5452_s7 + $0xbe0] ss:$16 sps:$4 sm:$0xff]  }
 0x181   : > { %3253 = vmatprep.subr.bf16.mxu0 %v5162_v3  ;;  %3631 = vmatprep.subr.bf16.mxu1 %v5165_v4  ;;  %v5253_v3 = vld [vmem:[%s5452_s7 + $0xbe8] ss:$16 sps:$4 sm:$0xff]  }
 0x182   : > { %3230 = vmatprep.mubr.bf16.mxu0 %v5226_v5  ;;  %3608 = vmatprep.mubr.bf16.mxu1 %v5226_v5  ;;  %v5256_v4 = vld [vmem:[%s5454_s8 + $0x28] ss:$48 sps:$4 sm:$0xff]   ;;  %v5259_v5 = vld [vmem:[%s5454_s8 + $0x8c] ss:$48 sps:$4 sm:$0xff]  }
 0x184   : > { %3254 = vmatpush1.bf16.msra.mxu0 %v5160_v6  ;;  %3632 = vmatpush1.bf16.msra.mxu1 %v5163_v7  ;;  %v5261_v6 = vld [vmem:[%s5454_s8 + $0x88] ss:$48 sps:$4 sm:$0xff]   ;;  %v5262_v7 = vld [vmem:[%s5454_s8 + $0xec] ss:$48 sps:$4 sm:$0xff]  }
 0x185   : > { %3255 = vmatprep.subr.bf16.mxu0 %v5168_v8  ;;  %3633 = vmatprep.subr.bf16.mxu1 %v5171_v9  ;;  %v5264_v8 = vld [vmem:[%s5454_s8 + $0xe8] ss:$48 sps:$4 sm:$0xff]   ;;  %v776_v9 = vld [vmem:[%s6326_s3] sm:$0xff] }
 0x187   : > { %3231 = vmatmul.mubr.bf16.gmra.mrb[4].mxu0 %v5228_v10  ;;  %3609 = vmatmul.mubr.bf16.gmra.mrb[4].mxu1 %v5228_v10  ;;  %v778_v10 = vld [vmem:[%s6326_s3 + $0x10] sm:$0xff] }
 0x188   : > { %3256 = vmatpush1.bf16.msra.mxu0 %v5166_v11  ;;  %3634 = vmatpush1.bf16.msra.mxu1 %v5169_v12  ;;  %v777_v11 = vld [vmem:[%s6326_s3 + $0x8] sm:$0xff]  ;;  %v779_v12 = vld [vmem:[%s6326_s3 + $0x18] sm:$0xff] }
 0x189   : > { %3257 = vmatprep.subr.bf16.mxu0 %v5174_v13  ;;  %3635 = vmatprep.subr.bf16.mxu1 %v5177_v14 }
 0x18a   : > { %3240 = vmatprep.mubr.bf16.mxu0 %v5241_v15  ;;  %3618 = vmatprep.mubr.bf16.mxu1 %v5241_v15  ;;  %v780_v15 = vld [vmem:[%s6326_s3 + $0x20] sm:$0xff] }
 0x18c   : > { %3258 = vmatpush1.bf16.msra.mxu0 %v5172_v16  ;;  %3636 = vmatpush1.bf16.msra.mxu1 %v5175_v17  ;;  %v782_v16 = vld [vmem:[%s6326_s3 + $0x30] sm:$0xff] }
 0x18d   : > { %3259 = vmatprep.subr.bf16.mxu0 %v5180_v18  ;;  %3637 = vmatprep.subr.bf16.mxu1 %v5183_v19 }
 0x18f   : > { %3241 = vmatmul.mubr.bf16.gmra.mrb[8].mxu0 %v5243_v20  ;;  %3619 = vmatmul.mubr.bf16.gmra.mrb[8].mxu1 %v5243_v20 }
 0x190   : > { %3260 = vmatpush1.bf16.msra.mxu0 %v5178_v21  ;;  %3638 = vmatpush1.bf16.msra.mxu1 %v5181_v22  ;;  %v781_v21 = vld [vmem:[%s6326_s3 + $0x28] sm:$0xff]  ;;  %v783_v22 = vld [vmem:[%s6326_s3 + $0x38] sm:$0xff] }
 0x191   : > { %3261 = vmatprep.subr.bf16.mxu0 %v5186_v23  ;;  %3639 = vmatprep.subr.bf16.mxu1 %v5189_v24 }
 0x192   : > { %3283 = vmatprep.mubr.bf16.mxu0 %v5258_v25  ;;  %3661 = vmatprep.mubr.bf16.mxu1 %v5258_v25 }
 0x194   : > { %3262 = vmatpush1.bf16.msra.mxu0 %v5184_v26  ;;  %3640 = vmatpush1.bf16.msra.mxu1 %v5187_v27 }
 0x195   : > { %3263 = vmatprep.subr.bf16.mxu0 %v5192_v28  ;;  %3641 = vmatprep.subr.bf16.mxu1 %v5195_v29 }
 0x198   : > { %3264 = vmatpush1.bf16.msra.mxu0 %v5190_v30  ;;  %3642 = vmatpush1.bf16.msra.mxu1 %v5193_v31 }
 0x199   : > { %3265 = vmatprep.subr.bf16.mxu0 %v5198_v32  ;;  %3643 = vmatprep.subr.bf16.mxu1 %v5201_v33  ;;  %v784_v33 = vld [vmem:[%s6326_s3 + $0x40] sm:$0xff] }
 0x19c   : > { %3266 = vmatpush1.bf16.msra.mxu0 %v5196_v34  ;;  %3644 = vmatpush1.bf16.msra.mxu1 %v5199_v35  ;;  %v786_v34 = vld [vmem:[%s6326_s3 + $0x50] sm:$0xff]  ;;  %v785_v35 = vld [vmem:[%s6326_s3 + $0x48] sm:$0xff] }
 0x19d   : > { %3267 = vmatprep.subr.bf16.mxu0 %v5204_v36  ;;  %3645 = vmatprep.subr.bf16.mxu1 %v5207_v37  ;;  %v787_v36 = vld [vmem:[%s6326_s3 + $0x58] sm:$0xff] }
 0x1a0   : > { %3268 = vmatpush1.bf16.msra.mxu0 %v5202_v38  ;;  %3646 = vmatpush1.bf16.msra.mxu1 %v5205_v39  ;;  %v788_v39 = vld [vmem:[%s6326_s3 + $0x60] sm:$0xff] }
 0x1a1   : > { %3269 = vmatprep.subr.bf16.mxu0 %v5210_v40  ;;  %3647 = vmatprep.subr.bf16.mxu1 %v5213_v41  ;;  %v790_v40 = vld [vmem:[%s6326_s3 + $0x70] sm:$0xff] }
 0x1a4   : > { %3270 = vmatpush1.bf16.msra.mxu0 %v5208_v42  ;;  %3648 = vmatpush1.bf16.msra.mxu1 %v5211_v43 }
 0x1a5   : > { %3271 = vmatprep.subr.bf16.mxu0 %v5216_v44  ;;  %3649 = vmatprep.subr.bf16.mxu1 %v5219_v45  ;;  %v789_v45 = vld [vmem:[%s6326_s3 + $0x68] sm:$0xff] }
 0x1a8   : > { %3272 = vmatpush1.bf16.msra.mxu0 %v5214_v46  ;;  %3650 = vmatpush1.bf16.msra.mxu1 %v5217_v47  ;;  %v791_v46 = vld [vmem:[%s6326_s3 + $0x78] sm:$0xff] }
 0x1a9   : > { %3273 = vmatprep.subr.bf16.mxu0 %v5222_v48  ;;  %3651 = vmatprep.subr.bf16.mxu1 %v5225_v49 }
 0x1ac   : > { %3274 = vmatpush1.bf16.msra.mxu0 %v5220_v50  ;;  %3652 = vmatpush1.bf16.msra.mxu1 %v5223_v51 }
 0x1ad   : > { %3275 = vmatprep.subr.bf16.mxu0 %v5231_v52  ;;  %3653 = vmatprep.subr.bf16.mxu1 %v5234_v53 }
 0x1b0   : > { %3276 = vmatpush1.bf16.msra.mxu0 %v5229_v54  ;;  %3654 = vmatpush1.bf16.msra.mxu1 %v5232_v55 }
 0x1b1   : > { %3277 = vmatprep.subr.bf16.mxu0 %v5237_v56  ;;  %3655 = vmatprep.subr.bf16.mxu1 %v5240_v57  ;;  %v792_v57 = vld [vmem:[%s6326_s3 + $0x80] sm:$0xff] }
 0x1b4   : > { %3278 = vmatpush1.bf16.msra.mxu0 %v5235_v58  ;;  %3656 = vmatpush1.bf16.msra.mxu1 %v5238_v59  ;;  %v794_v58 = vld [vmem:[%s6326_s3 + $0x90] sm:$0xff]  ;;  %v793_v59 = vld [vmem:[%s6326_s3 + $0x88] sm:$0xff] }
 0x1b5   : > { %3279 = vmatprep.subr.bf16.mxu0 %v5246_v60  ;;  %3657 = vmatprep.subr.bf16.mxu1 %v5249_v61  ;;  %v795_v60 = vld [vmem:[%s6326_s3 + $0x98] sm:$0xff] }
 0x1b8   : > { %3280 = vmatpush1.bf16.msra.mxu0 %v5244_v62  ;;  %3658 = vmatpush1.bf16.msra.mxu1 %v5247_v63  ;;  %v796_v63 = vld [vmem:[%s6326_s3 + $0xa0] sm:$0xff] }
 0x1b9   : > { %3281 = vmatprep.subr.bf16.mxu0 %v5252_v0  ;;  %3659 = vmatprep.subr.bf16.mxu1 %v5255_v1  ;;  %v798_v0 = vld [vmem:[%s6326_s3 + $0xb0] sm:$0xff] }
 0x1bc   : > { %3282 = vmatpush1.bf16.msra.mxu0 %v5250_v2  ;;  %3660 = vmatpush1.bf16.msra.mxu1 %v5253_v3 }
 0x1bf   : > { %3284 = vmatmul.mubr.bf16.vlgmr.msra.gmra.mrb[0].mxu0 %v5256_v4  ;;  %3662 = vmatmul.mubr.bf16.vlgmr.msra.gmra.mrb[0].mxu1 %v5256_v4 }
 0x1c0   : > { %3293 = vmatprep.mubr.bf16.mxu0 %v5259_v5  ;;  %3671 = vmatprep.mubr.bf16.mxu1 %v5259_v5  ;;  %v797_v5 = vld [vmem:[%s6326_s3 + $0xa8] sm:$0xff] }
 0x1c7   : > { %3294 = vmatmul.mubr.bf16.gmra.mrb[4].mxu0 %v5261_v6  ;;  %3672 = vmatmul.mubr.bf16.gmra.mrb[4].mxu1 %v5261_v6  ;;  %v799_v6 = vld [vmem:[%s6326_s3 + $0xb8] sm:$0xff] }
 0x1c8   : > { %3303 = vmatprep.mubr.bf16.mxu0 %v5262_v7  ;;  %3681 = vmatprep.mubr.bf16.mxu1 %v5262_v7 }
 0x1cf   : > { %3304 = vmatmul.mubr.bf16.gmra.mrb[8].mxu0 %v5264_v8  ;;  %3682 = vmatmul.mubr.bf16.gmra.mrb[8].mxu1 %v5264_v8 }
 0x292   : > { %v3285_v13 = vpop.f32.mrb[0].mxu0  ;;  %v3663_v14 = vpop.f32.mrb[0].mxu1 }
 0x293   : > { %v3692_v17 = vadd.f32 %v3285_v13, %v776_v9  ;;  %v3694_v18 = vadd.f32 %v3663_v14, %v778_v10  ;;  %v3287_v19 = vpop.f32.mrb[1].mxu0  ;;  %v3665_v20 = vpop.f32.mrb[1].mxu1 }
 0x294   : > { %v3693_v23 = vadd.f32 %v3287_v19, %v777_v11  ;;  %v3695_v24 = vadd.f32 %v3665_v20, %v779_v12  ;;  %v3289_v25 = vpop.f32.mrb[2].mxu0  ;;  %v3667_v26 = vpop.f32.mrb[2].mxu1  ;;  %v3768_v19 = vld [vmem:[%s6325_s2] ss:$2 sm:$0xf] (!%p4464_p11) }
 0x295   : > { %3716 = vst [vmem:[%s6326_s3] sm:$0xff] %v3692_v17  ;;  %3718 = vst [vmem:[%s6326_s3 + $0x10] sm:$0xff] %v3694_v18  ;;  %v3696_v27 = vadd.f32 %v3289_v25, %v780_v15  ;;  %v3698_v28 = vadd.f32 %v3667_v26, %v782_v16  ;;  %v3291_v29 = vpop.f32.mrb[3].mxu0  ;;  %v3669_v30 = vpop.f32.mrb[3].mxu1  ;;  %v3770_v17 = vlaneseq (!%p4464_p11)  ;;  %v4465_v20 = vld [vmem:[%s6325_s2 + $0x1] ss:$2 sm:$0xf] (!%p4464_p11) }
 0x296   : > { %3717 = vst [vmem:[%s6326_s3 + $0x8] sm:$0xff] %v3693_v23  ;;  %3719 = vst [vmem:[%s6326_s3 + $0x18] sm:$0xff] %v3695_v24  ;;  %v3697_v31 = vadd.f32 %v3291_v29, %v781_v21  ;;  %v3699_v32 = vadd.f32 %v3669_v30, %v783_v22 }
 0x297   : > { %3720 = vst [vmem:[%s6326_s3 + $0x20] sm:$0xff] %v3696_v27  ;;  %3722 = vst [vmem:[%s6326_s3 + $0x30] sm:$0xff] %v3698_v28  ;;  %v3771_v18 = vshrl.u32 (!%p4464_p11), %v3770_v17, 7 }
 0x298   : > { %3721 = vst [vmem:[%s6326_s3 + $0x28] sm:$0xff] %v3697_v31  ;;  %3723 = vst [vmem:[%s6326_s3 + $0x38] sm:$0xff] %v3699_v32 }
 0x299   : > { %v3772_v22 = vsub.s32 (!%p4464_p11), 0, %v3771_v18  ;;  %v3776_v24 = vsub.s32 (!%p4464_p11), 1, %v3771_v18  ;;  %v3780_v25 = vsub.s32 (!%p4464_p11), 2, %v3771_v18  ;;  %v3784_v26 = vsub.s32 (!%p4464_p11), 3, %v3771_v18 }
 0x29a   : > { %v3295_v37 = vpop.f32.mrb[4].mxu0  ;;  %v3673_v38 = vpop.f32.mrb[4].mxu1 }
 0x29b   : > { %v3700_v41 = vadd.f32 %v3295_v37, %v784_v33  ;;  %v3702_v42 = vadd.f32 %v3673_v38, %v786_v34  ;;  %v3297_v43 = vpop.f32.mrb[5].mxu0  ;;  %v3675_v44 = vpop.f32.mrb[5].mxu1  ;;  %v6115_v30 = vrot.slane (!%p4464_p11), %v3768_v19, %v3772_v22  ;;  %v6117_v31 = vrot.slane (!%p4464_p11), %v4465_v20, %v3772_v22 }
 0x29c   : > { %v3701_v47 = vadd.f32 %v3297_v43, %v785_v35  ;;  %v3703_v48 = vadd.f32 %v3675_v44, %v787_v36  ;;  %v3299_v49 = vpop.f32.mrb[6].mxu0  ;;  %v3677_v50 = vpop.f32.mrb[6].mxu1  ;;  %v3744_v21 = vld [vmem:[%s6326_s3] sm:$0xff] (!%p4464_p11)  ;;  %v3746_v27 = vld [vmem:[%s6326_s3 + $0x10] sm:$0xff] (!%p4464_p11)  ;;  %v6119_v32 = vrot.slane (!%p4464_p11), %v3768_v19, %v3776_v24  ;;  %v6121_v33 = vrot.slane (!%p4464_p11), %v4465_v20, %v3776_v24 }
 0x29d   : > { %3724 = vst [vmem:[%s6326_s3 + $0x40] sm:$0xff] %v3700_v41  ;;  %3726 = vst [vmem:[%s6326_s3 + $0x50] sm:$0xff] %v3702_v42  ;;  %v3704_v51 = vadd.f32 %v3299_v49, %v788_v39  ;;  %v3706_v52 = vadd.f32 %v3677_v50, %v790_v40  ;;  %v3301_v53 = vpop.f32.mrb[7].mxu0  ;;  %v3679_v54 = vpop.f32.mrb[7].mxu1  ;;  %v3745_v23 = vld [vmem:[%s6326_s3 + $0x8] sm:$0xff] (!%p4464_p11)  ;;  %v3747_v34 = vld [vmem:[%s6326_s3 + $0x18] sm:$0xff] (!%p4464_p11)  ;;  %v6132_v37 = vrot.slane (!%p4464_p11), %v3768_v19, %v3780_v25 }
 0x29e   : > { %3725 = vst [vmem:[%s6326_s3 + $0x48] sm:$0xff] %v3701_v47  ;;  %3727 = vst [vmem:[%s6326_s3 + $0x58] sm:$0xff] %v3703_v48  ;;  %v3705_v55 = vadd.f32 %v3301_v53, %v789_v45  ;;  %v3707_v56 = vadd.f32 %v3679_v54, %v791_v46  ;;  %v3748_v28 = vld [vmem:[%s6326_s3 + $0x20] sm:$0xff] (!%p4464_p11)  ;;  %v3750_v35 = vld [vmem:[%s6326_s3 + $0x30] sm:$0xff] (!%p4464_p11)  ;;  %v6134_v38 = vrot.slane (!%p4464_p11), %v4465_v20, %v3780_v25 }
 0x29f   : > { %3728 = vst [vmem:[%s6326_s3 + $0x60] sm:$0xff] %v3704_v51  ;;  %3730 = vst [vmem:[%s6326_s3 + $0x70] sm:$0xff] %v3706_v52  ;;  %v3749_v29 = vld [vmem:[%s6326_s3 + $0x28] sm:$0xff] (!%p4464_p11)  ;;  %v3751_v36 = vld [vmem:[%s6326_s3 + $0x38] sm:$0xff] (!%p4464_p11)  ;;  %v6136_v39 = vrot.slane (!%p4464_p11), %v3768_v19, %v3784_v26  ;;  %v6138_v40 = vrot.slane (!%p4464_p11), %v4465_v20, %v3784_v26  ;;  %v3790_v41 = vmul.f32 (!%p4464_p11), %v6115_v30, %v3744_v21 }
 0x2a0   : > { %3729 = vst [vmem:[%s6326_s3 + $0x68] sm:$0xff] %v3705_v55  ;;  %3731 = vst [vmem:[%s6326_s3 + $0x78] sm:$0xff] %v3707_v56  ;;  %v3791_v42 = vmul.f32 (!%p4464_p11), %v6119_v32, %v3745_v23  ;;  %v3794_v43 = vmul.f32 (!%p4464_p11), %v6115_v30, %v3748_v28  ;;  %v3795_v44 = vmul.f32 (!%p4464_p11), %v6119_v32, %v3749_v29 }
 0x2a1   : > { %v3792_v45 = vmul.f32 (!%p4464_p11), %v6132_v37, %v3746_v27  ;;  %v3793_v46 = vmul.f32 (!%p4464_p11), %v6136_v39, %v3747_v34  ;;  %v3796_v47 = vmul.f32 (!%p4464_p11), %v6132_v37, %v3750_v35  ;;  %v3797_v48 = vmul.f32 (!%p4464_p11), %v6136_v39, %v3751_v36 }
 0x2a2   : > { %v3305_v61 = vpop.f32.mrb[8].mxu0  ;;  %v3683_v62 = vpop.f32.mrb[8].mxu1  ;;  %3743 = sbr.rel (%p4464_p11) target bundleno = 697 (0x2b9), region = 63  ;;  %v3837_v49 = vadd.f32 (!%p4464_p11), %v6117_v31, %v3790_v41  ;;  %v3838_v50 = vadd.f32 (!%p4464_p11), %v6121_v33, %v3791_v42  ;;  %v3841_v51 = vadd.f32 (!%p4464_p11), %v6117_v31, %v3794_v43  ;;  %v3842_v52 = vadd.f32 (!%p4464_p11), %v6121_v33, %v3795_v44 }
 0x2a3   : > { %v3708_v1 = vadd.f32 %v3305_v61, %v792_v57  ;;  %v3710_v2 = vadd.f32 %v3683_v62, %v794_v58  ;;  %v3307_v3 = vpop.f32.mrb[9].mxu0  ;;  %v3685_v4 = vpop.f32.mrb[9].mxu1  ;;  %v3839_v56 = vadd.f32 (!%p4464_p11), %v6134_v38, %v3792_v45  ;;  %v3840_v57 = vadd.f32 (!%p4464_p11), %v6138_v40, %v3793_v46 }
 0x2a4   : > { %v3709_v7 = vadd.f32 %v3307_v3, %v793_v59  ;;  %v3711_v8 = vadd.f32 %v3685_v4, %v795_v60  ;;  %v3309_v9 = vpop.f32.mrb[10].mxu0  ;;  %v3687_v10 = vpop.f32.mrb[10].mxu1  ;;  %v3752_v53 = vld [vmem:[%s6326_s3 + $0x40] sm:$0xff] (!%p4464_p11)  ;;  %v3754_v55 = vld [vmem:[%s6326_s3 + $0x50] sm:$0xff] (!%p4464_p11)  ;;  %v3843_v58 = vadd.f32 (!%p4464_p11), %v6134_v38, %v3796_v47  ;;  %v3844_v59 = vadd.f32 (!%p4464_p11), %v6138_v40, %v3797_v48 }
 0x2a5   : > { %3732 = vst [vmem:[%s6326_s3 + $0x80] sm:$0xff] %v3708_v1  ;;  %3734 = vst [vmem:[%s6326_s3 + $0x90] sm:$0xff] %v3710_v2  ;;  %v3712_v11 = vadd.f32 %v3309_v9, %v796_v63  ;;  %v3714_v12 = vadd.f32 %v3687_v10, %v798_v0  ;;  %v3311_v13 = vpop.f32.mrb[11].mxu0  ;;  %v3689_v14 = vpop.f32.mrb[11].mxu1  ;;  %v3753_v54 = vld [vmem:[%s6326_s3 + $0x48] sm:$0xff] (!%p4464_p11)  ;;  %v3755_v60 = vld [vmem:[%s6326_s3 + $0x58] sm:$0xff] (!%p4464_p11)  ;;  %v3798_v9 = vmul.f32 (!%p4464_p11), %v6115_v30, %v3752_v53 }
 0x2a6   : > { %3733 = vst [vmem:[%s6326_s3 + $0x88] sm:$0xff] %v3709_v7  ;;  %3735 = vst [vmem:[%s6326_s3 + $0x98] sm:$0xff] %v3711_v8  ;;  %v3713_v15 = vadd.f32 %v3311_v13, %v797_v5  ;;  %v3715_v16 = vadd.f32 %v3689_v14, %v799_v6  ;;  %v3756_v61 = vld [vmem:[%s6326_s3 + $0x60] sm:$0xff] (!%p4464_p11)  ;;  %v3861_v63 = vmax.f32 (!%p4464_p11), %v3837_v49, 0.0  ;;  %v3862_v0 = vmax.f32 (!%p4464_p11), %v3838_v50, 0.0  ;;  %v3758_v3 = vld [vmem:[%s6326_s3 + $0x70] sm:$0xff] (!%p4464_p11) }
 0x2a7   : > { %3736 = vst [vmem:[%s6326_s3 + $0xa0] sm:$0xff] %v3712_v11  ;;  %3738 = vst [vmem:[%s6326_s3 + $0xb0] sm:$0xff] %v3714_v12  ;;  %v3757_v62 = vld [vmem:[%s6326_s3 + $0x68] sm:$0xff] (!%p4464_p11)  ;;  %v3865_v1 = vmax.f32 (!%p4464_p11), %v3841_v51, 0.0  ;;  %v3866_v2 = vmax.f32 (!%p4464_p11), %v3842_v52, 0.0  ;;  %v3759_v4 = vld [vmem:[%s6326_s3 + $0x78] sm:$0xff] (!%p4464_p11)  ;;  %v3799_v10 = vmul.f32 (!%p4464_p11), %v6119_v32, %v3753_v54  ;;  %v3800_v11 = vmul.f32 (!%p4464_p11), %v6132_v37, %v3754_v55 }
 0x2a8   : > { %3737 = vst [vmem:[%s6326_s3 + $0xa8] sm:$0xff] %v3713_v15  ;;  %3739 = vst [vmem:[%s6326_s3 + $0xb8] sm:$0xff] %v3715_v16  ;;  %v3863_v5 = vmax.f32 (!%p4464_p11), %v3839_v56, 0.0  ;;  %v3864_v6 = vmax.f32 (!%p4464_p11), %v3840_v57, 0.0  ;;  %v3867_v7 = vmax.f32 (!%p4464_p11), %v3843_v58, 0.0  ;;  %v3868_v8 = vmax.f32 (!%p4464_p11), %v3844_v59, 0.0 }
 0x2a9   : > { %3885 = vst [vmem:[%s6326_s3] sm:$0xff] %v3861_v63  ;;  %3886 = vst [vmem:[%s6326_s3 + $0x8] sm:$0xff] %v3862_v0  ;;  %v3801_v12 = vmul.f32 %v6136_v39, %v3755_v60  ;;  %v3802_v13 = vmul.f32 %v6115_v30, %v3756_v61  ;;  %v3803_v14 = vmul.f32 %v6119_v32, %v3757_v62 }
 0x2aa   : > { %3889 = vst [vmem:[%s6326_s3 + $0x20] sm:$0xff] %v3865_v1  ;;  %3890 = vst [vmem:[%s6326_s3 + $0x28] sm:$0xff] %v3866_v2  ;;  %v3804_v15 = vmul.f32 %v6132_v37, %v3758_v3  ;;  %v3805_v16 = vmul.f32 %v6136_v39, %v3759_v4  ;;  %v3845_v17 = vadd.f32 %v6117_v31, %v3798_v9 }
 0x2ab   : > { %3887 = vst [vmem:[%s6326_s3 + $0x10] sm:$0xff] %v3863_v5  ;;  %3888 = vst [vmem:[%s6326_s3 + $0x18] sm:$0xff] %v3864_v6  ;;  %v3846_v18 = vadd.f32 %v6121_v33, %v3799_v10  ;;  %v3847_v19 = vadd.f32 %v6134_v38, %v3800_v11  ;;  %v3848_v20 = vadd.f32 %v6138_v40, %v3801_v12 }
 0x2ac   : > { %3891 = vst [vmem:[%s6326_s3 + $0x30] sm:$0xff] %v3867_v7  ;;  %3892 = vst [vmem:[%s6326_s3 + $0x38] sm:$0xff] %v3868_v8  ;;  %v3760_v21 = vld [vmem:[%s6326_s3 + $0x80] sm:$0xff]  ;;  %v3762_v23 = vld [vmem:[%s6326_s3 + $0x90] sm:$0xff]  ;;  %v3849_v24 = vadd.f32 %v6117_v31, %v3802_v13  ;;  %v3850_v25 = vadd.f32 %v6121_v33, %v3803_v14  ;;  %v3851_v26 = vadd.f32 %v6134_v38, %v3804_v15  ;;  %v3869_v35 = vmax.f32 %v3845_v17, 0.0 }
 0x2ad   : > { %v3761_v22 = vld [vmem:[%s6326_s3 + $0x88] sm:$0xff]  ;;  %v3852_v27 = vadd.f32 %v6138_v40, %v3805_v16  ;;  %v3763_v28 = vld [vmem:[%s6326_s3 + $0x98] sm:$0xff]  ;;  %v3870_v36 = vmax.f32 %v3846_v18, 0.0  ;;  %v3871_v41 = vmax.f32 %v3847_v19, 0.0  ;;  %v3872_v42 = vmax.f32 %v3848_v20, 0.0 }
 0x2ae   : > { %v3764_v29 = vld [vmem:[%s6326_s3 + $0xa0] sm:$0xff]  ;;  %v3766_v43 = vld [vmem:[%s6326_s3 + $0xb0] sm:$0xff]  ;;  %v3873_v45 = vmax.f32 %v3849_v24, 0.0  ;;  %v3874_v46 = vmax.f32 %v3850_v25, 0.0  ;;  %v3875_v47 = vmax.f32 %v3851_v26, 0.0  ;;  %3893 = vst [vmem:[%s6326_s3 + $0x40] sm:$0xff] %v3869_v35  ;;  %v3806_v49 = vmul.f32 %v6115_v30, %v3760_v21 }
 0x2af   : > { %v3765_v34 = vld [vmem:[%s6326_s3 + $0xa8] sm:$0xff]  ;;  %v3767_v44 = vld [vmem:[%s6326_s3 + $0xb8] sm:$0xff]  ;;  %v3876_v48 = vmax.f32 %v3852_v27, 0.0  ;;  %3894 = vst [vmem:[%s6326_s3 + $0x48] sm:$0xff] %v3870_v36  ;;  %3895 = vst [vmem:[%s6326_s3 + $0x50] sm:$0xff] %v3871_v41  ;;  %v3807_v50 = vmul.f32 %v6119_v32, %v3761_v22  ;;  %v3808_v51 = vmul.f32 %v6132_v37, %v3762_v23  ;;  %v3809_v52 = vmul.f32 %v6136_v39, %v3763_v28 }
 0x2b0   : > { %3896 = vst [vmem:[%s6326_s3 + $0x58] sm:$0xff] %v3872_v42  ;;  %3897 = vst [vmem:[%s6326_s3 + $0x60] sm:$0xff] %v3873_v45  ;;  %v3810_v53 = vmul.f32 %v6115_v30, %v3764_v29  ;;  %v3811_v54 = vmul.f32 %v6119_v32, %v3765_v34  ;;  %v3812_v55 = vmul.f32 %v6132_v37, %v3766_v43 }
 0x2b1   : > { %3898 = vst [vmem:[%s6326_s3 + $0x68] sm:$0xff] %v3874_v46  ;;  %3899 = vst [vmem:[%s6326_s3 + $0x70] sm:$0xff] %v3875_v47  ;;  %v3813_v56 = vmul.f32 %v6136_v39, %v3767_v44  ;;  %v3853_v57 = vadd.f32 %v6117_v31, %v3806_v49  ;;  %v3854_v58 = vadd.f32 %v6121_v33, %v3807_v50 }
 0x2b2   : > { %3900 = vst [vmem:[%s6326_s3 + $0x78] sm:$0xff] %v3876_v48  ;;  %v3855_v59 = vadd.f32 %v6134_v38, %v3808_v51  ;;  %v3856_v60 = vadd.f32 %v6138_v40, %v3809_v52  ;;  %v3857_v61 = vadd.f32 %v6117_v31, %v3810_v53  ;;  %v3858_v62 = vadd.f32 %v6121_v33, %v3811_v54 }
 0x2b3   : > { %v3859_v30 = vadd.f32 %v6134_v38, %v3812_v55  ;;  %v3860_v32 = vadd.f32 %v6138_v40, %v3813_v56  ;;  %v3877_v63 = vmax.f32 %v3853_v57, 0.0  ;;  %v3878_v37 = vmax.f32 %v3854_v58, 0.0 }
 0x2b4   : > { %v3879_v0 = vmax.f32 %v3855_v59, 0.0  ;;  %v3880_v39 = vmax.f32 %v3856_v60, 0.0  ;;  %v3881_v1 = vmax.f32 %v3857_v61, 0.0  ;;  %v3882_v2 = vmax.f32 %v3858_v62, 0.0 }
 0x2b5   : > { %v3883_v3 = vmax.f32 %v3859_v30, 0.0  ;;  %v3884_v4 = vmax.f32 %v3860_v32, 0.0  ;;  %3901 = vst [vmem:[%s6326_s3 + $0x80] sm:$0xff] %v3877_v63  ;;  %3902 = vst [vmem:[%s6326_s3 + $0x88] sm:$0xff] %v3878_v37 }
 0x2b6   : > { %3903 = vst [vmem:[%s6326_s3 + $0x90] sm:$0xff] %v3879_v0  ;;  %3904 = vst [vmem:[%s6326_s3 + $0x98] sm:$0xff] %v3880_v39 }
 0x2b7   : > { %3905 = vst [vmem:[%s6326_s3 + $0xa0] sm:$0xff] %v3881_v1  ;;  %3906 = vst [vmem:[%s6326_s3 + $0xa8] sm:$0xff] %v3882_v2 }
 0x2b8   : > { %3907 = vst [vmem:[%s6326_s3 + $0xb0] sm:$0xff] %v3883_v3  ;;  %3908 = vst [vmem:[%s6326_s3 + $0xb8] sm:$0xff] %v3884_v4 }
 0x2b9 PF: > { %s13_s16 = sadd.s32 1, %s5303_s16   ;;  %s6327_s12 = smov %s5291_s13 }
 0x2ba   : > { %p10_p12 = scmp.ge.s32.totalorder %s13_s16, 8   ;;  %s6328_s13 = smov %s5361_s20 }
 0x2bb   : > { %s6329_s14 = smov %s5299_s15  ;;  %s6330_s15 = smov %s6332_s17 }
 0x2bc   :  { %12 = sbr.rel (!%p10_p12) target bundleno = 3 (0x3), region = 105 }

</bundles_post_ra>
